<compile_context>
chip_gen: v5e
topology: v5e:2x2
jax: 0.10.0
libtpu: 0.0.40
codegen_flags: <defaults>
</compile_context>

<pallas_src>
import functools

import jax
import jax.numpy as jnp
import numpy as np
from jax import lax
from jax.experimental import pallas as pl
from jax.experimental.pallas import tpu as pltpu


# ---------------------------------------------------------------------------
# Kernel body: the whole FeatureFusionBlock for one batch element.
# ---------------------------------------------------------------------------
def _ffb_body(x_ref, top_ref, rcu1_refs, rcu2_refs, out_ref, pad_ref, *, RB):
    # x_ref    : (1, H, W, C)        input activation (C already lane-padded)
    # top_ref  : (1, H, W, C) | None skip tensor
    # rcu*_refs: (w1, b1, w2, b2)    w: (3, 3, C, C) HWIO (compute dtype), b: (1, C) f32
    # out_ref  : (1, H, W, C)
    # pad_ref  : (2, H+2, W+2, C)    VMEM ping-pong buffers (compute dtype)
    H, W, C = out_ref.shape[1], out_ref.shape[2], out_ref.shape[3]
    cdt = pad_ref.dtype
    nblk = H // RB

    # Zero only the 1-wide halo border strips of both ping-pong buffers
    # (the interior is always fully overwritten before it is read).
    for s in range(2):
        pad_ref[s, 0:1, :, :] = jnp.zeros((1, W + 2, C), cdt)
        pad_ref[s, H + 1:H + 2, :, :] = jnp.zeros((1, W + 2, C), cdt)
        pad_ref[s, :, 0:1, :] = jnp.zeros((H + 2, 1, C), cdt)
        pad_ref[s, :, W + 1:W + 2, :] = jnp.zeros((H + 2, 1, C), cdt)

    # In-kernel padding: copy x into the interior of buffer 0.
    pad_ref[0, 1:H + 1, 1:W + 1, :] = x_ref[0].astype(cdt)

    def conv_rows(src, w_ref, b_ref, r0):
        """relu(conv3x3(pad[src]) + b) for image rows [r0, r0+RB) -> (RB*W, C) f32."""
        # Bias folded into the accumulator init (hoisted out of the tap loop).
        acc = jnp.broadcast_to(b_ref[...].astype(jnp.float32), (RB * W, C))
        for kw in range(3):
            # One kw-shifted tall slab per row-block (3 shifted loads, not 9).
            tall = pad_ref[src, pl.ds(r0, RB + 2), kw:kw + W, :]      # (RB+2, W, C)
            for kh in range(3):
                lhs = tall[kh:kh + RB].reshape(RB * W, C)             # free collapse
                acc = acc + jnp.dot(lhs, w_ref[kh, kw],
                                    preferred_element_type=jnp.float32)
        return jnp.maximum(acc, 0.0)

    def read_interior(src, r0):
        return pad_ref[src, pl.ds(r0 + 1, RB), 1:W + 1, :].reshape(RB * W, C)

    def run_rcu(w1, b1, w2, b2, add_top, write_out):
        # conv1 + relu : pad[0] -> pad[1]
        def c1(rb, carry):
            r0 = pl.multiple_of(rb * RB, RB)
            h = conv_rows(0, w1, b1, r0)
            pad_ref[1, pl.ds(r0 + 1, RB), 1:W + 1, :] = (
                h.astype(cdt).reshape(RB, W, C))
            return carry
        lax.fori_loop(0, nblk, c1, 0)

        # conv2 + relu + residual (+ skip) : pad[1] -> pad[0] or out_ref
        def c2(rb, carry):
            r0 = pl.multiple_of(rb * RB, RB)
            y = conv_rows(1, w2, b2, r0)
            y = y + read_interior(0, r0).astype(jnp.float32)          # + residual
            if add_top:
                y = y + top_ref[0, pl.ds(r0, RB), :, :].reshape(
                    RB * W, C).astype(jnp.float32)
            if write_out:
                out_ref[0, pl.ds(r0, RB), :, :] = (
                    y.reshape(RB, W, C).astype(out_ref.dtype))
            else:
                pad_ref[0, pl.ds(r0 + 1, RB), 1:W + 1, :] = (
                    y.astype(cdt).reshape(RB, W, C))
            return carry
        lax.fori_loop(0, nblk, c2, 0)

    if rcu1_refs is not None:                     # y1 = RCU1(x) + x_from_top -> pad[0]
        w1, b1, w2, b2 = rcu1_refs
        run_rcu(w1, b1, w2, b2, add_top=True, write_out=False)
    w1, b1, w2, b2 = rcu2_refs                    # out = RCU2(.)
    run_rcu(w1, b1, w2, b2, add_top=False, write_out=True)


def _ffb_kernel_fused(x_ref, top_ref, w1a, b1a, w2a, b2a, w1b, b1b, w2b, b2b,
                      out_ref, pad_ref, *, RB):
    _ffb_body(x_ref, top_ref, (w1a, b1a, w2a, b2a), (w1b, b1b, w2b, b2b),
              out_ref, pad_ref, RB=RB)


def _ffb_kernel_plain(x_ref, w1b, b1b, w2b, b2b, out_ref, pad_ref, *, RB):
    _ffb_body(x_ref, None, None, (w1b, b1b, w2b, b2b), out_ref, pad_ref, RB=RB)


# ---------------------------------------------------------------------------
# JAX wrapper (layout plumbing: channel padding, specs, parameter prep)
# ---------------------------------------------------------------------------
def _round_up(x, m):
    return (x + m - 1) // m * m


def _pad_channels(a, cp):
    c = a.shape[-1]
    if c == cp:
        return a
    pad = [(0, 0)] * (a.ndim - 1) + [(0, cp - c)]
    return jnp.pad(a, pad)


def _prep_rcu_params(rcu_params, cp, compute_dtype):
    """Zero-pad (w1, b1, w2, b2) to cp channels; weights in compute dtype, biases f32."""
    w1, b1, w2, b2 = rcu_params
    c = w1.shape[-1]

    def pw(w):
        if c != cp:
            w = jnp.pad(w, ((0, 0), (0, 0), (0, cp - c), (0, cp - c)))
        return w.astype(compute_dtype)

    def pb(b):
        b = b.reshape(1, -1)
        if c != cp:
            b = jnp.pad(b, ((0, 0), (0, cp - c)))
        return b.astype(jnp.float32)

    return pw(w1), pb(b1), pw(w2), pb(b2)


def feature_fusion_block(x, params, x_from_top=None, does_fusion=True,
                         compute_dtype=jnp.bfloat16, row_block=8):
    """Pallas FeatureFusionBlock.forward (NHWC activations, HWIO weights)."""
    N, H, W, C = x.shape
    fuse = x_from_top is not None
    if fuse:
        assert does_fusion and x.shape == x_from_top.shape

    Cp = _round_up(C, 128)   # lane-dense channel dim; padding is exact (zeros)
    RB = next(r for r in (row_block, 8, 4, 2, 1) if H % r == 0)

    act_spec = pl.BlockSpec((1, H, W, Cp), lambda n: (n, 0, 0, 0))
    w_spec = pl.BlockSpec((3, 3, Cp, Cp), lambda n: (0, 0, 0, 0))
    b_spec = pl.BlockSpec((1, Cp), lambda n: (0, 0))

    args = [_pad_channels(x, Cp)]
    in_specs = [act_spec]
    if fuse:
        args.append(_pad_channels(x_from_top, Cp))
        in_specs.append(act_spec)
        args += list(_prep_rcu_params(params["rcu1"], Cp, compute_dtype))
        in_specs += [w_spec, b_spec, w_spec, b_spec]
        kernel = functools.partial(_ffb_kernel_fused, RB=RB)
    else:
        kernel = functools.partial(_ffb_kernel_plain, RB=RB)
    args += list(_prep_rcu_params(params["rcu2"], Cp, compute_dtype))
    in_specs += [w_spec, b_spec, w_spec, b_spec]

    n_conv = 4 if fuse else 2
    itemsize = np.dtype(compute_dtype).itemsize
    cost = pl.CostEstimate(
        flops=2 * 9 * H * W * Cp * Cp * n_conv * N,
        transcendentals=0,
        bytes_accessed=int(N * H * W * Cp * 4 * (3 if fuse else 2)
                           + n_conv * (9 * Cp * Cp + Cp) * itemsize))

    out = pl.pallas_call(
        kernel,
        grid=(N,),
        in_specs=in_specs,
        out_specs=act_spec,
        out_shape=jax.ShapeDtypeStruct((N, H, W, Cp), x.dtype),
        scratch_shapes=[pltpu.VMEM((2, H + 2, W + 2, Cp), compute_dtype)],
        compiler_params=pltpu.CompilerParams(
            dimension_semantics=("parallel",),      # batch -> both TCs on v7x
            vmem_limit_bytes=48 * 1024 * 1024),
        cost_estimate=cost,
    )(*args)
    # TODO(synk): for production DPT sizes (C>=128, H,W ~ 100+) add a spatial
    # row-block grid axis with a halo-aware index_map so the working set stays
    # within v7x's 64 MiB VMEM; the shapes here fit in one block per image.
    return out[..., :C]


# ---------------------------------------------------------------------------
# Pure-JAX reference (for correctness checking)
# ---------------------------------------------------------------------------
def _conv3x3_ref(x, w, b):
    y = lax.conv_general_dilated(x, w, window_strides=(1, 1), padding="SAME",
                                 dimension_numbers=("NHWC", "HWIO", "NHWC"))
    return y + b.reshape(1, 1, 1, -1)


def _rcu_ref(x, p):
    w1, b1, w2, b2 = p
    h = jax.nn.relu(_conv3x3_ref(x, w1, b1))
    h = jax.nn.relu(_conv3x3_ref(h, w2, b2))
    return h + x


def feature_fusion_block_ref(x, params, x_from_top=None, does_fusion=True):
    if x_from_top is not None:
        assert does_fusion and x.shape == x_from_top.shape
        x = _rcu_ref(x, params["rcu1"]) + x_from_top
    return _rcu_ref(x, params["rcu2"])


# ---------------------------------------------------------------------------
# Deterministic parameter init (synthetic — not a checkpoint load)
# ---------------------------------------------------------------------------
def init_rcu_params(key, c):
    k1, k2, k3, k4 = jax.random.split(key, 4)
    scale = 1.0 / float(np.sqrt(9 * c))
    w1 = jax.random.normal(k1, (3, 3, c, c), jnp.float32) * scale
    b1 = jax.random.normal(k2, (c,), jnp.float32) * 0.1
    w2 = jax.random.normal(k3, (3, 3, c, c), jnp.float32) * scale
    b2 = jax.random.normal(k4, (c,), jnp.float32) * 0.1
    return (w1, b1, w2, b2)


if __name__ == "__main__":
    # torch NCHW equivalent: x = [2, 4, 16, 16]  ->  NHWC (2, 16, 16, 4) here.
    B, C, H, W = 2, 4, 16, 16
    key = jax.random.PRNGKey(0)
    kx, kt, kp1, kp2 = jax.random.split(key, 4)
    x = jax.random.normal(kx, (B, H, W, C), jnp.float32)
    x_top = jax.random.normal(kt, (B, H, W, C), jnp.float32)
    params = {"rcu1": init_rcu_params(kp1, C), "rcu2": init_rcu_params(kp2, C)}

    ref_fuse = feature_fusion_block_ref(x, params, x_from_top=x_top)
    ref_plain = feature_fusion_block_ref(x, params)

    # f32 compute: tight check on both paths (fusion and no-skip).
    out = jax.block_until_ready(feature_fusion_block(
        x, params, x_from_top=x_top, compute_dtype=jnp.float32))
    np.testing.assert_allclose(np.asarray(out), np.asarray(ref_fuse),
                               rtol=1e-3, atol=1e-3)

    out = jax.block_until_ready(feature_fusion_block(
        x, params, compute_dtype=jnp.float32))
    np.testing.assert_allclose(np.asarray(out), np.asarray(ref_plain),
                               rtol=1e-3, atol=1e-3)

    # Default path: bf16 matmul operands / bf16 VMEM intermediates, f32 accumulation.
    out = jax.block_until_ready(feature_fusion_block(x, params, x_from_top=x_top))
    np.testing.assert_allclose(np.asarray(out), np.asarray(ref_fuse),
                               rtol=5e-2, atol=2e-1)

    print("KERNEL_OK")
</pallas_src>

<mosaic_0001>
module attributes {stable_mosaic.version = 11 : i64} {
  func.func @_ffb_kernel_fused(%arg0: i32, %arg1: memref<1x16x16x128xf32, #tpu.memory_space<vmem>>, %arg2: memref<1x16x16x128xf32, #tpu.memory_space<vmem>>, %arg3: memref<3x3x128x128xf32, #tpu.memory_space<vmem>>, %arg4: memref<1x128xf32, #tpu.memory_space<vmem>>, %arg5: memref<3x3x128x128xf32, #tpu.memory_space<vmem>>, %arg6: memref<1x128xf32, #tpu.memory_space<vmem>>, %arg7: memref<3x3x128x128xf32, #tpu.memory_space<vmem>>, %arg8: memref<1x128xf32, #tpu.memory_space<vmem>>, %arg9: memref<3x3x128x128xf32, #tpu.memory_space<vmem>>, %arg10: memref<1x128xf32, #tpu.memory_space<vmem>>, %arg11: memref<1x16x16x128xf32, #tpu.memory_space<vmem>>, %arg12: memref<2x18x18x128xf32, #tpu.memory_space<vmem>>) attributes {dimension_semantics = [#tpu.dimension_semantics<parallel>], iteration_bounds = array<i64: 2>, scalar_prefetch = 0 : i64, scratch_operands = 1 : i64, tpu.core_type = #tpu.core_type<tc>, window_params = [{transform_indices = @transform_0, window_bounds = array<i64: 1, 16, 16, 128>}, {transform_indices = @transform_1, window_bounds = array<i64: 1, 16, 16, 128>}, {pipeline_mode = #tpu.pipeline_mode<synchronous>, transform_indices = @transform_2, window_bounds = array<i64: 3, 3, 128, 128>}, {pipeline_mode = #tpu.pipeline_mode<synchronous>, transform_indices = @transform_3, window_bounds = array<i64: 1, 128>}, {pipeline_mode = #tpu.pipeline_mode<synchronous>, transform_indices = @transform_4, window_bounds = array<i64: 3, 3, 128, 128>}, {pipeline_mode = #tpu.pipeline_mode<synchronous>, transform_indices = @transform_5, window_bounds = array<i64: 1, 128>}, {pipeline_mode = #tpu.pipeline_mode<synchronous>, transform_indices = @transform_6, window_bounds = array<i64: 3, 3, 128, 128>}, {pipeline_mode = #tpu.pipeline_mode<synchronous>, transform_indices = @transform_7, window_bounds = array<i64: 1, 128>}, {pipeline_mode = #tpu.pipeline_mode<synchronous>, transform_indices = @transform_8, window_bounds = array<i64: 3, 3, 128, 128>}, {pipeline_mode = #tpu.pipeline_mode<synchronous>, transform_indices = @transform_9, window_bounds = array<i64: 1, 128>}, {transform_indices = @transform_10, window_bounds = array<i64: 1, 16, 16, 128>}]} {
    %cst = arith.constant 0.000000e+00 : f32
    %0 = vector.broadcast %cst : f32 to vector<1x18x128xf32>
    %c0 = arith.constant 0 : index
    %c0_0 = arith.constant 0 : index
    %c0_1 = arith.constant 0 : index
    %c0_2 = arith.constant 0 : index
    %1 = vector.load %arg12[%c0, %c0_0, %c0_1, %c0_2] : memref<2x18x18x128xf32, #tpu.memory_space<vmem>>, vector<1x1x18x128xf32>
    %2 = vector.shape_cast %1 : vector<1x1x18x128xf32> to vector<1x18x128xf32>
    %3 = vector.shape_cast %0 : vector<1x18x128xf32> to vector<1x1x18x128xf32>
    tpu.vector_store %arg12[%c0, %c0_0, %c0_1, %c0_2], %3 {strides = array<i32>} : memref<2x18x18x128xf32, #tpu.memory_space<vmem>>, vector<1x1x18x128xf32>,
    %cst_3 = arith.constant 0.000000e+00 : f32
    %4 = vector.broadcast %cst_3 : f32 to vector<1x18x128xf32>
    %c0_4 = arith.constant 0 : index
    %c17 = arith.constant 17 : index
    %c0_5 = arith.constant 0 : index
    %c0_6 = arith.constant 0 : index
    %5 = vector.load %arg12[%c0_4, %c17, %c0_5, %c0_6] : memref<2x18x18x128xf32, #tpu.memory_space<vmem>>, vector<1x1x18x128xf32>
    %6 = vector.shape_cast %5 : vector<1x1x18x128xf32> to vector<1x18x128xf32>
    %7 = vector.shape_cast %4 : vector<1x18x128xf32> to vector<1x1x18x128xf32>
    tpu.vector_store %arg12[%c0_4, %c17, %c0_5, %c0_6], %7 {strides = array<i32>} : memref<2x18x18x128xf32, #tpu.memory_space<vmem>>, vector<1x1x18x128xf32>,
    %cst_7 = arith.constant 0.000000e+00 : f32
    %8 = vector.broadcast %cst_7 : f32 to vector<18x1x128xf32>
    %c0_8 = arith.constant 0 : index
    %c0_9 = arith.constant 0 : index
    %c0_10 = arith.constant 0 : index
    %c0_11 = arith.constant 0 : index
    %9 = vector.load %arg12[%c0_8, %c0_9, %c0_10, %c0_11] : memref<2x18x18x128xf32, #tpu.memory_space<vmem>>, vector<1x18x1x128xf32>
    %10 = vector.shape_cast %9 : vector<1x18x1x128xf32> to vector<18x1x128xf32>
    %11 = vector.shape_cast %8 : vector<18x1x128xf32> to vector<1x18x1x128xf32>
    tpu.vector_store %arg12[%c0_8, %c0_9, %c0_10, %c0_11], %11 {strides = array<i32>} : memref<2x18x18x128xf32, #tpu.memory_space<vmem>>, vector<1x18x1x128xf32>,
    %cst_12 = arith.constant 0.000000e+00 : f32
    %12 = vector.broadcast %cst_12 : f32 to vector<18x1x128xf32>
    %c0_13 = arith.constant 0 : index
    %c0_14 = arith.constant 0 : index
    %c17_15 = arith.constant 17 : index
    %c0_16 = arith.constant 0 : index
    %13 = vector.load %arg12[%c0_13, %c0_14, %c17_15, %c0_16] : memref<2x18x18x128xf32, #tpu.memory_space<vmem>>, vector<1x18x1x128xf32>
    %14 = vector.shape_cast %13 : vector<1x18x1x128xf32> to vector<18x1x128xf32>
    %15 = vector.shape_cast %12 : vector<18x1x128xf32> to vector<1x18x1x128xf32>
    tpu.vector_store %arg12[%c0_13, %c0_14, %c17_15, %c0_16], %15 {strides = array<i32>} : memref<2x18x18x128xf32, #tpu.memory_space<vmem>>, vector<1x18x1x128xf32>,
    %cst_17 = arith.constant 0.000000e+00 : f32
    %16 = vector.broadcast %cst_17 : f32 to vector<1x18x128xf32>
    %c1 = arith.constant 1 : index
    %c0_18 = arith.constant 0 : index
    %c0_19 = arith.constant 0 : index
    %c0_20 = arith.constant 0 : index
    %17 = vector.load %arg12[%c1, %c0_18, %c0_19, %c0_20] : memref<2x18x18x128xf32, #tpu.memory_space<vmem>>, vector<1x1x18x128xf32>
    %18 = vector.shape_cast %17 : vector<1x1x18x128xf32> to vector<1x18x128xf32>
    %19 = vector.shape_cast %16 : vector<1x18x128xf32> to vector<1x1x18x128xf32>
    tpu.vector_store %arg12[%c1, %c0_18, %c0_19, %c0_20], %19 {strides = array<i32>} : memref<2x18x18x128xf32, #tpu.memory_space<vmem>>, vector<1x1x18x128xf32>,
    %cst_21 = arith.constant 0.000000e+00 : f32
    %20 = vector.broadcast %cst_21 : f32 to vector<1x18x128xf32>
    %c1_22 = arith.constant 1 : index
    %c17_23 = arith.constant 17 : index
    %c0_24 = arith.constant 0 : index
    %c0_25 = arith.constant 0 : index
    %21 = vector.load %arg12[%c1_22, %c17_23, %c0_24, %c0_25] : memref<2x18x18x128xf32, #tpu.memory_space<vmem>>, vector<1x1x18x128xf32>
    %22 = vector.shape_cast %21 : vector<1x1x18x128xf32> to vector<1x18x128xf32>
    %23 = vector.shape_cast %20 : vector<1x18x128xf32> to vector<1x1x18x128xf32>
    tpu.vector_store %arg12[%c1_22, %c17_23, %c0_24, %c0_25], %23 {strides = array<i32>} : memref<2x18x18x128xf32, #tpu.memory_space<vmem>>, vector<1x1x18x128xf32>,
    %cst_26 = arith.constant 0.000000e+00 : f32
    %24 = vector.broadcast %cst_26 : f32 to vector<18x1x128xf32>
    %c1_27 = arith.constant 1 : index
    %c0_28 = arith.constant 0 : index
    %c0_29 = arith.constant 0 : index
    %c0_30 = arith.constant 0 : index
    %25 = vector.load %arg12[%c1_27, %c0_28, %c0_29, %c0_30] : memref<2x18x18x128xf32, #tpu.memory_space<vmem>>, vector<1x18x1x128xf32>
    %26 = vector.shape_cast %25 : vector<1x18x1x128xf32> to vector<18x1x128xf32>
    %27 = vector.shape_cast %24 : vector<18x1x128xf32> to vector<1x18x1x128xf32>
    tpu.vector_store %arg12[%c1_27, %c0_28, %c0_29, %c0_30], %27 {strides = array<i32>} : memref<2x18x18x128xf32, #tpu.memory_space<vmem>>, vector<1x18x1x128xf32>,
    %cst_31 = arith.constant 0.000000e+00 : f32
    %28 = vector.broadcast %cst_31 : f32 to vector<18x1x128xf32>
    %c1_32 = arith.constant 1 : index
    %c0_33 = arith.constant 0 : index
    %c17_34 = arith.constant 17 : index
    %c0_35 = arith.constant 0 : index
    %29 = vector.load %arg12[%c1_32, %c0_33, %c17_34, %c0_35] : memref<2x18x18x128xf32, #tpu.memory_space<vmem>>, vector<1x18x1x128xf32>
    %30 = vector.shape_cast %29 : vector<1x18x1x128xf32> to vector<18x1x128xf32>
    %31 = vector.shape_cast %28 : vector<18x1x128xf32> to vector<1x18x1x128xf32>
    tpu.vector_store %arg12[%c1_32, %c0_33, %c17_34, %c0_35], %31 {strides = array<i32>} : memref<2x18x18x128xf32, #tpu.memory_space<vmem>>, vector<1x18x1x128xf32>,
    %c0_36 = arith.constant 0 : index
    %c0_37 = arith.constant 0 : index
    %c0_38 = arith.constant 0 : index
    %c0_39 = arith.constant 0 : index
    %32 = vector.load %arg1[%c0_36, %c0_37, %c0_38, %c0_39] : memref<1x16x16x128xf32, #tpu.memory_space<vmem>>, vector<1x16x16x128xf32>
    %33 = vector.shape_cast %32 : vector<1x16x16x128xf32> to vector<16x16x128xf32>
    %c0_40 = arith.constant 0 : index
    %c1_41 = arith.constant 1 : index
    %c1_42 = arith.constant 1 : index
    %c0_43 = arith.constant 0 : index
    %34 = vector.load %arg12[%c0_40, %c1_41, %c1_42, %c0_43] : memref<2x18x18x128xf32, #tpu.memory_space<vmem>>, vector<1x16x16x128xf32>
    %35 = vector.shape_cast %34 : vector<1x16x16x128xf32> to vector<16x16x128xf32>
    %36 = vector.shape_cast %33 : vector<16x16x128xf32> to vector<1x16x16x128xf32>
    tpu.vector_store %arg12[%c0_40, %c1_41, %c1_42, %c0_43], %36 {strides = array<i32>} : memref<2x18x18x128xf32, #tpu.memory_space<vmem>>, vector<1x16x16x128xf32>,
    %c0_i32 = arith.constant 0 : i32
    %c2_i32 = arith.constant 2 : i32
    %37 = arith.addi %c0_i32, %c2_i32 : i32
    %c1_i32 = arith.constant 1 : i32
    scf.for %arg13 = %c0_i32 to %37 step %c1_i32  : i32 {
      %c8_i32 = arith.constant 8 : i32
      %41 = arith.muli %arg13, %c8_i32 : i32
      %42 = tpu.assume_multiple %41, 8 : i32
      %c0_57 = arith.constant 0 : index
      %c0_58 = arith.constant 0 : index
      %43 = vector.load %arg4[%c0_57, %c0_58] : memref<1x128xf32, #tpu.memory_space<vmem>>, vector<1x128xf32>
      %44 = vector.shape_cast %43 : vector<1x128xf32> to vector<1x128xf32>
      %45 = vector.broadcast %44 : vector<1x128xf32> to vector<128x128xf32>
      %c0_59 = arith.constant 0 : index
      %46 = arith.index_cast %42 : i32 to index
      %c0_60 = arith.constant 0 : index
      %c0_61 = arith.constant 0 : index
      %47 = vector.load %arg12[%c0_59, %46, %c0_60, %c0_61] : memref<2x18x18x128xf32, #tpu.memory_space<vmem>>, vector<1x10x16x128xf32>
      %48 = vector.shape_cast %47 : vector<1x10x16x128xf32> to vector<10x16x128xf32>
      %49 = vector.extract_strided_slice %48 {offsets = [0, 0, 0], sizes = [8, 16, 128], strides = [1, 1, 1]} : vector<10x16x128xf32> to vector<8x16x128xf32>
      %50 = vector.shape_cast %49 : vector<8x16x128xf32> to vector<128x128xf32>
      %c0_62 = arith.constant 0 : index
      %c0_63 = arith.constant 0 : index
      %c0_64 = arith.constant 0 : index
      %c0_65 = arith.constant 0 : index
      %51 = vector.load %arg3[%c0_62, %c0_63, %c0_64, %c0_65] : memref<3x3x128x128xf32, #tpu.memory_space<vmem>>, vector<1x1x128x128xf32>
      %52 = vector.shape_cast %51 : vector<1x1x128x128xf32> to vector<128x128xf32>
      %cst_66 = arith.constant dense<0.000000e+00> : vector<128x128xf32>
      %53 = tpu.matmul %50, %52, %cst_66 {dimension_numbers = #tpu.dot_dimension_numbers<[1], [0], [0], [1], [0, 0, 1, 1], [], []>} : vector<128x128xf32>, vector<128x128xf32>, vector<128x128xf32> -> vector<128x128xf32>
      %54 = arith.addf %45, %53 : vector<128x128xf32>
      %55 = vector.extract_strided_slice %48 {offsets = [1, 0, 0], sizes = [8, 16, 128], strides = [1, 1, 1]} : vector<10x16x128xf32> to vector<8x16x128xf32>
      %56 = vector.shape_cast %55 : vector<8x16x128xf32> to vector<128x128xf32>
      %c1_67 = arith.constant 1 : index
      %c0_68 = arith.constant 0 : index
      %c0_69 = arith.constant 0 : index
      %c0_70 = arith.constant 0 : index
      %57 = vector.load %arg3[%c1_67, %c0_68, %c0_69, %c0_70] : memref<3x3x128x128xf32, #tpu.memory_space<vmem>>, vector<1x1x128x128xf32>
      %58 = vector.shape_cast %57 : vector<1x1x128x128xf32> to vector<128x128xf32>
      %cst_71 = arith.constant dense<0.000000e+00> : vector<128x128xf32>
      %59 = tpu.matmul %56, %58, %cst_71 {dimension_numbers = #tpu.dot_dimension_numbers<[1], [0], [0], [1], [0, 0, 1, 1], [], []>} : vector<128x128xf32>, vector<128x128xf32>, vector<128x128xf32> -> vector<128x128xf32>
      %60 = arith.addf %54, %59 : vector<128x128xf32>
      %61 = vector.extract_strided_slice %48 {offsets = [2, 0, 0], sizes = [8, 16, 128], strides = [1, 1, 1]} : vector<10x16x128xf32> to vector<8x16x128xf32>
      %62 = vector.shape_cast %61 : vector<8x16x128xf32> to vector<128x128xf32>
      %c2 = arith.constant 2 : index
      %c0_72 = arith.constant 0 : index
      %c0_73 = arith.constant 0 : index
      %c0_74 = arith.constant 0 : index
      %63 = vector.load %arg3[%c2, %c0_72, %c0_73, %c0_74] : memref<3x3x128x128xf32, #tpu.memory_space<vmem>>, vector<1x1x128x128xf32>
      %64 = vector.shape_cast %63 : vector<1x1x128x128xf32> to vector<128x128xf32>
      %cst_75 = arith.constant dense<0.000000e+00> : vector<128x128xf32>
      %65 = tpu.matmul %62, %64, %cst_75 {dimension_numbers = #tpu.dot_dimension_numbers<[1], [0], [0], [1], [0, 0, 1, 1], [], []>} : vector<128x128xf32>, vector<128x128xf32>, vector<128x128xf32> -> vector<128x128xf32>
      %66 = arith.addf %60, %65 : vector<128x128xf32>
      %c0_76 = arith.constant 0 : index
      %67 = arith.index_cast %42 : i32 to index
      %c1_77 = arith.constant 1 : index
      %c0_78 = arith.constant 0 : index
      %68 = vector.load %arg12[%c0_76, %67, %c1_77, %c0_78] : memref<2x18x18x128xf32, #tpu.memory_space<vmem>>, vector<1x10x16x128xf32>
      %69 = vector.shape_cast %68 : vector<1x10x16x128xf32> to vector<10x16x128xf32>
      %70 = vector.extract_strided_slice %69 {offsets = [0, 0, 0], sizes = [8, 16, 128], strides = [1, 1, 1]} : vector<10x16x128xf32> to vector<8x16x128xf32>
      %71 = vector.shape_cast %70 : vector<8x16x128xf32> to vector<128x128xf32>
      %c0_79 = arith.constant 0 : index
      %c1_80 = arith.constant 1 : index
      %c0_81 = arith.constant 0 : index
      %c0_82 = arith.constant 0 : index
      %72 = vector.load %arg3[%c0_79, %c1_80, %c0_81, %c0_82] : memref<3x3x128x128xf32, #tpu.memory_space<vmem>>, vector<1x1x128x128xf32>
      %73 = vector.shape_cast %72 : vector<1x1x128x128xf32> to vector<128x128xf32>
      %cst_83 = arith.constant dense<0.000000e+00> : vector<128x128xf32>
      %74 = tpu.matmul %71, %73, %cst_83 {dimension_numbers = #tpu.dot_dimension_numbers<[1], [0], [0], [1], [0, 0, 1, 1], [], []>} : vector<128x128xf32>, vector<128x128xf32>, vector<128x128xf32> -> vector<128x128xf32>
      %75 = arith.addf %66, %74 : vector<128x128xf32>
      %76 = vector.extract_strided_slice %69 {offsets = [1, 0, 0], sizes = [8, 16, 128], strides = [1, 1, 1]} : vector<10x16x128xf32> to vector<8x16x128xf32>
      %77 = vector.shape_cast %76 : vector<8x16x128xf32> to vector<128x128xf32>
      %c1_84 = arith.constant 1 : index
      %c1_85 = arith.constant 1 : index
      %c0_86 = arith.constant 0 : index
      %c0_87 = arith.constant 0 : index
      %78 = vector.load %arg3[%c1_84, %c1_85, %c0_86, %c0_87] : memref<3x3x128x128xf32, #tpu.memory_space<vmem>>, vector<1x1x128x128xf32>
      %79 = vector.shape_cast %78 : vector<1x1x128x128xf32> to vector<128x128xf32>
      %cst_88 = arith.constant dense<0.000000e+00> : vector<128x128xf32>
      %80 = tpu.matmul %77, %79, %cst_88 {dimension_numbers = #tpu.dot_dimension_numbers<[1], [0], [0], [1], [0, 0, 1, 1], [], []>} : vector<128x128xf32>, vector<128x128xf32>, vector<128x128xf32> -> vector<128x128xf32>
      %81 = arith.addf %75, %80 : vector<128x128xf32>
      %82 = vector.extract_strided_slice %69 {offsets = [2, 0, 0], sizes = [8, 16, 128], strides = [1, 1, 1]} : vector<10x16x128xf32> to vector<8x16x128xf32>
      %83 = vector.shape_cast %82 : vector<8x16x128xf32> to vector<128x128xf32>
      %c2_89 = arith.constant 2 : index
      %c1_90 = arith.constant 1 : index
      %c0_91 = arith.constant 0 : index
      %c0_92 = arith.constant 0 : index
      %84 = vector.load %arg3[%c2_89, %c1_90, %c0_91, %c0_92] : memref<3x3x128x128xf32, #tpu.memory_space<vmem>>, vector<1x1x128x128xf32>
      %85 = vector.shape_cast %84 : vector<1x1x128x128xf32> to vector<128x128xf32>
      %cst_93 = arith.constant dense<0.000000e+00> : vector<128x128xf32>
      %86 = tpu.matmul %83, %85, %cst_93 {dimension_numbers = #tpu.dot_dimension_numbers<[1], [0], [0], [1], [0, 0, 1, 1], [], []>} : vector<128x128xf32>, vector<128x128xf32>, vector<128x128xf32> -> vector<128x128xf32>
      %87 = arith.addf %81, %86 : vector<128x128xf32>
      %c0_94 = arith.constant 0 : index
      %88 = arith.index_cast %42 : i32 to index
      %c2_95 = arith.constant 2 : index
      %c0_96 = arith.constant 0 : index
      %89 = vector.load %arg12[%c0_94, %88, %c2_95, %c0_96] : memref<2x18x18x128xf32, #tpu.memory_space<vmem>>, vector<1x10x16x128xf32>
      %90 = vector.shape_cast %89 : vector<1x10x16x128xf32> to vector<10x16x128xf32>
      %91 = vector.extract_strided_slice %90 {offsets = [0, 0, 0], sizes = [8, 16, 128], strides = [1, 1, 1]} : vector<10x16x128xf32> to vector<8x16x128xf32>
      %92 = vector.shape_cast %91 : vector<8x16x128xf32> to vector<128x128xf32>
      %c0_97 = arith.constant 0 : index
      %c2_98 = arith.constant 2 : index
      %c0_99 = arith.constant 0 : index
      %c0_100 = arith.constant 0 : index
      %93 = vector.load %arg3[%c0_97, %c2_98, %c0_99, %c0_100] : memref<3x3x128x128xf32, #tpu.memory_space<vmem>>, vector<1x1x128x128xf32>
      %94 = vector.shape_cast %93 : vector<1x1x128x128xf32> to vector<128x128xf32>
      %cst_101 = arith.constant dense<0.000000e+00> : vector<128x128xf32>
      %95 = tpu.matmul %92, %94, %cst_101 {dimension_numbers = #tpu.dot_dimension_numbers<[1], [0], [0], [1], [0, 0, 1, 1], [], []>} : vector<128x128xf32>, vector<128x128xf32>, vector<128x128xf32> -> vector<128x128xf32>
      %96 = arith.addf %87, %95 : vector<128x128xf32>
      %97 = vector.extract_strided_slice %90 {offsets = [1, 0, 0], sizes = [8, 16, 128], strides = [1, 1, 1]} : vector<10x16x128xf32> to vector<8x16x128xf32>
      %98 = vector.shape_cast %97 : vector<8x16x128xf32> to vector<128x128xf32>
      %c1_102 = arith.constant 1 : index
      %c2_103 = arith.constant 2 : index
      %c0_104 = arith.constant 0 : index
      %c0_105 = arith.constant 0 : index
      %99 = vector.load %arg3[%c1_102, %c2_103, %c0_104, %c0_105] : memref<3x3x128x128xf32, #tpu.memory_space<vmem>>, vector<1x1x128x128xf32>
      %100 = vector.shape_cast %99 : vector<1x1x128x128xf32> to vector<128x128xf32>
      %cst_106 = arith.constant dense<0.000000e+00> : vector<128x128xf32>
      %101 = tpu.matmul %98, %100, %cst_106 {dimension_numbers = #tpu.dot_dimension_numbers<[1], [0], [0], [1], [0, 0, 1, 1], [], []>} : vector<128x128xf32>, vector<128x128xf32>, vector<128x128xf32> -> vector<128x128xf32>
      %102 = arith.addf %96, %101 : vector<128x128xf32>
      %103 = vector.extract_strided_slice %90 {offsets = [2, 0, 0], sizes = [8, 16, 128], strides = [1, 1, 1]} : vector<10x16x128xf32> to vector<8x16x128xf32>
      %104 = vector.shape_cast %103 : vector<8x16x128xf32> to vector<128x128xf32>
      %c2_107 = arith.constant 2 : index
      %c2_108 = arith.constant 2 : index
      %c0_109 = arith.constant 0 : index
      %c0_110 = arith.constant 0 : index
      %105 = vector.load %arg3[%c2_107, %c2_108, %c0_109, %c0_110] : memref<3x3x128x128xf32, #tpu.memory_space<vmem>>, vector<1x1x128x128xf32>
      %106 = vector.shape_cast %105 : vector<1x1x128x128xf32> to vector<128x128xf32>
      %cst_111 = arith.constant dense<0.000000e+00> : vector<128x128xf32>
      %107 = tpu.matmul %104, %106, %cst_111 {dimension_numbers = #tpu.dot_dimension_numbers<[1], [0], [0], [1], [0, 0, 1, 1], [], []>} : vector<128x128xf32>, vector<128x128xf32>, vector<128x128xf32> -> vector<128x128xf32>
      %108 = arith.addf %102, %107 : vector<128x128xf32>
      %cst_112 = arith.constant 0.000000e+00 : f32
      %109 = vector.broadcast %cst_112 : f32 to vector<128x128xf32>
      %110 = arith.maximumf %108, %109 : vector<128x128xf32>
      %111 = vector.shape_cast %110 : vector<128x128xf32> to vector<8x16x128xf32>
      %c1_i32_113 = arith.constant 1 : i32
      %112 = arith.addi %42, %c1_i32_113 : i32
      %c1_114 = arith.constant 1 : index
      %113 = arith.index_cast %112 : i32 to index
      %c1_115 = arith.constant 1 : index
      %c0_116 = arith.constant 0 : index
      %114 = vector.load %arg12[%c1_114, %113, %c1_115, %c0_116] : memref<2x18x18x128xf32, #tpu.memory_space<vmem>>, vector<1x8x16x128xf32>
      %115 = vector.shape_cast %114 : vector<1x8x16x128xf32> to vector<8x16x128xf32>
      %116 = vector.shape_cast %111 : vector<8x16x128xf32> to vector<1x8x16x128xf32>
      tpu.vector_store %arg12[%c1_114, %113, %c1_115, %c0_116], %116 {strides = array<i32>} : memref<2x18x18x128xf32, #tpu.memory_space<vmem>>, vector<1x8x16x128xf32>,
    }
    %c2_i32_44 = arith.constant 2 : i32
    %c0_i32_45 = arith.constant 0 : i32
    %c2_i32_46 = arith.constant 2 : i32
    %38 = arith.addi %c0_i32_45, %c2_i32_46 : i32
    %c1_i32_47 = arith.constant 1 : i32
    scf.for %arg13 = %c0_i32_45 to %38 step %c1_i32_47  : i32 {
      %c8_i32 = arith.constant 8 : i32
      %41 = arith.muli %arg13, %c8_i32 : i32
      %42 = tpu.assume_multiple %41, 8 : i32
      %c0_57 = arith.constant 0 : index
      %c0_58 = arith.constant 0 : index
      %43 = vector.load %arg6[%c0_57, %c0_58] : memref<1x128xf32, #tpu.memory_space<vmem>>, vector<1x128xf32>
      %44 = vector.shape_cast %43 : vector<1x128xf32> to vector<1x128xf32>
      %45 = vector.broadcast %44 : vector<1x128xf32> to vector<128x128xf32>
      %c1_59 = arith.constant 1 : index
      %46 = arith.index_cast %42 : i32 to index
      %c0_60 = arith.constant 0 : index
      %c0_61 = arith.constant 0 : index
      %47 = vector.load %arg12[%c1_59, %46, %c0_60, %c0_61] : memref<2x18x18x128xf32, #tpu.memory_space<vmem>>, vector<1x10x16x128xf32>
      %48 = vector.shape_cast %47 : vector<1x10x16x128xf32> to vector<10x16x128xf32>
      %49 = vector.extract_strided_slice %48 {offsets = [0, 0, 0], sizes = [8, 16, 128], strides = [1, 1, 1]} : vector<10x16x128xf32> to vector<8x16x128xf32>
      %50 = vector.shape_cast %49 : vector<8x16x128xf32> to vector<128x128xf32>
      %c0_62 = arith.constant 0 : index
      %c0_63 = arith.constant 0 : index
      %c0_64 = arith.constant 0 : index
      %c0_65 = arith.constant 0 : index
      %51 = vector.load %arg5[%c0_62, %c0_63, %c0_64, %c0_65] : memref<3x3x128x128xf32, #tpu.memory_space<vmem>>, vector<1x1x128x128xf32>
      %52 = vector.shape_cast %51 : vector<1x1x128x128xf32> to vector<128x128xf32>
      %cst_66 = arith.constant dense<0.000000e+00> : vector<128x128xf32>
      %53 = tpu.matmul %50, %52, %cst_66 {dimension_numbers = #tpu.dot_dimension_numbers<[1], [0], [0], [1], [0, 0, 1, 1], [], []>} : vector<128x128xf32>, vector<128x128xf32>, vector<128x128xf32> -> vector<128x128xf32>
      %54 = arith.addf %45, %53 : vector<128x128xf32>
      %55 = vector.extract_strided_slice %48 {offsets = [1, 0, 0], sizes = [8, 16, 128], strides = [1, 1, 1]} : vector<10x16x128xf32> to vector<8x16x128xf32>
      %56 = vector.shape_cast %55 : vector<8x16x128xf32> to vector<128x128xf32>
      %c1_67 = arith.constant 1 : index
      %c0_68 = arith.constant 0 : index
      %c0_69 = arith.constant 0 : index
      %c0_70 = arith.constant 0 : index
      %57 = vector.load %arg5[%c1_67, %c0_68, %c0_69, %c0_70] : memref<3x3x128x128xf32, #tpu.memory_space<vmem>>, vector<1x1x128x128xf32>
      %58 = vector.shape_cast %57 : vector<1x1x128x128xf32> to vector<128x128xf32>
      %cst_71 = arith.constant dense<0.000000e+00> : vector<128x128xf32>
      %59 = tpu.matmul %56, %58, %cst_71 {dimension_numbers = #tpu.dot_dimension_numbers<[1], [0], [0], [1], [0, 0, 1, 1], [], []>} : vector<128x128xf32>, vector<128x128xf32>, vector<128x128xf32> -> vector<128x128xf32>
      %60 = arith.addf %54, %59 : vector<128x128xf32>
      %61 = vector.extract_strided_slice %48 {offsets = [2, 0, 0], sizes = [8, 16, 128], strides = [1, 1, 1]} : vector<10x16x128xf32> to vector<8x16x128xf32>
      %62 = vector.shape_cast %61 : vector<8x16x128xf32> to vector<128x128xf32>
      %c2 = arith.constant 2 : index
      %c0_72 = arith.constant 0 : index
      %c0_73 = arith.constant 0 : index
      %c0_74 = arith.constant 0 : index
      %63 = vector.load %arg5[%c2, %c0_72, %c0_73, %c0_74] : memref<3x3x128x128xf32, #tpu.memory_space<vmem>>, vector<1x1x128x128xf32>
      %64 = vector.shape_cast %63 : vector<1x1x128x128xf32> to vector<128x128xf32>
      %cst_75 = arith.constant dense<0.000000e+00> : vector<128x128xf32>
      %65 = tpu.matmul %62, %64, %cst_75 {dimension_numbers = #tpu.dot_dimension_numbers<[1], [0], [0], [1], [0, 0, 1, 1], [], []>} : vector<128x128xf32>, vector<128x128xf32>, vector<128x128xf32> -> vector<128x128xf32>
      %66 = arith.addf %60, %65 : vector<128x128xf32>
      %c1_76 = arith.constant 1 : index
      %67 = arith.index_cast %42 : i32 to index
      %c1_77 = arith.constant 1 : index
      %c0_78 = arith.constant 0 : index
      %68 = vector.load %arg12[%c1_76, %67, %c1_77, %c0_78] : memref<2x18x18x128xf32, #tpu.memory_space<vmem>>, vector<1x10x16x128xf32>
      %69 = vector.shape_cast %68 : vector<1x10x16x128xf32> to vector<10x16x128xf32>
      %70 = vector.extract_strided_slice %69 {offsets = [0, 0, 0], sizes = [8, 16, 128], strides = [1, 1, 1]} : vector<10x16x128xf32> to vector<8x16x128xf32>
      %71 = vector.shape_cast %70 : vector<8x16x128xf32> to vector<128x128xf32>
      %c0_79 = arith.constant 0 : index
      %c1_80 = arith.constant 1 : index
      %c0_81 = arith.constant 0 : index
      %c0_82 = arith.constant 0 : index
      %72 = vector.load %arg5[%c0_79, %c1_80, %c0_81, %c0_82] : memref<3x3x128x128xf32, #tpu.memory_space<vmem>>, vector<1x1x128x128xf32>
      %73 = vector.shape_cast %72 : vector<1x1x128x128xf32> to vector<128x128xf32>
      %cst_83 = arith.constant dense<0.000000e+00> : vector<128x128xf32>
      %74 = tpu.matmul %71, %73, %cst_83 {dimension_numbers = #tpu.dot_dimension_numbers<[1], [0], [0], [1], [0, 0, 1, 1], [], []>} : vector<128x128xf32>, vector<128x128xf32>, vector<128x128xf32> -> vector<128x128xf32>
      %75 = arith.addf %66, %74 : vector<128x128xf32>
      %76 = vector.extract_strided_slice %69 {offsets = [1, 0, 0], sizes = [8, 16, 128], strides = [1, 1, 1]} : vector<10x16x128xf32> to vector<8x16x128xf32>
      %77 = vector.shape_cast %76 : vector<8x16x128xf32> to vector<128x128xf32>
      %c1_84 = arith.constant 1 : index
      %c1_85 = arith.constant 1 : index
      %c0_86 = arith.constant 0 : index
      %c0_87 = arith.constant 0 : index
      %78 = vector.load %arg5[%c1_84, %c1_85, %c0_86, %c0_87] : memref<3x3x128x128xf32, #tpu.memory_space<vmem>>, vector<1x1x128x128xf32>
      %79 = vector.shape_cast %78 : vector<1x1x128x128xf32> to vector<128x128xf32>
      %cst_88 = arith.constant dense<0.000000e+00> : vector<128x128xf32>
      %80 = tpu.matmul %77, %79, %cst_88 {dimension_numbers = #tpu.dot_dimension_numbers<[1], [0], [0], [1], [0, 0, 1, 1], [], []>} : vector<128x128xf32>, vector<128x128xf32>, vector<128x128xf32> -> vector<128x128xf32>
      %81 = arith.addf %75, %80 : vector<128x128xf32>
      %82 = vector.extract_strided_slice %69 {offsets = [2, 0, 0], sizes = [8, 16, 128], strides = [1, 1, 1]} : vector<10x16x128xf32> to vector<8x16x128xf32>
      %83 = vector.shape_cast %82 : vector<8x16x128xf32> to vector<128x128xf32>
      %c2_89 = arith.constant 2 : index
      %c1_90 = arith.constant 1 : index
      %c0_91 = arith.constant 0 : index
      %c0_92 = arith.constant 0 : index
      %84 = vector.load %arg5[%c2_89, %c1_90, %c0_91, %c0_92] : memref<3x3x128x128xf32, #tpu.memory_space<vmem>>, vector<1x1x128x128xf32>
      %85 = vector.shape_cast %84 : vector<1x1x128x128xf32> to vector<128x128xf32>
      %cst_93 = arith.constant dense<0.000000e+00> : vector<128x128xf32>
      %86 = tpu.matmul %83, %85, %cst_93 {dimension_numbers = #tpu.dot_dimension_numbers<[1], [0], [0], [1], [0, 0, 1, 1], [], []>} : vector<128x128xf32>, vector<128x128xf32>, vector<128x128xf32> -> vector<128x128xf32>
      %87 = arith.addf %81, %86 : vector<128x128xf32>
      %c1_94 = arith.constant 1 : index
      %88 = arith.index_cast %42 : i32 to index
      %c2_95 = arith.constant 2 : index
      %c0_96 = arith.constant 0 : index
      %89 = vector.load %arg12[%c1_94, %88, %c2_95, %c0_96] : memref<2x18x18x128xf32, #tpu.memory_space<vmem>>, vector<1x10x16x128xf32>
      %90 = vector.shape_cast %89 : vector<1x10x16x128xf32> to vector<10x16x128xf32>
      %91 = vector.extract_strided_slice %90 {offsets = [0, 0, 0], sizes = [8, 16, 128], strides = [1, 1, 1]} : vector<10x16x128xf32> to vector<8x16x128xf32>
      %92 = vector.shape_cast %91 : vector<8x16x128xf32> to vector<128x128xf32>
      %c0_97 = arith.constant 0 : index
      %c2_98 = arith.constant 2 : index
      %c0_99 = arith.constant 0 : index
      %c0_100 = arith.constant 0 : index
      %93 = vector.load %arg5[%c0_97, %c2_98, %c0_99, %c0_100] : memref<3x3x128x128xf32, #tpu.memory_space<vmem>>, vector<1x1x128x128xf32>
      %94 = vector.shape_cast %93 : vector<1x1x128x128xf32> to vector<128x128xf32>
      %cst_101 = arith.constant dense<0.000000e+00> : vector<128x128xf32>
      %95 = tpu.matmul %92, %94, %cst_101 {dimension_numbers = #tpu.dot_dimension_numbers<[1], [0], [0], [1], [0, 0, 1, 1], [], []>} : vector<128x128xf32>, vector<128x128xf32>, vector<128x128xf32> -> vector<128x128xf32>
      %96 = arith.addf %87, %95 : vector<128x128xf32>
      %97 = vector.extract_strided_slice %90 {offsets = [1, 0, 0], sizes = [8, 16, 128], strides = [1, 1, 1]} : vector<10x16x128xf32> to vector<8x16x128xf32>
      %98 = vector.shape_cast %97 : vector<8x16x128xf32> to vector<128x128xf32>
      %c1_102 = arith.constant 1 : index
      %c2_103 = arith.constant 2 : index
      %c0_104 = arith.constant 0 : index
      %c0_105 = arith.constant 0 : index
      %99 = vector.load %arg5[%c1_102, %c2_103, %c0_104, %c0_105] : memref<3x3x128x128xf32, #tpu.memory_space<vmem>>, vector<1x1x128x128xf32>
      %100 = vector.shape_cast %99 : vector<1x1x128x128xf32> to vector<128x128xf32>
      %cst_106 = arith.constant dense<0.000000e+00> : vector<128x128xf32>
      %101 = tpu.matmul %98, %100, %cst_106 {dimension_numbers = #tpu.dot_dimension_numbers<[1], [0], [0], [1], [0, 0, 1, 1], [], []>} : vector<128x128xf32>, vector<128x128xf32>, vector<128x128xf32> -> vector<128x128xf32>
      %102 = arith.addf %96, %101 : vector<128x128xf32>
      %103 = vector.extract_strided_slice %90 {offsets = [2, 0, 0], sizes = [8, 16, 128], strides = [1, 1, 1]} : vector<10x16x128xf32> to vector<8x16x128xf32>
      %104 = vector.shape_cast %103 : vector<8x16x128xf32> to vector<128x128xf32>
      %c2_107 = arith.constant 2 : index
      %c2_108 = arith.constant 2 : index
      %c0_109 = arith.constant 0 : index
      %c0_110 = arith.constant 0 : index
      %105 = vector.load %arg5[%c2_107, %c2_108, %c0_109, %c0_110] : memref<3x3x128x128xf32, #tpu.memory_space<vmem>>, vector<1x1x128x128xf32>
      %106 = vector.shape_cast %105 : vector<1x1x128x128xf32> to vector<128x128xf32>
      %cst_111 = arith.constant dense<0.000000e+00> : vector<128x128xf32>
      %107 = tpu.matmul %104, %106, %cst_111 {dimension_numbers = #tpu.dot_dimension_numbers<[1], [0], [0], [1], [0, 0, 1, 1], [], []>} : vector<128x128xf32>, vector<128x128xf32>, vector<128x128xf32> -> vector<128x128xf32>
      %108 = arith.addf %102, %107 : vector<128x128xf32>
      %cst_112 = arith.constant 0.000000e+00 : f32
      %109 = vector.broadcast %cst_112 : f32 to vector<128x128xf32>
      %110 = arith.maximumf %108, %109 : vector<128x128xf32>
      %c1_i32_113 = arith.constant 1 : i32
      %111 = arith.addi %42, %c1_i32_113 : i32
      %c0_114 = arith.constant 0 : index
      %112 = arith.index_cast %111 : i32 to index
      %c1_115 = arith.constant 1 : index
      %c0_116 = arith.constant 0 : index
      %113 = vector.load %arg12[%c0_114, %112, %c1_115, %c0_116] : memref<2x18x18x128xf32, #tpu.memory_space<vmem>>, vector<1x8x16x128xf32>
      %114 = vector.shape_cast %113 : vector<1x8x16x128xf32> to vector<8x16x128xf32>
      %115 = vector.shape_cast %114 : vector<8x16x128xf32> to vector<128x128xf32>
      %116 = arith.addf %110, %115 : vector<128x128xf32>
      %c0_117 = arith.constant 0 : index
      %117 = arith.index_cast %42 : i32 to index
      %c0_118 = arith.constant 0 : index
      %c0_119 = arith.constant 0 : index
      %118 = vector.load %arg2[%c0_117, %117, %c0_118, %c0_119] : memref<1x16x16x128xf32, #tpu.memory_space<vmem>>, vector<1x8x16x128xf32>
      %119 = vector.shape_cast %118 : vector<1x8x16x128xf32> to vector<8x16x128xf32>
      %120 = vector.shape_cast %119 : vector<8x16x128xf32> to vector<128x128xf32>
      %121 = arith.addf %116, %120 : vector<128x128xf32>
      %122 = vector.shape_cast %121 : vector<128x128xf32> to vector<8x16x128xf32>
      %c1_i32_120 = arith.constant 1 : i32
      %123 = arith.addi %42, %c1_i32_120 : i32
      %c0_121 = arith.constant 0 : index
      %124 = arith.index_cast %123 : i32 to index
      %c1_122 = arith.constant 1 : index
      %c0_123 = arith.constant 0 : index
      %125 = vector.load %arg12[%c0_121, %124, %c1_122, %c0_123] : memref<2x18x18x128xf32, #tpu.memory_space<vmem>>, vector<1x8x16x128xf32>
      %126 = vector.shape_cast %125 : vector<1x8x16x128xf32> to vector<8x16x128xf32>
      %127 = vector.shape_cast %122 : vector<8x16x128xf32> to vector<1x8x16x128xf32>
      tpu.vector_store %arg12[%c0_121, %124, %c1_122, %c0_123], %127 {strides = array<i32>} : memref<2x18x18x128xf32, #tpu.memory_space<vmem>>, vector<1x8x16x128xf32>,
    }
    %c2_i32_48 = arith.constant 2 : i32
    %c0_i32_49 = arith.constant 0 : i32
    %c2_i32_50 = arith.constant 2 : i32
    %39 = arith.addi %c0_i32_49, %c2_i32_50 : i32
    %c1_i32_51 = arith.constant 1 : i32
    scf.for %arg13 = %c0_i32_49 to %39 step %c1_i32_51  : i32 {
      %c8_i32 = arith.constant 8 : i32
      %41 = arith.muli %arg13, %c8_i32 : i32
      %42 = tpu.assume_multiple %41, 8 : i32
      %c0_57 = arith.constant 0 : index
      %c0_58 = arith.constant 0 : index
      %43 = vector.load %arg8[%c0_57, %c0_58] : memref<1x128xf32, #tpu.memory_space<vmem>>, vector<1x128xf32>
      %44 = vector.shape_cast %43 : vector<1x128xf32> to vector<1x128xf32>
      %45 = vector.broadcast %44 : vector<1x128xf32> to vector<128x128xf32>
      %c0_59 = arith.constant 0 : index
      %46 = arith.index_cast %42 : i32 to index
      %c0_60 = arith.constant 0 : index
      %c0_61 = arith.constant 0 : index
      %47 = vector.load %arg12[%c0_59, %46, %c0_60, %c0_61] : memref<2x18x18x128xf32, #tpu.memory_space<vmem>>, vector<1x10x16x128xf32>
      %48 = vector.shape_cast %47 : vector<1x10x16x128xf32> to vector<10x16x128xf32>
      %49 = vector.extract_strided_slice %48 {offsets = [0, 0, 0], sizes = [8, 16, 128], strides = [1, 1, 1]} : vector<10x16x128xf32> to vector<8x16x128xf32>
      %50 = vector.shape_cast %49 : vector<8x16x128xf32> to vector<128x128xf32>
      %c0_62 = arith.constant 0 : index
      %c0_63 = arith.constant 0 : index
      %c0_64 = arith.constant 0 : index
      %c0_65 = arith.constant 0 : index
      %51 = vector.load %arg7[%c0_62, %c0_63, %c0_64, %c0_65] : memref<3x3x128x128xf32, #tpu.memory_space<vmem>>, vector<1x1x128x128xf32>
      %52 = vector.shape_cast %51 : vector<1x1x128x128xf32> to vector<128x128xf32>
      %cst_66 = arith.constant dense<0.000000e+00> : vector<128x128xf32>
      %53 = tpu.matmul %50, %52, %cst_66 {dimension_numbers = #tpu.dot_dimension_numbers<[1], [0], [0], [1], [0, 0, 1, 1], [], []>} : vector<128x128xf32>, vector<128x128xf32>, vector<128x128xf32> -> vector<128x128xf32>
      %54 = arith.addf %45, %53 : vector<128x128xf32>
      %55 = vector.extract_strided_slice %48 {offsets = [1, 0, 0], sizes = [8, 16, 128], strides = [1, 1, 1]} : vector<10x16x128xf32> to vector<8x16x128xf32>
      %56 = vector.shape_cast %55 : vector<8x16x128xf32> to vector<128x128xf32>
      %c1_67 = arith.constant 1 : index
      %c0_68 = arith.constant 0 : index
      %c0_69 = arith.constant 0 : index
      %c0_70 = arith.constant 0 : index
      %57 = vector.load %arg7[%c1_67, %c0_68, %c0_69, %c0_70] : memref<3x3x128x128xf32, #tpu.memory_space<vmem>>, vector<1x1x128x128xf32>
      %58 = vector.shape_cast %57 : vector<1x1x128x128xf32> to vector<128x128xf32>
      %cst_71 = arith.constant dense<0.000000e+00> : vector<128x128xf32>
      %59 = tpu.matmul %56, %58, %cst_71 {dimension_numbers = #tpu.dot_dimension_numbers<[1], [0], [0], [1], [0, 0, 1, 1], [], []>} : vector<128x128xf32>, vector<128x128xf32>, vector<128x128xf32> -> vector<128x128xf32>
      %60 = arith.addf %54, %59 : vector<128x128xf32>
      %61 = vector.extract_strided_slice %48 {offsets = [2, 0, 0], sizes = [8, 16, 128], strides = [1, 1, 1]} : vector<10x16x128xf32> to vector<8x16x128xf32>
      %62 = vector.shape_cast %61 : vector<8x16x128xf32> to vector<128x128xf32>
      %c2 = arith.constant 2 : index
      %c0_72 = arith.constant 0 : index
      %c0_73 = arith.constant 0 : index
      %c0_74 = arith.constant 0 : index
      %63 = vector.load %arg7[%c2, %c0_72, %c0_73, %c0_74] : memref<3x3x128x128xf32, #tpu.memory_space<vmem>>, vector<1x1x128x128xf32>
      %64 = vector.shape_cast %63 : vector<1x1x128x128xf32> to vector<128x128xf32>
      %cst_75 = arith.constant dense<0.000000e+00> : vector<128x128xf32>
      %65 = tpu.matmul %62, %64, %cst_75 {dimension_numbers = #tpu.dot_dimension_numbers<[1], [0], [0], [1], [0, 0, 1, 1], [], []>} : vector<128x128xf32>, vector<128x128xf32>, vector<128x128xf32> -> vector<128x128xf32>
      %66 = arith.addf %60, %65 : vector<128x128xf32>
      %c0_76 = arith.constant 0 : index
      %67 = arith.index_cast %42 : i32 to index
      %c1_77 = arith.constant 1 : index
      %c0_78 = arith.constant 0 : index
      %68 = vector.load %arg12[%c0_76, %67, %c1_77, %c0_78] : memref<2x18x18x128xf32, #tpu.memory_space<vmem>>, vector<1x10x16x128xf32>
      %69 = vector.shape_cast %68 : vector<1x10x16x128xf32> to vector<10x16x128xf32>
      %70 = vector.extract_strided_slice %69 {offsets = [0, 0, 0], sizes = [8, 16, 128], strides = [1, 1, 1]} : vector<10x16x128xf32> to vector<8x16x128xf32>
      %71 = vector.shape_cast %70 : vector<8x16x128xf32> to vector<128x128xf32>
      %c0_79 = arith.constant 0 : index
      %c1_80 = arith.constant 1 : index
      %c0_81 = arith.constant 0 : index
      %c0_82 = arith.constant 0 : index
      %72 = vector.load %arg7[%c0_79, %c1_80, %c0_81, %c0_82] : memref<3x3x128x128xf32, #tpu.memory_space<vmem>>, vector<1x1x128x128xf32>
      %73 = vector.shape_cast %72 : vector<1x1x128x128xf32> to vector<128x128xf32>
      %cst_83 = arith.constant dense<0.000000e+00> : vector<128x128xf32>
      %74 = tpu.matmul %71, %73, %cst_83 {dimension_numbers = #tpu.dot_dimension_numbers<[1], [0], [0], [1], [0, 0, 1, 1], [], []>} : vector<128x128xf32>, vector<128x128xf32>, vector<128x128xf32> -> vector<128x128xf32>
      %75 = arith.addf %66, %74 : vector<128x128xf32>
      %76 = vector.extract_strided_slice %69 {offsets = [1, 0, 0], sizes = [8, 16, 128], strides = [1, 1, 1]} : vector<10x16x128xf32> to vector<8x16x128xf32>
      %77 = vector.shape_cast %76 : vector<8x16x128xf32> to vector<128x128xf32>
      %c1_84 = arith.constant 1 : index
      %c1_85 = arith.constant 1 : index
      %c0_86 = arith.constant 0 : index
      %c0_87 = arith.constant 0 : index
      %78 = vector.load %arg7[%c1_84, %c1_85, %c0_86, %c0_87] : memref<3x3x128x128xf32, #tpu.memory_space<vmem>>, vector<1x1x128x128xf32>
      %79 = vector.shape_cast %78 : vector<1x1x128x128xf32> to vector<128x128xf32>
      %cst_88 = arith.constant dense<0.000000e+00> : vector<128x128xf32>
      %80 = tpu.matmul %77, %79, %cst_88 {dimension_numbers = #tpu.dot_dimension_numbers<[1], [0], [0], [1], [0, 0, 1, 1], [], []>} : vector<128x128xf32>, vector<128x128xf32>, vector<128x128xf32> -> vector<128x128xf32>
      %81 = arith.addf %75, %80 : vector<128x128xf32>
      %82 = vector.extract_strided_slice %69 {offsets = [2, 0, 0], sizes = [8, 16, 128], strides = [1, 1, 1]} : vector<10x16x128xf32> to vector<8x16x128xf32>
      %83 = vector.shape_cast %82 : vector<8x16x128xf32> to vector<128x128xf32>
      %c2_89 = arith.constant 2 : index
      %c1_90 = arith.constant 1 : index
      %c0_91 = arith.constant 0 : index
      %c0_92 = arith.constant 0 : index
      %84 = vector.load %arg7[%c2_89, %c1_90, %c0_91, %c0_92] : memref<3x3x128x128xf32, #tpu.memory_space<vmem>>, vector<1x1x128x128xf32>
      %85 = vector.shape_cast %84 : vector<1x1x128x128xf32> to vector<128x128xf32>
      %cst_93 = arith.constant dense<0.000000e+00> : vector<128x128xf32>
      %86 = tpu.matmul %83, %85, %cst_93 {dimension_numbers = #tpu.dot_dimension_numbers<[1], [0], [0], [1], [0, 0, 1, 1], [], []>} : vector<128x128xf32>, vector<128x128xf32>, vector<128x128xf32> -> vector<128x128xf32>
      %87 = arith.addf %81, %86 : vector<128x128xf32>
      %c0_94 = arith.constant 0 : index
      %88 = arith.index_cast %42 : i32 to index
      %c2_95 = arith.constant 2 : index
      %c0_96 = arith.constant 0 : index
      %89 = vector.load %arg12[%c0_94, %88, %c2_95, %c0_96] : memref<2x18x18x128xf32, #tpu.memory_space<vmem>>, vector<1x10x16x128xf32>
      %90 = vector.shape_cast %89 : vector<1x10x16x128xf32> to vector<10x16x128xf32>
      %91 = vector.extract_strided_slice %90 {offsets = [0, 0, 0], sizes = [8, 16, 128], strides = [1, 1, 1]} : vector<10x16x128xf32> to vector<8x16x128xf32>
      %92 = vector.shape_cast %91 : vector<8x16x128xf32> to vector<128x128xf32>
      %c0_97 = arith.constant 0 : index
      %c2_98 = arith.constant 2 : index
      %c0_99 = arith.constant 0 : index
      %c0_100 = arith.constant 0 : index
      %93 = vector.load %arg7[%c0_97, %c2_98, %c0_99, %c0_100] : memref<3x3x128x128xf32, #tpu.memory_space<vmem>>, vector<1x1x128x128xf32>
      %94 = vector.shape_cast %93 : vector<1x1x128x128xf32> to vector<128x128xf32>
      %cst_101 = arith.constant dense<0.000000e+00> : vector<128x128xf32>
      %95 = tpu.matmul %92, %94, %cst_101 {dimension_numbers = #tpu.dot_dimension_numbers<[1], [0], [0], [1], [0, 0, 1, 1], [], []>} : vector<128x128xf32>, vector<128x128xf32>, vector<128x128xf32> -> vector<128x128xf32>
      %96 = arith.addf %87, %95 : vector<128x128xf32>
      %97 = vector.extract_strided_slice %90 {offsets = [1, 0, 0], sizes = [8, 16, 128], strides = [1, 1, 1]} : vector<10x16x128xf32> to vector<8x16x128xf32>
      %98 = vector.shape_cast %97 : vector<8x16x128xf32> to vector<128x128xf32>
      %c1_102 = arith.constant 1 : index
      %c2_103 = arith.constant 2 : index
      %c0_104 = arith.constant 0 : index
      %c0_105 = arith.constant 0 : index
      %99 = vector.load %arg7[%c1_102, %c2_103, %c0_104, %c0_105] : memref<3x3x128x128xf32, #tpu.memory_space<vmem>>, vector<1x1x128x128xf32>
      %100 = vector.shape_cast %99 : vector<1x1x128x128xf32> to vector<128x128xf32>
      %cst_106 = arith.constant dense<0.000000e+00> : vector<128x128xf32>
      %101 = tpu.matmul %98, %100, %cst_106 {dimension_numbers = #tpu.dot_dimension_numbers<[1], [0], [0], [1], [0, 0, 1, 1], [], []>} : vector<128x128xf32>, vector<128x128xf32>, vector<128x128xf32> -> vector<128x128xf32>
      %102 = arith.addf %96, %101 : vector<128x128xf32>
      %103 = vector.extract_strided_slice %90 {offsets = [2, 0, 0], sizes = [8, 16, 128], strides = [1, 1, 1]} : vector<10x16x128xf32> to vector<8x16x128xf32>
      %104 = vector.shape_cast %103 : vector<8x16x128xf32> to vector<128x128xf32>
      %c2_107 = arith.constant 2 : index
      %c2_108 = arith.constant 2 : index
      %c0_109 = arith.constant 0 : index
      %c0_110 = arith.constant 0 : index
      %105 = vector.load %arg7[%c2_107, %c2_108, %c0_109, %c0_110] : memref<3x3x128x128xf32, #tpu.memory_space<vmem>>, vector<1x1x128x128xf32>
      %106 = vector.shape_cast %105 : vector<1x1x128x128xf32> to vector<128x128xf32>
      %cst_111 = arith.constant dense<0.000000e+00> : vector<128x128xf32>
      %107 = tpu.matmul %104, %106, %cst_111 {dimension_numbers = #tpu.dot_dimension_numbers<[1], [0], [0], [1], [0, 0, 1, 1], [], []>} : vector<128x128xf32>, vector<128x128xf32>, vector<128x128xf32> -> vector<128x128xf32>
      %108 = arith.addf %102, %107 : vector<128x128xf32>
      %cst_112 = arith.constant 0.000000e+00 : f32
      %109 = vector.broadcast %cst_112 : f32 to vector<128x128xf32>
      %110 = arith.maximumf %108, %109 : vector<128x128xf32>
      %111 = vector.shape_cast %110 : vector<128x128xf32> to vector<8x16x128xf32>
      %c1_i32_113 = arith.constant 1 : i32
      %112 = arith.addi %42, %c1_i32_113 : i32
      %c1_114 = arith.constant 1 : index
      %113 = arith.index_cast %112 : i32 to index
      %c1_115 = arith.constant 1 : index
      %c0_116 = arith.constant 0 : index
      %114 = vector.load %arg12[%c1_114, %113, %c1_115, %c0_116] : memref<2x18x18x128xf32, #tpu.memory_space<vmem>>, vector<1x8x16x128xf32>
      %115 = vector.shape_cast %114 : vector<1x8x16x128xf32> to vector<8x16x128xf32>
      %116 = vector.shape_cast %111 : vector<8x16x128xf32> to vector<1x8x16x128xf32>
      tpu.vector_store %arg12[%c1_114, %113, %c1_115, %c0_116], %116 {strides = array<i32>} : memref<2x18x18x128xf32, #tpu.memory_space<vmem>>, vector<1x8x16x128xf32>,
    }
    %c2_i32_52 = arith.constant 2 : i32
    %c0_i32_53 = arith.constant 0 : i32
    %c2_i32_54 = arith.constant 2 : i32
    %40 = arith.addi %c0_i32_53, %c2_i32_54 : i32
    %c1_i32_55 = arith.constant 1 : i32
    scf.for %arg13 = %c0_i32_53 to %40 step %c1_i32_55  : i32 {
      %c8_i32 = arith.constant 8 : i32
      %41 = arith.muli %arg13, %c8_i32 : i32
      %42 = tpu.assume_multiple %41, 8 : i32
      %c0_57 = arith.constant 0 : index
      %c0_58 = arith.constant 0 : index
      %43 = vector.load %arg10[%c0_57, %c0_58] : memref<1x128xf32, #tpu.memory_space<vmem>>, vector<1x128xf32>
      %44 = vector.shape_cast %43 : vector<1x128xf32> to vector<1x128xf32>
      %45 = vector.broadcast %44 : vector<1x128xf32> to vector<128x128xf32>
      %c1_59 = arith.constant 1 : index
      %46 = arith.index_cast %42 : i32 to index
      %c0_60 = arith.constant 0 : index
      %c0_61 = arith.constant 0 : index
      %47 = vector.load %arg12[%c1_59, %46, %c0_60, %c0_61] : memref<2x18x18x128xf32, #tpu.memory_space<vmem>>, vector<1x10x16x128xf32>
      %48 = vector.shape_cast %47 : vector<1x10x16x128xf32> to vector<10x16x128xf32>
      %49 = vector.extract_strided_slice %48 {offsets = [0, 0, 0], sizes = [8, 16, 128], strides = [1, 1, 1]} : vector<10x16x128xf32> to vector<8x16x128xf32>
      %50 = vector.shape_cast %49 : vector<8x16x128xf32> to vector<128x128xf32>
      %c0_62 = arith.constant 0 : index
      %c0_63 = arith.constant 0 : index
      %c0_64 = arith.constant 0 : index
      %c0_65 = arith.constant 0 : index
      %51 = vector.load %arg9[%c0_62, %c0_63, %c0_64, %c0_65] : memref<3x3x128x128xf32, #tpu.memory_space<vmem>>, vector<1x1x128x128xf32>
      %52 = vector.shape_cast %51 : vector<1x1x128x128xf32> to vector<128x128xf32>
      %cst_66 = arith.constant dense<0.000000e+00> : vector<128x128xf32>
      %53 = tpu.matmul %50, %52, %cst_66 {dimension_numbers = #tpu.dot_dimension_numbers<[1], [0], [0], [1], [0, 0, 1, 1], [], []>} : vector<128x128xf32>, vector<128x128xf32>, vector<128x128xf32> -> vector<128x128xf32>
      %54 = arith.addf %45, %53 : vector<128x128xf32>
      %55 = vector.extract_strided_slice %48 {offsets = [1, 0, 0], sizes = [8, 16, 128], strides = [1, 1, 1]} : vector<10x16x128xf32> to vector<8x16x128xf32>
      %56 = vector.shape_cast %55 : vector<8x16x128xf32> to vector<128x128xf32>
      %c1_67 = arith.constant 1 : index
      %c0_68 = arith.constant 0 : index
      %c0_69 = arith.constant 0 : index
      %c0_70 = arith.constant 0 : index
      %57 = vector.load %arg9[%c1_67, %c0_68, %c0_69, %c0_70] : memref<3x3x128x128xf32, #tpu.memory_space<vmem>>, vector<1x1x128x128xf32>
      %58 = vector.shape_cast %57 : vector<1x1x128x128xf32> to vector<128x128xf32>
      %cst_71 = arith.constant dense<0.000000e+00> : vector<128x128xf32>
      %59 = tpu.matmul %56, %58, %cst_71 {dimension_numbers = #tpu.dot_dimension_numbers<[1], [0], [0], [1], [0, 0, 1, 1], [], []>} : vector<128x128xf32>, vector<128x128xf32>, vector<128x128xf32> -> vector<128x128xf32>
      %60 = arith.addf %54, %59 : vector<128x128xf32>
      %61 = vector.extract_strided_slice %48 {offsets = [2, 0, 0], sizes = [8, 16, 128], strides = [1, 1, 1]} : vector<10x16x128xf32> to vector<8x16x128xf32>
      %62 = vector.shape_cast %61 : vector<8x16x128xf32> to vector<128x128xf32>
      %c2 = arith.constant 2 : index
      %c0_72 = arith.constant 0 : index
      %c0_73 = arith.constant 0 : index
      %c0_74 = arith.constant 0 : index
      %63 = vector.load %arg9[%c2, %c0_72, %c0_73, %c0_74] : memref<3x3x128x128xf32, #tpu.memory_space<vmem>>, vector<1x1x128x128xf32>
      %64 = vector.shape_cast %63 : vector<1x1x128x128xf32> to vector<128x128xf32>
      %cst_75 = arith.constant dense<0.000000e+00> : vector<128x128xf32>
      %65 = tpu.matmul %62, %64, %cst_75 {dimension_numbers = #tpu.dot_dimension_numbers<[1], [0], [0], [1], [0, 0, 1, 1], [], []>} : vector<128x128xf32>, vector<128x128xf32>, vector<128x128xf32> -> vector<128x128xf32>
      %66 = arith.addf %60, %65 : vector<128x128xf32>
      %c1_76 = arith.constant 1 : index
      %67 = arith.index_cast %42 : i32 to index
      %c1_77 = arith.constant 1 : index
      %c0_78 = arith.constant 0 : index
      %68 = vector.load %arg12[%c1_76, %67, %c1_77, %c0_78] : memref<2x18x18x128xf32, #tpu.memory_space<vmem>>, vector<1x10x16x128xf32>
      %69 = vector.shape_cast %68 : vector<1x10x16x128xf32> to vector<10x16x128xf32>
      %70 = vector.extract_strided_slice %69 {offsets = [0, 0, 0], sizes = [8, 16, 128], strides = [1, 1, 1]} : vector<10x16x128xf32> to vector<8x16x128xf32>
      %71 = vector.shape_cast %70 : vector<8x16x128xf32> to vector<128x128xf32>
      %c0_79 = arith.constant 0 : index
      %c1_80 = arith.constant 1 : index
      %c0_81 = arith.constant 0 : index
      %c0_82 = arith.constant 0 : index
      %72 = vector.load %arg9[%c0_79, %c1_80, %c0_81, %c0_82] : memref<3x3x128x128xf32, #tpu.memory_space<vmem>>, vector<1x1x128x128xf32>
      %73 = vector.shape_cast %72 : vector<1x1x128x128xf32> to vector<128x128xf32>
      %cst_83 = arith.constant dense<0.000000e+00> : vector<128x128xf32>
      %74 = tpu.matmul %71, %73, %cst_83 {dimension_numbers = #tpu.dot_dimension_numbers<[1], [0], [0], [1], [0, 0, 1, 1], [], []>} : vector<128x128xf32>, vector<128x128xf32>, vector<128x128xf32> -> vector<128x128xf32>
      %75 = arith.addf %66, %74 : vector<128x128xf32>
      %76 = vector.extract_strided_slice %69 {offsets = [1, 0, 0], sizes = [8, 16, 128], strides = [1, 1, 1]} : vector<10x16x128xf32> to vector<8x16x128xf32>
      %77 = vector.shape_cast %76 : vector<8x16x128xf32> to vector<128x128xf32>
      %c1_84 = arith.constant 1 : index
      %c1_85 = arith.constant 1 : index
      %c0_86 = arith.constant 0 : index
      %c0_87 = arith.constant 0 : index
      %78 = vector.load %arg9[%c1_84, %c1_85, %c0_86, %c0_87] : memref<3x3x128x128xf32, #tpu.memory_space<vmem>>, vector<1x1x128x128xf32>
      %79 = vector.shape_cast %78 : vector<1x1x128x128xf32> to vector<128x128xf32>
      %cst_88 = arith.constant dense<0.000000e+00> : vector<128x128xf32>
      %80 = tpu.matmul %77, %79, %cst_88 {dimension_numbers = #tpu.dot_dimension_numbers<[1], [0], [0], [1], [0, 0, 1, 1], [], []>} : vector<128x128xf32>, vector<128x128xf32>, vector<128x128xf32> -> vector<128x128xf32>
      %81 = arith.addf %75, %80 : vector<128x128xf32>
      %82 = vector.extract_strided_slice %69 {offsets = [2, 0, 0], sizes = [8, 16, 128], strides = [1, 1, 1]} : vector<10x16x128xf32> to vector<8x16x128xf32>
      %83 = vector.shape_cast %82 : vector<8x16x128xf32> to vector<128x128xf32>
      %c2_89 = arith.constant 2 : index
      %c1_90 = arith.constant 1 : index
      %c0_91 = arith.constant 0 : index
      %c0_92 = arith.constant 0 : index
      %84 = vector.load %arg9[%c2_89, %c1_90, %c0_91, %c0_92] : memref<3x3x128x128xf32, #tpu.memory_space<vmem>>, vector<1x1x128x128xf32>
      %85 = vector.shape_cast %84 : vector<1x1x128x128xf32> to vector<128x128xf32>
      %cst_93 = arith.constant dense<0.000000e+00> : vector<128x128xf32>
      %86 = tpu.matmul %83, %85, %cst_93 {dimension_numbers = #tpu.dot_dimension_numbers<[1], [0], [0], [1], [0, 0, 1, 1], [], []>} : vector<128x128xf32>, vector<128x128xf32>, vector<128x128xf32> -> vector<128x128xf32>
      %87 = arith.addf %81, %86 : vector<128x128xf32>
      %c1_94 = arith.constant 1 : index
      %88 = arith.index_cast %42 : i32 to index
      %c2_95 = arith.constant 2 : index
      %c0_96 = arith.constant 0 : index
      %89 = vector.load %arg12[%c1_94, %88, %c2_95, %c0_96] : memref<2x18x18x128xf32, #tpu.memory_space<vmem>>, vector<1x10x16x128xf32>
      %90 = vector.shape_cast %89 : vector<1x10x16x128xf32> to vector<10x16x128xf32>
      %91 = vector.extract_strided_slice %90 {offsets = [0, 0, 0], sizes = [8, 16, 128], strides = [1, 1, 1]} : vector<10x16x128xf32> to vector<8x16x128xf32>
      %92 = vector.shape_cast %91 : vector<8x16x128xf32> to vector<128x128xf32>
      %c0_97 = arith.constant 0 : index
      %c2_98 = arith.constant 2 : index
      %c0_99 = arith.constant 0 : index
      %c0_100 = arith.constant 0 : index
      %93 = vector.load %arg9[%c0_97, %c2_98, %c0_99, %c0_100] : memref<3x3x128x128xf32, #tpu.memory_space<vmem>>, vector<1x1x128x128xf32>
      %94 = vector.shape_cast %93 : vector<1x1x128x128xf32> to vector<128x128xf32>
      %cst_101 = arith.constant dense<0.000000e+00> : vector<128x128xf32>
      %95 = tpu.matmul %92, %94, %cst_101 {dimension_numbers = #tpu.dot_dimension_numbers<[1], [0], [0], [1], [0, 0, 1, 1], [], []>} : vector<128x128xf32>, vector<128x128xf32>, vector<128x128xf32> -> vector<128x128xf32>
      %96 = arith.addf %87, %95 : vector<128x128xf32>
      %97 = vector.extract_strided_slice %90 {offsets = [1, 0, 0], sizes = [8, 16, 128], strides = [1, 1, 1]} : vector<10x16x128xf32> to vector<8x16x128xf32>
      %98 = vector.shape_cast %97 : vector<8x16x128xf32> to vector<128x128xf32>
      %c1_102 = arith.constant 1 : index
      %c2_103 = arith.constant 2 : index
      %c0_104 = arith.constant 0 : index
      %c0_105 = arith.constant 0 : index
      %99 = vector.load %arg9[%c1_102, %c2_103, %c0_104, %c0_105] : memref<3x3x128x128xf32, #tpu.memory_space<vmem>>, vector<1x1x128x128xf32>
      %100 = vector.shape_cast %99 : vector<1x1x128x128xf32> to vector<128x128xf32>
      %cst_106 = arith.constant dense<0.000000e+00> : vector<128x128xf32>
      %101 = tpu.matmul %98, %100, %cst_106 {dimension_numbers = #tpu.dot_dimension_numbers<[1], [0], [0], [1], [0, 0, 1, 1], [], []>} : vector<128x128xf32>, vector<128x128xf32>, vector<128x128xf32> -> vector<128x128xf32>
      %102 = arith.addf %96, %101 : vector<128x128xf32>
      %103 = vector.extract_strided_slice %90 {offsets = [2, 0, 0], sizes = [8, 16, 128], strides = [1, 1, 1]} : vector<10x16x128xf32> to vector<8x16x128xf32>
      %104 = vector.shape_cast %103 : vector<8x16x128xf32> to vector<128x128xf32>
      %c2_107 = arith.constant 2 : index
      %c2_108 = arith.constant 2 : index
      %c0_109 = arith.constant 0 : index
      %c0_110 = arith.constant 0 : index
      %105 = vector.load %arg9[%c2_107, %c2_108, %c0_109, %c0_110] : memref<3x3x128x128xf32, #tpu.memory_space<vmem>>, vector<1x1x128x128xf32>
      %106 = vector.shape_cast %105 : vector<1x1x128x128xf32> to vector<128x128xf32>
      %cst_111 = arith.constant dense<0.000000e+00> : vector<128x128xf32>
      %107 = tpu.matmul %104, %106, %cst_111 {dimension_numbers = #tpu.dot_dimension_numbers<[1], [0], [0], [1], [0, 0, 1, 1], [], []>} : vector<128x128xf32>, vector<128x128xf32>, vector<128x128xf32> -> vector<128x128xf32>
      %108 = arith.addf %102, %107 : vector<128x128xf32>
      %cst_112 = arith.constant 0.000000e+00 : f32
      %109 = vector.broadcast %cst_112 : f32 to vector<128x128xf32>
      %110 = arith.maximumf %108, %109 : vector<128x128xf32>
      %c1_i32_113 = arith.constant 1 : i32
      %111 = arith.addi %42, %c1_i32_113 : i32
      %c0_114 = arith.constant 0 : index
      %112 = arith.index_cast %111 : i32 to index
      %c1_115 = arith.constant 1 : index
      %c0_116 = arith.constant 0 : index
      %113 = vector.load %arg12[%c0_114, %112, %c1_115, %c0_116] : memref<2x18x18x128xf32, #tpu.memory_space<vmem>>, vector<1x8x16x128xf32>
      %114 = vector.shape_cast %113 : vector<1x8x16x128xf32> to vector<8x16x128xf32>
      %115 = vector.shape_cast %114 : vector<8x16x128xf32> to vector<128x128xf32>
      %116 = arith.addf %110, %115 : vector<128x128xf32>
      %117 = vector.shape_cast %116 : vector<128x128xf32> to vector<8x16x128xf32>
      %c0_117 = arith.constant 0 : index
      %118 = arith.index_cast %42 : i32 to index
      %c0_118 = arith.constant 0 : index
      %c0_119 = arith.constant 0 : index
      %119 = vector.load %arg11[%c0_117, %118, %c0_118, %c0_119] : memref<1x16x16x128xf32, #tpu.memory_space<vmem>>, vector<1x8x16x128xf32>
      %120 = vector.shape_cast %119 : vector<1x8x16x128xf32> to vector<8x16x128xf32>
      %121 = vector.shape_cast %117 : vector<8x16x128xf32> to vector<1x8x16x128xf32>
      tpu.vector_store %arg11[%c0_117, %118, %c0_118, %c0_119], %121 {strides = array<i32>} : memref<1x16x16x128xf32, #tpu.memory_space<vmem>>, vector<1x8x16x128xf32>,
    }
    %c2_i32_56 = arith.constant 2 : i32
    return
  }
  func.func @transform_0(%arg0: i32) -> (i32, i32, i32, i32) {
    %c0_i32 = arith.constant 0 : i32
    %c0_i32_0 = arith.constant 0 : i32
    %c0_i32_1 = arith.constant 0 : i32
    %c0_i32_2 = arith.constant 0 : i32
    return %arg0, %c0_i32, %c0_i32_0, %c0_i32_1 : i32, i32, i32, i32
  }
  func.func @transform_1(%arg0: i32) -> (i32, i32, i32, i32) {
    %c0_i32 = arith.constant 0 : i32
    %c0_i32_0 = arith.constant 0 : i32
    %c0_i32_1 = arith.constant 0 : i32
    %c0_i32_2 = arith.constant 0 : i32
    return %arg0, %c0_i32, %c0_i32_0, %c0_i32_1 : i32, i32, i32, i32
  }
  func.func @transform_2(%arg0: i32) -> (i32, i32, i32, i32) {
    %c0_i32 = arith.constant 0 : i32
    %c0_i32_0 = arith.constant 0 : i32
    %c0_i32_1 = arith.constant 0 : i32
    %c0_i32_2 = arith.constant 0 : i32
    %c0_i32_3 = arith.constant 0 : i32
    return %c0_i32, %c0_i32_0, %c0_i32_1, %c0_i32_2 : i32, i32, i32, i32
  }
  func.func @transform_3(%arg0: i32) -> (i32, i32) {
    %c0_i32 = arith.constant 0 : i32
    %c0_i32_0 = arith.constant 0 : i32
    %c0_i32_1 = arith.constant 0 : i32
    return %c0_i32, %c0_i32_0 : i32, i32
  }
  func.func @transform_4(%arg0: i32) -> (i32, i32, i32, i32) {
    %c0_i32 = arith.constant 0 : i32
    %c0_i32_0 = arith.constant 0 : i32
    %c0_i32_1 = arith.constant 0 : i32
    %c0_i32_2 = arith.constant 0 : i32
    %c0_i32_3 = arith.constant 0 : i32
    return %c0_i32, %c0_i32_0, %c0_i32_1, %c0_i32_2 : i32, i32, i32, i32
  }
  func.func @transform_5(%arg0: i32) -> (i32, i32) {
    %c0_i32 = arith.constant 0 : i32
    %c0_i32_0 = arith.constant 0 : i32
    %c0_i32_1 = arith.constant 0 : i32
    return %c0_i32, %c0_i32_0 : i32, i32
  }
  func.func @transform_6(%arg0: i32) -> (i32, i32, i32, i32) {
    %c0_i32 = arith.constant 0 : i32
    %c0_i32_0 = arith.constant 0 : i32
    %c0_i32_1 = arith.constant 0 : i32
    %c0_i32_2 = arith.constant 0 : i32
    %c0_i32_3 = arith.constant 0 : i32
    return %c0_i32, %c0_i32_0, %c0_i32_1, %c0_i32_2 : i32, i32, i32, i32
  }
  func.func @transform_7(%arg0: i32) -> (i32, i32) {
    %c0_i32 = arith.constant 0 : i32
    %c0_i32_0 = arith.constant 0 : i32
    %c0_i32_1 = arith.constant 0 : i32
    return %c0_i32, %c0_i32_0 : i32, i32
  }
  func.func @transform_8(%arg0: i32) -> (i32, i32, i32, i32) {
    %c0_i32 = arith.constant 0 : i32
    %c0_i32_0 = arith.constant 0 : i32
    %c0_i32_1 = arith.constant 0 : i32
    %c0_i32_2 = arith.constant 0 : i32
    %c0_i32_3 = arith.constant 0 : i32
    return %c0_i32, %c0_i32_0, %c0_i32_1, %c0_i32_2 : i32, i32, i32, i32
  }
  func.func @transform_9(%arg0: i32) -> (i32, i32) {
    %c0_i32 = arith.constant 0 : i32
    %c0_i32_0 = arith.constant 0 : i32
    %c0_i32_1 = arith.constant 0 : i32
    return %c0_i32, %c0_i32_0 : i32, i32
  }
  func.func @transform_10(%arg0: i32) -> (i32, i32, i32, i32) {
    %c0_i32 = arith.constant 0 : i32
    %c0_i32_0 = arith.constant 0 : i32
    %c0_i32_1 = arith.constant 0 : i32
    %c0_i32_2 = arith.constant 0 : i32
    return %arg0, %c0_i32, %c0_i32_0, %c0_i32_1 : i32, i32, i32, i32
  }
}

</mosaic_0001>

<bundles_post_ra>
// kernel: tpu_custom_call.1
= control target key start
LH: loop header
LB: loop body
LE: loop exit
PB: predicated region body
PF: predicated region fallthrough
CT: control target
= control target key end

     0   :  { %s7603_s0 = inlined_call_operand.hbm [shape: f32[2,16,16,128], index: 0, kind: input, shape index: {}]   ;;  %s7604_s1 = inlined_call_operand.hbm [shape: f32[2,16,16,128], index: 1, kind: input, shape index: {}]   ;;  %s7605_s2 = inlined_call_operand.hbm [shape: f32[3,3,128,128], index: 2, kind: input, shape index: {}]   ;;  %s7606_s3 = inlined_call_operand.vmem [shape: f32[1,128], index: 3, kind: input, shape index: {}]   ;;  %s7607_s4 = inlined_call_operand.hbm [shape: f32[3,3,128,128], index: 4, kind: input, shape index: {}]   ;;  %s7608_s5 = inlined_call_operand.vmem [shape: f32[1,128], index: 5, kind: input, shape index: {}]   ;;  %s7609_s6 = inlined_call_operand.hbm [shape: f32[3,3,128,128], index: 6, kind: input, shape index: {}]   ;;  %s7610_s7 = inlined_call_operand.vmem [shape: f32[1,128], index: 7, kind: input, shape index: {}]   ;;  %s7611_s8 = inlined_call_operand.hbm [shape: f32[3,3,128,128], index: 8, kind: input, shape index: {}]   ;;  %s7612_s9 = inlined_call_operand.vmem [shape: f32[1,128], index: 9, kind: input, shape index: {}]   ;;  %s7613_s10 = inlined_call_operand.hbm [shape: f32[2,16,16,128], index: 10, kind: output, shape index: {}]  }
   0x1   :  { %7622 = sst [smem:[#allocation25_spill]] %s7603_s0 }
   0x2   :  { %7623 = sst [smem:[#allocation26_spill]] %s7605_s2 }
   0x3   :  { %7624 = sst [smem:[#allocation27_spill]] %s7607_s4 }
   0x4   :  { %7625 = sst [smem:[#allocation28_spill]] %s7609_s6 }
   0x5   :  { %7626 = sst [smem:[#allocation29_spill]] %s7611_s8 }
   0x6   :  { %15 = vsyncpa [#allocation4], 0 }
   0x7   :  { %17 = vsyncpa [#allocation4 + $0x1], 0 }
   0x8   :  { %18 = vsyncpa [#allocation7], 0 }
   0x9   :  { %20 = vsyncpa [#allocation7 + $0x1], 0 }
   0xa   :  { %21 = vsyncpa [#allocation10], 0 }
   0xb   :  { %22 = vsyncpa [#allocation13], 0 }
   0xc   :  { %23 = vsyncpa [#allocation5], 0 }
   0xd   :  { %25 = vsyncpa [#allocation5 + $0x1], 0  ;;  %s5832_s13 = smov 0   ;;  %s5834_s14 = smov 0  }
   0xe   :  { %s5836_s15 = smov 0   ;;  %s5838_s16 = smov 0  }
   0xf LB: > { %7627 = sst [smem:[#allocation21_spill]] %s5746_s15  ;;  %s5853_s17 = sadd.s32 4294967295, %s5750_s16   ;;  %s5750_s16 = sphi %s5838_s16, %s7646_s16   ;;  %s5746_s15 = sphi %s5836_s15, %s7648_s15   ;;  %s5742_s14 = sphi %s5834_s14, %s7650_s14   ;;  %s5738_s13 = sphi %s5832_s13, %s7649_s13  }
  0x10   : > { %s4900_s18 = sadd.s32 4294967294, %s5750_s16   ;;  %p51_p0 = scmp.ne.s32.totalorder %s5742_s14, %s5738_s13 }
  0x11   : > { %p52_p1 = scmp.eq.s32.totalorder %s5853_s17, 0  ;;  %p269_p2 = scmp.eq.s32.totalorder %s5853_s17, 1 }
  0x12   : > { %p275_p3 = scmp.eq.s32.totalorder %s4900_s18, 1  ;;  %p4901_p5 = scmp.ge.s32.totalorder %s5750_s16, 1 }
  0x13   : > { %p5862_p4 = por %p52_p1, %p51_p0  ;;  %p282_p7 = scmp.lt.s32.totalorder %s5750_s16, 3 }
  0x14   : > { %p5867_p6 = por %p275_p3, %p51_p0  ;;  %s7631_s2 = sld [smem:[#allocation26_spill]] }
  0x15   : > { %p5875_p8 = pnand %p4901_p5, %p282_p7  ;;  %s5768_s25 = smov [#allocation8]  }
  0x16   : > { %s7629_s20 = scalar_select %p5867_p6, 1, 0 }
  0x17   : > { %p5361_p9 = pneg %p5875_p8  ;;  %s295_s26 = sshll.u32 %s5768_s25, 4  ;;  %s296_s26 = int_to_ptr.vmem [resolvable:$true] %s295_s26 }
  0x18   : > { %7630 = sst [smem:[#allocation22_spill]] %s7629_s20  ;;  %s7614_s11 = smov 128  }
  0x19   : > { %p5883_p10 = pnand %p5361_p9, %p52_p1  ;;  %s7634_s4 = sld [smem:[#allocation27_spill]] }
  0x1a   : > { %s293_s23 = sshll.u32 %s7631_s2, 4  ;;  %s7616_s12 = smov 8   ;;  %s294_s23 = int_to_ptr.hbm [resolvable:$true] %s293_s23 }
  0x1b   : > { %5364 = dma.hbm_to_vmem [thread:$0]  (!%p5883_p10), %s294_s23, 18432, %s296_s26, [#allocation7], %s7614_s11, %s7614_s11, %s7616_s12  }
  0x1c   : > { %s5771_s18 = smov [#allocation9]   ;;  %s7635_s6 = sld [smem:[#allocation28_spill]] }
  0x1d   : > { %s312_s21 = sshll.u32 %s5771_s18, 4  ;;  %s7636_s8 = sld [smem:[#allocation29_spill]]  ;;  %s313_s21 = int_to_ptr.vmem [resolvable:$true] %s312_s21 }
  0x1e   : > { %s5772_s29 = smov [#allocation11]   ;;  %s5773_s22 = smov [#allocation12]  }
  0x1f   : > { %s310_s30 = sshll.u32 %s7634_s4, 4  ;;  %s329_s18 = sshll.u32 %s5772_s29, 4  ;;  %s311_s30 = int_to_ptr.hbm [resolvable:$true] %s310_s30  ;;  %s330_s18 = int_to_ptr.vmem [resolvable:$true] %s329_s18 }
  0x20   : > { %5367 = dma.hbm_to_vmem [thread:$0]  (!%p5883_p10), %s311_s30, 18432, %s313_s21, [#allocation10], %s7614_s11, %s7614_s11, %s7616_s12  }
  0x21   : > { %s346_s30 = sshll.u32 %s5773_s22, 4  ;;  %s5918_s21 = sadd.s32 1, %s5750_s16   ;;  %s347_s30 = int_to_ptr.vmem [resolvable:$true] %s346_s30 }
  0x22   : > { %s327_s2 = sshll.u32 %s7635_s6, 4  ;;  %7637 = sst [smem:[#allocation23_spill]] %s5918_s21  ;;  %s328_s2 = int_to_ptr.hbm [resolvable:$true] %s327_s2 }
  0x23   : > { %s344_s28 = sshll.u32 %s7636_s8, 4  ;;  %s38_s25 = sadd.s32 1, %s5746_s15  ;;  %s345_s28 = int_to_ptr.hbm [resolvable:$true] %s344_s28 }
  0x24   : > { %5370 = dma.hbm_to_vmem [thread:$0]  (!%p5883_p10), %s328_s2, 18432, %s330_s18, [#allocation10], %s7614_s11, %s7614_s11, %s7616_s12  }
  0x25   : > { %5373 = dma.hbm_to_vmem [thread:$0]  (!%p5883_p10), %s345_s28, 18432, %s347_s30, [#allocation13], %s7614_s11, %s7614_s11, %s7616_s12  }
  0x26   : > { %s35_s23 = ssub.s32 %s5750_s16, %s5918_s21  ;;  %p45_p12 = scmp.ne.s32.totalorder %s5746_s15, %s5742_s14 }
  0x27   : > { %p36_p13 = scmp.eq.s32.totalorder %s35_s23, 0  ;;  %p46_p0 = scmp.eq.s32.totalorder %s5750_s16, 0 }
  0x28   : > { %p5928_p3 = por %p269_p2, %p45_p12  ;;  %p5389_p5 = scmp.lt.s32.totalorder %s5750_s16, 2 }
  0x29   : > { %s5934_s26 = scalar_select %p36_p13, %s5746_s15, %s38_s25  }
  0x2a   : > { %p47_p7 = por %p46_p0, %p45_p12  ;;  %s363_s27 = sand.u32 1, %s5746_s15  }
  0x2b   : > { %7639 = sst [smem:[#allocation24_spill]] %s5934_s26  ;;  %s5937_s29 = sshll.u32 %s363_s27, 8 }
  0x2c   : > { %s5142_s28 = sshll.u32 %s5750_s16, 8  ;;  %s7640_s0 = sld [smem:[#allocation25_spill]] }
  0x2d   : > { %s367_s23 = scalar_lea.vmem [#allocation3], %s5937_s29  ;;  %p5944_p2 = pnand %p5389_p5, %p47_p7 }
  0x2e   : > { %s375_s11 = sshll.u32 %s367_s23, 4  ;;  %s394_s8 = scalar_lea.hbm %s7604_s1, %s5142_s28  ;;  %s376_s11 = int_to_ptr.vmem [resolvable:$true] %s375_s11 }
  0x2f   : > { %s395_s26 = sshll.u32 %s394_s8, 4  ;;  %s364_s15 = scalar_lea.sflag [#allocation4], %s363_s27  ;;  %s396_s26 = int_to_ptr.hbm [resolvable:$true] %s395_s26 }
  0x30   : > { %p5596_p10 = pneg %p5944_p2 }
  0x32   : > { %s372_s30 = scalar_lea.hbm %s7640_s0, %s5142_s28  ;;  %s5599_s23 = scalar_lea.hbm %s7640_s0, 512 }
  0x33   : > { %s373_s12 = sshll.u32 %s372_s30, 4  ;;  %s374_s12 = int_to_ptr.hbm [resolvable:$true] %s373_s12 }
  0x34   : > { %s5592_s21 = sshra.s32 %s374_s12, 4  ;;  %s5593_s21 = int_to_ptr.hbm [resolvable:$true] %s5592_s21 }
  0x35   : > { %s5594_s18 = scalar_lea.hbm %s5593_s21, 256  ;;  %p5600_p0 = scmp.lt.s32.totalorder %s5593_s21, %s7640_s0 }
  0x36   : > { %p5595_p9 = scmp.ne.s32.totalorder %s5593_s21, %s5594_s18  ;;  %p5601_p5 = scmp.lt.s32.totalorder %s5599_s23, %s5594_s18 }
  0x38   : > { %p5597_p12 = pnand %p5596_p10, %p5595_p9  ;;  %p5602_p7 = por %p5601_p5, %p5600_p0 }
  0x3a   : > { %p5598_p13 = pneg %p5597_p12 }
  0x3c   : > { %p5603_p11 = pnand %p5602_p7, %p5598_p13 }
  0x3e   : > { %5606 = shalt.err (!%p5603_p11)
}
  0x3f   : > { %s7642_s8 = smov 8   ;;  %s7643_s27 = smov 128  }
  0x40   : > { %5377 = dma.hbm_to_vmem [thread:$0]  (!%p5944_p2), %s374_s12, 4096, %s376_s11, %s364_s15, %s7643_s27, %s7643_s27, %s7642_s8  }
  0x41   : > { %s389_s28 = scalar_lea.vmem [#allocation6], %s5937_s29  ;;  %s385_s30 = sand.u32 1, %s5750_s16  }
  0x42   : > { %s397_s22 = sshll.u32 %s389_s28, 4  ;;  %s386_s6 = scalar_lea.sflag [#allocation7], %s385_s30  ;;  %s398_s22 = int_to_ptr.vmem [resolvable:$true] %s397_s22 }
  0x43   : > { %s5622_s21 = sshra.s32 %s396_s26, 4  ;;  %s5629_s0 = scalar_lea.hbm %s7604_s1, 512  ;;  %s5623_s21 = int_to_ptr.hbm [resolvable:$true] %s5622_s21 }
  0x44   : > { %s5624_s18 = scalar_lea.hbm %s5623_s21, 256  ;;  %p5630_p13 = scmp.lt.s32.totalorder %s5623_s21, %s7604_s1 }
  0x45   : > { %p5625_p9 = scmp.ne.s32.totalorder %s5623_s21, %s5624_s18  ;;  %p5631_p0 = scmp.lt.s32.totalorder %s5629_s0, %s5624_s18 }
  0x47   : > { %p5627_p11 = pnand %p5625_p9, %p5596_p10  ;;  %p5632_p5 = por %p5631_p0, %p5630_p13 }
  0x49   : > { %p5628_p12 = pneg %p5627_p11 }
  0x4b   : > { %p5633_p7 = pnand %p5632_p5, %p5628_p12 }
  0x4d   : > { %5636 = shalt.err (!%p5633_p7)
}
  0x4e   : > { %5380 = dma.hbm_to_vmem [thread:$0]  (!%p5944_p2), %s396_s26, 4096, %s398_s22, %s386_s6, %s7643_s27, %s7643_s27, %s7642_s8  }
  0x4f   : > { %409 = sbr.rel (%p5875_p8) target bundleno = 2056 (0x808), region = 60  ;;  %s5986_s11 = sand.u32 (!%p5875_p8), 1, %s5742_s14  }
  0x50   : > { %s5989_s20 = sshll.u32 (!%p5875_p8), %s5986_s11, 8  ;;  %s412_s0 = scalar_lea.sflag (!%p5875_p8), [#allocation4], %s5986_s11 }
  0x51   : > { %s5993_s12 = scalar_lea.vmem (!%p5875_p8), [#allocation3], %s5989_s20 }
  0x54   : > { %5713 = dma.done.wait (%p5862_p4), %s412_s0, 4096  }
  0x55   : > { %5715 = vsyncadd (%p5862_p4), %s412_s0, 4294963200  ;;  %s421_s4 = sand.u32 1, %s5853_s17   ;;  %s425_s26 = scalar_lea.vmem [#allocation6], %s5989_s20 }
  0x56   : > { %s422_s24 = scalar_lea.sflag [#allocation7], %s421_s4 }
  0x57   : > { %5717 = dma.done.wait (%p5862_p4), %s422_s24, 4096  }
  0x58   : > { %5719 = vsyncadd (%p5862_p4), %s422_s24, 4294963200 }
  0x59   : > { %5721 = dma.done.wait (%p52_p1), [#allocation7], 18432  }
  0x5a   : > { %5723 = vsyncadd (%p52_p1), [#allocation7], 4294948864 }
  0x5b   : > { %5725 = dma.done.wait (%p52_p1), [#allocation10], 36864  }
  0x5c   : > { %5727 = vsyncadd (%p52_p1), [#allocation10], 4294930432 }
  0x5d   : > { %5729 = dma.done.wait (%p52_p1), [#allocation13], 18432  }
  0x5e   : > { %5731 = vsyncadd (%p52_p1), [#allocation13], 4294948864  ;;  %v5774_v0 = vmov 0.0   ;;  %v575_v1 = vld [vmem:[%s5993_s12] sm:$0xff]  ;;  %v576_v2 = vld [vmem:[%s5993_s12 + $0x8] sm:$0xff]  ;;  %s487_s19 = scalar_lea.vmem [#allocation14], %s5989_s20 }
  0x5f   : > { %488 = vst [vmem:[#allocation2] sm:$0xff] %v5774_v0  ;;  %v577_v3 = vld [vmem:[%s5993_s12 + $0x10] sm:$0xff]  ;;  %v578_v4 = vld [vmem:[%s5993_s12 + $0x18] sm:$0xff]  ;;  %v579_v5 = vld [vmem:[%s5993_s12 + $0x20] sm:$0xff]  ;;  %s6134_s29 = smov 0  }
  0x60   : > { %489 = vst [vmem:[#allocation2 + $0x8] sm:$0xff] %v5774_v0  ;;  %v580_v6 = vld [vmem:[%s5993_s12 + $0x28] sm:$0xff]  ;;  %v581_v7 = vld [vmem:[%s5993_s12 + $0x30] sm:$0xff]  ;;  %v582_v8 = vld [vmem:[%s5993_s12 + $0x38] sm:$0xff] }
  0x61   : > { %490 = vst [vmem:[#allocation2 + $0x10] sm:$0x3] %v5774_v0  ;;  %v583_v9 = vld [vmem:[%s5993_s12 + $0x40] sm:$0xff]  ;;  %v584_v10 = vld [vmem:[%s5993_s12 + $0x48] sm:$0xff]  ;;  %v585_v11 = vld [vmem:[%s5993_s12 + $0x50] sm:$0xff] }
  0x62   : > { %492 = vst [vmem:[#allocation2 + $0x198] sm:$0xff] %v5774_v0  ;;  %v586_v12 = vld [vmem:[%s5993_s12 + $0x58] sm:$0xff]  ;;  %v587_v13 = vld [vmem:[%s5993_s12 + $0x60] sm:$0xff]  ;;  %v588_v14 = vld [vmem:[%s5993_s12 + $0x68] sm:$0xff] }
  0x63   : > { %493 = vst [vmem:[#allocation2 + $0x1a0] sm:$0xff] %v5774_v0  ;;  %v589_v15 = vld [vmem:[%s5993_s12 + $0x70] sm:$0xff]  ;;  %v590_v16 = vld [vmem:[%s5993_s12 + $0x78] sm:$0xff]  ;;  %v591_v17 = vld [vmem:[%s5993_s12 + $0x80] sm:$0xff] }
  0x64   : > { %494 = vst [vmem:[#allocation2 + $0x1a8] sm:$0x3] %v5774_v0  ;;  %v592_v18 = vld [vmem:[%s5993_s12 + $0x88] sm:$0xff]  ;;  %v593_v19 = vld [vmem:[%s5993_s12 + $0x90] sm:$0xff]  ;;  %v594_v20 = vld [vmem:[%s5993_s12 + $0x98] sm:$0xff] }
  0x65   : > { %495 = vst [vmem:[#allocation2] sm:$0x1] %v5774_v0  ;;  %v595_v21 = vld [vmem:[%s5993_s12 + $0xa0] sm:$0xff]  ;;  %v596_v22 = vld [vmem:[%s5993_s12 + $0xa8] sm:$0xff]  ;;  %v597_v23 = vld [vmem:[%s5993_s12 + $0xb0] sm:$0xff] }
  0x66   : > { %496 = vst [vmem:[#allocation2 + $0x18] sm:$0x1] %v5774_v0  ;;  %v598_v24 = vld [vmem:[%s5993_s12 + $0xb8] sm:$0xff]  ;;  %v599_v25 = vld [vmem:[%s5993_s12 + $0xc0] sm:$0xff]  ;;  %v600_v26 = vld [vmem:[%s5993_s12 + $0xc8] sm:$0xff] }
  0x67   : > { %497 = vst [vmem:[#allocation2 + $0x30] sm:$0x1] %v5774_v0  ;;  %v601_v27 = vld [vmem:[%s5993_s12 + $0xd0] sm:$0xff]  ;;  %v602_v28 = vld [vmem:[%s5993_s12 + $0xd8] sm:$0xff]  ;;  %v603_v29 = vld [vmem:[%s5993_s12 + $0xe0] sm:$0xff] }
  0x68   : > { %498 = vst [vmem:[#allocation2 + $0x48] sm:$0x1] %v5774_v0  ;;  %v604_v30 = vld [vmem:[%s5993_s12 + $0xe8] sm:$0xff]  ;;  %v605_v31 = vld [vmem:[%s5993_s12 + $0xf0] sm:$0xff]  ;;  %v606_v32 = vld [vmem:[%s5993_s12 + $0xf8] sm:$0xff] }
  0x69   : > { %499 = vst [vmem:[#allocation2 + $0x60] sm:$0x1] %v5774_v0 }
  0x6a   : > { %500 = vst [vmem:[#allocation2 + $0x78] sm:$0x1] %v5774_v0 }
  0x6b   : > { %501 = vst [vmem:[#allocation2 + $0x90] sm:$0x1] %v5774_v0 }
  0x6c   : > { %502 = vst [vmem:[#allocation2 + $0xa8] sm:$0x1] %v5774_v0 }
  0x6d   : > { %503 = vst [vmem:[#allocation2 + $0xc0] sm:$0x1] %v5774_v0 }
  0x6e   : > { %504 = vst [vmem:[#allocation2 + $0xd8] sm:$0x1] %v5774_v0 }
  0x6f   : > { %505 = vst [vmem:[#allocation2 + $0xf0] sm:$0x1] %v5774_v0 }
  0x70   : > { %506 = vst [vmem:[#allocation2 + $0x108] sm:$0x1] %v5774_v0 }
  0x71   : > { %507 = vst [vmem:[#allocation2 + $0x120] sm:$0x1] %v5774_v0 }
  0x72   : > { %508 = vst [vmem:[#allocation2 + $0x138] sm:$0x1] %v5774_v0 }
  0x73   : > { %509 = vst [vmem:[#allocation2 + $0x150] sm:$0x1] %v5774_v0 }
  0x74   : > { %510 = vst [vmem:[#allocation2 + $0x168] sm:$0x1] %v5774_v0 }
  0x75   : > { %511 = vst [vmem:[#allocation2 + $0x180] sm:$0x1] %v5774_v0 }
  0x76   : > { %514 = vst [vmem:[#allocation2 + $0x29] sm:$0x1] %v5774_v0 }
  0x77   : > { %515 = vst [vmem:[#allocation2 + $0x41] sm:$0x1] %v5774_v0 }
  0x78   : > { %516 = vst [vmem:[#allocation2 + $0x59] sm:$0x1] %v5774_v0 }
  0x79   : > { %517 = vst [vmem:[#allocation2 + $0x71] sm:$0x1] %v5774_v0 }
  0x7a   : > { %518 = vst [vmem:[#allocation2 + $0x89] sm:$0x1] %v5774_v0 }
  0x7b   : > { %519 = vst [vmem:[#allocation2 + $0xa1] sm:$0x1] %v5774_v0 }
  0x7c   : > { %520 = vst [vmem:[#allocation2 + $0xb9] sm:$0x1] %v5774_v0 }
  0x7d   : > { %521 = vst [vmem:[#allocation2 + $0xd1] sm:$0x1] %v5774_v0 }
  0x7e   : > { %522 = vst [vmem:[#allocation2 + $0xe9] sm:$0x1] %v5774_v0 }
  0x7f   : > { %523 = vst [vmem:[#allocation2 + $0x101] sm:$0x1] %v5774_v0 }
  0x80   : > { %524 = vst [vmem:[#allocation2 + $0x119] sm:$0x1] %v5774_v0 }
  0x81   : > { %525 = vst [vmem:[#allocation2 + $0x131] sm:$0x1] %v5774_v0 }
  0x82   : > { %526 = vst [vmem:[#allocation2 + $0x149] sm:$0x1] %v5774_v0 }
  0x83   : > { %527 = vst [vmem:[#allocation2 + $0x161] sm:$0x1] %v5774_v0 }
  0x84   : > { %528 = vst [vmem:[#allocation2 + $0x179] sm:$0x1] %v5774_v0 }
  0x85   : > { %529 = vst [vmem:[#allocation2 + $0x191] sm:$0x1] %v5774_v0 }
  0x86   : > { %532 = vst [vmem:[#allocation2 + $0x1b0] sm:$0xff] %v5774_v0 }
  0x87   : > { %533 = vst [vmem:[#allocation2 + $0x1b8] sm:$0xff] %v5774_v0 }
  0x88   : > { %534 = vst [vmem:[#allocation2 + $0x1c0] sm:$0x3] %v5774_v0 }
  0x89   : > { %536 = vst [vmem:[#allocation2 + $0x348] sm:$0xff] %v5774_v0 }
  0x8a   : > { %537 = vst [vmem:[#allocation2 + $0x350] sm:$0xff] %v5774_v0 }
  0x8b   : > { %538 = vst [vmem:[#allocation2 + $0x358] sm:$0x3] %v5774_v0 }
  0x8c   : > { %540 = vst [vmem:[#allocation2 + $0x1c8] sm:$0x1] %v5774_v0 }
  0x8d   : > { %541 = vst [vmem:[#allocation2 + $0x1e0] sm:$0x1] %v5774_v0 }
  0x8e   : > { %542 = vst [vmem:[#allocation2 + $0x1f8] sm:$0x1] %v5774_v0 }
  0x8f   : > { %543 = vst [vmem:[#allocation2 + $0x210] sm:$0x1] %v5774_v0 }
  0x90   : > { %544 = vst [vmem:[#allocation2 + $0x228] sm:$0x1] %v5774_v0 }
  0x91   : > { %545 = vst [vmem:[#allocation2 + $0x240] sm:$0x1] %v5774_v0 }
  0x92   : > { %546 = vst [vmem:[#allocation2 + $0x258] sm:$0x1] %v5774_v0 }
  0x93   : > { %547 = vst [vmem:[#allocation2 + $0x270] sm:$0x1] %v5774_v0 }
  0x94   : > { %548 = vst [vmem:[#allocation2 + $0x288] sm:$0x1] %v5774_v0 }
  0x95   : > { %549 = vst [vmem:[#allocation2 + $0x2a0] sm:$0x1] %v5774_v0 }
  0x96   : > { %550 = vst [vmem:[#allocation2 + $0x2b8] sm:$0x1] %v5774_v0 }
  0x97   : > { %551 = vst [vmem:[#allocation2 + $0x2d0] sm:$0x1] %v5774_v0 }
  0x98   : > { %552 = vst [vmem:[#allocation2 + $0x2e8] sm:$0x1] %v5774_v0 }
  0x99   : > { %553 = vst [vmem:[#allocation2 + $0x300] sm:$0x1] %v5774_v0 }
  0x9a   : > { %554 = vst [vmem:[#allocation2 + $0x318] sm:$0x1] %v5774_v0 }
  0x9b   : > { %555 = vst [vmem:[#allocation2 + $0x330] sm:$0x1] %v5774_v0 }
  0x9c   : > { %558 = vst [vmem:[#allocation2 + $0x1d9] sm:$0x1] %v5774_v0 }
  0x9d   : > { %559 = vst [vmem:[#allocation2 + $0x1f1] sm:$0x1] %v5774_v0 }
  0x9e   : > { %560 = vst [vmem:[#allocation2 + $0x209] sm:$0x1] %v5774_v0 }
  0x9f   : > { %561 = vst [vmem:[#allocation2 + $0x221] sm:$0x1] %v5774_v0 }
  0xa0   : > { %562 = vst [vmem:[#allocation2 + $0x239] sm:$0x1] %v5774_v0 }
  0xa1   : > { %563 = vst [vmem:[#allocation2 + $0x251] sm:$0x1] %v5774_v0 }
  0xa2   : > { %564 = vst [vmem:[#allocation2 + $0x269] sm:$0x1] %v5774_v0 }
  0xa3   : > { %565 = vst [vmem:[#allocation2 + $0x281] sm:$0x1] %v5774_v0 }
  0xa4   : > { %566 = vst [vmem:[#allocation2 + $0x299] sm:$0x1] %v5774_v0 }
  0xa5   : > { %567 = vst [vmem:[#allocation2 + $0x2b1] sm:$0x1] %v5774_v0 }
  0xa6   : > { %568 = vst [vmem:[#allocation2 + $0x2c9] sm:$0x1] %v5774_v0 }
  0xa7   : > { %569 = vst [vmem:[#allocation2 + $0x2e1] sm:$0x1] %v5774_v0 }
  0xa8   : > { %570 = vst [vmem:[#allocation2 + $0x2f9] sm:$0x1] %v5774_v0 }
  0xa9   : > { %571 = vst [vmem:[#allocation2 + $0x311] sm:$0x1] %v5774_v0 }
  0xaa   : > { %572 = vst [vmem:[#allocation2 + $0x329] sm:$0x1] %v5774_v0 }
  0xab   : > { %573 = vst [vmem:[#allocation2 + $0x341] sm:$0x1] %v5774_v0 }
  0xac   : > { %512 = vst [vmem:[#allocation2 + $0x198] sm:$0x1] %v5774_v0 }
  0xad   : > { %513 = vst [vmem:[#allocation2 + $0x11] sm:$0x1] %v5774_v0 }
  0xae   : > { %530 = vst [vmem:[#allocation2 + $0x1a9] sm:$0x1] %v5774_v0 }
  0xaf   : > { %539 = vst [vmem:[#allocation2 + $0x1b0] sm:$0x1] %v5774_v0 }
  0xb0   : > { %556 = vst [vmem:[#allocation2 + $0x348] sm:$0x1] %v5774_v0 }
  0xb1   : > { %557 = vst [vmem:[#allocation2 + $0x1c1] sm:$0x1] %v5774_v0 }
  0xb2   : > { %574 = vst [vmem:[#allocation2 + $0x359] sm:$0x1] %v5774_v0 }
  0xb3   : > { %608 = vst [vmem:[#allocation2 + $0x19] sm:$0xff] %v575_v1 }
  0xb4   : > { %609 = vst [vmem:[#allocation2 + $0x21] sm:$0xff] %v576_v2 }
  0xb5   : > { %610 = vst [vmem:[#allocation2 + $0x31] sm:$0xff] %v577_v3 }
  0xb6   : > { %611 = vst [vmem:[#allocation2 + $0x39] sm:$0xff] %v578_v4 }
  0xb7   : > { %612 = vst [vmem:[#allocation2 + $0x49] sm:$0xff] %v579_v5 }
  0xb8   : > { %613 = vst [vmem:[#allocation2 + $0x51] sm:$0xff] %v580_v6 }
  0xb9   : > { %614 = vst [vmem:[#allocation2 + $0x61] sm:$0xff] %v581_v7 }
  0xba   : > { %615 = vst [vmem:[#allocation2 + $0x69] sm:$0xff] %v582_v8 }
  0xbb   : > { %616 = vst [vmem:[#allocation2 + $0x79] sm:$0xff] %v583_v9 }
  0xbc   : > { %617 = vst [vmem:[#allocation2 + $0x81] sm:$0xff] %v584_v10 }
  0xbd   : > { %618 = vst [vmem:[#allocation2 + $0x91] sm:$0xff] %v585_v11 }
  0xbe   : > { %619 = vst [vmem:[#allocation2 + $0x99] sm:$0xff] %v586_v12 }
  0xbf   : > { %620 = vst [vmem:[#allocation2 + $0xa9] sm:$0xff] %v587_v13 }
  0xc0   : > { %621 = vst [vmem:[#allocation2 + $0xb1] sm:$0xff] %v588_v14 }
  0xc1   : > { %622 = vst [vmem:[#allocation2 + $0xc1] sm:$0xff] %v589_v15 }
  0xc2   : > { %623 = vst [vmem:[#allocation2 + $0xc9] sm:$0xff] %v590_v16 }
  0xc3   : > { %624 = vst [vmem:[#allocation2 + $0xd9] sm:$0xff] %v591_v17 }
  0xc4   : > { %625 = vst [vmem:[#allocation2 + $0xe1] sm:$0xff] %v592_v18 }
  0xc5   : > { %626 = vst [vmem:[#allocation2 + $0xf1] sm:$0xff] %v593_v19 }
  0xc6   : > { %627 = vst [vmem:[#allocation2 + $0xf9] sm:$0xff] %v594_v20 }
  0xc7   : > { %628 = vst [vmem:[#allocation2 + $0x109] sm:$0xff] %v595_v21 }
  0xc8   : > { %629 = vst [vmem:[#allocation2 + $0x111] sm:$0xff] %v596_v22 }
  0xc9   : > { %630 = vst [vmem:[#allocation2 + $0x121] sm:$0xff] %v597_v23 }
  0xca   : > { %631 = vst [vmem:[#allocation2 + $0x129] sm:$0xff] %v598_v24 }
  0xcb   : > { %632 = vst [vmem:[#allocation2 + $0x139] sm:$0xff] %v599_v25 }
  0xcc   : > { %633 = vst [vmem:[#allocation2 + $0x141] sm:$0xff] %v600_v26 }
  0xcd   : > { %634 = vst [vmem:[#allocation2 + $0x151] sm:$0xff] %v601_v27 }
  0xce   : > { %635 = vst [vmem:[#allocation2 + $0x159] sm:$0xff] %v602_v28 }
  0xcf   : > { %636 = vst [vmem:[#allocation2 + $0x169] sm:$0xff] %v603_v29 }
  0xd0   : > { %637 = vst [vmem:[#allocation2 + $0x171] sm:$0xff] %v604_v30 }
  0xd1   : > { %638 = vst [vmem:[#allocation2 + $0x181] sm:$0xff] %v605_v31 }
  0xd2   : > { %639 = vst [vmem:[#allocation2 + $0x189] sm:$0xff] %v606_v32 }
  0xd3 LB: >> { %v688_v33 = vld [vmem:[#allocation8 + $0x78] sm:$0xff]  ;;  %v687_v34 = vld [vmem:[#allocation8 + $0x70] sm:$0xff]  ;;  %v686_v35 = vld [vmem:[#allocation8 + $0x68] sm:$0xff]  ;;  %s4922_s8 = smul.u32 192, %s5754_s29  ;;  %s645_s29 = sadd.s32 1, %s5754_s29   ;;  %s5754_s29 = sphi %s6134_s29, %s645_s29  }
  0xd4   : >> { %5147 = vmatpush.msra.mxu1 %v688_v33  ;;  %5148 = vmatpush.msra.mxu2 %v688_v33  ;;  %v685_v36 = vld [vmem:[#allocation8 + $0x60] sm:$0xff]  ;;  %v684_v37 = vld [vmem:[#allocation8 + $0x58] sm:$0xff]  ;;  %v683_v38 = vld [vmem:[#allocation8 + $0x50] sm:$0xff]  ;;  %p642_p1 = scmp.ge.s32.totalorder %s645_s29, 2  }
  0xd5   : >> { %5149 = vmatpush.msra.mxu3 %v688_v33  ;;  %689 = vmatpush.msra.mxu0 %v688_v33  ;;  %v682_v39 = vld [vmem:[#allocation8 + $0x48] sm:$0xff]  ;;  %v681_v40 = vld [vmem:[#allocation8 + $0x40] sm:$0xff]  ;;  %v680_v41 = vld [vmem:[#allocation8 + $0x38] sm:$0xff]  ;;  %s6140_s27 = scalar_lea.vmem [#allocation2], %s4922_s8  ;;  %s6478_s30 = smov (%p642_p1), 0  }
  0xd6   : >> { %5150 = vmatpush.msra.mxu1 %v687_v34  ;;  %5151 = vmatpush.msra.mxu2 %v687_v34  ;;  %v679_v42 = vld [vmem:[#allocation8 + $0x30] sm:$0xff]  ;;  %v678_v43 = vld [vmem:[#allocation8 + $0x28] sm:$0xff]  ;;  %v677_v44 = vld [vmem:[#allocation8 + $0x20] sm:$0xff] }
  0xd7   : >> { %5152 = vmatpush.msra.mxu3 %v687_v34  ;;  %690 = vmatpush.msra.mxu0 %v687_v34  ;;  %v676_v45 = vld [vmem:[#allocation8 + $0x18] sm:$0xff]  ;;  %v675_v46 = vld [vmem:[#allocation8 + $0x10] sm:$0xff]  ;;  %v674_v47 = vld [vmem:[#allocation8 + $0x8] sm:$0xff] }
  0xd8   : >> { %5153 = vmatpush.msra.mxu1 %v686_v35  ;;  %5154 = vmatpush.msra.mxu2 %v686_v35  ;;  %v673_v48 = vld [vmem:[#allocation8] sm:$0xff]  ;;  %v884_v51 = vld [vmem:[#allocation8 + $0x378] sm:$0xff]  ;;  %v883_v54 = vld [vmem:[#allocation8 + $0x370] sm:$0xff] }
  0xd9   : >> { %5155 = vmatpush.msra.mxu3 %v686_v35  ;;  %691 = vmatpush.msra.mxu0 %v686_v35  ;;  %v6143_v49 = vld [vmem:[%s6140_s27 + $0x30] sm:$0xff]  ;;  %v6146_v50 = vld [vmem:[%s6140_s27 + $0x60] sm:$0xff]  ;;  %v786_v52 = vld [vmem:[#allocation8 + $0x1f8] sm:$0xff] }
  0xda   : >> { %5156 = vmatpush.msra.mxu1 %v685_v36  ;;  %5157 = vmatpush.msra.mxu2 %v685_v36  ;;  %v6149_v53 = vld [vmem:[%s6140_s27 + $0x90] sm:$0xff]  ;;  %v1002_v55 = vld [vmem:[#allocation8 + $0xf8] sm:$0xff]  ;;  %v882_v57 = vld [vmem:[#allocation8 + $0x368] sm:$0xff] }
  0xdb   : >> { %5158 = vmatpush.msra.mxu3 %v685_v36  ;;  %692 = vmatpush.msra.mxu0 %v685_v36  ;;  %v785_v56 = vld [vmem:[#allocation8 + $0x1f0] sm:$0xff]  ;;  %v784_v59 = vld [vmem:[#allocation8 + $0x1e8] sm:$0xff]  ;;  %v653_v60 = vld [vmem:[%s6140_s27] sm:$0xff] }
  0xdc   : >> { %5159 = vmatpush.msra.mxu1 %v684_v37  ;;  %5160 = vmatpush.msra.mxu2 %v684_v37  ;;  %v1001_v58 = vld [vmem:[#allocation8 + $0xf0] sm:$0xff]  ;;  %v881_v61 = vld [vmem:[#allocation8 + $0x360] sm:$0xff]  ;;  %v1000_v62 = vld [vmem:[#allocation8 + $0xe8] sm:$0xff] }
  0xdd   : >> { %5161 = vmatpush.msra.mxu3 %v684_v37  ;;  %693 = vmatpush.msra.mxu0 %v684_v37  ;;  %v783_v63 = vld [vmem:[#allocation8 + $0x1e0] sm:$0xff]  ;;  %v6156_v0 = vld [vmem:[%s6140_s27 + $0x68] sm:$0xff]  ;;  %v6159_v1 = vld [vmem:[%s6140_s27 + $0x38] sm:$0xff] }
  0xde   : >> { %5162 = vmatpush.msra.mxu1 %v683_v38  ;;  %5163 = vmatpush.msra.mxu2 %v683_v38  ;;  %v880_v2 = vld [vmem:[#allocation8 + $0x358] sm:$0xff]  ;;  %v999_v3 = vld [vmem:[#allocation8 + $0xe0] sm:$0xff]  ;;  %v879_v6 = vld [vmem:[#allocation8 + $0x350] sm:$0xff] }
  0xdf   : >> { %5164 = vmatpush.msra.mxu3 %v683_v38  ;;  %694 = vmatpush.msra.mxu0 %v683_v38  ;;  %v782_v4 = vld [vmem:[#allocation8 + $0x1d8] sm:$0xff]  ;;  %v781_v9 = vld [vmem:[#allocation8 + $0x1d0] sm:$0xff]  ;;  %v878_v10 = vld [vmem:[#allocation8 + $0x348] sm:$0xff] }
  0xe0   : >> { %5165 = vmatpush.msra.mxu1 %v682_v39  ;;  %5166 = vmatpush.msra.mxu2 %v682_v39  ;;  %v6163_v5 = vld [vmem:[%s6140_s27 + $0x98] sm:$0xff]  ;;  %v997_v11 = vld [vmem:[#allocation8 + $0xd0] sm:$0xff]  ;;  %v780_v13 = vld [vmem:[#allocation8 + $0x1c8] sm:$0xff] }
  0xe1   : >> { %5167 = vmatpush.msra.mxu3 %v682_v39  ;;  %695 = vmatpush.msra.mxu0 %v682_v39  ;;  %v998_v7 = vld [vmem:[#allocation8 + $0xd8] sm:$0xff]  ;;  %v1099_v12 = vld [vmem:[#allocation8 + $0x270] sm:$0xff]  ;;  %v877_v14 = vld [vmem:[#allocation8 + $0x340] sm:$0xff] }
  0xe2   : >> { %5168 = vmatpush.msra.mxu1 %v681_v40  ;;  %5169 = vmatpush.msra.mxu2 %v681_v40  ;;  %v1100_v8 = vld [vmem:[#allocation8 + $0x278] sm:$0xff]  ;;  %v996_v15 = vld [vmem:[#allocation8 + $0xc8] sm:$0xff]  ;;  %v779_v17 = vld [vmem:[#allocation8 + $0x1c0] sm:$0xff] }
  0xe3   : >> { %5170 = vmatpush.msra.mxu3 %v681_v40  ;;  %696 = vmatpush.msra.mxu0 %v681_v40  ;;  %v1098_v16 = vld [vmem:[#allocation8 + $0x268] sm:$0xff]  ;;  %v6168_v18 = vld [vmem:[%s6140_s27 + $0x78] sm:$0xff]  ;;  %v995_v21 = vld [vmem:[#allocation8 + $0xc0] sm:$0xff] }
  0xe4   : >> { %5171 = vmatpush.msra.mxu1 %v680_v41  ;;  %5172 = vmatpush.msra.mxu2 %v680_v41  ;;  %v6171_v19 = vld [vmem:[%s6140_s27 + $0x48] sm:$0xff]  ;;  %v876_v20 = vld [vmem:[#allocation8 + $0x338] sm:$0xff]  ;;  %v1097_v22 = vld [vmem:[#allocation8 + $0x260] sm:$0xff] }
  0xe5   : >> { %5173 = vmatpush.msra.mxu3 %v680_v41  ;;  %697 = vmatpush.msra.mxu0 %v680_v41  ;;  %v778_v23 = vld [vmem:[#allocation8 + $0x1b8] sm:$0xff]  ;;  %v654_v24 = vld [vmem:[%s6140_s27 + $0x8] sm:$0xff]  ;;  %v875_v26 = vld [vmem:[#allocation8 + $0x330] sm:$0xff] }
  0xe6   : >> { %5174 = vmatpush.msra.mxu1 %v679_v42  ;;  %5175 = vmatpush.msra.mxu2 %v679_v42  ;;  %v6177_v25 = vld [vmem:[%s6140_s27 + $0xa8] sm:$0xff]  ;;  %v994_v27 = vld [vmem:[#allocation8 + $0xb8] sm:$0xff]  ;;  %v777_v29 = vld [vmem:[#allocation8 + $0x1b0] sm:$0xff] }
  0xe7   : >> { %5176 = vmatpush.msra.mxu3 %v679_v42  ;;  %698 = vmatpush.msra.mxu0 %v679_v42  ;;  %v1096_v28 = vld [vmem:[#allocation8 + $0x258] sm:$0xff]  ;;  %v874_v30 = vld [vmem:[#allocation8 + $0x328] sm:$0xff]  ;;  %v993_v31 = vld [vmem:[#allocation8 + $0xb0] sm:$0xff] }
  0xe8   : >> { %5177 = vmatpush.msra.mxu1 %v678_v43  ;;  %5178 = vmatpush.msra.mxu2 %v678_v43  ;;  %v1095_v32 = vld [vmem:[#allocation8 + $0x250] sm:$0xff]  ;;  %v776_v33 = vld [vmem:[#allocation8 + $0x1a8] sm:$0xff]  ;;  %v873_v34 = vld [vmem:[#allocation8 + $0x320] sm:$0xff] }
  0xe9   : >> { %5179 = vmatpush.msra.mxu3 %v678_v43  ;;  %699 = vmatpush.msra.mxu0 %v678_v43  ;;  %v992_v35 = vld [vmem:[#allocation8 + $0xa8] sm:$0xff]  ;;  %v775_v37 = vld [vmem:[#allocation8 + $0x1a0] sm:$0xff]  ;;  %v6184_v39 = vld [vmem:[%s6140_s27 + $0x50] sm:$0xff] }
  0xea   : >> { %5180 = vmatpush.msra.mxu1 %v677_v44  ;;  %5181 = vmatpush.msra.mxu2 %v677_v44  ;;  %v1094_v36 = vld [vmem:[#allocation8 + $0x248] sm:$0xff]  ;;  %v6181_v38 = vld [vmem:[%s6140_s27 + $0x80] sm:$0xff]  ;;  %v872_v40 = vld [vmem:[#allocation8 + $0x318] sm:$0xff] }
  0xeb   : >> { %5182 = vmatpush.msra.mxu3 %v677_v44  ;;  %700 = vmatpush.msra.mxu0 %v677_v44  ;;  %v991_v41 = vld [vmem:[#allocation8 + $0xa0] sm:$0xff]  ;;  %v774_v43 = vld [vmem:[#allocation8 + $0x198] sm:$0xff] }
  0xec   : >> { %5183 = vmatpush.msra.mxu1 %v676_v45  ;;  %5184 = vmatpush.msra.mxu2 %v676_v45  ;;  %v1093_v42 = vld [vmem:[#allocation8 + $0x240] sm:$0xff]  ;;  %v655_v44 = vld [vmem:[%s6140_s27 + $0x18] sm:$0xff] }
  0xed   : >> { %5185 = vmatpush.msra.mxu3 %v676_v45  ;;  %701 = vmatpush.msra.mxu0 %v676_v45  ;;  %v6190_v45 = vld [vmem:[%s6140_s27 + $0xb0] sm:$0xff] }
  0xee   : >> { %5186 = vmatpush.msra.mxu1 %v675_v46  ;;  %5187 = vmatpush.msra.mxu2 %v675_v46 }
  0xef   : >> { %5188 = vmatpush.msra.mxu3 %v675_v46  ;;  %702 = vmatpush.msra.mxu0 %v675_v46  ;;  %v871_v46 = vld [vmem:[#allocation8 + $0x310] sm:$0xff] }
  0xf0   : >> { %5189 = vmatpush.msra.mxu1 %v674_v47  ;;  %5190 = vmatpush.msra.mxu2 %v674_v47 }
  0xf1   : >> { %5191 = vmatpush.msra.mxu3 %v674_v47  ;;  %703 = vmatpush.msra.mxu0 %v674_v47  ;;  %v990_v47 = vld [vmem:[#allocation8 + $0x98] sm:$0xff] }
  0xf2   : >> { %5192 = vmatpush.msra.mxu1 %v673_v48  ;;  %5193 = vmatpush.msra.mxu2 %v673_v48 }
  0xf3   : >> { %717 = vmatmul.f32.vlgmr.msra.gmra.mxu1 %v6143_v49  ;;  %729 = vmatmul.f32.vlgmr.msra.gmra.mxu2 %v6146_v50 }
  0xf4   : >> { %885 = vmatpush.msrb.mxu2 %v884_v51  ;;  %5194 = vmatpush.msra.mxu3 %v673_v48  ;;  %v773_v51 = vld [vmem:[#allocation8 + $0x190] sm:$0xff] }
  0xf5   : >> { %787 = vmatpush.msrb.mxu1 %v786_v52  ;;  %741 = vmatmul.f32.vlgmr.msra.gmra.mxu3 %v6149_v53  ;;  %v870_v52 = vld [vmem:[#allocation8 + $0x308] sm:$0xff] }
  0xf6   : >> { %886 = vmatpush.msrb.mxu2 %v883_v54  ;;  %1003 = vmatpush.msrb.mxu3 %v1002_v55  ;;  %v989_v54 = vld [vmem:[#allocation8 + $0x90] sm:$0xff] }
  0xf7   : >> { %788 = vmatpush.msrb.mxu1 %v785_v56  ;;  %704 = vmatpush.msra.mxu0 %v673_v48  ;;  %v1092_v48 = vld [vmem:[#allocation8 + $0x238] sm:$0xff]  ;;  %v1091_v55 = vld [vmem:[#allocation8 + $0x230] sm:$0xff]  ;;  %v772_v56 = vld [vmem:[#allocation8 + $0x188] sm:$0xff] }
  0xf8   : >> { %887 = vmatpush.msrb.mxu2 %v882_v57  ;;  %1004 = vmatpush.msrb.mxu3 %v1001_v58  ;;  %v869_v57 = vld [vmem:[#allocation8 + $0x300] sm:$0xff]  ;;  %v988_v58 = vld [vmem:[#allocation8 + $0x88] sm:$0xff] }
  0xf9   : >> { %789 = vmatpush.msrb.mxu1 %v784_v59  ;;  %705 = vmatmul.f32.vlgmr.msra.gmra.mxu0 %v653_v60  ;;  %v1090_v59 = vld [vmem:[#allocation8 + $0x228] sm:$0xff]  ;;  %v771_v60 = vld [vmem:[#allocation8 + $0x180] sm:$0xff] }
  0xfa   : >> { %888 = vmatpush.msrb.mxu2 %v881_v61  ;;  %1005 = vmatpush.msrb.mxu3 %v1000_v62  ;;  %v987_v61 = vld [vmem:[#allocation8 + $0x80] sm:$0xff] }
  0xfb   : >> { %790 = vmatpush.msrb.mxu1 %v783_v63  ;;  %732 = vmatmul.f32.gmra.mxu2 %v6156_v0  ;;  %v1089_v62 = vld [vmem:[#allocation8 + $0x220] sm:$0xff]  ;;  %v1316_v63 = vld [vmem:[#allocation8 + $0x178] sm:$0xff] }
  0xfc   : >> { %720 = vmatmul.f32.gmra.mxu1 %v6159_v1  ;;  %889 = vmatpush.msrb.mxu2 %v880_v2  ;;  %v656_v2 = vld [vmem:[%s6140_s27 + $0x20] sm:$0xff] }
  0xfd   : >> { %1006 = vmatpush.msrb.mxu3 %v999_v3  ;;  %791 = vmatpush.msrb.mxu1 %v782_v4  ;;  %v966_v3 = vld [vmem:[%s6140_s27 + $0x1] sm:$0xff]  ;;  %v1088_v4 = vld [vmem:[#allocation8 + $0x218] sm:$0xff] }
  0xfe   : >> { %744 = vmatmul.f32.gmra.mxu3 %v6163_v5  ;;  %890 = vmatpush.msrb.mxu2 %v879_v6  ;;  %v1414_v6 = vld [vmem:[#allocation8 + $0x2f8] sm:$0xff] }
  0xff   : >> { %1007 = vmatpush.msrb.mxu3 %v998_v7  ;;  %1101 = vmatpush.msrb.mxu0 %v1100_v8  ;;  %v1198_v7 = vld [vmem:[#allocation8 + $0x3f8] sm:$0xff]  ;;  %v1315_v8 = vld [vmem:[#allocation8 + $0x170] sm:$0xff] }
 0x100   : >> { %792 = vmatpush.msrb.mxu1 %v781_v9  ;;  %891 = vmatpush.msrb.mxu2 %v878_v10  ;;  %v1087_v9 = vld [vmem:[#allocation8 + $0x210] sm:$0xff] }
 0x101   : >> { %1008 = vmatpush.msrb.mxu3 %v997_v11  ;;  %1102 = vmatpush.msrb.mxu0 %v1099_v12  ;;  %v1413_v10 = vld [vmem:[#allocation8 + $0x2f0] sm:$0xff]  ;;  %v1314_v12 = vld [vmem:[#allocation8 + $0x168] sm:$0xff] }
 0x102   : >> { %793 = vmatpush.msrb.mxu1 %v780_v13  ;;  %892 = vmatpush.msrb.mxu2 %v877_v14  ;;  %v1197_v11 = vld [vmem:[#allocation8 + $0x3f0] sm:$0xff]  ;;  %v1086_v13 = vld [vmem:[#allocation8 + $0x208] sm:$0xff] }
 0x103   : >> { %1009 = vmatpush.msrb.mxu3 %v996_v15  ;;  %1103 = vmatpush.msrb.mxu0 %v1098_v16  ;;  %v1412_v14 = vld [vmem:[#allocation8 + $0x2e8] sm:$0xff]  ;;  %v1085_v15 = vld [vmem:[#allocation8 + $0x200] sm:$0xff] }
 0x104   : >> { %794 = vmatpush.msrb.mxu1 %v779_v17  ;;  %735 = vmatmul.f32.gmra.mxu2 %v6168_v18  ;;  %v1196_v16 = vld [vmem:[#allocation8 + $0x3e8] sm:$0xff] }
 0x105   : >> { %723 = vmatmul.f32.gmra.mxu1 %v6171_v19  ;;  %893 = vmatpush.msrb.mxu2 %v876_v20  ;;  %v967_v17 = vld [vmem:[%s6140_s27 + $0x9] sm:$0xff]  ;;  %v968_v20 = vld [vmem:[%s6140_s27 + $0x19] sm:$0xff] }
 0x106   : >> { %1010 = vmatpush.msrb.mxu3 %v995_v21  ;;  %1104 = vmatpush.msrb.mxu0 %v1097_v22  ;;  %v1512_v21 = vld [vmem:[#allocation8 + $0x478] sm:$0xff]  ;;  %v1313_v22 = vld [vmem:[#allocation8 + $0x160] sm:$0xff] }
 0x107   : >> { %795 = vmatpush.msrb.mxu1 %v778_v23  ;;  %708 = vmatmul.f32.gmra.mxu0 %v654_v24  ;;  %v1411_v23 = vld [vmem:[#allocation8 + $0x2e0] sm:$0xff] }
 0x108   : >> { %747 = vmatmul.f32.gmra.mxu3 %v6177_v25  ;;  %894 = vmatpush.msrb.mxu2 %v875_v26  ;;  %v1195_v24 = vld [vmem:[#allocation8 + $0x3e0] sm:$0xff]  ;;  %v1511_v26 = vld [vmem:[#allocation8 + $0x470] sm:$0xff] }
 0x109   : >> { %1011 = vmatpush.msrb.mxu3 %v994_v27  ;;  %1105 = vmatpush.msrb.mxu0 %v1096_v28  ;;  %v1312_v27 = vld [vmem:[#allocation8 + $0x158] sm:$0xff] }
 0x10a   : >> { %796 = vmatpush.msrb.mxu1 %v777_v29  ;;  %895 = vmatpush.msrb.mxu2 %v874_v30  ;;  %v1410_v28 = vld [vmem:[#allocation8 + $0x2d8] sm:$0xff]  ;;  %v1510_v30 = vld [vmem:[#allocation8 + $0x468] sm:$0xff] }
 0x10b   : >> { %1012 = vmatpush.msrb.mxu3 %v993_v31  ;;  %1106 = vmatpush.msrb.mxu0 %v1095_v32  ;;  %v1194_v29 = vld [vmem:[#allocation8 + $0x3d8] sm:$0xff]  ;;  %v1311_v31 = vld [vmem:[#allocation8 + $0x150] sm:$0xff]  ;;  %v1509_v32 = vld [vmem:[#allocation8 + $0x460] sm:$0xff] }
 0x10c   : >> { %797 = vmatpush.msrb.mxu1 %v776_v33  ;;  %896 = vmatpush.msrb.mxu2 %v873_v34  ;;  %v1409_v33 = vld [vmem:[#allocation8 + $0x2d0] sm:$0xff]  ;;  %v969_v34 = vld [vmem:[%s6140_s27 + $0x21] sm:$0xff] }
 0x10d   : >> { %1013 = vmatpush.msrb.mxu3 %v992_v35  ;;  %1107 = vmatpush.msrb.mxu0 %v1094_v36  ;;  %v1508_v35 = vld [vmem:[#allocation8 + $0x458] sm:$0xff]  ;;  %v1193_v36 = vld [vmem:[#allocation8 + $0x3d0] sm:$0xff] }
 0x10e   : >> { %798 = vmatpush.msrb.mxu1 %v775_v37  ;;  %738 = vmatmul.f32.gmra.mxu2 %v6181_v38  ;;  %v1310_v37 = vld [vmem:[#allocation8 + $0x148] sm:$0xff] }
 0x10f   : >> { %726 = vmatmul.f32.gmra.mxu1 %v6184_v39  ;;  %897 = vmatpush.msrb.mxu2 %v872_v40  ;;  %v1408_v40 = vld [vmem:[#allocation8 + $0x2c8] sm:$0xff] }
 0x110   : >> { %1014 = vmatpush.msrb.mxu3 %v991_v41  ;;  %1108 = vmatpush.msrb.mxu0 %v1093_v42  ;;  %v1507_v41 = vld [vmem:[#allocation8 + $0x450] sm:$0xff]  ;;  %v1192_v42 = vld [vmem:[#allocation8 + $0x3c8] sm:$0xff] }
 0x111   : >> { %799 = vmatpush.msrb.mxu1 %v774_v43  ;;  %711 = vmatmul.f32.gmra.mxu0 %v655_v44  ;;  %v1309_v43 = vld [vmem:[#allocation8 + $0x140] sm:$0xff] }
 0x112   : >> { %750 = vmatmul.f32.gmra.mxu3 %v6190_v45  ;;  %898 = vmatpush.msrb.mxu2 %v871_v46  ;;  %v1506_v46 = vld [vmem:[#allocation8 + $0x448] sm:$0xff] }
 0x113   : >> { %1015 = vmatpush.msrb.mxu3 %v990_v47  ;;  %1109 = vmatpush.msrb.mxu0 %v1092_v48  ;;  %v1191_v47 = vld [vmem:[#allocation8 + $0x3c0] sm:$0xff] }
 0x114   : >> { %800 = vmatpush.msrb.mxu1 %v773_v51  ;;  %899 = vmatpush.msrb.mxu2 %v870_v52  ;;  %v6210_v48 = vld [vmem:[%s6140_s27 + $0x39] sm:$0xff] }
 0x115   : >> { %1016 = vmatpush.msrb.mxu3 %v989_v54  ;;  %1110 = vmatpush.msrb.mxu0 %v1091_v55  ;;  %v1308_v51 = vld [vmem:[#allocation8 + $0x138] sm:$0xff]  ;;  %v1505_v52 = vld [vmem:[#allocation8 + $0x440] sm:$0xff]  ;;  %v6217_v55 = vld [vmem:[%s6140_s27 + $0x49] sm:$0xff] }
 0x116   : >> { %801 = vmatpush.msrb.mxu1 %v772_v56  ;;  %900 = vmatpush.msrb.mxu2 %v869_v57  ;;  %v1190_v54 = vld [vmem:[#allocation8 + $0x3b8] sm:$0xff]  ;;  %v1405_v56 = vld [vmem:[#allocation8 + $0x2b0] sm:$0xff] }
 0x117   : >> { %1017 = vmatpush.msrb.mxu3 %v988_v58  ;;  %1111 = vmatpush.msrb.mxu0 %v1090_v59  ;;  %v1504_v57 = vld [vmem:[#allocation8 + $0x438] sm:$0xff]  ;;  %v1189_v58 = vld [vmem:[#allocation8 + $0x3b0] sm:$0xff] }
 0x118   : >> { %802 = vmatpush.msrb.mxu1 %v771_v60  ;;  %901 = vmatmul.f32.vlgmr.msrb.gmra.mxu2 %v6143_v49  ;;  %v6224_v59 = vld [vmem:[%s6140_s27 + $0x51] sm:$0xff]  ;;  %v1404_v60 = vld [vmem:[#allocation8 + $0x2a8] sm:$0xff] }
 0x119   : >> { %803 = vmatmul.f32.vlgmr.msrb.gmra.mxu1 %v655_v44  ;;  %1018 = vmatpush.msrb.mxu3 %v987_v61  ;;  %v1407_v44 = vld [vmem:[#allocation8 + $0x2c0] sm:$0xff]  ;;  %v1503_v61 = vld [vmem:[#allocation8 + $0x430] sm:$0xff] }
 0x11a   : >> { %1112 = vmatpush.msrb.mxu0 %v1089_v62  ;;  %1317 = vmatpush.msra.mxu2 %v1316_v63  ;;  %v1188_v62 = vld [vmem:[#allocation8 + $0x3a8] sm:$0xff] }
 0x11b   : >> { %714 = vmatmul.f32.gmra.mxu0 %v656_v2  ;;  %1019 = vmatmul.f32.vlgmr.msrb.gmra.mxu3 %v966_v3  ;;  %v6231_v63 = vld [vmem:[%s6140_s27 + $0x61] sm:$0xff] }
 0x11c   : >> { %1113 = vmatpush.msrb.mxu0 %v1088_v4  ;;  %1415 = vmatpush.msra.mxu3 %v1414_v6  ;;  %v1502_v3 = vld [vmem:[#allocation8 + $0x428] sm:$0xff]  ;;  %v1187_v4 = vld [vmem:[#allocation8 + $0x3a0] sm:$0xff] }
 0x11d   : >> { %1199 = vmatpush.msra.mxu1 %v1198_v7  ;;  %1318 = vmatpush.msra.mxu2 %v1315_v8  ;;  %v6238_v6 = vld [vmem:[%s6140_s27 + $0x69] sm:$0xff]  ;;  %v1402_v7 = vld [vmem:[#allocation8 + $0x298] sm:$0xff]  ;;  %v1501_v8 = vld [vmem:[#allocation8 + $0x420] sm:$0xff] }
 0x11e   : >> { %1114 = vmatpush.msrb.mxu0 %v1087_v9  ;;  %1416 = vmatpush.msra.mxu3 %v1413_v10  ;;  %v1186_v9 = vld [vmem:[#allocation8 + $0x398] sm:$0xff] }
 0x11f   : >> { %1200 = vmatpush.msra.mxu1 %v1197_v11  ;;  %1319 = vmatpush.msra.mxu2 %v1314_v12  ;;  %v6245_v10 = vld [vmem:[%s6140_s27 + $0x79] sm:$0xff]  ;;  %v1401_v11 = vld [vmem:[#allocation8 + $0x290] sm:$0xff] }
 0x120   : >> { %1115 = vmatpush.msrb.mxu0 %v1086_v13  ;;  %904 = vmatmul.f32.gmra.mxu2 %v6159_v1  ;;  %v1500_v12 = vld [vmem:[#allocation8 + $0x418] sm:$0xff]  ;;  %v1185_v13 = vld [vmem:[#allocation8 + $0x390] sm:$0xff] }
 0x121   : >> { %806 = vmatmul.f32.gmra.mxu1 %v656_v2  ;;  %1417 = vmatpush.msra.mxu3 %v1412_v14  ;;  %v1403_v2 = vld [vmem:[#allocation8 + $0x2a0] sm:$0xff] }
 0x122   : >> { %1116 = vmatpush.msrb.mxu0 %v1085_v15  ;;  %1201 = vmatpush.msra.mxu1 %v1196_v16  ;;  %v6252_v14 = vld [vmem:[%s6140_s27 + $0x81] sm:$0xff]  ;;  %v1499_v16 = vld [vmem:[#allocation8 + $0x410] sm:$0xff] }
 0x123   : >> { %1022 = vmatmul.f32.gmra.mxu3 %v967_v17  ;;  %1117 = vmatmul.f32.vlgmr.msrb.gmra.mxu0 %v968_v20  ;;  %v1400_v15 = vld [vmem:[#allocation8 + $0x288] sm:$0xff] }
 0x124   : >> { %1513 = vmatpush.msra.mxu0 %v1512_v21  ;;  %1320 = vmatpush.msra.mxu2 %v1313_v22  ;;  %v1184_v17 = vld [vmem:[#allocation8 + $0x388] sm:$0xff]  ;;  %v1399_v22 = vld [vmem:[#allocation8 + $0x280] sm:$0xff] }
 0x125   : >> { %1418 = vmatpush.msra.mxu3 %v1411_v23  ;;  %1202 = vmatpush.msra.mxu1 %v1195_v24  ;;  %v1498_v23 = vld [vmem:[#allocation8 + $0x408] sm:$0xff]  ;;  %v1183_v24 = vld [vmem:[#allocation8 + $0x380] sm:$0xff] }
 0x126   : >> { %1514 = vmatpush.msra.mxu0 %v1511_v26  ;;  %1321 = vmatpush.msra.mxu2 %v1312_v27  ;;  %v669_v26 = vld [vmem:[%s6140_s27 + $0xc0] sm:$0xff] }
 0x127   : >> { %1419 = vmatpush.msra.mxu3 %v1410_v28  ;;  %1203 = vmatpush.msra.mxu1 %v1194_v29  ;;  %v6270_v28 = vld [vmem:[%s6140_s27 + $0x99] sm:$0xff] }
 0x128   : >> { %907 = vmatmul.f32.gmra.mxu2 %v6171_v19  ;;  %1515 = vmatpush.msra.mxu0 %v1510_v30 }
 0x129   : >> { %809 = vmatmul.f32.gmra.mxu1 %v6143_v49  ;;  %1322 = vmatpush.msra.mxu2 %v1311_v31  ;;  %v6204_v49 = vld [vmem:[%s6140_s27 + $0x31] sm:$0xff]  ;;  %v1497_v31 = vld [vmem:[#allocation8 + $0x400] sm:$0xff] }
 0x12a   : >> { %1516 = vmatpush.msra.mxu0 %v1509_v32  ;;  %1420 = vmatpush.msra.mxu3 %v1409_v33  ;;  %v670_v32 = vld [vmem:[%s6140_s27 + $0xc8] sm:$0xff] }
 0x12b   : >> { %1025 = vmatmul.f32.gmra.mxu3 %v968_v20  ;;  %1120 = vmatmul.f32.gmra.mxu0 %v969_v34  ;;  %v6259_v20 = vld [vmem:[%s6140_s27 + $0x91] sm:$0xff] }
 0x12c   : >> { %1517 = vmatpush.msra.mxu0 %v1508_v35  ;;  %1204 = vmatpush.msra.mxu1 %v1193_v36 }
 0x12d   : >> { %1323 = vmatpush.msra.mxu2 %v1310_v37  ;;  %1421 = vmatpush.msra.mxu3 %v1408_v40  ;;  %v671_v37 = vld [vmem:[%s6140_s27 + $0xd8] sm:$0xff]  ;;  %v6296_v40 = vld [vmem:[%s7606_s3] ss:$0 sm:$0xff] }
 0x12e   : >> { %1518 = vmatpush.msra.mxu0 %v1507_v41  ;;  %1205 = vmatpush.msra.mxu1 %v1192_v42 }
 0x12f   : >> { %1324 = vmatpush.msra.mxu2 %v1309_v43  ;;  %1422 = vmatpush.msra.mxu3 %v1407_v44 }
 0x130   : >> { %910 = vmatmul.f32.gmra.mxu2 %v6184_v39  ;;  %1519 = vmatpush.msra.mxu0 %v1506_v46 }
 0x131   : >> { %812 = vmatmul.f32.gmra.mxu1 %v6159_v1  ;;  %1325 = vmatpush.msra.mxu2 %v1308_v51  ;;  %v1406_v1 = vld [vmem:[#allocation8 + $0x2b8] sm:$0xff] }
 0x132   : >> { %1206 = vmatpush.msra.mxu1 %v1191_v47  ;;  %1423 = vmatpush.msra.mxu3 %v1406_v1  ;;  %v672_v47 = vld [vmem:[%s6140_s27 + $0xe0] sm:$0xff] }
 0x133   : >> { %1028 = vmatmul.f32.gmra.mxu3 %v969_v34  ;;  %1123 = vmatmul.f32.gmra.mxu0 %v6204_v49  ;;  %v6283_v34 = vld [vmem:[%s6140_s27 + $0xa9] sm:$0xff]  ;;  %v6313_v1 = vld [vmem:[%s6140_s27 + $0xc1] sm:$0xff] }
 0x134   : >> { %1520 = vmatpush.msra.mxu0 %v1505_v52  ;;  %1207 = vmatpush.msra.mxu1 %v1190_v54 }
 0x135   : >> { %1424 = vmatpush.msra.mxu3 %v1405_v56  ;;  %v1280_v56 = vld [vmem:[%s6140_s27 + $0x2] sm:$0xff] }
 0x136   : >> { %1521 = vmatpush.msra.mxu0 %v1504_v57  ;;  %1208 = vmatpush.msra.mxu1 %v1189_v58 }
 0x137   : >> { %1425 = vmatpush.msra.mxu3 %v1404_v60 }
 0x138   : >> { %913 = vmatmul.f32.gmra.mxu2 %v6146_v50  ;;  %1522 = vmatpush.msra.mxu0 %v1503_v61  ;;  %v6326_v61 = vld [vmem:[%s6140_s27 + $0xc9] sm:$0xff] }
 0x139   : >> { %815 = vmatmul.f32.gmra.mxu1 %v6171_v19  ;;  %v1307_v19 = vld [vmem:[#allocation8 + $0x130] sm:$0xff]  ;;  %1426 = vmatpush.msra.mxu3 %v1403_v2 }
 0x13a   : >> { %1326 = vmatpush.msra.mxu2 %v1307_v19  ;;  %1209 = vmatpush.msra.mxu1 %v1188_v62  ;;  %v1282_v62 = vld [vmem:[%s6140_s27 + $0x1a] sm:$0xff] }
 0x13b   : >> { %1031 = vmatmul.f32.gmra.mxu3 %v6204_v49  ;;  %1126 = vmatmul.f32.gmra.mxu0 %v6210_v48 }
 0x13c   : >> { %1523 = vmatpush.msra.mxu0 %v1502_v3  ;;  %1210 = vmatpush.msra.mxu1 %v1187_v4  ;;  %v1281_v4 = vld [vmem:[%s6140_s27 + $0xa] sm:$0xff] }
 0x13d   : >> { %1427 = vmatpush.msra.mxu3 %v1402_v7 }
 0x13e   : >> { %1524 = vmatpush.msra.mxu0 %v1501_v8  ;;  %1211 = vmatpush.msra.mxu1 %v1186_v9 }
 0x13f   : >> { %1428 = vmatpush.msra.mxu3 %v1401_v11  ;;  %v1283_v11 = vld [vmem:[%s6140_s27 + $0x22] sm:$0xff] }
 0x140   : >> { %916 = vmatmul.f32.gmra.mxu2 %v6156_v0  ;;  %1525 = vmatpush.msra.mxu0 %v1500_v12  ;;  %v1284_v12 = vld [vmem:[%s6140_s27 + $0x32] sm:$0xff] }
 0x141   : >> { %818 = vmatmul.f32.gmra.mxu1 %v6184_v39  ;;  %v1306_v39 = vld [vmem:[#allocation8 + $0x128] sm:$0xff]  ;;  %1429 = vmatpush.msra.mxu3 %v1400_v15 }
 0x142   : >> { %1327 = vmatpush.msra.mxu2 %v1306_v39  ;;  %1212 = vmatpush.msra.mxu1 %v1185_v13 }
 0x143   : >> { %1034 = vmatmul.f32.gmra.mxu3 %v6210_v48  ;;  %1129 = vmatmul.f32.gmra.mxu0 %v6217_v55 }
 0x144   : >> { %1526 = vmatpush.msra.mxu0 %v1499_v16  ;;  %1213 = vmatpush.msra.mxu1 %v1184_v17 }
 0x145   : >> { %1430 = vmatpush.msra.mxu3 %v1399_v22 }
 0x146   : >> { %1527 = vmatpush.msra.mxu0 %v1498_v23  ;;  %1214 = vmatpush.msra.mxu1 %v1183_v24  ;;  %v1285_v23 = vld [vmem:[%s6140_s27 + $0x3a] sm:$0xff] }
 0x148   : >> { %919 = vmatmul.f32.gmra.mxu2 %v6168_v18  ;;  %1528 = vmatpush.msra.mxu0 %v1497_v31 }
 0x149   : >> { %821 = vmatmul.f32.gmra.mxu1 %v6146_v50  ;;  %v1305_v50 = vld [vmem:[#allocation8 + $0x120] sm:$0xff] }
 0x14a   : >> { %1328 = vmatpush.msra.mxu2 %v1305_v50 }
 0x14b   : >> { %1037 = vmatmul.f32.gmra.mxu3 %v6217_v55  ;;  %1132 = vmatmul.f32.gmra.mxu0 %v6224_v59 }
 0x150   : >> { %922 = vmatmul.f32.gmra.mxu2 %v6181_v38 }
 0x151   : >> { %824 = vmatmul.f32.gmra.mxu1 %v6156_v0  ;;  %v1304_v0 = vld [vmem:[#allocation8 + $0x118] sm:$0xff] }
 0x152   : >> { %1329 = vmatpush.msra.mxu2 %v1304_v0 }
 0x153   : >> { %1040 = vmatmul.f32.gmra.mxu3 %v6224_v59  ;;  %1135 = vmatmul.f32.gmra.mxu0 %v6231_v63 }
 0x158   : >> { %925 = vmatmul.f32.gmra.mxu2 %v6149_v53 }
 0x159   : >> { %827 = vmatmul.f32.gmra.mxu1 %v6168_v18  ;;  %v1303_v18 = vld [vmem:[#allocation8 + $0x110] sm:$0xff] }
 0x15a   : >> { %1330 = vmatpush.msra.mxu2 %v1303_v18 }
 0x15b   : >> { %1043 = vmatmul.f32.gmra.mxu3 %v6231_v63  ;;  %1138 = vmatmul.f32.gmra.mxu0 %v6238_v6 }
 0x160   : >> { %928 = vmatmul.f32.gmra.mxu2 %v6163_v5 }
 0x161   : >> { %830 = vmatmul.f32.gmra.mxu1 %v6181_v38  ;;  %v1302_v38 = vld [vmem:[#allocation8 + $0x108] sm:$0xff] }
 0x162   : >> { %1331 = vmatpush.msra.mxu2 %v1302_v38 }
 0x163   : >> { %1046 = vmatmul.f32.gmra.mxu3 %v6238_v6  ;;  %1141 = vmatmul.f32.gmra.mxu0 %v6245_v10 }
 0x168   : >> { %931 = vmatmul.f32.gmra.mxu2 %v6177_v25 }
 0x169   : >> { %833 = vmatmul.f32.gmra.mxu1 %v6149_v53  ;;  %v1301_v53 = vld [vmem:[#allocation8 + $0x100] sm:$0xff] }
 0x16a   : >> { %1332 = vmatpush.msra.mxu2 %v1301_v53 }
 0x16b   : >> { %1049 = vmatmul.f32.gmra.mxu3 %v6245_v10  ;;  %1144 = vmatmul.f32.gmra.mxu0 %v6252_v14 }
 0x170   : >> { %934 = vmatmul.f32.gmra.mxu2 %v6190_v45  ;;  %v6261_v21 = vpop.f32.mrf.mxu1 }
 0x171   : >> { %836 = vmatmul.f32.gmra.mxu1 %v6163_v5 }
 0x173   : >> { %1052 = vmatmul.f32.gmra.mxu3 %v6252_v14  ;;  %1147 = vmatmul.f32.gmra.mxu0 %v6259_v20 }
 0x176   : >> { %v6267_v27 = vpop.f32.mrf.mxu2  ;;  %v706_v30 = vpop.f32.mrf.mxu0 }
 0x177   : >> { %v754_v39 = vadd.f32 %v6296_v40, %v706_v30 }
 0x178   : >> { %937 = vmatmul.f32.gmra.mxu2 %v669_v26  ;;  %v6272_v5 = vpop.f32.mrf.mxu3 }
 0x179   : >> { %839 = vmatmul.f32.gmra.mxu1 %v6177_v25  ;;  %v6275_v29 = vpop.f32.mrf.mxu1 }
 0x17b   : >> { %1055 = vmatmul.f32.gmra.mxu3 %v6259_v20  ;;  %1150 = vmatmul.f32.gmra.mxu0 %v6270_v28 }
 0x17e   : >> { %v6280_v33 = vpop.f32.mrf.mxu2 }
 0x180   : >> { %940 = vmatmul.f32.gmra.mxu2 %v670_v32 }
 0x181   : >> { %842 = vmatmul.f32.gmra.mxu1 %v6190_v45  ;;  %v6286_v25 = vpop.f32.mrf.mxu3  ;;  %v6299_v45 = vld [vmem:[%s6140_s27 + $0xb1] sm:$0xff] }
 0x182   : >> { %v6288_v35 = vpop.f32.mrf.mxu1 }
 0x183   : >> { %1058 = vmatmul.f32.gmra.mxu3 %v6270_v28  ;;  %1153 = vmatmul.f32.gmra.mxu0 %v6283_v34 }
 0x184   : >> { %v709_v36 = vpop.f32.mrf.mxu0 }
 0x185   : >> { %v755_v9 = vadd.f32 %v6296_v40, %v709_v36 }
 0x187   : >> { %v736_v41 = vpop.f32.mrf.mxu2 }
 0x188   : >> { %943 = vmatmul.f32.gmra.mxu2 %v671_v37  ;;  %v6302_v42 = vadd.f32 %v6296_v40, %v736_v41  ;;  %v1286_v41 = vld [vmem:[%s6140_s27 + $0x4a] sm:$0xff] }
 0x189   : >> { %845 = vmatmul.f32.gmra.mxu1 %v669_v26 }
 0x18b   : >> { %1061 = vmatmul.f32.gmra.mxu3 %v6283_v34  ;;  %1156 = vmatmul.f32.gmra.mxu0 %v6299_v45  ;;  %v748_v43 = vpop.f32.mrf.mxu3 }
 0x18c   : >> { %v6306_v44 = vpop.f32.mrf.mxu1  ;;  %v6309_v46 = vadd.f32 %v6296_v40, %v748_v43 }
 0x18e   : >> { %v712_v51 = vpop.f32.mrf.mxu0 }
 0x18f   : >> { %v756_v53 = vadd.f32 %v6296_v40, %v712_v51 }
 0x190   : >> { %946 = vmatmul.f32.gmra.mxu2 %v672_v47 }
 0x191   : >> { %848 = vmatmul.f32.gmra.mxu1 %v670_v32  ;;  %v739_v52 = vpop.f32.mrf.mxu2 }
 0x192   : >> { %v6316_v54 = vadd.f32 %v6296_v40, %v739_v52 }
 0x193   : >> { %1064 = vmatmul.f32.gmra.mxu3 %v6299_v45  ;;  %1159 = vmatmul.f32.gmra.mxu0 %v6313_v1 }
 0x195   : >> { %v751_v19 = vpop.f32.mrf.mxu3 }
 0x196   : >> { %v6322_v57 = vadd.f32 %v6296_v40, %v751_v19  ;;  %v804_v58 = vpop.f32.mrf.mxu1 }
 0x197   : >> { %v852_v50 = vadd.f32 %v804_v58, %v754_v39  ;;  %v1287_v39 = vld [vmem:[%s6140_s27 + $0x52] sm:$0xff] }
 0x198   : >> { %v715_v60 = vpop.f32.mrf.mxu0  ;;  %1333 = vmatmul.f32.vlgmr.msra.gmra.mxu2 %v1280_v56  ;;  %v758_v56 = vadd.f32 %v6296_v40, %v6261_v21 }
 0x199   : >> { %1215 = vmatmul.f32.vlgmr.msra.gmra.mxu1 %v6204_v49  ;;  %v757_v36 = vadd.f32 %v6296_v40, %v715_v60 }
 0x19b   : >> { %1162 = vmatmul.f32.gmra.mxu0 %v6326_v61  ;;  %1431 = vmatmul.f32.vlgmr.msra.gmra.mxu3 %v1282_v62  ;;  %v902_v2 = vpop.f32.mrf.mxu2 }
 0x19c   : >> { %v950_v3 = vadd.f32 %v902_v2, %v852_v50 }
 0x19e   : >> { %v807_v0 = vpop.f32.mrf.mxu1  ;;  %v1020_v7 = vpop.f32.mrf.mxu3 }
 0x19f   : >> { %v6332_v8 = vadd.f32 %v1020_v7, %v950_v3  ;;  %v853_v49 = vadd.f32 %v807_v0, %v755_v9  ;;  %v1288_v0 = vld [vmem:[%s6140_s27 + $0x62] sm:$0xff] }
 0x1a0   : >> { %v6335_v18 = vpop.f32.mrf.mxu0  ;;  %1336 = vmatmul.f32.gmra.mxu2 %v1281_v4  ;;  %v759_v4 = vadd.f32 %v6296_v40, %v6275_v29 }
 0x1a1   : >> { %1218 = vmatmul.f32.gmra.mxu1 %v6210_v48 }
 0x1a3   : >> { %1434 = vmatmul.f32.gmra.mxu3 %v1283_v11  ;;  %1529 = vmatmul.f32.vlgmr.msra.gmra.mxu0 %v1284_v12  ;;  %v905_v13 = vpop.f32.mrf.mxu2 }
 0x1a4   : >> { %v951_v38 = vadd.f32 %v905_v13, %v853_v49  ;;  %v760_v13 = vadd.f32 %v6296_v40, %v6288_v35 }
 0x1a6   : >> { %v810_v15 = vpop.f32.mrf.mxu1  ;;  %v1023_v16 = vpop.f32.mrf.mxu3 }
 0x1a7   : >> { %v6340_v17 = vadd.f32 %v1023_v16, %v951_v38  ;;  %v854_v24 = vadd.f32 %v810_v15, %v756_v53  ;;  %v1289_v38 = vld [vmem:[%s6140_s27 + $0x6a] sm:$0xff] }
 0x1a8   : >> { %v6343_v22 = vpop.f32.mrf.mxu0  ;;  %1339 = vmatmul.f32.gmra.mxu2 %v1282_v62 }
 0x1a9   : >> { %1221 = vmatmul.f32.gmra.mxu1 %v6217_v55 }
 0x1ab   : >> { %1437 = vmatmul.f32.gmra.mxu3 %v1284_v12  ;;  %1532 = vmatmul.f32.gmra.mxu0 %v1285_v23  ;;  %v908_v48 = vpop.f32.mrf.mxu2 }
 0x1ac   : >> { %v952_v26 = vadd.f32 %v908_v48, %v854_v24  ;;  %v761_v48 = vadd.f32 %v6296_v40, %v6306_v44 }
 0x1ae   : >> { %v813_v30 = vpop.f32.mrf.mxu1  ;;  %v1026_v31 = vpop.f32.mrf.mxu3 }
 0x1af   : >> { %v6347_v32 = vadd.f32 %v1026_v31, %v952_v26  ;;  %v855_v43 = vadd.f32 %v813_v30, %v757_v36  ;;  %v1290_v26 = vld [vmem:[%s6140_s27 + $0x7a] sm:$0xff]  ;;  %v762_v36 = vadd.f32 %v6296_v40, %v6267_v27 }
 0x1b0   : >> { %v6350_v37 = vpop.f32.mrf.mxu0  ;;  %1342 = vmatmul.f32.gmra.mxu2 %v1283_v11 }
 0x1b1   : >> { %1224 = vmatmul.f32.gmra.mxu1 %v6224_v59 }
 0x1b3   : >> { %1440 = vmatmul.f32.gmra.mxu3 %v1285_v23  ;;  %1535 = vmatmul.f32.gmra.mxu0 %v1286_v41  ;;  %v911_v55 = vpop.f32.mrf.mxu2 }
 0x1b4   : >> { %v953_v47 = vadd.f32 %v911_v55, %v855_v43 }
 0x1b6   : >> { %v816_v51 = vpop.f32.mrf.mxu1  ;;  %v1029_v52 = vpop.f32.mrf.mxu3 }
 0x1b7   : >> { %v6354_v19 = vadd.f32 %v1029_v52, %v953_v47  ;;  %v856_v59 = vadd.f32 %v816_v51, %v758_v56  ;;  %v1291_v51 = vld [vmem:[%s6140_s27 + $0x82] sm:$0xff]  ;;  %v763_v56 = vadd.f32 %v6296_v40, %v6280_v33 }
 0x1b8   : >> { %v6358_v58 = vpop.f32.mrf.mxu0  ;;  %1345 = vmatmul.f32.gmra.mxu2 %v1284_v12 }
 0x1b9   : >> { %1227 = vmatmul.f32.gmra.mxu1 %v6231_v63 }
 0x1bb   : >> { %1443 = vmatmul.f32.gmra.mxu3 %v1286_v41  ;;  %1538 = vmatmul.f32.gmra.mxu0 %v1287_v39  ;;  %v914_v60 = vpop.f32.mrf.mxu2 }
 0x1bc   : >> { %v954_v62 = vadd.f32 %v914_v60, %v856_v59 }
 0x1be   : >> { %v819_v50 = vpop.f32.mrf.mxu1  ;;  %v1032_v2 = vpop.f32.mrf.mxu3 }
 0x1bf   : >> { %v6362_v3 = vadd.f32 %v1032_v2, %v954_v62  ;;  %v857_v63 = vadd.f32 %v819_v50, %v759_v4  ;;  %v1292_v50 = vld [vmem:[%s6140_s27 + $0x92] sm:$0xff] }
 0x1c0   : >> { %v6366_v21 = vpop.f32.mrf.mxu0  ;;  %1348 = vmatmul.f32.gmra.mxu2 %v1285_v23 }
 0x1c1   : >> { %1230 = vmatmul.f32.gmra.mxu1 %v6238_v6 }
 0x1c3   : >> { %1446 = vmatmul.f32.gmra.mxu3 %v1287_v39  ;;  %1541 = vmatmul.f32.gmra.mxu0 %v1288_v0  ;;  %v917_v7 = vpop.f32.mrf.mxu2 }
 0x1c4   : >> { %v955_v9 = vadd.f32 %v917_v7, %v857_v63 }
 0x1c6   : >> { %v822_v11 = vpop.f32.mrf.mxu1  ;;  %v1035_v12 = vpop.f32.mrf.mxu3 }
 0x1c7   : >> { %v6370_v49 = vadd.f32 %v1035_v12, %v955_v9  ;;  %v858_v6 = vadd.f32 %v822_v11, %v760_v13  ;;  %v1293_v11 = vld [vmem:[%s6140_s27 + $0x9a] sm:$0xff] }
 0x1c8   : >> { %v6374_v29 = vpop.f32.mrf.mxu0  ;;  %1351 = vmatmul.f32.gmra.mxu2 %v1286_v41 }
 0x1c9   : >> { %1233 = vmatmul.f32.gmra.mxu1 %v6245_v10 }
 0x1cb   : >> { %1449 = vmatmul.f32.gmra.mxu3 %v1288_v0  ;;  %1544 = vmatmul.f32.gmra.mxu0 %v1289_v38  ;;  %v920_v15 = vpop.f32.mrf.mxu2 }
 0x1cc   : >> { %v956_v16 = vadd.f32 %v920_v15, %v858_v6 }
 0x1ce   : >> { %v825_v53 = vpop.f32.mrf.mxu1  ;;  %v1038_v23 = vpop.f32.mrf.mxu3 }
 0x1cf   : >> { %v6378_v24 = vadd.f32 %v1038_v23, %v956_v16  ;;  %v859_v10 = vadd.f32 %v825_v53, %v761_v48 }
 0x1d0   : >> { %v6382_v35 = vpop.f32.mrf.mxu0  ;;  %1354 = vmatmul.f32.gmra.mxu2 %v1287_v39 }
 0x1d1   : >> { %1236 = vmatmul.f32.gmra.mxu1 %v6252_v14 }
 0x1d3   : >> { %1452 = vmatmul.f32.gmra.mxu3 %v1289_v38  ;;  %1547 = vmatmul.f32.gmra.mxu0 %v1290_v26  ;;  %v923_v30 = vpop.f32.mrf.mxu2 }
 0x1d4   : >> { %v957_v31 = vadd.f32 %v923_v30, %v859_v10 }
 0x1d6   : >> { %v828_v41 = vpop.f32.mrf.mxu1  ;;  %v1041_v43 = vpop.f32.mrf.mxu3 }
 0x1d7   : >> { %v860_v55 = vadd.f32 %v828_v41, %v762_v36  ;;  %v6388_v47 = vadd.f32 %v1041_v43, %v957_v31  ;;  %v1295_v41 = vld [vmem:[%s6140_s27 + $0xb2] sm:$0xff] }
 0x1d8   : >> { %v6390_v44 = vpop.f32.mrf.mxu0  ;;  %1357 = vmatmul.f32.gmra.mxu2 %v1288_v0 }
 0x1d9   : >> { %1239 = vmatmul.f32.gmra.mxu1 %v6259_v20 }
 0x1db   : >> { %1455 = vmatmul.f32.gmra.mxu3 %v1290_v26  ;;  %1550 = vmatmul.f32.gmra.mxu0 %v1291_v51  ;;  %v926_v14 = vpop.f32.mrf.mxu2 }
 0x1dc   : >> { %v958_v52 = vadd.f32 %v926_v14, %v860_v55 }
 0x1de   : >> { %v831_v27 = vpop.f32.mrf.mxu1  ;;  %v1044_v39 = vpop.f32.mrf.mxu3 }
 0x1df   : >> { %v861_v59 = vadd.f32 %v831_v27, %v763_v56  ;;  %v1076_v60 = vadd.f32 %v1044_v39, %v958_v52  ;;  %v1296_v39 = vld [vmem:[%s6140_s27 + $0xc2] sm:$0xff] }
 0x1e0   : >> { %v1142_v62 = vpop.f32.mrf.mxu0  ;;  %1360 = vmatmul.f32.gmra.mxu2 %v1289_v38 }
 0x1e1   : >> { %v6397_v2 = vadd.f32 %v1142_v62, %v1076_v60  ;;  %1242 = vmatmul.f32.gmra.mxu1 %v6270_v28 }
 0x1e3   : >> { %1458 = vmatmul.f32.gmra.mxu3 %v1291_v51  ;;  %1553 = vmatmul.f32.gmra.mxu0 %v1292_v50  ;;  %v929_v20 = vpop.f32.mrf.mxu2 }
 0x1e4   : >> { %v959_v4 = vadd.f32 %v929_v20, %v861_v59 }
 0x1e6   : >> { %v834_v0 = vpop.f32.mrf.mxu1  ;;  %v1047_v63 = vpop.f32.mrf.mxu3 }
 0x1e7   : >> { %v862_v33 = vadd.f32 %v834_v0, %v6302_v42  ;;  %v1077_v7 = vadd.f32 %v1047_v63, %v959_v4  ;;  %v1294_v42 = vld [vmem:[%s6140_s27 + $0xaa] sm:$0xff] }
 0x1e8   : >> { %v1145_v9 = vpop.f32.mrf.mxu0  ;;  %1363 = vmatmul.f32.gmra.mxu2 %v1290_v26  ;;  %v766_v26 = vadd.f32 %v6296_v40, %v6272_v5  ;;  %v1297_v0 = vld [vmem:[%s6140_s27 + $0xca] sm:$0xff] }
 0x1e9   : >> { %v6402_v12 = vadd.f32 %v1145_v9, %v1077_v7  ;;  %1245 = vmatmul.f32.gmra.mxu1 %v6283_v34 }
 0x1eb   : >> { %1461 = vmatmul.f32.gmra.mxu3 %v1292_v50  ;;  %1556 = vmatmul.f32.gmra.mxu0 %v1293_v11  ;;  %v932_v28 = vpop.f32.mrf.mxu2 }
 0x1ec   : >> { %v960_v13 = vadd.f32 %v932_v28, %v862_v33 }
 0x1ee   : >> { %v837_v38 = vpop.f32.mrf.mxu1  ;;  %v1050_v6 = vpop.f32.mrf.mxu3 }
 0x1ef   : >> { %v863_v15 = vadd.f32 %v837_v38, %v6316_v54  ;;  %v1078_v16 = vadd.f32 %v1050_v6, %v960_v13  ;;  %v1298_v38 = vld [vmem:[%s6140_s27 + $0xda] sm:$0xff] }
 0x1f0   : >> { %v1148_v53 = vpop.f32.mrf.mxu0  ;;  %1366 = vmatmul.f32.gmra.mxu2 %v1291_v51  ;;  %v767_v51 = vadd.f32 %v6296_v40, %v6286_v25  ;;  %v984_v40 = vld [vmem:[%s6140_s27 + $0xd9] sm:$0xff] }
 0x1f1   : >> { %v6407_v23 = vadd.f32 %v1148_v53, %v1078_v16  ;;  %1248 = vmatmul.f32.gmra.mxu1 %v6299_v45 }
 0x1f3   : >> { %1464 = vmatmul.f32.gmra.mxu3 %v1293_v11  ;;  %1559 = vmatmul.f32.gmra.mxu0 %v1294_v42  ;;  %v935_v34 = vpop.f32.mrf.mxu2 }
 0x1f4   : >> { %v961_v48 = vadd.f32 %v935_v34, %v863_v15 }
 0x1f6   : >> { %v840_v10 = vpop.f32.mrf.mxu1  ;;  %v1053_v30 = vpop.f32.mrf.mxu3 }
 0x1f7   : >> { %v864_v31 = vadd.f32 %v840_v10, %v766_v26  ;;  %v1079_v54 = vadd.f32 %v1053_v30, %v961_v48  ;;  %v1166_v48 = vadd.f32 %v6335_v18, %v6332_v8 }
 0x1f8   : >> { %v1151_v36 = vpop.f32.mrf.mxu0  ;;  %1369 = vmatmul.f32.gmra.mxu2 %v1292_v50 }
 0x1f9   : >> { %v6413_v43 = vadd.f32 %v1151_v36, %v1079_v54  ;;  %1251 = vmatmul.f32.gmra.mxu1 %v6313_v1 }
 0x1fb   : >> { %1467 = vmatmul.f32.gmra.mxu3 %v1294_v42  ;;  %1562 = vmatmul.f32.gmra.mxu0 %v1295_v41  ;;  %v938_v45 = vpop.f32.mrf.mxu2 }
 0x1fc   : >> { %v962_v55 = vadd.f32 %v938_v45, %v864_v31 }
 0x1fe   : >> { %v843_v5 = vpop.f32.mrf.mxu1  ;;  %v1056_v14 = vpop.f32.mrf.mxu3 }
 0x1ff   : >> { %v865_v52 = vadd.f32 %v843_v5, %v767_v51  ;;  %v1080_v56 = vadd.f32 %v1056_v14, %v962_v55  ;;  %v1167_v55 = vadd.f32 %v6343_v22, %v6340_v17 }
 0x200   : >> { %v1154_v27 = vpop.f32.mrf.mxu0  ;;  %1372 = vmatmul.f32.gmra.mxu2 %v1293_v11  ;;  %v985_v11 = vld [vmem:[%s6140_s27 + $0xe1] sm:$0xff] }
 0x201   : >> { %v6419_v59 = vadd.f32 %v1154_v27, %v1080_v56  ;;  %1254 = vmatmul.f32.gmra.mxu1 %v6326_v61 }
 0x203   : >> { %1470 = vmatmul.f32.gmra.mxu3 %v1295_v41  ;;  %1565 = vmatmul.f32.gmra.mxu0 %v1296_v39  ;;  %v941_v1 = vpop.f32.mrf.mxu2 }
 0x204   : >> { %v963_v60 = vadd.f32 %v941_v1, %v865_v52  ;;  %v1168_v1 = vadd.f32 %v6350_v37, %v6347_v32 }
 0x206   : >> { %v846_v62 = vpop.f32.mrf.mxu1  ;;  %v1059_v25 = vpop.f32.mrf.mxu3 }
 0x207   : >> { %v866_v50 = vadd.f32 %v846_v62, %v6309_v46  ;;  %v1081_v20 = vadd.f32 %v1059_v25, %v963_v60 }
 0x208   : >> { %v1157_v4 = vpop.f32.mrf.mxu0  ;;  %1375 = vmatmul.f32.gmra.mxu2 %v1294_v42 }
 0x209   : >> { %v6425_v63 = vadd.f32 %v1157_v4, %v1081_v20  ;;  %1257 = vmatmul.f32.gmra.mxu1 %v984_v40 }
 0x20b   : >> { %1473 = vmatmul.f32.gmra.mxu3 %v1296_v39  ;;  %1568 = vmatmul.f32.gmra.mxu0 %v1297_v0  ;;  %v944_v61 = vpop.f32.mrf.mxu2 }
 0x20c   : >> { %v964_v33 = vadd.f32 %v944_v61, %v866_v50 }
 0x20e   : >> { %v849_v7 = vpop.f32.mrf.mxu1  ;;  %v1062_v9 = vpop.f32.mrf.mxu3 }
 0x20f   : >> { %v867_v28 = vadd.f32 %v849_v7, %v6322_v57  ;;  %v1082_v13 = vadd.f32 %v1062_v9, %v964_v33  ;;  %v1299_v57 = vld [vmem:[%s6140_s27 + $0xe2] sm:$0xff] }
 0x210   : >> { %v1160_v46 = vpop.f32.mrf.mxu0  ;;  %1378 = vmatmul.f32.gmra.mxu2 %v1295_v41 }
 0x211   : >> { %v6430_v6 = vadd.f32 %v1160_v46, %v1082_v13  ;;  %1260 = vmatmul.f32.gmra.mxu1 %v985_v11  ;;  %v1170_v46 = vadd.f32 %v6366_v21, %v6362_v3 }
 0x213   : >> { %1476 = vmatmul.f32.gmra.mxu3 %v1297_v0  ;;  %1571 = vmatmul.f32.gmra.mxu0 %v1298_v38  ;;  %v947_v15 = vpop.f32.mrf.mxu2  ;;  %v1169_v0 = vadd.f32 %v6358_v58, %v6354_v19 }
 0x214   : >> { %v965_v16 = vadd.f32 %v947_v15, %v867_v28 }
 0x216   : >> { %v1065_v53 = vpop.f32.mrf.mxu3  ;;  %v1216_v42 = vpop.f32.mrf.mxu1 }
 0x217   : >> { %v1083_v34 = vadd.f32 %v1065_v53, %v965_v16  ;;  %v1264_v30 = vadd.f32 %v1216_v42, %v1166_v48 }
 0x218   : >> { %v1163_v26 = vpop.f32.mrf.mxu0 }
 0x219   : >> { %v6435_v10 = vadd.f32 %v1163_v26, %v1083_v34  ;;  %v1171_v26 = vadd.f32 %v6374_v29, %v6370_v49 }
 0x21b   : >> { %1574 = vmatmul.f32.gmra.mxu0 %v1299_v57  ;;  %v1334_v31 = vpop.f32.mrf.mxu2 }
 0x21c   : >> { %v1382_v54 = vadd.f32 %v1334_v31, %v1264_v30 }
 0x21e   : >> { %v1219_v36 = vpop.f32.mrf.mxu1  ;;  %v1432_v41 = vpop.f32.mrf.mxu3 }
 0x21f   : >> { %v1480_v45 = vadd.f32 %v1432_v41, %v1382_v54  ;;  %v1265_v14 = vadd.f32 %v1219_v36, %v1167_v55  ;;  %v1172_v55 = vadd.f32 %v6382_v35, %v6378_v24 }
 0x220   : >> { %v1530_v51 = vpop.f32.mrf.mxu0 }
 0x221   : >> { %v1578_v5 = vadd.f32 %v1530_v51, %v1480_v45 }
 0x223   : >> { %v1594_v8 = vmax.f32 %v1578_v5, 0.0  ;;  %v1337_v18 = vpop.f32.mrf.mxu2 }
 0x224   : >> { %v1383_v52 = vadd.f32 %v1337_v18, %v1265_v14 }
 0x225   : >> { %4925 = vst [vmem:[%s6140_s27 + $0x1c9] sm:$0xff] %v1594_v8 }
 0x226   : >> { %v1222_v56 = vpop.f32.mrf.mxu1  ;;  %v1435_v27 = vpop.f32.mrf.mxu3 }
 0x227   : >> { %v1481_v39 = vadd.f32 %v1435_v27, %v1383_v52  ;;  %v1266_v25 = vadd.f32 %v1222_v56, %v1168_v1  ;;  %v1173_v27 = vadd.f32 %v6390_v44, %v6388_v47 }
 0x228   : >> { %v1533_v60 = vpop.f32.mrf.mxu0 }
 0x229   : >> { %v1579_v62 = vadd.f32 %v1533_v60, %v1481_v39 }
 0x22b   : >> { %v1595_v40 = vmax.f32 %v1579_v62, 0.0  ;;  %v1340_v17 = vpop.f32.mrf.mxu2 }
 0x22c   : >> { %v1384_v22 = vadd.f32 %v1340_v17, %v1266_v25 }
 0x22d   : >> { %4926 = vst [vmem:[%s6140_s27 + $0x1d1] sm:$0xff] %v1595_v40 }
 0x22e   : >> { %v1225_v50 = vpop.f32.mrf.mxu1  ;;  %v1438_v20 = vpop.f32.mrf.mxu3 }
 0x22f   : >> { %v1482_v4 = vadd.f32 %v1438_v20, %v1384_v22  ;;  %v1267_v7 = vadd.f32 %v1225_v50, %v1169_v0 }
 0x230   : >> { %v1536_v61 = vpop.f32.mrf.mxu0 }
 0x231   : >> { %v1580_v33 = vadd.f32 %v1536_v61, %v1482_v4 }
 0x233   : >> { %v1596_v9 = vmax.f32 %v1580_v33, 0.0  ;;  %v1343_v32 = vpop.f32.mrf.mxu2 }
 0x234   : >> { %v1385_v37 = vadd.f32 %v1343_v32, %v1267_v7 }
 0x235   : >> { %4927 = vst [vmem:[%s6140_s27 + $0x1e1] sm:$0xff] %v1596_v9 }
 0x236   : >> { %v1228_v11 = vpop.f32.mrf.mxu1  ;;  %v1441_v28 = vpop.f32.mrf.mxu3 }
 0x237   : >> { %v1483_v13 = vadd.f32 %v1441_v28, %v1385_v37  ;;  %v1268_v16 = vadd.f32 %v1228_v11, %v1170_v46 }
 0x238   : >> { %v1539_v38 = vpop.f32.mrf.mxu0 }
 0x239   : >> { %v1581_v15 = vadd.f32 %v1539_v38, %v1483_v13 }
 0x23b   : >> { %v1597_v53 = vmax.f32 %v1581_v15, 0.0  ;;  %v1346_v19 = vpop.f32.mrf.mxu2 }
 0x23c   : >> { %v1386_v58 = vadd.f32 %v1346_v19, %v1268_v16 }
 0x23d   : >> { %4928 = vst [vmem:[%s6140_s27 + $0x1e9] sm:$0xff] %v1597_v53 }
 0x23e   : >> { %v1231_v42 = vpop.f32.mrf.mxu1  ;;  %v1444_v34 = vpop.f32.mrf.mxu3 }
 0x23f   : >> { %v1484_v48 = vadd.f32 %v1444_v34, %v1386_v58  ;;  %v1269_v31 = vadd.f32 %v1231_v42, %v1171_v26 }
 0x240   : >> { %v1542_v57 = vpop.f32.mrf.mxu0 }
 0x241   : >> { %v1582_v30 = vadd.f32 %v1542_v57, %v1484_v48 }
 0x243   : >> { %v1598_v54 = vmax.f32 %v1582_v30, 0.0  ;;  %v1349_v3 = vpop.f32.mrf.mxu2 }
 0x244   : >> { %v1387_v21 = vadd.f32 %v1349_v3, %v1269_v31 }
 0x245   : >> { %4929 = vst [vmem:[%s6140_s27 + $0x1f9] sm:$0xff] %v1598_v54 }
 0x246   : >> { %v1234_v36 = vpop.f32.mrf.mxu1  ;;  %v1447_v41 = vpop.f32.mrf.mxu3 }
 0x247   : >> { %v1485_v45 = vadd.f32 %v1447_v41, %v1387_v21  ;;  %v1270_v14 = vadd.f32 %v1234_v36, %v1172_v55 }
 0x248   : >> { %v1545_v51 = vpop.f32.mrf.mxu0 }
 0x249   : >> { %v1583_v5 = vadd.f32 %v1545_v51, %v1485_v45 }
 0x24b   : >> { %v1599_v8 = vmax.f32 %v1583_v5, 0.0  ;;  %v1352_v49 = vpop.f32.mrf.mxu2 }
 0x24c   : >> { %v1388_v29 = vadd.f32 %v1352_v49, %v1270_v14 }
 0x24d   : >> { %4930 = vst [vmem:[%s6140_s27 + $0x201] sm:$0xff] %v1599_v8 }
 0x24e   : >> { %v1237_v18 = vpop.f32.mrf.mxu1  ;;  %v1450_v52 = vpop.f32.mrf.mxu3 }
 0x24f   : >> { %v1486_v56 = vadd.f32 %v1450_v52, %v1388_v29  ;;  %v1271_v60 = vadd.f32 %v1237_v18, %v1173_v27 }
 0x250   : >> { %v1548_v39 = vpop.f32.mrf.mxu0 }
 0x251   : >> { %v1584_v1 = vadd.f32 %v1548_v39, %v1486_v56 }
 0x253   : >> { %v1600_v62 = vmax.f32 %v1584_v1, 0.0  ;;  %v1355_v24 = vpop.f32.mrf.mxu2 }
 0x254   : >> { %v1389_v35 = vadd.f32 %v1355_v24, %v1271_v60 }
 0x255   : >> { %4931 = vst [vmem:[%s6140_s27 + $0x211] sm:$0xff] %v1600_v62 }
 0x256   : >> { %v1240_v25 = vpop.f32.mrf.mxu1  ;;  %v1453_v40 = vpop.f32.mrf.mxu3 }
 0x257   : >> { %v1487_v17 = vadd.f32 %v1453_v40, %v1389_v35  ;;  %v1272_v20 = vadd.f32 %v1240_v25, %v6397_v2 }
 0x258   : >> { %v1551_v22 = vpop.f32.mrf.mxu0 }
 0x259   : >> { %v1585_v50 = vadd.f32 %v1551_v22, %v1487_v17 }
 0x25b   : >> { %v1601_v4 = vmax.f32 %v1585_v50, 0.0  ;;  %v1358_v0 = vpop.f32.mrf.mxu2 }
 0x25c   : >> { %v1390_v61 = vadd.f32 %v1358_v0, %v1272_v20 }
 0x25d   : >> { %4932 = vst [vmem:[%s6140_s27 + $0x219] sm:$0xff] %v1601_v4 }
 0x25e   : >> { %v1243_v47 = vpop.f32.mrf.mxu1  ;;  %v1456_v44 = vpop.f32.mrf.mxu3 }
 0x25f   : >> { %v1488_v33 = vadd.f32 %v1456_v44, %v1390_v61  ;;  %v1273_v32 = vadd.f32 %v1243_v47, %v6402_v12 }
 0x260   : >> { %v1554_v7 = vpop.f32.mrf.mxu0 }
 0x261   : >> { %v1586_v9 = vadd.f32 %v1554_v7, %v1488_v33 }
 0x263   : >> { %v1602_v37 = vmax.f32 %v1586_v9, 0.0  ;;  %v1361_v11 = vpop.f32.mrf.mxu2 }
 0x264   : >> { %v1391_v28 = vadd.f32 %v1361_v11, %v1273_v32 }
 0x265   : >> { %4933 = vst [vmem:[%s6140_s27 + $0x229] sm:$0xff] %v1602_v37 }
 0x266   : >> { %v1246_v13 = vpop.f32.mrf.mxu1  ;;  %v1459_v46 = vpop.f32.mrf.mxu3 }
 0x267   : >> { %v1489_v38 = vadd.f32 %v1459_v46, %v1391_v28  ;;  %v1274_v16 = vadd.f32 %v1246_v13, %v6407_v23 }
 0x268   : >> { %v1557_v2 = vpop.f32.mrf.mxu0 }
 0x269   : >> { %v1587_v15 = vadd.f32 %v1557_v2, %v1489_v38 }
 0x26b   : >> { %v1603_v53 = vmax.f32 %v1587_v15, 0.0  ;;  %v1364_v19 = vpop.f32.mrf.mxu2 }
 0x26c   : >> { %v1392_v58 = vadd.f32 %v1364_v19, %v1274_v16 }
 0x26d   : >> { %4934 = vst [vmem:[%s6140_s27 + $0x231] sm:$0xff] %v1603_v53 }
 0x26e   : >> { %v1249_v42 = vpop.f32.mrf.mxu1  ;;  %v1462_v34 = vpop.f32.mrf.mxu3 }
 0x26f   : >> { %v1490_v48 = vadd.f32 %v1462_v34, %v1392_v58  ;;  %v1275_v57 = vadd.f32 %v1249_v42, %v6413_v43 }
 0x270   : >> { %v1560_v12 = vpop.f32.mrf.mxu0 }
 0x271   : >> { %v1588_v26 = vadd.f32 %v1560_v12, %v1490_v48 }
 0x273   : >> { %v1604_v30 = vmax.f32 %v1588_v26, 0.0  ;;  %v1367_v31 = vpop.f32.mrf.mxu2 }
 0x274   : >> { %v1393_v54 = vadd.f32 %v1367_v31, %v1275_v57 }
 0x275   : >> { %4935 = vst [vmem:[%s6140_s27 + $0x241] sm:$0xff] %v1604_v30 }
 0x276   : >> { %v1252_v3 = vpop.f32.mrf.mxu1  ;;  %v1465_v21 = vpop.f32.mrf.mxu3 }
 0x277   : >> { %v1491_v36 = vadd.f32 %v1465_v21, %v1393_v54  ;;  %v1276_v45 = vadd.f32 %v1252_v3, %v6419_v59 }
 0x278   : >> { %v1563_v23 = vpop.f32.mrf.mxu0 }
 0x279   : >> { %v1589_v41 = vadd.f32 %v1563_v23, %v1491_v36 }
 0x27b   : >> { %v1605_v55 = vmax.f32 %v1589_v41, 0.0  ;;  %v1370_v51 = vpop.f32.mrf.mxu2 }
 0x27c   : >> { %v1394_v5 = vadd.f32 %v1370_v51, %v1276_v45 }
 0x27d   : >> { %4936 = vst [vmem:[%s6140_s27 + $0x249] sm:$0xff] %v1605_v55 }
 0x27e   : >> { %v1255_v14 = vpop.f32.mrf.mxu1  ;;  %v1468_v8 = vpop.f32.mrf.mxu3 }
 0x27f   : >> { %v1492_v49 = vadd.f32 %v1468_v8, %v1394_v5  ;;  %v1277_v18 = vadd.f32 %v1255_v14, %v6425_v63 }
 0x280   : >> { %v1566_v43 = vpop.f32.mrf.mxu0 }
 0x281   : >> { %v1590_v29 = vadd.f32 %v1566_v43, %v1492_v49 }
 0x283   : >> { %v1606_v52 = vmax.f32 %v1590_v29, 0.0  ;;  %v1373_v56 = vpop.f32.mrf.mxu2 }
 0x284   : >> { %v1395_v27 = vadd.f32 %v1373_v56, %v1277_v18 }
 0x285   : >> { %4937 = vst [vmem:[%s6140_s27 + $0x259] sm:$0xff] %v1606_v52 }
 0x286   : >> { %v1258_v39 = vpop.f32.mrf.mxu1  ;;  %v1471_v1 = vpop.f32.mrf.mxu3 }
 0x287   : >> { %v1493_v60 = vadd.f32 %v1471_v1, %v1395_v27  ;;  %v1278_v24 = vadd.f32 %v1258_v39, %v6430_v6 }
 0x288   : >> { %v1569_v59 = vpop.f32.mrf.mxu0 }
 0x289   : >> { %v1591_v62 = vadd.f32 %v1569_v59, %v1493_v60 }
 0x28b   : >> { %v1607_v35 = vmax.f32 %v1591_v62, 0.0  ;;  %v1376_v25 = vpop.f32.mrf.mxu2 }
 0x28c   : >> { %v1396_v40 = vadd.f32 %v1376_v25, %v1278_v24 }
 0x28d   : >> { %4938 = vst [vmem:[%s6140_s27 + $0x261] sm:$0xff] %v1607_v35 }
 0x28e   : >> { %v1474_v17 = vpop.f32.mrf.mxu3  ;;  %v1261_v22 = vpop.f32.mrf.mxu1 }
 0x28f   : >> { %v1494_v63 = vadd.f32 %v1474_v17, %v1396_v40  ;;  %v1279_v4 = vadd.f32 %v1261_v22, %v6435_v10 }
 0x290   : >> { %v1572_v50 = vpop.f32.mrf.mxu0 }
 0x291   : >> { %v1592_v20 = vadd.f32 %v1572_v50, %v1494_v63 }
 0x293   : >> { %v1608_v0 = vmax.f32 %v1592_v20, 0.0  ;;  %v1379_v61 = vpop.f32.mrf.mxu2 }
 0x294   : >> { %v1397_v47 = vadd.f32 %v1379_v61, %v1279_v4 }
 0x295   : >> { %4939 = vst [vmem:[%s6140_s27 + $0x271] sm:$0xff] %v1608_v0 }
 0x296   : >> { %v1477_v44 = vpop.f32.mrf.mxu3 }
 0x297   : >> { %v1495_v33 = vadd.f32 %v1477_v44, %v1397_v47 }
 0x298   : >> { %v1575_v7 = vpop.f32.mrf.mxu0 }
 0x299   : >> { %v1593_v6 = vadd.f32 %v1575_v7, %v1495_v33  ;;  %644 = sbr.rel (!%p642_p1) target bundleno = 211 (0xd3), region = 208 }
 0x29b   : >> { %v1609_v9 = vmax.f32 %v1593_v6, 0.0 }
 0x29d   : >> { %4940 = vst [vmem:[%s6140_s27 + $0x279] sm:$0xff] %v1609_v9 }
 0x29e LB: >> { %v1679_v10 = vld [vmem:[#allocation9 + $0x78] sm:$0xff]  ;;  %v1678_v32 = vld [vmem:[#allocation9 + $0x70] sm:$0xff]  ;;  %v1677_v37 = vld [vmem:[#allocation9 + $0x68] sm:$0xff]  ;;  %s4779_s6 = smul.u32 192, %s5758_s30  ;;  %s5144_s25 = sshll.u32 %s5758_s30, 7  ;;  %s5758_s30 = sphi %s6478_s30, %s1635_s30  }
 0x29f   : >> { %5195 = vmatpush.msra.mxu1 %v1679_v10  ;;  %5196 = vmatpush.msra.mxu2 %v1679_v10  ;;  %v1676_v11 = vld [vmem:[#allocation9 + $0x60] sm:$0xff]  ;;  %v1675_v28 = vld [vmem:[#allocation9 + $0x58] sm:$0xff]  ;;  %v1674_v13 = vld [vmem:[#allocation9 + $0x50] sm:$0xff]  ;;  %s6786_s15 = scalar_lea.vmem %s425_s26, %s5144_s25 [#allocation6]  ;;  %s1635_s30 = sadd.s32 1, %s5758_s30  }
 0x2a0   : >> { %5197 = vmatpush.msra.mxu3 %v1679_v10  ;;  %1680 = vmatpush.msra.mxu0 %v1679_v10  ;;  %v1673_v46 = vld [vmem:[#allocation9 + $0x48] sm:$0xff]  ;;  %v1672_v38 = vld [vmem:[#allocation9 + $0x40] sm:$0xff]  ;;  %v1671_v2 = vld [vmem:[#allocation9 + $0x38] sm:$0xff]  ;;  %s6484_s21 = scalar_lea.vmem [#allocation2], %s4779_s6  ;;  %p1632_p4 = scmp.ge.s32.totalorder %s1635_s30, 2  }
 0x2a1   : >> { %5198 = vmatpush.msra.mxu1 %v1678_v32  ;;  %5199 = vmatpush.msra.mxu2 %v1678_v32  ;;  %v1670_v15 = vld [vmem:[#allocation9 + $0x30] sm:$0xff]  ;;  %v1669_v16 = vld [vmem:[#allocation9 + $0x28] sm:$0xff]  ;;  %v1668_v53 = vld [vmem:[#allocation9 + $0x20] sm:$0xff]  ;;  %s6859_s0 = smov (%p1632_p4), 0  }
 0x2a2   : >> { %5200 = vmatpush.msra.mxu3 %v1678_v32  ;;  %1681 = vmatpush.msra.mxu0 %v1678_v32  ;;  %v1667_v19 = vld [vmem:[#allocation9 + $0x18] sm:$0xff]  ;;  %v1666_v58 = vld [vmem:[#allocation9 + $0x10] sm:$0xff]  ;;  %v1665_v42 = vld [vmem:[#allocation9 + $0x8] sm:$0xff] }
 0x2a3   : >> { %5201 = vmatpush.msra.mxu1 %v1677_v37  ;;  %5202 = vmatpush.msra.mxu2 %v1677_v37  ;;  %v1664_v34 = vld [vmem:[#allocation9] sm:$0xff]  ;;  %v1875_v26 = vld [vmem:[#allocation9 + $0x378] sm:$0xff]  ;;  %v1874_v31 = vld [vmem:[#allocation9 + $0x370] sm:$0xff] }
 0x2a4   : >> { %5203 = vmatpush.msra.mxu3 %v1677_v37  ;;  %1682 = vmatpush.msra.mxu0 %v1677_v37  ;;  %v6487_v48 = vld [vmem:[%s6484_s21 + $0x1e0] sm:$0xff]  ;;  %v6490_v12 = vld [vmem:[%s6484_s21 + $0x210] sm:$0xff]  ;;  %v1777_v57 = vld [vmem:[#allocation9 + $0x1f8] sm:$0xff] }
 0x2a5   : >> { %5204 = vmatpush.msra.mxu1 %v1676_v11  ;;  %5205 = vmatpush.msra.mxu2 %v1676_v11  ;;  %v6493_v30 = vld [vmem:[%s6484_s21 + $0x240] sm:$0xff]  ;;  %v1993_v54 = vld [vmem:[#allocation9 + $0xf8] sm:$0xff]  ;;  %v1776_v3 = vld [vmem:[#allocation9 + $0x1f0] sm:$0xff] }
 0x2a6   : >> { %5206 = vmatpush.msra.mxu3 %v1676_v11  ;;  %1683 = vmatpush.msra.mxu0 %v1676_v11  ;;  %v1873_v21 = vld [vmem:[#allocation9 + $0x368] sm:$0xff]  ;;  %v1992_v36 = vld [vmem:[#allocation9 + $0xf0] sm:$0xff]  ;;  %v1872_v45 = vld [vmem:[#allocation9 + $0x360] sm:$0xff] }
 0x2a7   : >> { %5207 = vmatpush.msra.mxu1 %v1675_v28  ;;  %5208 = vmatpush.msra.mxu2 %v1675_v28  ;;  %v1775_v23 = vld [vmem:[#allocation9 + $0x1e8] sm:$0xff]  ;;  %v4942_v41 = vld [vmem:[%s6484_s21 + $0x1b0] sm:$0xff]  ;;  %v1774_v51 = vld [vmem:[#allocation9 + $0x1e0] sm:$0xff] }
 0x2a8   : >> { %5209 = vmatpush.msra.mxu3 %v1675_v28  ;;  %1684 = vmatpush.msra.mxu0 %v1675_v28  ;;  %v1991_v55 = vld [vmem:[#allocation9 + $0xe8] sm:$0xff]  ;;  %v6500_v5 = vld [vmem:[%s6484_s21 + $0x218] sm:$0xff]  ;;  %v1990_v49 = vld [vmem:[#allocation9 + $0xe0] sm:$0xff] }
 0x2a9   : >> { %5210 = vmatpush.msra.mxu1 %v1674_v13  ;;  %5211 = vmatpush.msra.mxu2 %v1674_v13  ;;  %v6503_v14 = vld [vmem:[%s6484_s21 + $0x1e8] sm:$0xff]  ;;  %v1871_v8 = vld [vmem:[#allocation9 + $0x358] sm:$0xff]  ;;  %v1870_v18 = vld [vmem:[#allocation9 + $0x350] sm:$0xff] }
 0x2aa   : >> { %5212 = vmatpush.msra.mxu3 %v1674_v13  ;;  %1685 = vmatpush.msra.mxu0 %v1674_v13  ;;  %v1773_v43 = vld [vmem:[#allocation9 + $0x1d8] sm:$0xff]  ;;  %v6507_v29 = vld [vmem:[%s6484_s21 + $0x248] sm:$0xff]  ;;  %v1772_v27 = vld [vmem:[#allocation9 + $0x1d0] sm:$0xff] }
 0x2ab   : >> { %5213 = vmatpush.msra.mxu1 %v1673_v46  ;;  %5214 = vmatpush.msra.mxu2 %v1673_v46  ;;  %v1989_v52 = vld [vmem:[#allocation9 + $0xd8] sm:$0xff]  ;;  %v1869_v39 = vld [vmem:[#allocation9 + $0x348] sm:$0xff]  ;;  %v1988_v1 = vld [vmem:[#allocation9 + $0xd0] sm:$0xff] }
 0x2ac   : >> { %5215 = vmatpush.msra.mxu3 %v1673_v46  ;;  %1686 = vmatpush.msra.mxu0 %v1673_v46  ;;  %v2091_v56 = vld [vmem:[#allocation9 + $0x278] sm:$0xff]  ;;  %v2090_v60 = vld [vmem:[#allocation9 + $0x270] sm:$0xff]  ;;  %v1771_v59 = vld [vmem:[#allocation9 + $0x1c8] sm:$0xff] }
 0x2ad   : >> { %5216 = vmatpush.msra.mxu1 %v1672_v38  ;;  %5217 = vmatpush.msra.mxu2 %v1672_v38  ;;  %v1868_v62 = vld [vmem:[#allocation9 + $0x340] sm:$0xff]  ;;  %v1987_v24 = vld [vmem:[#allocation9 + $0xc8] sm:$0xff]  ;;  %v6515_v17 = vld [vmem:[%s6484_s21 + $0x1f8] sm:$0xff] }
 0x2ae   : >> { %5218 = vmatpush.msra.mxu3 %v1672_v38  ;;  %1687 = vmatpush.msra.mxu0 %v1672_v38  ;;  %v2089_v35 = vld [vmem:[#allocation9 + $0x268] sm:$0xff]  ;;  %v1770_v25 = vld [vmem:[#allocation9 + $0x1c0] sm:$0xff]  ;;  %v1867_v22 = vld [vmem:[#allocation9 + $0x338] sm:$0xff] }
 0x2af   : >> { %5219 = vmatpush.msra.mxu1 %v1671_v2  ;;  %5220 = vmatpush.msra.mxu2 %v1671_v2  ;;  %v6512_v40 = vld [vmem:[%s6484_s21 + $0x228] sm:$0xff]  ;;  %v1986_v63 = vld [vmem:[#allocation9 + $0xc0] sm:$0xff]  ;;  %v1769_v20 = vld [vmem:[#allocation9 + $0x1b8] sm:$0xff] }
 0x2b0   : >> { %5221 = vmatpush.msra.mxu3 %v1671_v2  ;;  %1688 = vmatpush.msra.mxu0 %v1671_v2  ;;  %v2088_v50 = vld [vmem:[#allocation9 + $0x260] sm:$0xff]  ;;  %v4943_v4 = vld [vmem:[%s6484_s21 + $0x1b8] sm:$0xff]  ;;  %v1866_v61 = vld [vmem:[#allocation9 + $0x330] sm:$0xff] }
 0x2b1   : >> { %5222 = vmatpush.msra.mxu1 %v1670_v15  ;;  %5223 = vmatpush.msra.mxu2 %v1670_v15  ;;  %v6521_v0 = vld [vmem:[%s6484_s21 + $0x258] sm:$0xff]  ;;  %v1768_v33 = vld [vmem:[#allocation9 + $0x1b0] sm:$0xff]  ;;  %v1865_v7 = vld [vmem:[#allocation9 + $0x328] sm:$0xff] }
 0x2b2   : >> { %5224 = vmatpush.msra.mxu3 %v1670_v15  ;;  %1689 = vmatpush.msra.mxu0 %v1670_v15  ;;  %v1985_v47 = vld [vmem:[#allocation9 + $0xb8] sm:$0xff]  ;;  %v1984_v6 = vld [vmem:[#allocation9 + $0xb0] sm:$0xff]  ;;  %v1767_v10 = vld [vmem:[#allocation9 + $0x1a8] sm:$0xff] }
 0x2b3   : >> { %5225 = vmatpush.msra.mxu1 %v1669_v16  ;;  %5226 = vmatpush.msra.mxu2 %v1669_v16  ;;  %v2087_v44 = vld [vmem:[#allocation9 + $0x258] sm:$0xff]  ;;  %v2086_v9 = vld [vmem:[#allocation9 + $0x250] sm:$0xff]  ;;  %v1864_v32 = vld [vmem:[#allocation9 + $0x320] sm:$0xff] }
 0x2b4   : >> { %5227 = vmatpush.msra.mxu3 %v1669_v16  ;;  %1690 = vmatpush.msra.mxu0 %v1669_v16  ;;  %v1983_v37 = vld [vmem:[#allocation9 + $0xa8] sm:$0xff]  ;;  %v1766_v28 = vld [vmem:[#allocation9 + $0x1a0] sm:$0xff]  ;;  %v6525_v13 = vld [vmem:[%s6484_s21 + $0x230] sm:$0xff] }
 0x2b5   : >> { %5228 = vmatpush.msra.mxu1 %v1668_v53  ;;  %5229 = vmatpush.msra.mxu2 %v1668_v53  ;;  %v2085_v11 = vld [vmem:[#allocation9 + $0x248] sm:$0xff]  ;;  %v6528_v46 = vld [vmem:[%s6484_s21 + $0x200] sm:$0xff]  ;;  %v1863_v38 = vld [vmem:[#allocation9 + $0x318] sm:$0xff] }
 0x2b6   : >> { %5230 = vmatpush.msra.mxu3 %v1668_v53  ;;  %1691 = vmatpush.msra.mxu0 %v1668_v53  ;;  %v1982_v2 = vld [vmem:[#allocation9 + $0xa0] sm:$0xff]  ;;  %v1765_v16 = vld [vmem:[#allocation9 + $0x198] sm:$0xff]  ;;  %v4944_v53 = vld [vmem:[%s6484_s21 + $0x1c8] sm:$0xff] }
 0x2b7   : >> { %5231 = vmatpush.msra.mxu1 %v1667_v19  ;;  %5232 = vmatpush.msra.mxu2 %v1667_v19  ;;  %v2084_v15 = vld [vmem:[#allocation9 + $0x240] sm:$0xff] }
 0x2b8   : >> { %5233 = vmatpush.msra.mxu3 %v1667_v19  ;;  %1692 = vmatpush.msra.mxu0 %v1667_v19  ;;  %v6534_v19 = vld [vmem:[%s6484_s21 + $0x260] sm:$0xff] }
 0x2b9   : >> { %5234 = vmatpush.msra.mxu1 %v1666_v58  ;;  %5235 = vmatpush.msra.mxu2 %v1666_v58 }
 0x2ba   : >> { %5236 = vmatpush.msra.mxu3 %v1666_v58  ;;  %1693 = vmatpush.msra.mxu0 %v1666_v58  ;;  %v1862_v58 = vld [vmem:[#allocation9 + $0x310] sm:$0xff] }
 0x2bb   : >> { %5237 = vmatpush.msra.mxu1 %v1665_v42  ;;  %5238 = vmatpush.msra.mxu2 %v1665_v42 }
 0x2bc   : >> { %5239 = vmatpush.msra.mxu3 %v1665_v42  ;;  %1694 = vmatpush.msra.mxu0 %v1665_v42  ;;  %v1981_v42 = vld [vmem:[#allocation9 + $0x98] sm:$0xff] }
 0x2bd   : >> { %5240 = vmatpush.msra.mxu1 %v1664_v34  ;;  %5241 = vmatpush.msra.mxu2 %v1664_v34 }
 0x2be   : >> { %1708 = vmatmul.f32.vlgmr.msra.gmra.mxu1 %v6487_v48  ;;  %1720 = vmatmul.f32.vlgmr.msra.gmra.mxu2 %v6490_v12 }
 0x2bf   : >> { %1876 = vmatpush.msrb.mxu2 %v1875_v26  ;;  %5242 = vmatpush.msra.mxu3 %v1664_v34  ;;  %v1764_v26 = vld [vmem:[#allocation9 + $0x190] sm:$0xff] }
 0x2c0   : >> { %1778 = vmatpush.msrb.mxu1 %v1777_v57  ;;  %1732 = vmatmul.f32.vlgmr.msra.gmra.mxu3 %v6493_v30  ;;  %v1861_v57 = vld [vmem:[#allocation9 + $0x308] sm:$0xff] }
 0x2c1   : >> { %1877 = vmatpush.msrb.mxu2 %v1874_v31  ;;  %1994 = vmatpush.msrb.mxu3 %v1993_v54  ;;  %v1980_v31 = vld [vmem:[#allocation9 + $0x90] sm:$0xff] }
 0x2c2   : >> { %1779 = vmatpush.msrb.mxu1 %v1776_v3  ;;  %1695 = vmatpush.msra.mxu0 %v1664_v34  ;;  %v2083_v34 = vld [vmem:[#allocation9 + $0x238] sm:$0xff]  ;;  %v2082_v54 = vld [vmem:[#allocation9 + $0x230] sm:$0xff]  ;;  %v1763_v3 = vld [vmem:[#allocation9 + $0x188] sm:$0xff] }
 0x2c3   : >> { %1878 = vmatpush.msrb.mxu2 %v1873_v21  ;;  %1995 = vmatpush.msrb.mxu3 %v1992_v36  ;;  %v1860_v21 = vld [vmem:[#allocation9 + $0x300] sm:$0xff]  ;;  %v1979_v36 = vld [vmem:[#allocation9 + $0x88] sm:$0xff] }
 0x2c4   : >> { %1780 = vmatpush.msrb.mxu1 %v1775_v23  ;;  %1696 = vmatmul.f32.vlgmr.msra.gmra.mxu0 %v4942_v41  ;;  %v2081_v23 = vld [vmem:[#allocation9 + $0x228] sm:$0xff]  ;;  %v1762_v41 = vld [vmem:[#allocation9 + $0x180] sm:$0xff] }
 0x2c5   : >> { %1879 = vmatpush.msrb.mxu2 %v1872_v45  ;;  %1996 = vmatpush.msrb.mxu3 %v1991_v55  ;;  %v1978_v45 = vld [vmem:[#allocation9 + $0x80] sm:$0xff] }
 0x2c6   : >> { %1781 = vmatpush.msrb.mxu1 %v1774_v51  ;;  %1723 = vmatmul.f32.gmra.mxu2 %v6500_v5  ;;  %v2080_v55 = vld [vmem:[#allocation9 + $0x220] sm:$0xff]  ;;  %v2307_v51 = vld [vmem:[#allocation9 + $0x178] sm:$0xff] }
 0x2c7   : >> { %1711 = vmatmul.f32.gmra.mxu1 %v6503_v14  ;;  %1880 = vmatpush.msrb.mxu2 %v1871_v8  ;;  %v4945_v8 = vld [vmem:[%s6484_s21 + $0x1d0] sm:$0xff] }
 0x2c8   : >> { %1997 = vmatpush.msrb.mxu3 %v1990_v49  ;;  %1782 = vmatpush.msrb.mxu1 %v1773_v43  ;;  %v4962_v49 = vld [vmem:[%s6484_s21 + $0x1b1] sm:$0xff] }
 0x2c9   : >> { %1735 = vmatmul.f32.gmra.mxu3 %v6507_v29  ;;  %1881 = vmatpush.msrb.mxu2 %v1870_v18  ;;  %v2079_v43 = vld [vmem:[#allocation9 + $0x218] sm:$0xff] }
 0x2ca   : >> { %1998 = vmatpush.msrb.mxu3 %v1989_v52  ;;  %2092 = vmatpush.msrb.mxu0 %v2091_v56  ;;  %v2405_v18 = vld [vmem:[#allocation9 + $0x2f8] sm:$0xff]  ;;  %v2306_v56 = vld [vmem:[#allocation9 + $0x170] sm:$0xff] }
 0x2cb   : >> { %1783 = vmatpush.msrb.mxu1 %v1772_v27  ;;  %1882 = vmatpush.msrb.mxu2 %v1869_v39  ;;  %v2189_v52 = vld [vmem:[#allocation9 + $0x3f8] sm:$0xff]  ;;  %v2078_v27 = vld [vmem:[#allocation9 + $0x210] sm:$0xff] }
 0x2cc   : >> { %1999 = vmatpush.msrb.mxu3 %v1988_v1  ;;  %2093 = vmatpush.msrb.mxu0 %v2090_v60  ;;  %v2404_v39 = vld [vmem:[#allocation9 + $0x2f0] sm:$0xff]  ;;  %v2305_v60 = vld [vmem:[#allocation9 + $0x168] sm:$0xff] }
 0x2cd   : >> { %1784 = vmatpush.msrb.mxu1 %v1771_v59  ;;  %1883 = vmatpush.msrb.mxu2 %v1868_v62  ;;  %v2188_v1 = vld [vmem:[#allocation9 + $0x3f0] sm:$0xff]  ;;  %v2077_v59 = vld [vmem:[#allocation9 + $0x208] sm:$0xff] }
 0x2ce   : >> { %2000 = vmatpush.msrb.mxu3 %v1987_v24  ;;  %2094 = vmatpush.msrb.mxu0 %v2089_v35  ;;  %v2403_v62 = vld [vmem:[#allocation9 + $0x2e8] sm:$0xff]  ;;  %v2076_v24 = vld [vmem:[#allocation9 + $0x200] sm:$0xff] }
 0x2cf   : >> { %1785 = vmatpush.msrb.mxu1 %v1770_v25  ;;  %1726 = vmatmul.f32.gmra.mxu2 %v6512_v40  ;;  %v2187_v35 = vld [vmem:[#allocation9 + $0x3e8] sm:$0xff]  ;;  %v4963_v25 = vld [vmem:[%s6484_s21 + $0x1b9] sm:$0xff] }
 0x2d0   : >> { %1714 = vmatmul.f32.gmra.mxu1 %v6515_v17  ;;  %1884 = vmatpush.msrb.mxu2 %v1867_v22  ;;  %v4964_v22 = vld [vmem:[%s6484_s21 + $0x1c9] sm:$0xff] }
 0x2d1   : >> { %2001 = vmatpush.msrb.mxu3 %v1986_v63  ;;  %2095 = vmatpush.msrb.mxu0 %v2088_v50  ;;  %v2503_v63 = vld [vmem:[#allocation9 + $0x478] sm:$0xff]  ;;  %v2304_v50 = vld [vmem:[#allocation9 + $0x160] sm:$0xff] }
 0x2d2   : >> { %1786 = vmatpush.msrb.mxu1 %v1769_v20  ;;  %1699 = vmatmul.f32.gmra.mxu0 %v4943_v4  ;;  %v2402_v20 = vld [vmem:[#allocation9 + $0x2e0] sm:$0xff] }
 0x2d3   : >> { %1738 = vmatmul.f32.gmra.mxu3 %v6521_v0  ;;  %1885 = vmatpush.msrb.mxu2 %v1866_v61  ;;  %v2186_v4 = vld [vmem:[#allocation9 + $0x3e0] sm:$0xff]  ;;  %v2502_v61 = vld [vmem:[#allocation9 + $0x470] sm:$0xff] }
 0x2d4   : >> { %2002 = vmatpush.msrb.mxu3 %v1985_v47  ;;  %2096 = vmatpush.msrb.mxu0 %v2087_v44  ;;  %v2303_v47 = vld [vmem:[#allocation9 + $0x158] sm:$0xff] }
 0x2d5   : >> { %1787 = vmatpush.msrb.mxu1 %v1768_v33  ;;  %1886 = vmatpush.msrb.mxu2 %v1865_v7  ;;  %v2401_v44 = vld [vmem:[#allocation9 + $0x2d8] sm:$0xff]  ;;  %v2501_v7 = vld [vmem:[#allocation9 + $0x468] sm:$0xff] }
 0x2d6   : >> { %2003 = vmatpush.msrb.mxu3 %v1984_v6  ;;  %2097 = vmatpush.msrb.mxu0 %v2086_v9  ;;  %v2185_v33 = vld [vmem:[#allocation9 + $0x3d8] sm:$0xff]  ;;  %v2302_v6 = vld [vmem:[#allocation9 + $0x150] sm:$0xff]  ;;  %v2500_v9 = vld [vmem:[#allocation9 + $0x460] sm:$0xff] }
 0x2d7   : >> { %1788 = vmatpush.msrb.mxu1 %v1767_v10  ;;  %1887 = vmatpush.msrb.mxu2 %v1864_v32  ;;  %v2400_v10 = vld [vmem:[#allocation9 + $0x2d0] sm:$0xff] }
 0x2d8   : >> { %2004 = vmatpush.msrb.mxu3 %v1983_v37  ;;  %2098 = vmatpush.msrb.mxu0 %v2085_v11  ;;  %v4965_v32 = vld [vmem:[%s6484_s21 + $0x1d1] sm:$0xff] }
 0x2d9   : >> { %1789 = vmatpush.msrb.mxu1 %v1766_v28  ;;  %1729 = vmatmul.f32.gmra.mxu2 %v6525_v13  ;;  %v2499_v37 = vld [vmem:[#allocation9 + $0x458] sm:$0xff]  ;;  %v2184_v11 = vld [vmem:[#allocation9 + $0x3d0] sm:$0xff]  ;;  %v2301_v28 = vld [vmem:[#allocation9 + $0x148] sm:$0xff] }
 0x2da   : >> { %1717 = vmatmul.f32.gmra.mxu1 %v6528_v46  ;;  %1888 = vmatpush.msrb.mxu2 %v1863_v38  ;;  %v2399_v38 = vld [vmem:[#allocation9 + $0x2c8] sm:$0xff] }
 0x2db   : >> { %2005 = vmatpush.msrb.mxu3 %v1982_v2  ;;  %2099 = vmatpush.msrb.mxu0 %v2084_v15  ;;  %v2498_v2 = vld [vmem:[#allocation9 + $0x450] sm:$0xff]  ;;  %v2183_v15 = vld [vmem:[#allocation9 + $0x3c8] sm:$0xff] }
 0x2dc   : >> { %1790 = vmatpush.msrb.mxu1 %v1765_v16  ;;  %1702 = vmatmul.f32.gmra.mxu0 %v4944_v53  ;;  %v2300_v16 = vld [vmem:[#allocation9 + $0x140] sm:$0xff] }
 0x2dd   : >> { %1741 = vmatmul.f32.gmra.mxu3 %v6534_v19  ;;  %1889 = vmatpush.msrb.mxu2 %v1862_v58  ;;  %v2497_v58 = vld [vmem:[#allocation9 + $0x448] sm:$0xff] }
 0x2de   : >> { %2006 = vmatpush.msrb.mxu3 %v1981_v42  ;;  %2100 = vmatpush.msrb.mxu0 %v2083_v34  ;;  %v2182_v42 = vld [vmem:[#allocation9 + $0x3c0] sm:$0xff]  ;;  %v6554_v34 = vld [vmem:[%s6484_s21 + $0x1e9] sm:$0xff] }
 0x2df   : >> { %1791 = vmatpush.msrb.mxu1 %v1764_v26  ;;  %1890 = vmatpush.msrb.mxu2 %v1861_v57  ;;  %v2299_v26 = vld [vmem:[#allocation9 + $0x138] sm:$0xff]  ;;  %v2496_v57 = vld [vmem:[#allocation9 + $0x440] sm:$0xff] }
 0x2e0   : >> { %2007 = vmatpush.msrb.mxu3 %v1980_v31  ;;  %2101 = vmatpush.msrb.mxu0 %v2082_v54  ;;  %v2181_v31 = vld [vmem:[#allocation9 + $0x3b8] sm:$0xff] }
 0x2e1   : >> { %1792 = vmatpush.msrb.mxu1 %v1763_v3  ;;  %1891 = vmatpush.msrb.mxu2 %v1860_v21  ;;  %v6561_v54 = vld [vmem:[%s6484_s21 + $0x1f9] sm:$0xff]  ;;  %v2396_v3 = vld [vmem:[#allocation9 + $0x2b0] sm:$0xff] }
 0x2e2   : >> { %2008 = vmatpush.msrb.mxu3 %v1979_v36  ;;  %2102 = vmatpush.msrb.mxu0 %v2081_v23  ;;  %v2495_v21 = vld [vmem:[#allocation9 + $0x438] sm:$0xff]  ;;  %v2180_v36 = vld [vmem:[#allocation9 + $0x3b0] sm:$0xff]  ;;  %v6568_v23 = vld [vmem:[%s6484_s21 + $0x201] sm:$0xff] }
 0x2e3   : >> { %1793 = vmatpush.msrb.mxu1 %v1762_v41  ;;  %1892 = vmatmul.f32.vlgmr.msrb.gmra.mxu2 %v6487_v48  ;;  %v2395_v41 = vld [vmem:[#allocation9 + $0x2a8] sm:$0xff] }
 0x2e4   : >> { %1794 = vmatmul.f32.vlgmr.msrb.gmra.mxu1 %v4944_v53  ;;  %2009 = vmatpush.msrb.mxu3 %v1978_v45  ;;  %v2398_v53 = vld [vmem:[#allocation9 + $0x2c0] sm:$0xff]  ;;  %v2494_v45 = vld [vmem:[#allocation9 + $0x430] sm:$0xff] }
 0x2e5   : >> { %2103 = vmatpush.msrb.mxu0 %v2080_v55  ;;  %2308 = vmatpush.msra.mxu2 %v2307_v51  ;;  %v2179_v55 = vld [vmem:[#allocation9 + $0x3a8] sm:$0xff]  ;;  %v6575_v51 = vld [vmem:[%s6484_s21 + $0x211] sm:$0xff] }
 0x2e6   : >> { %1705 = vmatmul.f32.gmra.mxu0 %v4945_v8  ;;  %2010 = vmatmul.f32.vlgmr.msrb.gmra.mxu3 %v4962_v49  ;;  %v2493_v49 = vld [vmem:[#allocation9 + $0x428] sm:$0xff] }
 0x2e7   : >> { %2104 = vmatpush.msrb.mxu0 %v2079_v43  ;;  %2406 = vmatpush.msra.mxu3 %v2405_v18  ;;  %v2178_v43 = vld [vmem:[#allocation9 + $0x3a0] sm:$0xff] }
 0x2e8   : >> { %2190 = vmatpush.msra.mxu1 %v2189_v52  ;;  %2309 = vmatpush.msra.mxu2 %v2306_v56  ;;  %v6582_v18 = vld [vmem:[%s6484_s21 + $0x219] sm:$0xff] }
 0x2e9   : >> { %2105 = vmatpush.msrb.mxu0 %v2078_v27  ;;  %2407 = vmatpush.msra.mxu3 %v2404_v39  ;;  %v2393_v52 = vld [vmem:[#allocation9 + $0x298] sm:$0xff]  ;;  %v2492_v56 = vld [vmem:[#allocation9 + $0x420] sm:$0xff]  ;;  %v6589_v39 = vld [vmem:[%s6484_s21 + $0x229] sm:$0xff] }
 0x2ea   : >> { %2191 = vmatpush.msra.mxu1 %v2188_v1  ;;  %2310 = vmatpush.msra.mxu2 %v2305_v60  ;;  %v2177_v27 = vld [vmem:[#allocation9 + $0x398] sm:$0xff]  ;;  %v2392_v1 = vld [vmem:[#allocation9 + $0x290] sm:$0xff] }
 0x2eb   : >> { %2106 = vmatpush.msrb.mxu0 %v2077_v59  ;;  %1895 = vmatmul.f32.gmra.mxu2 %v6503_v14  ;;  %v2491_v60 = vld [vmem:[#allocation9 + $0x418] sm:$0xff]  ;;  %v2176_v59 = vld [vmem:[#allocation9 + $0x390] sm:$0xff] }
 0x2ec   : >> { %1797 = vmatmul.f32.gmra.mxu1 %v4945_v8  ;;  %2408 = vmatpush.msra.mxu3 %v2403_v62  ;;  %v2394_v8 = vld [vmem:[#allocation9 + $0x2a0] sm:$0xff]  ;;  %v6596_v62 = vld [vmem:[%s6484_s21 + $0x231] sm:$0xff] }
 0x2ed   : >> { %2107 = vmatpush.msrb.mxu0 %v2076_v24  ;;  %2192 = vmatpush.msra.mxu1 %v2187_v35  ;;  %v2391_v24 = vld [vmem:[#allocation9 + $0x288] sm:$0xff]  ;;  %v2490_v35 = vld [vmem:[#allocation9 + $0x410] sm:$0xff] }
 0x2ee   : >> { %2013 = vmatmul.f32.gmra.mxu3 %v4963_v25  ;;  %2108 = vmatmul.f32.vlgmr.msrb.gmra.mxu0 %v4964_v22  ;;  %v2175_v25 = vld [vmem:[#allocation9 + $0x388] sm:$0xff] }
 0x2ef   : >> { %2504 = vmatpush.msra.mxu0 %v2503_v63  ;;  %2311 = vmatpush.msra.mxu2 %v2304_v50  ;;  %v2390_v50 = vld [vmem:[#allocation9 + $0x280] sm:$0xff] }
 0x2f0   : >> { %2409 = vmatpush.msra.mxu3 %v2402_v20  ;;  %2193 = vmatpush.msra.mxu1 %v2186_v4  ;;  %v2489_v20 = vld [vmem:[#allocation9 + $0x408] sm:$0xff]  ;;  %v2174_v4 = vld [vmem:[#allocation9 + $0x380] sm:$0xff] }
 0x2f1   : >> { %2505 = vmatpush.msra.mxu0 %v2502_v61  ;;  %2312 = vmatpush.msra.mxu2 %v2303_v47  ;;  %v4958_v61 = vld [vmem:[%s6484_s21 + $0x270] sm:$0xff] }
 0x2f2   : >> { %2410 = vmatpush.msra.mxu3 %v2401_v44  ;;  %2194 = vmatpush.msra.mxu1 %v2185_v33  ;;  %v6614_v44 = vld [vmem:[%s6484_s21 + $0x249] sm:$0xff] }
 0x2f3   : >> { %1898 = vmatmul.f32.gmra.mxu2 %v6515_v17  ;;  %2506 = vmatpush.msra.mxu0 %v2501_v7 }
 0x2f4   : >> { %1800 = vmatmul.f32.gmra.mxu1 %v6487_v48  ;;  %2313 = vmatpush.msra.mxu2 %v2302_v6  ;;  %v6548_v48 = vld [vmem:[%s6484_s21 + $0x1e1] sm:$0xff] }
 0x2f5   : >> { %2507 = vmatpush.msra.mxu0 %v2500_v9  ;;  %2411 = vmatpush.msra.mxu3 %v2400_v10  ;;  %v2488_v6 = vld [vmem:[#allocation9 + $0x400] sm:$0xff]  ;;  %v4959_v9 = vld [vmem:[%s6484_s21 + $0x278] sm:$0xff] }
 0x2f6   : >> { %2016 = vmatmul.f32.gmra.mxu3 %v4964_v22  ;;  %2111 = vmatmul.f32.gmra.mxu0 %v4965_v32  ;;  %v6603_v22 = vld [vmem:[%s6484_s21 + $0x241] sm:$0xff] }
 0x2f7   : >> { %2508 = vmatpush.msra.mxu0 %v2499_v37  ;;  %2195 = vmatpush.msra.mxu1 %v2184_v11 }
 0x2f8   : >> { %2314 = vmatpush.msra.mxu2 %v2301_v28  ;;  %2412 = vmatpush.msra.mxu3 %v2399_v38  ;;  %v4960_v28 = vld [vmem:[%s6484_s21 + $0x288] sm:$0xff]  ;;  %v6640_v38 = vld [vmem:[%s7608_s5] ss:$0 sm:$0xff] }
 0x2f9   : >> { %2509 = vmatpush.msra.mxu0 %v2498_v2  ;;  %2196 = vmatpush.msra.mxu1 %v2183_v15 }
 0x2fa   : >> { %2315 = vmatpush.msra.mxu2 %v2300_v16  ;;  %2413 = vmatpush.msra.mxu3 %v2398_v53 }
 0x2fb   : >> { %1901 = vmatmul.f32.gmra.mxu2 %v6528_v46  ;;  %2510 = vmatpush.msra.mxu0 %v2497_v58 }
 0x2fc   : >> { %1803 = vmatmul.f32.gmra.mxu1 %v6503_v14  ;;  %2316 = vmatpush.msra.mxu2 %v2299_v26  ;;  %v2397_v14 = vld [vmem:[#allocation9 + $0x2b8] sm:$0xff] }
 0x2fd   : >> { %2197 = vmatpush.msra.mxu1 %v2182_v42  ;;  %2414 = vmatpush.msra.mxu3 %v2397_v14  ;;  %v4961_v42 = vld [vmem:[%s6484_s21 + $0x290] sm:$0xff] }
 0x2fe   : >> { %2019 = vmatmul.f32.gmra.mxu3 %v4965_v32  ;;  %2114 = vmatmul.f32.gmra.mxu0 %v6548_v48  ;;  %v6627_v32 = vld [vmem:[%s6484_s21 + $0x259] sm:$0xff]  ;;  %v6657_v14 = vld [vmem:[%s6484_s21 + $0x271] sm:$0xff] }
 0x2ff   : >> { %2511 = vmatpush.msra.mxu0 %v2496_v57  ;;  %2198 = vmatpush.msra.mxu1 %v2181_v31 }
 0x300   : >> { %2415 = vmatpush.msra.mxu3 %v2396_v3  ;;  %v4982_v3 = vld [vmem:[%s6484_s21 + $0x1b2] sm:$0xff] }
 0x301   : >> { %2512 = vmatpush.msra.mxu0 %v2495_v21  ;;  %2199 = vmatpush.msra.mxu1 %v2180_v36 }
 0x302   : >> { %2416 = vmatpush.msra.mxu3 %v2395_v41 }
 0x303   : >> { %1904 = vmatmul.f32.gmra.mxu2 %v6490_v12  ;;  %2513 = vmatpush.msra.mxu0 %v2494_v45  ;;  %v6670_v45 = vld [vmem:[%s6484_s21 + $0x279] sm:$0xff] }
 0x304   : >> { %1806 = vmatmul.f32.gmra.mxu1 %v6515_v17  ;;  %v2298_v17 = vld [vmem:[#allocation9 + $0x130] sm:$0xff]  ;;  %2417 = vmatpush.msra.mxu3 %v2394_v8 }
 0x305   : >> { %2317 = vmatpush.msra.mxu2 %v2298_v17  ;;  %2200 = vmatpush.msra.mxu1 %v2179_v55  ;;  %v4984_v55 = vld [vmem:[%s6484_s21 + $0x1ca] sm:$0xff] }
 0x306   : >> { %2022 = vmatmul.f32.gmra.mxu3 %v6548_v48  ;;  %2117 = vmatmul.f32.gmra.mxu0 %v6554_v34 }
 0x307   : >> { %2514 = vmatpush.msra.mxu0 %v2493_v49  ;;  %2201 = vmatpush.msra.mxu1 %v2178_v43  ;;  %v4983_v43 = vld [vmem:[%s6484_s21 + $0x1ba] sm:$0xff] }
 0x308   : >> { %2418 = vmatpush.msra.mxu3 %v2393_v52 }
 0x309   : >> { %2515 = vmatpush.msra.mxu0 %v2492_v56  ;;  %2202 = vmatpush.msra.mxu1 %v2177_v27 }
 0x30a   : >> { %2419 = vmatpush.msra.mxu3 %v2392_v1  ;;  %v4985_v1 = vld [vmem:[%s6484_s21 + $0x1d2] sm:$0xff] }
 0x30b   : >> { %1907 = vmatmul.f32.gmra.mxu2 %v6500_v5  ;;  %2516 = vmatpush.msra.mxu0 %v2491_v60  ;;  %v4986_v60 = vld [vmem:[%s6484_s21 + $0x1e2] sm:$0xff] }
 0x30c   : >> { %1809 = vmatmul.f32.gmra.mxu1 %v6528_v46  ;;  %v2297_v46 = vld [vmem:[#allocation9 + $0x128] sm:$0xff]  ;;  %2420 = vmatpush.msra.mxu3 %v2391_v24 }
 0x30d   : >> { %2318 = vmatpush.msra.mxu2 %v2297_v46  ;;  %2203 = vmatpush.msra.mxu1 %v2176_v59 }
 0x30e   : >> { %2025 = vmatmul.f32.gmra.mxu3 %v6554_v34  ;;  %2120 = vmatmul.f32.gmra.mxu0 %v6561_v54 }
 0x30f   : >> { %2517 = vmatpush.msra.mxu0 %v2490_v35  ;;  %2204 = vmatpush.msra.mxu1 %v2175_v25 }
 0x310   : >> { %2421 = vmatpush.msra.mxu3 %v2390_v50 }
 0x311   : >> { %2518 = vmatpush.msra.mxu0 %v2489_v20  ;;  %2205 = vmatpush.msra.mxu1 %v2174_v4  ;;  %v4987_v20 = vld [vmem:[%s6484_s21 + $0x1ea] sm:$0xff] }
 0x313   : >> { %1910 = vmatmul.f32.gmra.mxu2 %v6512_v40  ;;  %2519 = vmatpush.msra.mxu0 %v2488_v6 }
 0x314   : >> { %1812 = vmatmul.f32.gmra.mxu1 %v6490_v12  ;;  %v2296_v12 = vld [vmem:[#allocation9 + $0x120] sm:$0xff] }
 0x315   : >> { %2319 = vmatpush.msra.mxu2 %v2296_v12 }
 0x316   : >> { %2028 = vmatmul.f32.gmra.mxu3 %v6561_v54  ;;  %2123 = vmatmul.f32.gmra.mxu0 %v6568_v23 }
 0x31b   : >> { %1913 = vmatmul.f32.gmra.mxu2 %v6525_v13 }
 0x31c   : >> { %1815 = vmatmul.f32.gmra.mxu1 %v6500_v5  ;;  %v2295_v5 = vld [vmem:[#allocation9 + $0x118] sm:$0xff] }
 0x31d   : >> { %2320 = vmatpush.msra.mxu2 %v2295_v5 }
 0x31e   : >> { %2031 = vmatmul.f32.gmra.mxu3 %v6568_v23  ;;  %2126 = vmatmul.f32.gmra.mxu0 %v6575_v51 }
 0x323   : >> { %1916 = vmatmul.f32.gmra.mxu2 %v6493_v30 }
 0x324   : >> { %1818 = vmatmul.f32.gmra.mxu1 %v6512_v40  ;;  %v2294_v40 = vld [vmem:[#allocation9 + $0x110] sm:$0xff] }
 0x325   : >> { %2321 = vmatpush.msra.mxu2 %v2294_v40 }
 0x326   : >> { %2034 = vmatmul.f32.gmra.mxu3 %v6575_v51  ;;  %2129 = vmatmul.f32.gmra.mxu0 %v6582_v18 }
 0x32b   : >> { %1919 = vmatmul.f32.gmra.mxu2 %v6507_v29 }
 0x32c   : >> { %1821 = vmatmul.f32.gmra.mxu1 %v6525_v13  ;;  %v2293_v13 = vld [vmem:[#allocation9 + $0x108] sm:$0xff] }
 0x32d   : >> { %2322 = vmatpush.msra.mxu2 %v2293_v13 }
 0x32e   : >> { %2037 = vmatmul.f32.gmra.mxu3 %v6582_v18  ;;  %2132 = vmatmul.f32.gmra.mxu0 %v6589_v39 }
 0x333   : >> { %1922 = vmatmul.f32.gmra.mxu2 %v6521_v0 }
 0x334   : >> { %1824 = vmatmul.f32.gmra.mxu1 %v6493_v30  ;;  %v2292_v30 = vld [vmem:[#allocation9 + $0x100] sm:$0xff] }
 0x335   : >> { %2323 = vmatpush.msra.mxu2 %v2292_v30 }
 0x336   : >> { %2040 = vmatmul.f32.gmra.mxu3 %v6589_v39  ;;  %2135 = vmatmul.f32.gmra.mxu0 %v6596_v62 }
 0x33b   : >> { %1925 = vmatmul.f32.gmra.mxu2 %v6534_v19  ;;  %v6605_v63 = vpop.f32.mrf.mxu1 }
 0x33c   : >> { %1827 = vmatmul.f32.gmra.mxu1 %v6507_v29 }
 0x33e   : >> { %2043 = vmatmul.f32.gmra.mxu3 %v6596_v62  ;;  %2138 = vmatmul.f32.gmra.mxu0 %v6603_v22 }
 0x341   : >> { %v6611_v47 = vpop.f32.mrf.mxu2  ;;  %v1697_v7 = vpop.f32.mrf.mxu0 }
 0x342   : >> { %v1745_v46 = vadd.f32 %v6640_v38, %v1697_v7 }
 0x343   : >> { %1928 = vmatmul.f32.gmra.mxu2 %v4958_v61  ;;  %v6616_v29 = vpop.f32.mrf.mxu3 }
 0x344   : >> { %1830 = vmatmul.f32.gmra.mxu1 %v6521_v0  ;;  %v6619_v33 = vpop.f32.mrf.mxu1 }
 0x346   : >> { %2046 = vmatmul.f32.gmra.mxu3 %v6603_v22  ;;  %2141 = vmatmul.f32.gmra.mxu0 %v6614_v44 }
 0x349   : >> { %v6624_v10 = vpop.f32.mrf.mxu2 }
 0x34b   : >> { %1931 = vmatmul.f32.gmra.mxu2 %v4959_v9 }
 0x34c   : >> { %1833 = vmatmul.f32.gmra.mxu1 %v6534_v19  ;;  %v6630_v0 = vpop.f32.mrf.mxu3  ;;  %v6643_v19 = vld [vmem:[%s6484_s21 + $0x261] sm:$0xff] }
 0x34d   : >> { %v6632_v37 = vpop.f32.mrf.mxu1 }
 0x34e   : >> { %2049 = vmatmul.f32.gmra.mxu3 %v6614_v44  ;;  %2144 = vmatmul.f32.gmra.mxu0 %v6627_v32 }
 0x34f   : >> { %v1700_v11 = vpop.f32.mrf.mxu0 }
 0x350   : >> { %v1746_v27 = vadd.f32 %v6640_v38, %v1700_v11 }
 0x352   : >> { %v1727_v2 = vpop.f32.mrf.mxu2 }
 0x353   : >> { %1934 = vmatmul.f32.gmra.mxu2 %v4960_v28  ;;  %v6646_v15 = vadd.f32 %v6640_v38, %v1727_v2  ;;  %v4988_v2 = vld [vmem:[%s6484_s21 + $0x1fa] sm:$0xff] }
 0x354   : >> { %1836 = vmatmul.f32.gmra.mxu1 %v4958_v61 }
 0x356   : >> { %2052 = vmatmul.f32.gmra.mxu3 %v6627_v32  ;;  %2147 = vmatmul.f32.gmra.mxu0 %v6643_v19  ;;  %v1739_v16 = vpop.f32.mrf.mxu3 }
 0x357   : >> { %v6650_v53 = vpop.f32.mrf.mxu1  ;;  %v6653_v58 = vadd.f32 %v6640_v38, %v1739_v16 }
 0x359   : >> { %v1703_v26 = vpop.f32.mrf.mxu0 }
 0x35a   : >> { %v1747_v30 = vadd.f32 %v6640_v38, %v1703_v26 }
 0x35b   : >> { %1937 = vmatmul.f32.gmra.mxu2 %v4961_v42 }
 0x35c   : >> { %1839 = vmatmul.f32.gmra.mxu1 %v4959_v9  ;;  %v1730_v57 = vpop.f32.mrf.mxu2 }
 0x35d   : >> { %v6660_v31 = vadd.f32 %v6640_v38, %v1730_v57 }
 0x35e   : >> { %2055 = vmatmul.f32.gmra.mxu3 %v6643_v19  ;;  %2150 = vmatmul.f32.gmra.mxu0 %v6657_v14 }
 0x360   : >> { %v1742_v17 = vpop.f32.mrf.mxu3 }
 0x361   : >> { %v6666_v21 = vadd.f32 %v6640_v38, %v1742_v17  ;;  %v1795_v36 = vpop.f32.mrf.mxu1 }
 0x362   : >> { %v1843_v12 = vadd.f32 %v1795_v36, %v1745_v46  ;;  %v4989_v46 = vld [vmem:[%s6484_s21 + $0x202] sm:$0xff] }
 0x363   : >> { %v1706_v41 = vpop.f32.mrf.mxu0  ;;  %2324 = vmatmul.f32.vlgmr.msra.gmra.mxu2 %v4982_v3  ;;  %v1749_v3 = vadd.f32 %v6640_v38, %v6605_v63 }
 0x364   : >> { %2206 = vmatmul.f32.vlgmr.msra.gmra.mxu1 %v6548_v48  ;;  %v1748_v11 = vadd.f32 %v6640_v38, %v1706_v41 }
 0x366   : >> { %2153 = vmatmul.f32.gmra.mxu0 %v6670_v45  ;;  %2422 = vmatmul.f32.vlgmr.msra.gmra.mxu3 %v4984_v55  ;;  %v1893_v8 = vpop.f32.mrf.mxu2 }
 0x367   : >> { %v1941_v49 = vadd.f32 %v1893_v8, %v1843_v12 }
 0x369   : >> { %v1798_v5 = vpop.f32.mrf.mxu1  ;;  %v2011_v52 = vpop.f32.mrf.mxu3 }
 0x36a   : >> { %v6676_v56 = vadd.f32 %v2011_v52, %v1941_v49  ;;  %v1844_v48 = vadd.f32 %v1798_v5, %v1746_v27  ;;  %v4990_v5 = vld [vmem:[%s6484_s21 + $0x212] sm:$0xff] }
 0x36b   : >> { %v6679_v40 = vpop.f32.mrf.mxu0  ;;  %2327 = vmatmul.f32.gmra.mxu2 %v4983_v43  ;;  %v1750_v43 = vadd.f32 %v6640_v38, %v6619_v33 }
 0x36c   : >> { %2209 = vmatmul.f32.gmra.mxu1 %v6554_v34 }
 0x36e   : >> { %2425 = vmatmul.f32.gmra.mxu3 %v4985_v1  ;;  %2520 = vmatmul.f32.vlgmr.msra.gmra.mxu0 %v4986_v60  ;;  %v1896_v59 = vpop.f32.mrf.mxu2 }
 0x36f   : >> { %v1942_v13 = vadd.f32 %v1896_v59, %v1844_v48  ;;  %v1751_v59 = vadd.f32 %v6640_v38, %v6632_v37 }
 0x371   : >> { %v1801_v24 = vpop.f32.mrf.mxu1  ;;  %v2014_v35 = vpop.f32.mrf.mxu3 }
 0x372   : >> { %v6684_v25 = vadd.f32 %v2014_v35, %v1942_v13  ;;  %v1845_v4 = vadd.f32 %v1801_v24, %v1747_v30  ;;  %v4991_v13 = vld [vmem:[%s6484_s21 + $0x21a] sm:$0xff] }
 0x373   : >> { %v6687_v50 = vpop.f32.mrf.mxu0  ;;  %2330 = vmatmul.f32.gmra.mxu2 %v4984_v55 }
 0x374   : >> { %2212 = vmatmul.f32.gmra.mxu1 %v6561_v54 }
 0x376   : >> { %2428 = vmatmul.f32.gmra.mxu3 %v4986_v60  ;;  %2523 = vmatmul.f32.gmra.mxu0 %v4987_v20  ;;  %v1899_v34 = vpop.f32.mrf.mxu2 }
 0x377   : >> { %v1943_v61 = vadd.f32 %v1899_v34, %v1845_v4  ;;  %v1752_v34 = vadd.f32 %v6640_v38, %v6650_v53 }
 0x379   : >> { %v1804_v7 = vpop.f32.mrf.mxu1  ;;  %v2017_v6 = vpop.f32.mrf.mxu3 }
 0x37a   : >> { %v6691_v9 = vadd.f32 %v2017_v6, %v1943_v61  ;;  %v1846_v16 = vadd.f32 %v1804_v7, %v1748_v11  ;;  %v4992_v61 = vld [vmem:[%s6484_s21 + $0x22a] sm:$0xff]  ;;  %v1753_v11 = vadd.f32 %v6640_v38, %v6611_v47 }
 0x37b   : >> { %v6694_v28 = vpop.f32.mrf.mxu0  ;;  %2333 = vmatmul.f32.gmra.mxu2 %v4985_v1 }
 0x37c   : >> { %2215 = vmatmul.f32.gmra.mxu1 %v6568_v23 }
 0x37e   : >> { %2431 = vmatmul.f32.gmra.mxu3 %v4987_v20  ;;  %2526 = vmatmul.f32.gmra.mxu0 %v4988_v2  ;;  %v1902_v54 = vpop.f32.mrf.mxu2 }
 0x37f   : >> { %v1944_v42 = vadd.f32 %v1902_v54, %v1846_v16 }
 0x381   : >> { %v1807_v26 = vpop.f32.mrf.mxu1  ;;  %v2020_v57 = vpop.f32.mrf.mxu3 }
 0x382   : >> { %v6698_v17 = vadd.f32 %v2020_v57, %v1944_v42  ;;  %v1847_v23 = vadd.f32 %v1807_v26, %v1749_v3  ;;  %v4993_v26 = vld [vmem:[%s6484_s21 + $0x232] sm:$0xff]  ;;  %v1754_v3 = vadd.f32 %v6640_v38, %v6624_v10 }
 0x383   : >> { %v6702_v36 = vpop.f32.mrf.mxu0  ;;  %2336 = vmatmul.f32.gmra.mxu2 %v4986_v60 }
 0x384   : >> { %2218 = vmatmul.f32.gmra.mxu1 %v6575_v51 }
 0x386   : >> { %2434 = vmatmul.f32.gmra.mxu3 %v4988_v2  ;;  %2529 = vmatmul.f32.gmra.mxu0 %v4989_v46  ;;  %v1905_v41 = vpop.f32.mrf.mxu2 }
 0x387   : >> { %v1945_v55 = vadd.f32 %v1905_v41, %v1847_v23 }
 0x389   : >> { %v1810_v12 = vpop.f32.mrf.mxu1  ;;  %v2023_v8 = vpop.f32.mrf.mxu3 }
 0x38a   : >> { %v6706_v49 = vadd.f32 %v2023_v8, %v1945_v55  ;;  %v1848_v51 = vadd.f32 %v1810_v12, %v1750_v43  ;;  %v4994_v12 = vld [vmem:[%s6484_s21 + $0x242] sm:$0xff] }
 0x38b   : >> { %v6710_v63 = vpop.f32.mrf.mxu0  ;;  %2339 = vmatmul.f32.gmra.mxu2 %v4987_v20 }
 0x38c   : >> { %2221 = vmatmul.f32.gmra.mxu1 %v6582_v18 }
 0x38e   : >> { %2437 = vmatmul.f32.gmra.mxu3 %v4989_v46  ;;  %2532 = vmatmul.f32.gmra.mxu0 %v4990_v5  ;;  %v1908_v52 = vpop.f32.mrf.mxu2 }
 0x38f   : >> { %v1946_v27 = vadd.f32 %v1908_v52, %v1848_v51 }
 0x391   : >> { %v1813_v1 = vpop.f32.mrf.mxu1  ;;  %v2026_v60 = vpop.f32.mrf.mxu3 }
 0x392   : >> { %v6714_v48 = vadd.f32 %v2026_v60, %v1946_v27  ;;  %v1849_v18 = vadd.f32 %v1813_v1, %v1751_v59  ;;  %v4995_v1 = vld [vmem:[%s6484_s21 + $0x24a] sm:$0xff] }
 0x393   : >> { %v6718_v33 = vpop.f32.mrf.mxu0  ;;  %2342 = vmatmul.f32.gmra.mxu2 %v4988_v2 }
 0x394   : >> { %2224 = vmatmul.f32.gmra.mxu1 %v6589_v39 }
 0x396   : >> { %2440 = vmatmul.f32.gmra.mxu3 %v4990_v5  ;;  %2535 = vmatmul.f32.gmra.mxu0 %v4991_v13  ;;  %v1911_v24 = vpop.f32.mrf.mxu2 }
 0x397   : >> { %v1947_v35 = vadd.f32 %v1911_v24, %v1849_v18 }
 0x399   : >> { %v1816_v30 = vpop.f32.mrf.mxu1  ;;  %v2029_v20 = vpop.f32.mrf.mxu3 }
 0x39a   : >> { %v6722_v4 = vadd.f32 %v2029_v20, %v1947_v35  ;;  %v1850_v39 = vadd.f32 %v1816_v30, %v1752_v34 }
 0x39b   : >> { %v6726_v37 = vpop.f32.mrf.mxu0  ;;  %2345 = vmatmul.f32.gmra.mxu2 %v4989_v46 }
 0x39c   : >> { %2227 = vmatmul.f32.gmra.mxu1 %v6596_v62 }
 0x39e   : >> { %2443 = vmatmul.f32.gmra.mxu3 %v4991_v13  ;;  %2538 = vmatmul.f32.gmra.mxu0 %v4992_v61  ;;  %v1914_v7 = vpop.f32.mrf.mxu2 }
 0x39f   : >> { %v1948_v6 = vadd.f32 %v1914_v7, %v1850_v39 }
 0x3a1   : >> { %v1819_v2 = vpop.f32.mrf.mxu1  ;;  %v2032_v16 = vpop.f32.mrf.mxu3 }
 0x3a2   : >> { %v1851_v54 = vadd.f32 %v1819_v2, %v1753_v11  ;;  %v6732_v42 = vadd.f32 %v2032_v16, %v1948_v6  ;;  %v4997_v2 = vld [vmem:[%s6484_s21 + $0x262] sm:$0xff] }
 0x3a3   : >> { %v6734_v53 = vpop.f32.mrf.mxu0  ;;  %2348 = vmatmul.f32.gmra.mxu2 %v4990_v5 }
 0x3a4   : >> { %2230 = vmatmul.f32.gmra.mxu1 %v6603_v22 }
 0x3a6   : >> { %2446 = vmatmul.f32.gmra.mxu3 %v4992_v61  ;;  %2541 = vmatmul.f32.gmra.mxu0 %v4993_v26  ;;  %v1917_v62 = vpop.f32.mrf.mxu2 }
 0x3a7   : >> { %v1949_v57 = vadd.f32 %v1917_v62, %v1851_v54 }
 0x3a9   : >> { %v1822_v47 = vpop.f32.mrf.mxu1  ;;  %v2035_v46 = vpop.f32.mrf.mxu3 }
 0x3aa   : >> { %v1852_v23 = vadd.f32 %v1822_v47, %v1754_v3  ;;  %v2067_v41 = vadd.f32 %v2035_v46, %v1949_v57  ;;  %v4998_v46 = vld [vmem:[%s6484_s21 + $0x272] sm:$0xff] }
 0x3ab   : >> { %v2133_v55 = vpop.f32.mrf.mxu0  ;;  %2351 = vmatmul.f32.gmra.mxu2 %v4991_v13 }
 0x3ac   : >> { %v6741_v8 = vadd.f32 %v2133_v55, %v2067_v41  ;;  %2233 = vmatmul.f32.gmra.mxu1 %v6614_v44 }
 0x3ae   : >> { %2449 = vmatmul.f32.gmra.mxu3 %v4993_v26  ;;  %2544 = vmatmul.f32.gmra.mxu0 %v4994_v12  ;;  %v1920_v22 = vpop.f32.mrf.mxu2 }
 0x3af   : >> { %v1950_v43 = vadd.f32 %v1920_v22, %v1852_v23 }
 0x3b1   : >> { %v1825_v5 = vpop.f32.mrf.mxu1  ;;  %v2038_v51 = vpop.f32.mrf.mxu3 }
 0x3b2   : >> { %v1853_v10 = vadd.f32 %v1825_v5, %v6646_v15  ;;  %v2068_v52 = vadd.f32 %v2038_v51, %v1950_v43  ;;  %v4996_v15 = vld [vmem:[%s6484_s21 + $0x25a] sm:$0xff] }
 0x3b3   : >> { %v2136_v27 = vpop.f32.mrf.mxu0  ;;  %2354 = vmatmul.f32.gmra.mxu2 %v4992_v61  ;;  %v1757_v61 = vadd.f32 %v6640_v38, %v6616_v29  ;;  %v4999_v5 = vld [vmem:[%s6484_s21 + $0x27a] sm:$0xff] }
 0x3b4   : >> { %v6746_v60 = vadd.f32 %v2136_v27, %v2068_v52  ;;  %2236 = vmatmul.f32.gmra.mxu1 %v6627_v32 }
 0x3b6   : >> { %2452 = vmatmul.f32.gmra.mxu3 %v4994_v12  ;;  %2547 = vmatmul.f32.gmra.mxu0 %v4995_v1  ;;  %v1923_v44 = vpop.f32.mrf.mxu2 }
 0x3b7   : >> { %v1951_v59 = vadd.f32 %v1923_v44, %v1853_v10 }
 0x3b9   : >> { %v1828_v13 = vpop.f32.mrf.mxu1  ;;  %v2041_v18 = vpop.f32.mrf.mxu3 }
 0x3ba   : >> { %v1854_v24 = vadd.f32 %v1828_v13, %v6660_v31  ;;  %v2069_v35 = vadd.f32 %v2041_v18, %v1951_v59  ;;  %v5000_v13 = vld [vmem:[%s6484_s21 + $0x28a] sm:$0xff] }
 0x3bb   : >> { %v2139_v30 = vpop.f32.mrf.mxu0  ;;  %2357 = vmatmul.f32.gmra.mxu2 %v4993_v26  ;;  %v1758_v26 = vadd.f32 %v6640_v38, %v6630_v0  ;;  %v4980_v38 = vld [vmem:[%s6484_s21 + $0x289] sm:$0xff] }
 0x3bc   : >> { %v6751_v20 = vadd.f32 %v2139_v30, %v2069_v35  ;;  %2239 = vmatmul.f32.gmra.mxu1 %v6643_v19 }
 0x3be   : >> { %2455 = vmatmul.f32.gmra.mxu3 %v4995_v1  ;;  %2550 = vmatmul.f32.gmra.mxu0 %v4996_v15  ;;  %v1926_v32 = vpop.f32.mrf.mxu2 }
 0x3bf   : >> { %v1952_v34 = vadd.f32 %v1926_v32, %v1854_v24 }
 0x3c1   : >> { %v1831_v39 = vpop.f32.mrf.mxu1  ;;  %v2044_v7 = vpop.f32.mrf.mxu3 }
 0x3c2   : >> { %v1855_v6 = vadd.f32 %v1831_v39, %v1757_v61  ;;  %v2070_v31 = vadd.f32 %v2044_v7, %v1952_v34  ;;  %v5001_v61 = vld [vmem:[%s6484_s21 + $0x292] sm:$0xff] }
 0x3c3   : >> { %v2142_v11 = vpop.f32.mrf.mxu0  ;;  %2360 = vmatmul.f32.gmra.mxu2 %v4994_v12 }
 0x3c4   : >> { %v6757_v16 = vadd.f32 %v2142_v11, %v2070_v31  ;;  %2242 = vmatmul.f32.gmra.mxu1 %v6657_v14 }
 0x3c6   : >> { %2458 = vmatmul.f32.gmra.mxu3 %v4996_v15  ;;  %2553 = vmatmul.f32.gmra.mxu0 %v4997_v2  ;;  %v1929_v19 = vpop.f32.mrf.mxu2 }
 0x3c7   : >> { %v1953_v54 = vadd.f32 %v1929_v19, %v1855_v6 }
 0x3c9   : >> { %v1834_v29 = vpop.f32.mrf.mxu1  ;;  %v2047_v62 = vpop.f32.mrf.mxu3 }
 0x3ca   : >> { %v1856_v57 = vadd.f32 %v1834_v29, %v1758_v26  ;;  %v2071_v3 = vadd.f32 %v2047_v62, %v1953_v54  ;;  %v2158_v54 = vadd.f32 %v6687_v50, %v6684_v25  ;;  %v2159_v50 = vadd.f32 %v6694_v28, %v6691_v9 }
 0x3cb   : >> { %v2145_v47 = vpop.f32.mrf.mxu0  ;;  %2363 = vmatmul.f32.gmra.mxu2 %v4995_v1  ;;  %v4981_v1 = vld [vmem:[%s6484_s21 + $0x291] sm:$0xff]  ;;  %v2160_v9 = vadd.f32 %v6702_v36, %v6698_v17  ;;  %v2161_v17 = vadd.f32 %v6710_v63, %v6706_v49  ;;  %v2162_v49 = vadd.f32 %v6718_v33, %v6714_v48  ;;  %v2163_v48 = vadd.f32 %v6726_v37, %v6722_v4 }
 0x3cc   : >> { %v6763_v23 = vadd.f32 %v2145_v47, %v2071_v3  ;;  %2245 = vmatmul.f32.gmra.mxu1 %v6670_v45  ;;  %v2638_v3 = vld [vmem:[%s6786_s15] sm:$0xff]  ;;  %v2164_v4 = vadd.f32 %v6734_v53, %v6732_v42 }
 0x3ce   : >> { %2461 = vmatmul.f32.gmra.mxu3 %v4997_v2  ;;  %2556 = vmatmul.f32.gmra.mxu0 %v4998_v46  ;;  %v1932_v14 = vpop.f32.mrf.mxu2 }
 0x3cf   : >> { %v1954_v41 = vadd.f32 %v1932_v14, %v1856_v57 }
 0x3d1   : >> { %v1837_v55 = vpop.f32.mrf.mxu1  ;;  %v2050_v0 = vpop.f32.mrf.mxu3 }
 0x3d2   : >> { %v1857_v12 = vadd.f32 %v1837_v55, %v6653_v58  ;;  %v2072_v22 = vadd.f32 %v2050_v0, %v1954_v41 }
 0x3d3   : >> { %v2148_v43 = vpop.f32.mrf.mxu0  ;;  %2366 = vmatmul.f32.gmra.mxu2 %v4996_v15 }
 0x3d4   : >> { %v6769_v51 = vadd.f32 %v2148_v43, %v2072_v22  ;;  %2248 = vmatmul.f32.gmra.mxu1 %v4980_v38  ;;  %v5005_v22 = vld [vmem:[%s6484_s21 + $0x21] sm:$0xff] }
 0x3d6   : >> { %2464 = vmatmul.f32.gmra.mxu3 %v4998_v46  ;;  %2559 = vmatmul.f32.gmra.mxu0 %v4999_v5  ;;  %v1935_v45 = vpop.f32.mrf.mxu2 }
 0x3d7   : >> { %v1955_v10 = vadd.f32 %v1935_v45, %v1857_v12  ;;  %v2639_v45 = vld [vmem:[%s6786_s15 + $0x8] sm:$0xff] }
 0x3d9   : >> { %v1840_v52 = vpop.f32.mrf.mxu1  ;;  %v2053_v27 = vpop.f32.mrf.mxu3 }
 0x3da   : >> { %v1858_v44 = vadd.f32 %v1840_v52, %v6666_v21  ;;  %v2073_v59 = vadd.f32 %v2053_v27, %v1955_v10  ;;  %v2157_v21 = vadd.f32 %v6679_v40, %v6676_v56  ;;  %v5004_v40 = vld [vmem:[%s6484_s21 + $0x19] sm:$0xff] }
 0x3db   : >> { %v2151_v58 = vpop.f32.mrf.mxu0  ;;  %2369 = vmatmul.f32.gmra.mxu2 %v4997_v2 }
 0x3dc   : >> { %v6774_v18 = vadd.f32 %v2151_v58, %v2073_v59  ;;  %2251 = vmatmul.f32.gmra.mxu1 %v4981_v1 }
 0x3de   : >> { %2467 = vmatmul.f32.gmra.mxu3 %v4999_v5  ;;  %2562 = vmatmul.f32.gmra.mxu0 %v5000_v13  ;;  %v1938_v24 = vpop.f32.mrf.mxu2 }
 0x3df   : >> { %v1956_v35 = vadd.f32 %v1938_v24, %v1858_v44  ;;  %v5006_v24 = vld [vmem:[%s6484_s21 + $0x31] sm:$0xff] }
 0x3e1   : >> { %v2056_v30 = vpop.f32.mrf.mxu3  ;;  %v2207_v15 = vpop.f32.mrf.mxu1 }
 0x3e2   : >> { %v2074_v32 = vadd.f32 %v2056_v30, %v1956_v35  ;;  %v2255_v7 = vadd.f32 %v2207_v15, %v2157_v21  ;;  %v2640_v15 = vld [vmem:[%s6786_s15 + $0x10] sm:$0xff] }
 0x3e3   : >> { %v2154_v34 = vpop.f32.mrf.mxu0 }
 0x3e4   : >> { %v6779_v39 = vadd.f32 %v2154_v34, %v2074_v32 }
 0x3e6   : >> { %2565 = vmatmul.f32.gmra.mxu0 %v5001_v61  ;;  %v2325_v6 = vpop.f32.mrf.mxu2 }
 0x3e7   : >> { %v2373_v31 = vadd.f32 %v2325_v6, %v2255_v7 }
 0x3e9   : >> { %v2210_v11 = vpop.f32.mrf.mxu1  ;;  %v2423_v2 = vpop.f32.mrf.mxu3 }
 0x3ea   : >> { %v2471_v19 = vadd.f32 %v2423_v2, %v2373_v31  ;;  %v2256_v56 = vadd.f32 %v2210_v11, %v2158_v54  ;;  %v5007_v2 = vld [vmem:[%s6484_s21 + $0x39] sm:$0xff] }
 0x3eb   : >> { %v2521_v26 = vpop.f32.mrf.mxu0 }
 0x3ec   : >> { %v2569_v29 = vadd.f32 %v2521_v26, %v2471_v19  ;;  %v2641_v26 = vld [vmem:[%s6786_s15 + $0x18] sm:$0xff] }
 0x3ee   : >> { %v2585_v62 = vmax.f32 %v2569_v29, 0.0  ;;  %v2328_v57 = vpop.f32.mrf.mxu2 }
 0x3ef   : >> { %v2374_v47 = vadd.f32 %v2328_v57, %v2256_v56 }
 0x3f0   : >> { %v2620_v46 = vadd.f32 %v5004_v40, %v2585_v62 }
 0x3f1   : >> { %v2213_v14 = vpop.f32.mrf.mxu1  ;;  %v2426_v41 = vpop.f32.mrf.mxu3 }
 0x3f2   : >> { %v2654_v55 = vadd.f32 %v2638_v3, %v2620_v46  ;;  %v2472_v25 = vadd.f32 %v2426_v41, %v2374_v47  ;;  %v2257_v12 = vadd.f32 %v2213_v14, %v2159_v50  ;;  %v5008_v14 = vld [vmem:[%s6484_s21 + $0x49] sm:$0xff] }
 0x3f3   : >> { %v2524_v0 = vpop.f32.mrf.mxu0 }
 0x3f4   : >> { %5021 = vst [vmem:[%s6484_s21 + $0x19] sm:$0xff] %v2654_v55  ;;  %v2570_v38 = vadd.f32 %v2524_v0, %v2472_v25  ;;  %v2642_v25 = vld [vmem:[%s6786_s15 + $0x20] sm:$0xff] }
 0x3f6   : >> { %v2586_v43 = vmax.f32 %v2570_v38, 0.0  ;;  %v2331_v5 = vpop.f32.mrf.mxu2 }
 0x3f7   : >> { %v2375_v10 = vadd.f32 %v2331_v5, %v2257_v12 }
 0x3f8   : >> { %v2621_v52 = vadd.f32 %v5005_v22, %v2586_v43 }
 0x3f9   : >> { %v2216_v27 = vpop.f32.mrf.mxu1  ;;  %v2429_v1 = vpop.f32.mrf.mxu3 }
 0x3fa   : >> { %v2655_v44 = vadd.f32 %v2639_v45, %v2621_v52  ;;  %v2473_v59 = vadd.f32 %v2429_v1, %v2375_v10  ;;  %v2258_v13 = vadd.f32 %v2216_v27, %v2160_v9  ;;  %v5009_v10 = vld [vmem:[%s6484_s21 + $0x51] sm:$0xff]  ;;  %v2643_v1 = vld [vmem:[%s6786_s15 + $0x28] sm:$0xff] }
 0x3fb   : >> { %v2527_v28 = vpop.f32.mrf.mxu0 }
 0x3fc   : >> { %5022 = vst [vmem:[%s6484_s21 + $0x21] sm:$0xff] %v2655_v44  ;;  %v2571_v58 = vadd.f32 %v2527_v28, %v2473_v59 }
 0x3fe   : >> { %v2587_v35 = vmax.f32 %v2571_v58, 0.0  ;;  %v2334_v30 = vpop.f32.mrf.mxu2 }
 0x3ff   : >> { %v2376_v32 = vadd.f32 %v2334_v30, %v2258_v13  ;;  %v5010_v30 = vld [vmem:[%s6484_s21 + $0x61] sm:$0xff] }
 0x400   : >> { %v2622_v21 = vadd.f32 %v5006_v24, %v2587_v35 }
 0x401   : >> { %v2219_v34 = vpop.f32.mrf.mxu1  ;;  %v2432_v61 = vpop.f32.mrf.mxu3 }
 0x402   : >> { %v2656_v7 = vadd.f32 %v2640_v15, %v2622_v21  ;;  %v2474_v6 = vadd.f32 %v2432_v61, %v2376_v32  ;;  %v2259_v11 = vadd.f32 %v2219_v34, %v2161_v17  ;;  %v2644_v21 = vld [vmem:[%s6786_s15 + $0x30] sm:$0xff] }
 0x403   : >> { %v2530_v36 = vpop.f32.mrf.mxu0 }
 0x404   : >> { %5023 = vst [vmem:[%s6484_s21 + $0x31] sm:$0xff] %v2656_v7  ;;  %v2572_v31 = vadd.f32 %v2530_v36, %v2474_v6 }
 0x406   : >> { %v2588_v19 = vmax.f32 %v2572_v31, 0.0  ;;  %v2337_v54 = vpop.f32.mrf.mxu2 }
 0x407   : >> { %v2377_v29 = vadd.f32 %v2337_v54, %v2259_v11  ;;  %v5011_v11 = vld [vmem:[%s6484_s21 + $0x69] sm:$0xff]  ;;  %v2645_v54 = vld [vmem:[%s6786_s15 + $0x38] sm:$0xff] }
 0x408   : >> { %v2623_v56 = vadd.f32 %v5007_v2, %v2588_v19 }
 0x409   : >> { %v2222_v40 = vpop.f32.mrf.mxu1  ;;  %v2435_v62 = vpop.f32.mrf.mxu3 }
 0x40a   : >> { %v2657_v57 = vadd.f32 %v2641_v26, %v2623_v56  ;;  %v2475_v3 = vadd.f32 %v2435_v62, %v2377_v29  ;;  %v2260_v46 = vadd.f32 %v2222_v40, %v2162_v49 }
 0x40b   : >> { %v2533_v63 = vpop.f32.mrf.mxu0 }
 0x40c   : >> { %5024 = vst [vmem:[%s6484_s21 + $0x39] sm:$0xff] %v2657_v57  ;;  %v2573_v47 = vadd.f32 %v2533_v63, %v2475_v3 }
 0x40e   : >> { %v2589_v41 = vmax.f32 %v2573_v47, 0.0  ;;  %v2340_v55 = vpop.f32.mrf.mxu2  ;;  %v5012_v47 = vld [vmem:[%s6484_s21 + $0x79] sm:$0xff] }
 0x40f   : >> { %v2378_v50 = vadd.f32 %v2340_v55, %v2260_v46 }
 0x410   : >> { %v2624_v0 = vadd.f32 %v5008_v14, %v2589_v41  ;;  %v2646_v14 = vld [vmem:[%s6786_s15 + $0x40] sm:$0xff] }
 0x411   : >> { %v2225_v38 = vpop.f32.mrf.mxu1  ;;  %v2438_v12 = vpop.f32.mrf.mxu3 }
 0x412   : >> { %v2658_v22 = vadd.f32 %v2642_v25, %v2624_v0  ;;  %v2476_v43 = vadd.f32 %v2438_v12, %v2378_v50  ;;  %v2261_v45 = vadd.f32 %v2225_v38, %v2163_v48  ;;  %v5013_v48 = vld [vmem:[%s6484_s21 + $0x81] sm:$0xff] }
 0x413   : >> { %v2536_v33 = vpop.f32.mrf.mxu0 }
 0x414   : >> { %5025 = vst [vmem:[%s6484_s21 + $0x49] sm:$0xff] %v2658_v22  ;;  %v2574_v5 = vadd.f32 %v2536_v33, %v2476_v43 }
 0x416   : >> { %v2590_v52 = vmax.f32 %v2574_v5, 0.0  ;;  %v2343_v27 = vpop.f32.mrf.mxu2  ;;  %v2647_v5 = vld [vmem:[%s6786_s15 + $0x48] sm:$0xff] }
 0x417   : >> { %v2379_v44 = vadd.f32 %v2343_v27, %v2261_v45 }
 0x418   : >> { %v2625_v59 = vadd.f32 %v5009_v10, %v2590_v52 }
 0x419   : >> { %v2228_v9 = vpop.f32.mrf.mxu1  ;;  %v2441_v28 = vpop.f32.mrf.mxu3 }
 0x41a   : >> { %v2659_v58 = vadd.f32 %v2643_v1, %v2625_v59  ;;  %v2477_v13 = vadd.f32 %v2441_v28, %v2379_v44  ;;  %v2262_v35 = vadd.f32 %v2228_v9, %v2164_v4  ;;  %v2648_v4 = vld [vmem:[%s6786_s15 + $0x50] sm:$0xff] }
 0x41b   : >> { %v2539_v37 = vpop.f32.mrf.mxu0 }
 0x41c   : >> { %5026 = vst [vmem:[%s6484_s21 + $0x51] sm:$0xff] %v2659_v58  ;;  %v2575_v24 = vadd.f32 %v2539_v37, %v2477_v13  ;;  %v5014_v58 = vld [vmem:[%s6484_s21 + $0x91] sm:$0xff] }
 0x41e   : >> { %v2591_v15 = vmax.f32 %v2575_v24, 0.0  ;;  %v2346_v32 = vpop.f32.mrf.mxu2 }
 0x41f   : >> { %v2380_v34 = vadd.f32 %v2346_v32, %v2262_v35 }
 0x420   : >> { %v2626_v61 = vadd.f32 %v5010_v30, %v2591_v15 }
 0x421   : >> { %v2231_v7 = vpop.f32.mrf.mxu1  ;;  %v2444_v6 = vpop.f32.mrf.mxu3 }
 0x422   : >> { %v2660_v17 = vadd.f32 %v2644_v21, %v2626_v61  ;;  %v2478_v36 = vadd.f32 %v2444_v6, %v2380_v34  ;;  %v2263_v53 = vadd.f32 %v2231_v7, %v6741_v8  ;;  %v5015_v7 = vld [vmem:[%s6484_s21 + $0x99] sm:$0xff] }
 0x423   : >> { %v2542_v31 = vpop.f32.mrf.mxu0 }
 0x424   : >> { %5027 = vst [vmem:[%s6484_s21 + $0x61] sm:$0xff] %v2660_v17  ;;  %v2576_v42 = vadd.f32 %v2542_v31, %v2478_v36  ;;  %v2649_v17 = vld [vmem:[%s6786_s15 + $0x58] sm:$0xff] }
 0x426   : >> { %v2592_v2 = vmax.f32 %v2576_v42, 0.0  ;;  %v2349_v19 = vpop.f32.mrf.mxu2 }
 0x427   : >> { %v2381_v26 = vadd.f32 %v2349_v19, %v2263_v53 }
 0x428   : >> { %v2627_v29 = vadd.f32 %v5011_v11, %v2592_v2 }
 0x429   : >> { %v2234_v56 = vpop.f32.mrf.mxu1  ;;  %v2447_v40 = vpop.f32.mrf.mxu3 }
 0x42a   : >> { %v2661_v62 = vadd.f32 %v2645_v54, %v2627_v29  ;;  %v2479_v57 = vadd.f32 %v2447_v40, %v2381_v26  ;;  %v2264_v63 = vadd.f32 %v2234_v56, %v6746_v60  ;;  %v5016_v29 = vld [vmem:[%s6484_s21 + $0xa9] sm:$0xff]  ;;  %v2650_v40 = vld [vmem:[%s6786_s15 + $0x60] sm:$0xff] }
 0x42b   : >> { %v2545_v3 = vpop.f32.mrf.mxu0 }
 0x42c   : >> { %5028 = vst [vmem:[%s6484_s21 + $0x69] sm:$0xff] %v2661_v62  ;;  %v2577_v49 = vadd.f32 %v2545_v3, %v2479_v57 }
 0x42e   : >> { %v2593_v8 = vmax.f32 %v2577_v49, 0.0  ;;  %v2352_v46 = vpop.f32.mrf.mxu2 }
 0x42f   : >> { %v2382_v41 = vadd.f32 %v2352_v46, %v2264_v63 }
 0x430   : >> { %v2628_v55 = vadd.f32 %v5012_v47, %v2593_v8 }
 0x431   : >> { %v2237_v25 = vpop.f32.mrf.mxu1  ;;  %v2450_v50 = vpop.f32.mrf.mxu3 }
 0x432   : >> { %v2662_v0 = vadd.f32 %v2646_v14, %v2628_v55  ;;  %v2480_v38 = vadd.f32 %v2450_v50, %v2382_v41  ;;  %v2265_v43 = vadd.f32 %v2237_v25, %v6751_v20  ;;  %v5017_v41 = vld [vmem:[%s6484_s21 + $0xb1] sm:$0xff]  ;;  %v2651_v25 = vld [vmem:[%s6786_s15 + $0x68] sm:$0xff] }
 0x433   : >> { %v2548_v12 = vpop.f32.mrf.mxu0 }
 0x434   : >> { %5029 = vst [vmem:[%s6484_s21 + $0x79] sm:$0xff] %v2662_v0  ;;  %v2578_v22 = vadd.f32 %v2548_v12, %v2480_v38 }
 0x436   : >> { %v2594_v60 = vmax.f32 %v2578_v22, 0.0  ;;  %v2355_v33 = vpop.f32.mrf.mxu2 }
 0x437   : >> { %v2383_v45 = vadd.f32 %v2355_v33, %v2265_v43 }
 0x438   : >> { %v2629_v10 = vadd.f32 %v5013_v48, %v2594_v60 }
 0x439   : >> { %v2240_v52 = vpop.f32.mrf.mxu1  ;;  %v2453_v27 = vpop.f32.mrf.mxu3 }
 0x43a   : >> { %v2663_v1 = vadd.f32 %v2647_v5, %v2629_v10  ;;  %v2481_v44 = vadd.f32 %v2453_v27, %v2383_v45  ;;  %v2266_v28 = vadd.f32 %v2240_v52, %v6757_v16  ;;  %v2652_v10 = vld [vmem:[%s6786_s15 + $0x70] sm:$0xff] }
 0x43b   : >> { %v2551_v59 = vpop.f32.mrf.mxu0 }
 0x43c   : >> { %5030 = vst [vmem:[%s6484_s21 + $0x81] sm:$0xff] %v2663_v1  ;;  %v2579_v9 = vadd.f32 %v2551_v59, %v2481_v44 }
 0x43e   : >> { %v2595_v20 = vmax.f32 %v2579_v9, 0.0  ;;  %v2358_v13 = vpop.f32.mrf.mxu2 }
 0x43f   : >> { %v2384_v37 = vadd.f32 %v2358_v13, %v2266_v28  ;;  %v2653_v13 = vld [vmem:[%s6786_s15 + $0x78] sm:$0xff] }
 0x440   : >> { %v2630_v24 = vadd.f32 %v5014_v58, %v2595_v20  ;;  %v5019_v58 = vld [vmem:[%s6484_s21 + $0xc9] sm:$0xff] }
 0x441   : >> { %v2243_v35 = vpop.f32.mrf.mxu1  ;;  %v2456_v30 = vpop.f32.mrf.mxu3 }
 0x442   : >> { %v2664_v15 = vadd.f32 %v2648_v4, %v2630_v24  ;;  %v2482_v32 = vadd.f32 %v2456_v30, %v2384_v37  ;;  %v2267_v61 = vadd.f32 %v2243_v35, %v6763_v23 }
 0x443   : >> { %v2554_v21 = vpop.f32.mrf.mxu0 }
 0x444   : >> { %5031 = vst [vmem:[%s6484_s21 + $0x91] sm:$0xff] %v2664_v15  ;;  %v2580_v34 = vadd.f32 %v2554_v21, %v2482_v32 }
 0x446   : >> { %v2596_v16 = vmax.f32 %v2580_v34, 0.0  ;;  %v2361_v6 = vpop.f32.mrf.mxu2 }
 0x447   : >> { %v2385_v36 = vadd.f32 %v2361_v6, %v2267_v61 }
 0x448   : >> { %v2631_v31 = vadd.f32 %v5015_v7, %v2596_v16 }
 0x449   : >> { %v2246_v42 = vpop.f32.mrf.mxu1  ;;  %v2459_v53 = vpop.f32.mrf.mxu3 }
 0x44a   : >> { %v2665_v11 = vadd.f32 %v2649_v17, %v2631_v31  ;;  %v2483_v2 = vadd.f32 %v2459_v53, %v2385_v36  ;;  %v2268_v26 = vadd.f32 %v2246_v42, %v6769_v51 }
 0x44b   : >> { %v2557_v19 = vpop.f32.mrf.mxu0 }
 0x44c   : >> { %5032 = vst [vmem:[%s6484_s21 + $0x99] sm:$0xff] %v2665_v11  ;;  %v2581_v54 = vadd.f32 %v2557_v19, %v2483_v2 }
 0x44e   : >> { %v2597_v23 = vmax.f32 %v2581_v54, 0.0  ;;  %v2364_v56 = vpop.f32.mrf.mxu2 }
 0x44f   : >> { %v2386_v62 = vadd.f32 %v2364_v56, %v2268_v26 }
 0x450   : >> { %v2632_v57 = vadd.f32 %v5016_v29, %v2597_v23 }
 0x451   : >> { %v2249_v3 = vpop.f32.mrf.mxu1  ;;  %v2462_v49 = vpop.f32.mrf.mxu3 }
 0x452   : >> { %v2666_v63 = vadd.f32 %v2650_v40, %v2632_v57  ;;  %v2484_v47 = vadd.f32 %v2462_v49, %v2386_v62  ;;  %v2269_v14 = vadd.f32 %v2249_v3, %v6774_v18  ;;  %v5018_v18 = vld [vmem:[%s6484_s21 + $0xc1] sm:$0xff] }
 0x453   : >> { %v2560_v8 = vpop.f32.mrf.mxu0 }
 0x454   : >> { %5033 = vst [vmem:[%s6484_s21 + $0xa9] sm:$0xff] %v2666_v63  ;;  %v2582_v46 = vadd.f32 %v2560_v8, %v2484_v47 }
 0x456   : >> { %v2598_v51 = vmax.f32 %v2582_v46, 0.0  ;;  %v2367_v55 = vpop.f32.mrf.mxu2 }
 0x457   : >> { %v2387_v50 = vadd.f32 %v2367_v55, %v2269_v14 }
 0x458   : >> { %v2633_v0 = vadd.f32 %v5017_v41, %v2598_v51 }
 0x459   : >> { %v2465_v38 = vpop.f32.mrf.mxu3  ;;  %v2252_v22 = vpop.f32.mrf.mxu1 }
 0x45a   : >> { %v2667_v12 = vadd.f32 %v2651_v25, %v2633_v0  ;;  %v2485_v43 = vadd.f32 %v2465_v38, %v2387_v50  ;;  %v2270_v33 = vadd.f32 %v2252_v22, %v6779_v39 }
 0x45b   : >> { %v2563_v48 = vpop.f32.mrf.mxu0 }
 0x45c   : >> { %5034 = vst [vmem:[%s6484_s21 + $0xb1] sm:$0xff] %v2667_v12  ;;  %v2583_v60 = vadd.f32 %v2563_v48, %v2485_v43 }
 0x45e   : >> { %v2599_v5 = vmax.f32 %v2583_v60, 0.0  ;;  %v2370_v45 = vpop.f32.mrf.mxu2 }
 0x45f   : >> { %v2388_v52 = vadd.f32 %v2370_v45, %v2270_v33 }
 0x460   : >> { %v2634_v27 = vadd.f32 %v5018_v18, %v2599_v5 }
 0x461   : >> { %v2468_v1 = vpop.f32.mrf.mxu3 }
 0x462   : >> { %v2668_v44 = vadd.f32 %v2652_v10, %v2634_v27  ;;  %v2486_v59 = vadd.f32 %v2468_v1, %v2388_v52 }
 0x463   : >> { %v2566_v9 = vpop.f32.mrf.mxu0 }
 0x464   : >> { %5035 = vst [vmem:[%s6484_s21 + $0xc1] sm:$0xff] %v2668_v44  ;;  %v2584_v28 = vadd.f32 %v2566_v9, %v2486_v59 }
 0x466   : >> { %v2600_v20 = vmax.f32 %v2584_v28, 0.0 }
 0x468   : >> { %v2635_v4 = vadd.f32 %v5019_v58, %v2600_v20  ;;  %1634 = sbr.rel (!%p1632_p4) target bundleno = 670 (0x29e), region = 219 }
 0x46a   : >> { %v2669_v37 = vadd.f32 %v2653_v13, %v2635_v4 }
 0x46c   : >> { %5036 = vst [vmem:[%s6484_s21 + $0xc9] sm:$0xff] %v2669_v37 }
 0x46d LB: >> { %v2734_v39 = vld [vmem:[#allocation11 + $0x78] sm:$0xff]  ;;  %v2733_v24 = vld [vmem:[#allocation11 + $0x70] sm:$0xff]  ;;  %v2732_v35 = vld [vmem:[#allocation11 + $0x68] sm:$0xff]  ;;  %s5038_s12 = smul.u32 192, %s5762_s0  ;;  %s2691_s0 = sadd.s32 1, %s5762_s0   ;;  %s5762_s0 = sphi %s6859_s0, %s2691_s0  }
 0x46e   : >> { %5243 = vmatpush.msra.mxu1 %v2734_v39  ;;  %5244 = vmatpush.msra.mxu2 %v2734_v39  ;;  %v2731_v30 = vld [vmem:[#allocation11 + $0x60] sm:$0xff]  ;;  %v2730_v15 = vld [vmem:[#allocation11 + $0x58] sm:$0xff]  ;;  %v2729_v32 = vld [vmem:[#allocation11 + $0x50] sm:$0xff]  ;;  %p2688_p8 = scmp.ge.s32.totalorder %s2691_s0, 2  }
 0x46f   : >> { %5245 = vmatpush.msra.mxu3 %v2734_v39  ;;  %2735 = vmatpush.msra.mxu0 %v2734_v39  ;;  %v2728_v21 = vld [vmem:[#allocation11 + $0x48] sm:$0xff]  ;;  %v2727_v34 = vld [vmem:[#allocation11 + $0x40] sm:$0xff]  ;;  %v2726_v61 = vld [vmem:[#allocation11 + $0x38] sm:$0xff]  ;;  %s6865_s4 = scalar_lea.vmem [#allocation2], %s5038_s12  ;;  %s7203_s29 = smov (%p2688_p8), 0  }
 0x470   : >> { %5246 = vmatpush.msra.mxu1 %v2733_v24  ;;  %5247 = vmatpush.msra.mxu2 %v2733_v24  ;;  %v2725_v7 = vld [vmem:[#allocation11 + $0x30] sm:$0xff]  ;;  %v2724_v16 = vld [vmem:[#allocation11 + $0x28] sm:$0xff]  ;;  %v2723_v6 = vld [vmem:[#allocation11 + $0x20] sm:$0xff] }
 0x471   : >> { %5248 = vmatpush.msra.mxu3 %v2733_v24  ;;  %2736 = vmatpush.msra.mxu0 %v2733_v24  ;;  %v2722_v17 = vld [vmem:[#allocation11 + $0x18] sm:$0xff]  ;;  %v2721_v36 = vld [vmem:[#allocation11 + $0x10] sm:$0xff]  ;;  %v2720_v31 = vld [vmem:[#allocation11 + $0x8] sm:$0xff] }
 0x472   : >> { %5249 = vmatpush.msra.mxu1 %v2732_v35  ;;  %5250 = vmatpush.msra.mxu2 %v2732_v35  ;;  %v2719_v42 = vld [vmem:[#allocation11] sm:$0xff]  ;;  %v2930_v2 = vld [vmem:[#allocation11 + $0x378] sm:$0xff]  ;;  %v2929_v26 = vld [vmem:[#allocation11 + $0x370] sm:$0xff] }
 0x473   : >> { %5251 = vmatpush.msra.mxu3 %v2732_v35  ;;  %2737 = vmatpush.msra.mxu0 %v2732_v35  ;;  %v6868_v53 = vld [vmem:[%s6865_s4 + $0x30] sm:$0xff]  ;;  %v6871_v11 = vld [vmem:[%s6865_s4 + $0x60] sm:$0xff]  ;;  %v2832_v19 = vld [vmem:[#allocation11 + $0x1f8] sm:$0xff] }
 0x474   : >> { %5252 = vmatpush.msra.mxu1 %v2731_v30  ;;  %5253 = vmatpush.msra.mxu2 %v2731_v30  ;;  %v6874_v54 = vld [vmem:[%s6865_s4 + $0x90] sm:$0xff]  ;;  %v3048_v29 = vld [vmem:[#allocation11 + $0xf8] sm:$0xff]  ;;  %v2928_v56 = vld [vmem:[#allocation11 + $0x368] sm:$0xff] }
 0x475   : >> { %5254 = vmatpush.msra.mxu3 %v2731_v30  ;;  %2738 = vmatpush.msra.mxu0 %v2731_v30  ;;  %v2831_v23 = vld [vmem:[#allocation11 + $0x1f0] sm:$0xff]  ;;  %v2830_v62 = vld [vmem:[#allocation11 + $0x1e8] sm:$0xff]  ;;  %v2699_v57 = vld [vmem:[%s6865_s4] sm:$0xff] }
 0x476   : >> { %5255 = vmatpush.msra.mxu1 %v2730_v15  ;;  %5256 = vmatpush.msra.mxu2 %v2730_v15  ;;  %v3047_v40 = vld [vmem:[#allocation11 + $0xf0] sm:$0xff]  ;;  %v2927_v3 = vld [vmem:[#allocation11 + $0x360] sm:$0xff]  ;;  %v3046_v49 = vld [vmem:[#allocation11 + $0xe8] sm:$0xff] }
 0x477   : >> { %5257 = vmatpush.msra.mxu3 %v2730_v15  ;;  %2739 = vmatpush.msra.mxu0 %v2730_v15  ;;  %v2829_v63 = vld [vmem:[#allocation11 + $0x1e0] sm:$0xff]  ;;  %v6881_v47 = vld [vmem:[%s6865_s4 + $0x68] sm:$0xff]  ;;  %v6884_v8 = vld [vmem:[%s6865_s4 + $0x38] sm:$0xff] }
 0x478   : >> { %5258 = vmatpush.msra.mxu1 %v2729_v32  ;;  %5259 = vmatpush.msra.mxu2 %v2729_v32  ;;  %v2926_v46 = vld [vmem:[#allocation11 + $0x358] sm:$0xff]  ;;  %v3045_v14 = vld [vmem:[#allocation11 + $0xe0] sm:$0xff]  ;;  %v2925_v55 = vld [vmem:[#allocation11 + $0x350] sm:$0xff] }
 0x479   : >> { %5260 = vmatpush.msra.mxu3 %v2729_v32  ;;  %2740 = vmatpush.msra.mxu0 %v2729_v32  ;;  %v2828_v41 = vld [vmem:[#allocation11 + $0x1d8] sm:$0xff]  ;;  %v2827_v0 = vld [vmem:[#allocation11 + $0x1d0] sm:$0xff]  ;;  %v2924_v38 = vld [vmem:[#allocation11 + $0x348] sm:$0xff] }
 0x47a   : >> { %5261 = vmatpush.msra.mxu1 %v2728_v21  ;;  %5262 = vmatpush.msra.mxu2 %v2728_v21  ;;  %v6888_v51 = vld [vmem:[%s6865_s4 + $0x98] sm:$0xff]  ;;  %v3043_v12 = vld [vmem:[#allocation11 + $0xd0] sm:$0xff]  ;;  %v2826_v43 = vld [vmem:[#allocation11 + $0x1c8] sm:$0xff] }
 0x47b   : >> { %5263 = vmatpush.msra.mxu3 %v2728_v21  ;;  %2741 = vmatpush.msra.mxu0 %v2728_v21  ;;  %v3044_v25 = vld [vmem:[#allocation11 + $0xd8] sm:$0xff]  ;;  %v3145_v22 = vld [vmem:[#allocation11 + $0x270] sm:$0xff]  ;;  %v2923_v48 = vld [vmem:[#allocation11 + $0x340] sm:$0xff] }
 0x47c   : >> { %5264 = vmatpush.msra.mxu1 %v2727_v34  ;;  %5265 = vmatpush.msra.mxu2 %v2727_v34  ;;  %v3146_v50 = vld [vmem:[#allocation11 + $0x278] sm:$0xff]  ;;  %v3042_v60 = vld [vmem:[#allocation11 + $0xc8] sm:$0xff]  ;;  %v2825_v18 = vld [vmem:[#allocation11 + $0x1c0] sm:$0xff] }
 0x47d   : >> { %5266 = vmatpush.msra.mxu3 %v2727_v34  ;;  %2742 = vmatpush.msra.mxu0 %v2727_v34  ;;  %v3144_v33 = vld [vmem:[#allocation11 + $0x268] sm:$0xff]  ;;  %v6893_v5 = vld [vmem:[%s6865_s4 + $0x78] sm:$0xff]  ;;  %v3041_v52 = vld [vmem:[#allocation11 + $0xc0] sm:$0xff] }
 0x47e   : >> { %5267 = vmatpush.msra.mxu1 %v2726_v61  ;;  %5268 = vmatpush.msra.mxu2 %v2726_v61  ;;  %v6896_v45 = vld [vmem:[%s6865_s4 + $0x48] sm:$0xff]  ;;  %v2922_v10 = vld [vmem:[#allocation11 + $0x338] sm:$0xff]  ;;  %v3143_v27 = vld [vmem:[#allocation11 + $0x260] sm:$0xff] }
 0x47f   : >> { %5269 = vmatpush.msra.mxu3 %v2726_v61  ;;  %2743 = vmatpush.msra.mxu0 %v2726_v61  ;;  %v2824_v1 = vld [vmem:[#allocation11 + $0x1b8] sm:$0xff]  ;;  %v2700_v44 = vld [vmem:[%s6865_s4 + $0x8] sm:$0xff]  ;;  %v2921_v9 = vld [vmem:[#allocation11 + $0x330] sm:$0xff] }
 0x480   : >> { %5270 = vmatpush.msra.mxu1 %v2725_v7  ;;  %5271 = vmatpush.msra.mxu2 %v2725_v7  ;;  %v6902_v59 = vld [vmem:[%s6865_s4 + $0xa8] sm:$0xff]  ;;  %v3040_v28 = vld [vmem:[#allocation11 + $0xb8] sm:$0xff]  ;;  %v2823_v20 = vld [vmem:[#allocation11 + $0x1b0] sm:$0xff] }
 0x481   : >> { %5272 = vmatpush.msra.mxu3 %v2725_v7  ;;  %2744 = vmatpush.msra.mxu0 %v2725_v7  ;;  %v3142_v58 = vld [vmem:[#allocation11 + $0x258] sm:$0xff]  ;;  %v2920_v13 = vld [vmem:[#allocation11 + $0x328] sm:$0xff]  ;;  %v3039_v4 = vld [vmem:[#allocation11 + $0xb0] sm:$0xff] }
 0x482   : >> { %5273 = vmatpush.msra.mxu1 %v2724_v16  ;;  %5274 = vmatpush.msra.mxu2 %v2724_v16  ;;  %v3141_v37 = vld [vmem:[#allocation11 + $0x250] sm:$0xff]  ;;  %v2822_v39 = vld [vmem:[#allocation11 + $0x1a8] sm:$0xff]  ;;  %v2919_v24 = vld [vmem:[#allocation11 + $0x320] sm:$0xff] }
 0x483   : >> { %5275 = vmatpush.msra.mxu3 %v2724_v16  ;;  %2745 = vmatpush.msra.mxu0 %v2724_v16  ;;  %v3038_v35 = vld [vmem:[#allocation11 + $0xa8] sm:$0xff]  ;;  %v2821_v15 = vld [vmem:[#allocation11 + $0x1a0] sm:$0xff]  ;;  %v6909_v21 = vld [vmem:[%s6865_s4 + $0x50] sm:$0xff] }
 0x484   : >> { %5276 = vmatpush.msra.mxu1 %v2723_v6  ;;  %5277 = vmatpush.msra.mxu2 %v2723_v6  ;;  %v3140_v30 = vld [vmem:[#allocation11 + $0x248] sm:$0xff]  ;;  %v6906_v32 = vld [vmem:[%s6865_s4 + $0x80] sm:$0xff]  ;;  %v2918_v34 = vld [vmem:[#allocation11 + $0x318] sm:$0xff] }
 0x485   : >> { %5278 = vmatpush.msra.mxu3 %v2723_v6  ;;  %2746 = vmatpush.msra.mxu0 %v2723_v6  ;;  %v3037_v61 = vld [vmem:[#allocation11 + $0xa0] sm:$0xff]  ;;  %v2820_v16 = vld [vmem:[#allocation11 + $0x198] sm:$0xff] }
 0x486   : >> { %5279 = vmatpush.msra.mxu1 %v2722_v17  ;;  %5280 = vmatpush.msra.mxu2 %v2722_v17  ;;  %v3139_v7 = vld [vmem:[#allocation11 + $0x240] sm:$0xff]  ;;  %v2701_v6 = vld [vmem:[%s6865_s4 + $0x18] sm:$0xff] }
 0x487   : >> { %5281 = vmatpush.msra.mxu3 %v2722_v17  ;;  %2747 = vmatpush.msra.mxu0 %v2722_v17  ;;  %v6915_v17 = vld [vmem:[%s6865_s4 + $0xb0] sm:$0xff] }
 0x488   : >> { %5282 = vmatpush.msra.mxu1 %v2721_v36  ;;  %5283 = vmatpush.msra.mxu2 %v2721_v36 }
 0x489   : >> { %5284 = vmatpush.msra.mxu3 %v2721_v36  ;;  %2748 = vmatpush.msra.mxu0 %v2721_v36  ;;  %v2917_v36 = vld [vmem:[#allocation11 + $0x310] sm:$0xff] }
 0x48a   : >> { %5285 = vmatpush.msra.mxu1 %v2720_v31  ;;  %5286 = vmatpush.msra.mxu2 %v2720_v31 }
 0x48b   : >> { %5287 = vmatpush.msra.mxu3 %v2720_v31  ;;  %2749 = vmatpush.msra.mxu0 %v2720_v31  ;;  %v3036_v31 = vld [vmem:[#allocation11 + $0x98] sm:$0xff] }
 0x48c   : >> { %5288 = vmatpush.msra.mxu1 %v2719_v42  ;;  %5289 = vmatpush.msra.mxu2 %v2719_v42 }
 0x48d   : >> { %2763 = vmatmul.f32.vlgmr.msra.gmra.mxu1 %v6868_v53  ;;  %2775 = vmatmul.f32.vlgmr.msra.gmra.mxu2 %v6871_v11 }
 0x48e   : >> { %2931 = vmatpush.msrb.mxu2 %v2930_v2  ;;  %5290 = vmatpush.msra.mxu3 %v2719_v42  ;;  %v2819_v2 = vld [vmem:[#allocation11 + $0x190] sm:$0xff] }
 0x48f   : >> { %2833 = vmatpush.msrb.mxu1 %v2832_v19  ;;  %2787 = vmatmul.f32.vlgmr.msra.gmra.mxu3 %v6874_v54  ;;  %v2916_v19 = vld [vmem:[#allocation11 + $0x308] sm:$0xff] }
 0x490   : >> { %2932 = vmatpush.msrb.mxu2 %v2929_v26  ;;  %3049 = vmatpush.msrb.mxu3 %v3048_v29  ;;  %v3035_v26 = vld [vmem:[#allocation11 + $0x90] sm:$0xff] }
 0x491   : >> { %2834 = vmatpush.msrb.mxu1 %v2831_v23  ;;  %2750 = vmatpush.msra.mxu0 %v2719_v42  ;;  %v3138_v42 = vld [vmem:[#allocation11 + $0x238] sm:$0xff]  ;;  %v3137_v29 = vld [vmem:[#allocation11 + $0x230] sm:$0xff]  ;;  %v2818_v23 = vld [vmem:[#allocation11 + $0x188] sm:$0xff] }
 0x492   : >> { %2933 = vmatpush.msrb.mxu2 %v2928_v56  ;;  %3050 = vmatpush.msrb.mxu3 %v3047_v40  ;;  %v2915_v56 = vld [vmem:[#allocation11 + $0x300] sm:$0xff]  ;;  %v3034_v40 = vld [vmem:[#allocation11 + $0x88] sm:$0xff] }
 0x493   : >> { %2835 = vmatpush.msrb.mxu1 %v2830_v62  ;;  %2751 = vmatmul.f32.vlgmr.msra.gmra.mxu0 %v2699_v57  ;;  %v3136_v62 = vld [vmem:[#allocation11 + $0x228] sm:$0xff]  ;;  %v2817_v57 = vld [vmem:[#allocation11 + $0x180] sm:$0xff] }
 0x494   : >> { %2934 = vmatpush.msrb.mxu2 %v2927_v3  ;;  %3051 = vmatpush.msrb.mxu3 %v3046_v49  ;;  %v3033_v3 = vld [vmem:[#allocation11 + $0x80] sm:$0xff] }
 0x495   : >> { %2836 = vmatpush.msrb.mxu1 %v2829_v63  ;;  %2778 = vmatmul.f32.gmra.mxu2 %v6881_v47  ;;  %v3135_v49 = vld [vmem:[#allocation11 + $0x220] sm:$0xff]  ;;  %v3362_v63 = vld [vmem:[#allocation11 + $0x178] sm:$0xff] }
 0x496   : >> { %2766 = vmatmul.f32.gmra.mxu1 %v6884_v8  ;;  %2935 = vmatpush.msrb.mxu2 %v2926_v46  ;;  %v2702_v46 = vld [vmem:[%s6865_s4 + $0x20] sm:$0xff] }
 0x497   : >> { %3052 = vmatpush.msrb.mxu3 %v3045_v14  ;;  %2837 = vmatpush.msrb.mxu1 %v2828_v41  ;;  %v3012_v14 = vld [vmem:[%s6865_s4 + $0x1] sm:$0xff]  ;;  %v3134_v41 = vld [vmem:[#allocation11 + $0x218] sm:$0xff] }
 0x498   : >> { %2790 = vmatmul.f32.gmra.mxu3 %v6888_v51  ;;  %2936 = vmatpush.msrb.mxu2 %v2925_v55  ;;  %v3460_v55 = vld [vmem:[#allocation11 + $0x2f8] sm:$0xff] }
 0x499   : >> { %3053 = vmatpush.msrb.mxu3 %v3044_v25  ;;  %3147 = vmatpush.msrb.mxu0 %v3146_v50  ;;  %v3244_v25 = vld [vmem:[#allocation11 + $0x3f8] sm:$0xff]  ;;  %v3361_v50 = vld [vmem:[#allocation11 + $0x170] sm:$0xff] }
 0x49a   : >> { %2838 = vmatpush.msrb.mxu1 %v2827_v0  ;;  %2937 = vmatpush.msrb.mxu2 %v2924_v38  ;;  %v3133_v0 = vld [vmem:[#allocation11 + $0x210] sm:$0xff] }
 0x49b   : >> { %3054 = vmatpush.msrb.mxu3 %v3043_v12  ;;  %3148 = vmatpush.msrb.mxu0 %v3145_v22  ;;  %v3459_v38 = vld [vmem:[#allocation11 + $0x2f0] sm:$0xff]  ;;  %v3360_v22 = vld [vmem:[#allocation11 + $0x168] sm:$0xff] }
 0x49c   : >> { %2839 = vmatpush.msrb.mxu1 %v2826_v43  ;;  %2938 = vmatpush.msrb.mxu2 %v2923_v48  ;;  %v3243_v12 = vld [vmem:[#allocation11 + $0x3f0] sm:$0xff]  ;;  %v3132_v43 = vld [vmem:[#allocation11 + $0x208] sm:$0xff] }
 0x49d   : >> { %3055 = vmatpush.msrb.mxu3 %v3042_v60  ;;  %3149 = vmatpush.msrb.mxu0 %v3144_v33  ;;  %v3458_v48 = vld [vmem:[#allocation11 + $0x2e8] sm:$0xff]  ;;  %v3131_v60 = vld [vmem:[#allocation11 + $0x200] sm:$0xff] }
 0x49e   : >> { %2840 = vmatpush.msrb.mxu1 %v2825_v18  ;;  %2781 = vmatmul.f32.gmra.mxu2 %v6893_v5  ;;  %v3242_v33 = vld [vmem:[#allocation11 + $0x3e8] sm:$0xff] }
 0x49f   : >> { %2769 = vmatmul.f32.gmra.mxu1 %v6896_v45  ;;  %2939 = vmatpush.msrb.mxu2 %v2922_v10  ;;  %v3013_v18 = vld [vmem:[%s6865_s4 + $0x9] sm:$0xff]  ;;  %v3014_v10 = vld [vmem:[%s6865_s4 + $0x19] sm:$0xff] }
 0x4a0   : >> { %3056 = vmatpush.msrb.mxu3 %v3041_v52  ;;  %3150 = vmatpush.msrb.mxu0 %v3143_v27  ;;  %v3558_v52 = vld [vmem:[#allocation11 + $0x478] sm:$0xff]  ;;  %v3359_v27 = vld [vmem:[#allocation11 + $0x160] sm:$0xff] }
 0x4a1   : >> { %2841 = vmatpush.msrb.mxu1 %v2824_v1  ;;  %2754 = vmatmul.f32.gmra.mxu0 %v2700_v44  ;;  %v3457_v1 = vld [vmem:[#allocation11 + $0x2e0] sm:$0xff] }
 0x4a2   : >> { %2793 = vmatmul.f32.gmra.mxu3 %v6902_v59  ;;  %2940 = vmatpush.msrb.mxu2 %v2921_v9  ;;  %v3241_v44 = vld [vmem:[#allocation11 + $0x3e0] sm:$0xff]  ;;  %v3557_v9 = vld [vmem:[#allocation11 + $0x470] sm:$0xff] }
 0x4a3   : >> { %3057 = vmatpush.msrb.mxu3 %v3040_v28  ;;  %3151 = vmatpush.msrb.mxu0 %v3142_v58  ;;  %v3358_v28 = vld [vmem:[#allocation11 + $0x158] sm:$0xff] }
 0x4a4   : >> { %2842 = vmatpush.msrb.mxu1 %v2823_v20  ;;  %2941 = vmatpush.msrb.mxu2 %v2920_v13  ;;  %v3456_v58 = vld [vmem:[#allocation11 + $0x2d8] sm:$0xff]  ;;  %v3556_v13 = vld [vmem:[#allocation11 + $0x468] sm:$0xff] }
 0x4a5   : >> { %3058 = vmatpush.msrb.mxu3 %v3039_v4  ;;  %3152 = vmatpush.msrb.mxu0 %v3141_v37  ;;  %v3240_v20 = vld [vmem:[#allocation11 + $0x3d8] sm:$0xff]  ;;  %v3357_v4 = vld [vmem:[#allocation11 + $0x150] sm:$0xff]  ;;  %v3555_v37 = vld [vmem:[#allocation11 + $0x460] sm:$0xff] }
 0x4a6   : >> { %2843 = vmatpush.msrb.mxu1 %v2822_v39  ;;  %2942 = vmatpush.msrb.mxu2 %v2919_v24  ;;  %v3455_v39 = vld [vmem:[#allocation11 + $0x2d0] sm:$0xff]  ;;  %v3015_v24 = vld [vmem:[%s6865_s4 + $0x21] sm:$0xff] }
 0x4a7   : >> { %3059 = vmatpush.msrb.mxu3 %v3038_v35  ;;  %3153 = vmatpush.msrb.mxu0 %v3140_v30  ;;  %v3554_v35 = vld [vmem:[#allocation11 + $0x458] sm:$0xff]  ;;  %v3239_v30 = vld [vmem:[#allocation11 + $0x3d0] sm:$0xff] }
 0x4a8   : >> { %2844 = vmatpush.msrb.mxu1 %v2821_v15  ;;  %2784 = vmatmul.f32.gmra.mxu2 %v6906_v32  ;;  %v3356_v15 = vld [vmem:[#allocation11 + $0x148] sm:$0xff] }
 0x4a9   : >> { %2772 = vmatmul.f32.gmra.mxu1 %v6909_v21  ;;  %2943 = vmatpush.msrb.mxu2 %v2918_v34  ;;  %v3454_v34 = vld [vmem:[#allocation11 + $0x2c8] sm:$0xff] }
 0x4aa   : >> { %3060 = vmatpush.msrb.mxu3 %v3037_v61  ;;  %3154 = vmatpush.msrb.mxu0 %v3139_v7  ;;  %v3553_v61 = vld [vmem:[#allocation11 + $0x450] sm:$0xff]  ;;  %v3238_v7 = vld [vmem:[#allocation11 + $0x3c8] sm:$0xff] }
 0x4ab   : >> { %2845 = vmatpush.msrb.mxu1 %v2820_v16  ;;  %2757 = vmatmul.f32.gmra.mxu0 %v2701_v6  ;;  %v3355_v16 = vld [vmem:[#allocation11 + $0x140] sm:$0xff] }
 0x4ac   : >> { %2796 = vmatmul.f32.gmra.mxu3 %v6915_v17  ;;  %2944 = vmatpush.msrb.mxu2 %v2917_v36  ;;  %v3552_v36 = vld [vmem:[#allocation11 + $0x448] sm:$0xff] }
 0x4ad   : >> { %3061 = vmatpush.msrb.mxu3 %v3036_v31  ;;  %3155 = vmatpush.msrb.mxu0 %v3138_v42  ;;  %v3237_v31 = vld [vmem:[#allocation11 + $0x3c0] sm:$0xff] }
 0x4ae   : >> { %2846 = vmatpush.msrb.mxu1 %v2819_v2  ;;  %2945 = vmatpush.msrb.mxu2 %v2916_v19  ;;  %v6935_v42 = vld [vmem:[%s6865_s4 + $0x39] sm:$0xff] }
 0x4af   : >> { %3062 = vmatpush.msrb.mxu3 %v3035_v26  ;;  %3156 = vmatpush.msrb.mxu0 %v3137_v29  ;;  %v3354_v2 = vld [vmem:[#allocation11 + $0x138] sm:$0xff]  ;;  %v3551_v19 = vld [vmem:[#allocation11 + $0x440] sm:$0xff]  ;;  %v6942_v29 = vld [vmem:[%s6865_s4 + $0x49] sm:$0xff] }
 0x4b0   : >> { %2847 = vmatpush.msrb.mxu1 %v2818_v23  ;;  %2946 = vmatpush.msrb.mxu2 %v2915_v56  ;;  %v3236_v26 = vld [vmem:[#allocation11 + $0x3b8] sm:$0xff]  ;;  %v3451_v23 = vld [vmem:[#allocation11 + $0x2b0] sm:$0xff] }
 0x4b1   : >> { %3063 = vmatpush.msrb.mxu3 %v3034_v40  ;;  %3157 = vmatpush.msrb.mxu0 %v3136_v62  ;;  %v3550_v56 = vld [vmem:[#allocation11 + $0x438] sm:$0xff]  ;;  %v3235_v40 = vld [vmem:[#allocation11 + $0x3b0] sm:$0xff] }
 0x4b2   : >> { %2848 = vmatpush.msrb.mxu1 %v2817_v57  ;;  %2947 = vmatmul.f32.vlgmr.msrb.gmra.mxu2 %v6868_v53  ;;  %v6949_v62 = vld [vmem:[%s6865_s4 + $0x51] sm:$0xff]  ;;  %v3450_v57 = vld [vmem:[#allocation11 + $0x2a8] sm:$0xff] }
 0x4b3   : >> { %2849 = vmatmul.f32.vlgmr.msrb.gmra.mxu1 %v2701_v6  ;;  %3064 = vmatpush.msrb.mxu3 %v3033_v3  ;;  %v3453_v6 = vld [vmem:[#allocation11 + $0x2c0] sm:$0xff]  ;;  %v3549_v3 = vld [vmem:[#allocation11 + $0x430] sm:$0xff] }
 0x4b4   : >> { %3158 = vmatpush.msrb.mxu0 %v3135_v49  ;;  %3363 = vmatpush.msra.mxu2 %v3362_v63  ;;  %v3234_v49 = vld [vmem:[#allocation11 + $0x3a8] sm:$0xff] }
 0x4b5   : >> { %2760 = vmatmul.f32.gmra.mxu0 %v2702_v46  ;;  %3065 = vmatmul.f32.vlgmr.msrb.gmra.mxu3 %v3012_v14  ;;  %v6956_v63 = vld [vmem:[%s6865_s4 + $0x61] sm:$0xff] }
 0x4b6   : >> { %3159 = vmatpush.msrb.mxu0 %v3134_v41  ;;  %3461 = vmatpush.msra.mxu3 %v3460_v55  ;;  %v3548_v14 = vld [vmem:[#allocation11 + $0x428] sm:$0xff]  ;;  %v3233_v41 = vld [vmem:[#allocation11 + $0x3a0] sm:$0xff] }
 0x4b7   : >> { %3245 = vmatpush.msra.mxu1 %v3244_v25  ;;  %3364 = vmatpush.msra.mxu2 %v3361_v50  ;;  %v6963_v55 = vld [vmem:[%s6865_s4 + $0x69] sm:$0xff]  ;;  %v3448_v25 = vld [vmem:[#allocation11 + $0x298] sm:$0xff]  ;;  %v3547_v50 = vld [vmem:[#allocation11 + $0x420] sm:$0xff] }
 0x4b8   : >> { %3160 = vmatpush.msrb.mxu0 %v3133_v0  ;;  %3462 = vmatpush.msra.mxu3 %v3459_v38  ;;  %v3232_v0 = vld [vmem:[#allocation11 + $0x398] sm:$0xff] }
 0x4b9   : >> { %3246 = vmatpush.msra.mxu1 %v3243_v12  ;;  %3365 = vmatpush.msra.mxu2 %v3360_v22  ;;  %v6970_v38 = vld [vmem:[%s6865_s4 + $0x79] sm:$0xff]  ;;  %v3447_v12 = vld [vmem:[#allocation11 + $0x290] sm:$0xff] }
 0x4ba   : >> { %3161 = vmatpush.msrb.mxu0 %v3132_v43  ;;  %2950 = vmatmul.f32.gmra.mxu2 %v6884_v8  ;;  %v3546_v22 = vld [vmem:[#allocation11 + $0x418] sm:$0xff]  ;;  %v3231_v43 = vld [vmem:[#allocation11 + $0x390] sm:$0xff] }
 0x4bb   : >> { %2852 = vmatmul.f32.gmra.mxu1 %v2702_v46  ;;  %3463 = vmatpush.msra.mxu3 %v3458_v48  ;;  %v3449_v46 = vld [vmem:[#allocation11 + $0x2a0] sm:$0xff] }
 0x4bc   : >> { %3162 = vmatpush.msrb.mxu0 %v3131_v60  ;;  %3247 = vmatpush.msra.mxu1 %v3242_v33  ;;  %v6977_v48 = vld [vmem:[%s6865_s4 + $0x81] sm:$0xff]  ;;  %v3545_v33 = vld [vmem:[#allocation11 + $0x410] sm:$0xff] }
 0x4bd   : >> { %3068 = vmatmul.f32.gmra.mxu3 %v3013_v18  ;;  %3163 = vmatmul.f32.vlgmr.msrb.gmra.mxu0 %v3014_v10  ;;  %v3446_v60 = vld [vmem:[#allocation11 + $0x288] sm:$0xff] }
 0x4be   : >> { %3559 = vmatpush.msra.mxu0 %v3558_v52  ;;  %3366 = vmatpush.msra.mxu2 %v3359_v27  ;;  %v3230_v18 = vld [vmem:[#allocation11 + $0x388] sm:$0xff]  ;;  %v3445_v27 = vld [vmem:[#allocation11 + $0x280] sm:$0xff] }
 0x4bf   : >> { %3464 = vmatpush.msra.mxu3 %v3457_v1  ;;  %3248 = vmatpush.msra.mxu1 %v3241_v44  ;;  %v3544_v1 = vld [vmem:[#allocation11 + $0x408] sm:$0xff]  ;;  %v3229_v44 = vld [vmem:[#allocation11 + $0x380] sm:$0xff] }
 0x4c0   : >> { %3560 = vmatpush.msra.mxu0 %v3557_v9  ;;  %3367 = vmatpush.msra.mxu2 %v3358_v28  ;;  %v2715_v9 = vld [vmem:[%s6865_s4 + $0xc0] sm:$0xff] }
 0x4c1   : >> { %3465 = vmatpush.msra.mxu3 %v3456_v58  ;;  %3249 = vmatpush.msra.mxu1 %v3240_v20  ;;  %v6995_v58 = vld [vmem:[%s6865_s4 + $0x99] sm:$0xff] }
 0x4c2   : >> { %2953 = vmatmul.f32.gmra.mxu2 %v6896_v45  ;;  %3561 = vmatpush.msra.mxu0 %v3556_v13 }
 0x4c3   : >> { %2855 = vmatmul.f32.gmra.mxu1 %v6868_v53  ;;  %3368 = vmatpush.msra.mxu2 %v3357_v4  ;;  %v6929_v53 = vld [vmem:[%s6865_s4 + $0x31] sm:$0xff]  ;;  %v3543_v4 = vld [vmem:[#allocation11 + $0x400] sm:$0xff] }
 0x4c4   : >> { %3562 = vmatpush.msra.mxu0 %v3555_v37  ;;  %3466 = vmatpush.msra.mxu3 %v3455_v39  ;;  %v2716_v37 = vld [vmem:[%s6865_s4 + $0xc8] sm:$0xff] }
 0x4c5   : >> { %3071 = vmatmul.f32.gmra.mxu3 %v3014_v10  ;;  %3166 = vmatmul.f32.gmra.mxu0 %v3015_v24  ;;  %v6984_v10 = vld [vmem:[%s6865_s4 + $0x91] sm:$0xff] }
 0x4c6   : >> { %3563 = vmatpush.msra.mxu0 %v3554_v35  ;;  %3250 = vmatpush.msra.mxu1 %v3239_v30 }
 0x4c7   : >> { %3369 = vmatpush.msra.mxu2 %v3356_v15  ;;  %3467 = vmatpush.msra.mxu3 %v3454_v34  ;;  %v2717_v15 = vld [vmem:[%s6865_s4 + $0xd8] sm:$0xff]  ;;  %v7021_v34 = vld [vmem:[%s7610_s7] ss:$0 sm:$0xff] }
 0x4c8   : >> { %3564 = vmatpush.msra.mxu0 %v3553_v61  ;;  %3251 = vmatpush.msra.mxu1 %v3238_v7 }
 0x4c9   : >> { %3370 = vmatpush.msra.mxu2 %v3355_v16  ;;  %3468 = vmatpush.msra.mxu3 %v3453_v6 }
 0x4ca   : >> { %2956 = vmatmul.f32.gmra.mxu2 %v6909_v21  ;;  %3565 = vmatpush.msra.mxu0 %v3552_v36 }
 0x4cb   : >> { %2858 = vmatmul.f32.gmra.mxu1 %v6884_v8  ;;  %3371 = vmatpush.msra.mxu2 %v3354_v2  ;;  %v3452_v8 = vld [vmem:[#allocation11 + $0x2b8] sm:$0xff] }
 0x4cc   : >> { %3252 = vmatpush.msra.mxu1 %v3237_v31  ;;  %3469 = vmatpush.msra.mxu3 %v3452_v8  ;;  %v2718_v31 = vld [vmem:[%s6865_s4 + $0xe0] sm:$0xff] }
 0x4cd   : >> { %3074 = vmatmul.f32.gmra.mxu3 %v3015_v24  ;;  %3169 = vmatmul.f32.gmra.mxu0 %v6929_v53  ;;  %v7008_v24 = vld [vmem:[%s6865_s4 + $0xa9] sm:$0xff]  ;;  %v7038_v8 = vld [vmem:[%s6865_s4 + $0xc1] sm:$0xff] }
 0x4ce   : >> { %3566 = vmatpush.msra.mxu0 %v3551_v19  ;;  %3253 = vmatpush.msra.mxu1 %v3236_v26 }
 0x4cf   : >> { %3470 = vmatpush.msra.mxu3 %v3451_v23  ;;  %v3326_v23 = vld [vmem:[%s6865_s4 + $0x2] sm:$0xff] }
 0x4d0   : >> { %3567 = vmatpush.msra.mxu0 %v3550_v56  ;;  %3254 = vmatpush.msra.mxu1 %v3235_v40 }
 0x4d1   : >> { %3471 = vmatpush.msra.mxu3 %v3450_v57 }
 0x4d2   : >> { %2959 = vmatmul.f32.gmra.mxu2 %v6871_v11  ;;  %3568 = vmatpush.msra.mxu0 %v3549_v3  ;;  %v7051_v3 = vld [vmem:[%s6865_s4 + $0xc9] sm:$0xff] }
 0x4d3   : >> { %2861 = vmatmul.f32.gmra.mxu1 %v6896_v45  ;;  %v3353_v45 = vld [vmem:[#allocation11 + $0x130] sm:$0xff]  ;;  %3472 = vmatpush.msra.mxu3 %v3449_v46 }
 0x4d4   : >> { %3372 = vmatpush.msra.mxu2 %v3353_v45  ;;  %3255 = vmatpush.msra.mxu1 %v3234_v49  ;;  %v3328_v49 = vld [vmem:[%s6865_s4 + $0x1a] sm:$0xff] }
 0x4d5   : >> { %3077 = vmatmul.f32.gmra.mxu3 %v6929_v53  ;;  %3172 = vmatmul.f32.gmra.mxu0 %v6935_v42 }
 0x4d6   : >> { %3569 = vmatpush.msra.mxu0 %v3548_v14  ;;  %3256 = vmatpush.msra.mxu1 %v3233_v41  ;;  %v3327_v41 = vld [vmem:[%s6865_s4 + $0xa] sm:$0xff] }
 0x4d7   : >> { %3473 = vmatpush.msra.mxu3 %v3448_v25 }
 0x4d8   : >> { %3570 = vmatpush.msra.mxu0 %v3547_v50  ;;  %3257 = vmatpush.msra.mxu1 %v3232_v0 }
 0x4d9   : >> { %3474 = vmatpush.msra.mxu3 %v3447_v12  ;;  %v3329_v12 = vld [vmem:[%s6865_s4 + $0x22] sm:$0xff] }
 0x4da   : >> { %2962 = vmatmul.f32.gmra.mxu2 %v6881_v47  ;;  %3571 = vmatpush.msra.mxu0 %v3546_v22  ;;  %v3330_v22 = vld [vmem:[%s6865_s4 + $0x32] sm:$0xff] }
 0x4db   : >> { %2864 = vmatmul.f32.gmra.mxu1 %v6909_v21  ;;  %v3352_v21 = vld [vmem:[#allocation11 + $0x128] sm:$0xff]  ;;  %3475 = vmatpush.msra.mxu3 %v3446_v60 }
 0x4dc   : >> { %3373 = vmatpush.msra.mxu2 %v3352_v21  ;;  %3258 = vmatpush.msra.mxu1 %v3231_v43 }
 0x4dd   : >> { %3080 = vmatmul.f32.gmra.mxu3 %v6935_v42  ;;  %3175 = vmatmul.f32.gmra.mxu0 %v6942_v29 }
 0x4de   : >> { %3572 = vmatpush.msra.mxu0 %v3545_v33  ;;  %3259 = vmatpush.msra.mxu1 %v3230_v18 }
 0x4df   : >> { %3476 = vmatpush.msra.mxu3 %v3445_v27 }
 0x4e0   : >> { %3573 = vmatpush.msra.mxu0 %v3544_v1  ;;  %3260 = vmatpush.msra.mxu1 %v3229_v44  ;;  %v3331_v1 = vld [vmem:[%s6865_s4 + $0x3a] sm:$0xff] }
 0x4e2   : >> { %2965 = vmatmul.f32.gmra.mxu2 %v6893_v5  ;;  %3574 = vmatpush.msra.mxu0 %v3543_v4 }
 0x4e3   : >> { %2867 = vmatmul.f32.gmra.mxu1 %v6871_v11  ;;  %v3351_v11 = vld [vmem:[#allocation11 + $0x120] sm:$0xff] }
 0x4e4   : >> { %3374 = vmatpush.msra.mxu2 %v3351_v11 }
 0x4e5   : >> { %3083 = vmatmul.f32.gmra.mxu3 %v6942_v29  ;;  %3178 = vmatmul.f32.gmra.mxu0 %v6949_v62 }
 0x4ea   : >> { %2968 = vmatmul.f32.gmra.mxu2 %v6906_v32 }
 0x4eb   : >> { %2870 = vmatmul.f32.gmra.mxu1 %v6881_v47  ;;  %v3350_v47 = vld [vmem:[#allocation11 + $0x118] sm:$0xff] }
 0x4ec   : >> { %3375 = vmatpush.msra.mxu2 %v3350_v47 }
 0x4ed   : >> { %3086 = vmatmul.f32.gmra.mxu3 %v6949_v62  ;;  %3181 = vmatmul.f32.gmra.mxu0 %v6956_v63 }
 0x4f2   : >> { %2971 = vmatmul.f32.gmra.mxu2 %v6874_v54 }
 0x4f3   : >> { %2873 = vmatmul.f32.gmra.mxu1 %v6893_v5  ;;  %v3349_v5 = vld [vmem:[#allocation11 + $0x110] sm:$0xff] }
 0x4f4   : >> { %3376 = vmatpush.msra.mxu2 %v3349_v5 }
 0x4f5   : >> { %3089 = vmatmul.f32.gmra.mxu3 %v6956_v63  ;;  %3184 = vmatmul.f32.gmra.mxu0 %v6963_v55 }
 0x4fa   : >> { %2974 = vmatmul.f32.gmra.mxu2 %v6888_v51 }
 0x4fb   : >> { %2876 = vmatmul.f32.gmra.mxu1 %v6906_v32  ;;  %v3348_v32 = vld [vmem:[#allocation11 + $0x108] sm:$0xff] }
 0x4fc   : >> { %3377 = vmatpush.msra.mxu2 %v3348_v32 }
 0x4fd   : >> { %3092 = vmatmul.f32.gmra.mxu3 %v6963_v55  ;;  %3187 = vmatmul.f32.gmra.mxu0 %v6970_v38 }
 0x502   : >> { %2977 = vmatmul.f32.gmra.mxu2 %v6902_v59 }
 0x503   : >> { %2879 = vmatmul.f32.gmra.mxu1 %v6874_v54  ;;  %v3347_v54 = vld [vmem:[#allocation11 + $0x100] sm:$0xff] }
 0x504   : >> { %3378 = vmatpush.msra.mxu2 %v3347_v54 }
 0x505   : >> { %3095 = vmatmul.f32.gmra.mxu3 %v6970_v38  ;;  %3190 = vmatmul.f32.gmra.mxu0 %v6977_v48 }
 0x50a   : >> { %2980 = vmatmul.f32.gmra.mxu2 %v6915_v17  ;;  %v6986_v52 = vpop.f32.mrf.mxu1 }
 0x50b   : >> { %2882 = vmatmul.f32.gmra.mxu1 %v6888_v51 }
 0x50d   : >> { %3098 = vmatmul.f32.gmra.mxu3 %v6977_v48  ;;  %3193 = vmatmul.f32.gmra.mxu0 %v6984_v10 }
 0x510   : >> { %v6992_v28 = vpop.f32.mrf.mxu2  ;;  %v2752_v13 = vpop.f32.mrf.mxu0 }
 0x511   : >> { %v2800_v21 = vadd.f32 %v7021_v34, %v2752_v13 }
 0x512   : >> { %2983 = vmatmul.f32.gmra.mxu2 %v2715_v9  ;;  %v6997_v51 = vpop.f32.mrf.mxu3 }
 0x513   : >> { %2885 = vmatmul.f32.gmra.mxu1 %v6902_v59  ;;  %v7000_v20 = vpop.f32.mrf.mxu1 }
 0x515   : >> { %3101 = vmatmul.f32.gmra.mxu3 %v6984_v10  ;;  %3196 = vmatmul.f32.gmra.mxu0 %v6995_v58 }
 0x518   : >> { %v7005_v39 = vpop.f32.mrf.mxu2 }
 0x51a   : >> { %2986 = vmatmul.f32.gmra.mxu2 %v2716_v37 }
 0x51b   : >> { %2888 = vmatmul.f32.gmra.mxu1 %v6915_v17  ;;  %v7011_v59 = vpop.f32.mrf.mxu3  ;;  %v7024_v17 = vld [vmem:[%s6865_s4 + $0xb1] sm:$0xff] }
 0x51c   : >> { %v7013_v35 = vpop.f32.mrf.mxu1 }
 0x51d   : >> { %3104 = vmatmul.f32.gmra.mxu3 %v6995_v58  ;;  %3199 = vmatmul.f32.gmra.mxu0 %v7008_v24 }
 0x51e   : >> { %v2755_v30 = vpop.f32.mrf.mxu0 }
 0x51f   : >> { %v2801_v0 = vadd.f32 %v7021_v34, %v2755_v30 }
 0x521   : >> { %v2782_v61 = vpop.f32.mrf.mxu2 }
 0x522   : >> { %2989 = vmatmul.f32.gmra.mxu2 %v2717_v15  ;;  %v7027_v7 = vadd.f32 %v7021_v34, %v2782_v61  ;;  %v3332_v61 = vld [vmem:[%s6865_s4 + $0x4a] sm:$0xff] }
 0x523   : >> { %2891 = vmatmul.f32.gmra.mxu1 %v2715_v9 }
 0x525   : >> { %3107 = vmatmul.f32.gmra.mxu3 %v7008_v24  ;;  %3202 = vmatmul.f32.gmra.mxu0 %v7024_v17  ;;  %v2794_v16 = vpop.f32.mrf.mxu3 }
 0x526   : >> { %v7031_v6 = vpop.f32.mrf.mxu1  ;;  %v7034_v36 = vadd.f32 %v7021_v34, %v2794_v16 }
 0x528   : >> { %v2758_v2 = vpop.f32.mrf.mxu0 }
 0x529   : >> { %v2802_v54 = vadd.f32 %v7021_v34, %v2758_v2 }
 0x52a   : >> { %2992 = vmatmul.f32.gmra.mxu2 %v2718_v31 }
 0x52b   : >> { %2894 = vmatmul.f32.gmra.mxu1 %v2716_v37  ;;  %v2785_v19 = vpop.f32.mrf.mxu2 }
 0x52c   : >> { %v7041_v26 = vadd.f32 %v7021_v34, %v2785_v19 }
 0x52d   : >> { %3110 = vmatmul.f32.gmra.mxu3 %v7024_v17  ;;  %3205 = vmatmul.f32.gmra.mxu0 %v7038_v8 }
 0x52f   : >> { %v2797_v45 = vpop.f32.mrf.mxu3 }
 0x530   : >> { %v7047_v56 = vadd.f32 %v7021_v34, %v2797_v45  ;;  %v2850_v40 = vpop.f32.mrf.mxu1 }
 0x531   : >> { %v2898_v11 = vadd.f32 %v2850_v40, %v2800_v21  ;;  %v3333_v21 = vld [vmem:[%s6865_s4 + $0x52] sm:$0xff] }
 0x532   : >> { %v2761_v57 = vpop.f32.mrf.mxu0  ;;  %3379 = vmatmul.f32.vlgmr.msra.gmra.mxu2 %v3326_v23  ;;  %v2804_v23 = vadd.f32 %v7021_v34, %v6986_v52 }
 0x533   : >> { %3261 = vmatmul.f32.vlgmr.msra.gmra.mxu1 %v6929_v53  ;;  %v2803_v30 = vadd.f32 %v7021_v34, %v2761_v57 }
 0x535   : >> { %3208 = vmatmul.f32.gmra.mxu0 %v7051_v3  ;;  %3477 = vmatmul.f32.vlgmr.msra.gmra.mxu3 %v3328_v49  ;;  %v2948_v46 = vpop.f32.mrf.mxu2 }
 0x536   : >> { %v2996_v14 = vadd.f32 %v2948_v46, %v2898_v11 }
 0x538   : >> { %v2853_v47 = vpop.f32.mrf.mxu1  ;;  %v3066_v25 = vpop.f32.mrf.mxu3 }
 0x539   : >> { %v7057_v50 = vadd.f32 %v3066_v25, %v2996_v14  ;;  %v2899_v53 = vadd.f32 %v2853_v47, %v2801_v0  ;;  %v3334_v47 = vld [vmem:[%s6865_s4 + $0x62] sm:$0xff] }
 0x53a   : >> { %v7060_v5 = vpop.f32.mrf.mxu0  ;;  %3382 = vmatmul.f32.gmra.mxu2 %v3327_v41  ;;  %v2805_v41 = vadd.f32 %v7021_v34, %v7000_v20 }
 0x53b   : >> { %3264 = vmatmul.f32.gmra.mxu1 %v6935_v42 }
 0x53d   : >> { %3480 = vmatmul.f32.gmra.mxu3 %v3329_v12  ;;  %3575 = vmatmul.f32.vlgmr.msra.gmra.mxu0 %v3330_v22  ;;  %v2951_v43 = vpop.f32.mrf.mxu2 }
 0x53e   : >> { %v2997_v32 = vadd.f32 %v2951_v43, %v2899_v53  ;;  %v2806_v43 = vadd.f32 %v7021_v34, %v7013_v35 }
 0x540   : >> { %v2856_v60 = vpop.f32.mrf.mxu1  ;;  %v3069_v33 = vpop.f32.mrf.mxu3 }
 0x541   : >> { %v7065_v18 = vadd.f32 %v3069_v33, %v2997_v32  ;;  %v2900_v44 = vadd.f32 %v2856_v60, %v2802_v54  ;;  %v3335_v32 = vld [vmem:[%s6865_s4 + $0x6a] sm:$0xff] }
 0x542   : >> { %v7068_v27 = vpop.f32.mrf.mxu0  ;;  %3385 = vmatmul.f32.gmra.mxu2 %v3328_v49 }
 0x543   : >> { %3267 = vmatmul.f32.gmra.mxu1 %v6942_v29 }
 0x545   : >> { %3483 = vmatmul.f32.gmra.mxu3 %v3330_v22  ;;  %3578 = vmatmul.f32.gmra.mxu0 %v3331_v1  ;;  %v2954_v42 = vpop.f32.mrf.mxu2 }
 0x546   : >> { %v2998_v9 = vadd.f32 %v2954_v42, %v2900_v44  ;;  %v2807_v42 = vadd.f32 %v7021_v34, %v7031_v6 }
 0x548   : >> { %v2859_v13 = vpop.f32.mrf.mxu1  ;;  %v3072_v4 = vpop.f32.mrf.mxu3 }
 0x549   : >> { %v7072_v37 = vadd.f32 %v3072_v4, %v2998_v9  ;;  %v2901_v16 = vadd.f32 %v2859_v13, %v2803_v30  ;;  %v3336_v9 = vld [vmem:[%s6865_s4 + $0x7a] sm:$0xff]  ;;  %v2808_v30 = vadd.f32 %v7021_v34, %v6992_v28 }
 0x54a   : >> { %v7075_v15 = vpop.f32.mrf.mxu0  ;;  %3388 = vmatmul.f32.gmra.mxu2 %v3329_v12 }
 0x54b   : >> { %3270 = vmatmul.f32.gmra.mxu1 %v6949_v62 }
 0x54d   : >> { %3486 = vmatmul.f32.gmra.mxu3 %v3331_v1  ;;  %3581 = vmatmul.f32.gmra.mxu0 %v3332_v61  ;;  %v2957_v29 = vpop.f32.mrf.mxu2 }
 0x54e   : >> { %v2999_v31 = vadd.f32 %v2957_v29, %v2901_v16 }
 0x550   : >> { %v2862_v2 = vpop.f32.mrf.mxu1  ;;  %v3075_v19 = vpop.f32.mrf.mxu3 }
 0x551   : >> { %v7079_v45 = vadd.f32 %v3075_v19, %v2999_v31  ;;  %v2902_v62 = vadd.f32 %v2862_v2, %v2804_v23  ;;  %v3337_v2 = vld [vmem:[%s6865_s4 + $0x82] sm:$0xff]  ;;  %v2809_v23 = vadd.f32 %v7021_v34, %v7005_v39 }
 0x552   : >> { %v7083_v40 = vpop.f32.mrf.mxu0  ;;  %3391 = vmatmul.f32.gmra.mxu2 %v3330_v22 }
 0x553   : >> { %3273 = vmatmul.f32.gmra.mxu1 %v6956_v63 }
 0x555   : >> { %3489 = vmatmul.f32.gmra.mxu3 %v3332_v61  ;;  %3584 = vmatmul.f32.gmra.mxu0 %v3333_v21  ;;  %v2960_v57 = vpop.f32.mrf.mxu2 }
 0x556   : >> { %v3000_v49 = vadd.f32 %v2960_v57, %v2902_v62 }
 0x558   : >> { %v2865_v11 = vpop.f32.mrf.mxu1  ;;  %v3078_v46 = vpop.f32.mrf.mxu3 }
 0x559   : >> { %v7087_v14 = vadd.f32 %v3078_v46, %v3000_v49  ;;  %v2903_v63 = vadd.f32 %v2865_v11, %v2805_v41  ;;  %v3338_v11 = vld [vmem:[%s6865_s4 + $0x92] sm:$0xff] }
 0x55a   : >> { %v7091_v52 = vpop.f32.mrf.mxu0  ;;  %3394 = vmatmul.f32.gmra.mxu2 %v3331_v1 }
 0x55b   : >> { %3276 = vmatmul.f32.gmra.mxu1 %v6963_v55 }
 0x55d   : >> { %3492 = vmatmul.f32.gmra.mxu3 %v3333_v21  ;;  %3587 = vmatmul.f32.gmra.mxu0 %v3334_v47  ;;  %v2963_v25 = vpop.f32.mrf.mxu2 }
 0x55e   : >> { %v3001_v0 = vadd.f32 %v2963_v25, %v2903_v63 }
 0x560   : >> { %v2868_v12 = vpop.f32.mrf.mxu1  ;;  %v3081_v22 = vpop.f32.mrf.mxu3 }
 0x561   : >> { %v7095_v53 = vadd.f32 %v3081_v22, %v3001_v0  ;;  %v2904_v55 = vadd.f32 %v2868_v12, %v2806_v43  ;;  %v3339_v12 = vld [vmem:[%s6865_s4 + $0x9a] sm:$0xff] }
 0x562   : >> { %v7099_v20 = vpop.f32.mrf.mxu0  ;;  %3397 = vmatmul.f32.gmra.mxu2 %v3332_v61 }
 0x563   : >> { %3279 = vmatmul.f32.gmra.mxu1 %v6970_v38 }
 0x565   : >> { %3495 = vmatmul.f32.gmra.mxu3 %v3334_v47  ;;  %3590 = vmatmul.f32.gmra.mxu0 %v3335_v32  ;;  %v2966_v60 = vpop.f32.mrf.mxu2 }
 0x566   : >> { %v3002_v33 = vadd.f32 %v2966_v60, %v2904_v55 }
 0x568   : >> { %v2871_v54 = vpop.f32.mrf.mxu1  ;;  %v3084_v1 = vpop.f32.mrf.mxu3 }
 0x569   : >> { %v7103_v44 = vadd.f32 %v3084_v1, %v3002_v33  ;;  %v2905_v38 = vadd.f32 %v2871_v54, %v2807_v42 }
 0x56a   : >> { %v7107_v35 = vpop.f32.mrf.mxu0  ;;  %3400 = vmatmul.f32.gmra.mxu2 %v3333_v21 }
 0x56b   : >> { %3282 = vmatmul.f32.gmra.mxu1 %v6977_v48 }
 0x56d   : >> { %3498 = vmatmul.f32.gmra.mxu3 %v3335_v32  ;;  %3593 = vmatmul.f32.gmra.mxu0 %v3336_v9  ;;  %v2969_v13 = vpop.f32.mrf.mxu2 }
 0x56e   : >> { %v3003_v4 = vadd.f32 %v2969_v13, %v2905_v38 }
 0x570   : >> { %v2874_v61 = vpop.f32.mrf.mxu1  ;;  %v3087_v16 = vpop.f32.mrf.mxu3 }
 0x571   : >> { %v2906_v29 = vadd.f32 %v2874_v61, %v2808_v30  ;;  %v7113_v31 = vadd.f32 %v3087_v16, %v3003_v4  ;;  %v3341_v61 = vld [vmem:[%s6865_s4 + $0xb2] sm:$0xff] }
 0x572   : >> { %v7115_v6 = vpop.f32.mrf.mxu0  ;;  %3403 = vmatmul.f32.gmra.mxu2 %v3334_v47 }
 0x573   : >> { %3285 = vmatmul.f32.gmra.mxu1 %v6984_v10 }
 0x575   : >> { %3501 = vmatmul.f32.gmra.mxu3 %v3336_v9  ;;  %3596 = vmatmul.f32.gmra.mxu0 %v3337_v2  ;;  %v2972_v48 = vpop.f32.mrf.mxu2 }
 0x576   : >> { %v3004_v19 = vadd.f32 %v2972_v48, %v2906_v29 }
 0x578   : >> { %v2877_v28 = vpop.f32.mrf.mxu1  ;;  %v3090_v21 = vpop.f32.mrf.mxu3 }
 0x579   : >> { %v2907_v62 = vadd.f32 %v2877_v28, %v2809_v23  ;;  %v3122_v57 = vadd.f32 %v3090_v21, %v3004_v19  ;;  %v3342_v21 = vld [vmem:[%s6865_s4 + $0xc2] sm:$0xff] }
 0x57a   : >> { %v3188_v49 = vpop.f32.mrf.mxu0  ;;  %3406 = vmatmul.f32.gmra.mxu2 %v3335_v32 }
 0x57b   : >> { %v7122_v46 = vadd.f32 %v3188_v49, %v3122_v57  ;;  %3288 = vmatmul.f32.gmra.mxu1 %v6995_v58 }
 0x57d   : >> { %3504 = vmatmul.f32.gmra.mxu3 %v3337_v2  ;;  %3599 = vmatmul.f32.gmra.mxu0 %v3338_v11  ;;  %v2975_v10 = vpop.f32.mrf.mxu2 }
 0x57e   : >> { %v3005_v41 = vadd.f32 %v2975_v10, %v2907_v62 }
 0x580   : >> { %v2880_v47 = vpop.f32.mrf.mxu1  ;;  %v3093_v63 = vpop.f32.mrf.mxu3 }
 0x581   : >> { %v2908_v39 = vadd.f32 %v2880_v47, %v7027_v7  ;;  %v3123_v25 = vadd.f32 %v3093_v63, %v3005_v41  ;;  %v3340_v7 = vld [vmem:[%s6865_s4 + $0xaa] sm:$0xff] }
 0x582   : >> { %v3191_v0 = vpop.f32.mrf.mxu0  ;;  %3409 = vmatmul.f32.gmra.mxu2 %v3336_v9  ;;  %v2812_v9 = vadd.f32 %v7021_v34, %v6997_v51  ;;  %v3343_v47 = vld [vmem:[%s6865_s4 + $0xca] sm:$0xff] }
 0x583   : >> { %v7127_v22 = vadd.f32 %v3191_v0, %v3123_v25  ;;  %3291 = vmatmul.f32.gmra.mxu1 %v7008_v24 }
 0x585   : >> { %3507 = vmatmul.f32.gmra.mxu3 %v3338_v11  ;;  %3602 = vmatmul.f32.gmra.mxu0 %v3339_v12  ;;  %v2978_v58 = vpop.f32.mrf.mxu2 }
 0x586   : >> { %v3006_v43 = vadd.f32 %v2978_v58, %v2908_v39 }
 0x588   : >> { %v2883_v32 = vpop.f32.mrf.mxu1  ;;  %v3096_v55 = vpop.f32.mrf.mxu3 }
 0x589   : >> { %v2909_v60 = vadd.f32 %v2883_v32, %v7041_v26  ;;  %v3124_v33 = vadd.f32 %v3096_v55, %v3006_v43  ;;  %v3344_v32 = vld [vmem:[%s6865_s4 + $0xda] sm:$0xff] }
 0x58a   : >> { %v3194_v54 = vpop.f32.mrf.mxu0  ;;  %3412 = vmatmul.f32.gmra.mxu2 %v3337_v2  ;;  %v2813_v2 = vadd.f32 %v7021_v34, %v7011_v59  ;;  %v3030_v34 = vld [vmem:[%s6865_s4 + $0xd9] sm:$0xff] }
 0x58b   : >> { %v7132_v1 = vadd.f32 %v3194_v54, %v3124_v33  ;;  %3294 = vmatmul.f32.gmra.mxu1 %v7024_v17 }
 0x58d   : >> { %3510 = vmatmul.f32.gmra.mxu3 %v3339_v12  ;;  %3605 = vmatmul.f32.gmra.mxu0 %v3340_v7  ;;  %v2981_v24 = vpop.f32.mrf.mxu2 }
 0x58e   : >> { %v3007_v42 = vadd.f32 %v2981_v24, %v2909_v60 }
 0x590   : >> { %v2886_v38 = vpop.f32.mrf.mxu1  ;;  %v3099_v13 = vpop.f32.mrf.mxu3 }
 0x591   : >> { %v2910_v4 = vadd.f32 %v2886_v38, %v2812_v9  ;;  %v3125_v26 = vadd.f32 %v3099_v13, %v3007_v42  ;;  %v3212_v42 = vadd.f32 %v7060_v5, %v7057_v50 }
 0x592   : >> { %v3197_v30 = vpop.f32.mrf.mxu0  ;;  %3415 = vmatmul.f32.gmra.mxu2 %v3338_v11 }
 0x593   : >> { %v7138_v16 = vadd.f32 %v3197_v30, %v3125_v26  ;;  %3297 = vmatmul.f32.gmra.mxu1 %v7038_v8 }
 0x595   : >> { %3513 = vmatmul.f32.gmra.mxu3 %v3340_v7  ;;  %3608 = vmatmul.f32.gmra.mxu0 %v3341_v61  ;;  %v2984_v17 = vpop.f32.mrf.mxu2 }
 0x596   : >> { %v3008_v29 = vadd.f32 %v2984_v17, %v2910_v4 }
 0x598   : >> { %v2889_v51 = vpop.f32.mrf.mxu1  ;;  %v3102_v48 = vpop.f32.mrf.mxu3 }
 0x599   : >> { %v2911_v19 = vadd.f32 %v2889_v51, %v2813_v2  ;;  %v3126_v23 = vadd.f32 %v3102_v48, %v3008_v29  ;;  %v3213_v29 = vadd.f32 %v7068_v27, %v7065_v18 }
 0x59a   : >> { %v3200_v28 = vpop.f32.mrf.mxu0  ;;  %3418 = vmatmul.f32.gmra.mxu2 %v3339_v12  ;;  %v3031_v12 = vld [vmem:[%s6865_s4 + $0xe1] sm:$0xff] }
 0x59b   : >> { %v7144_v62 = vadd.f32 %v3200_v28, %v3126_v23  ;;  %3300 = vmatmul.f32.gmra.mxu1 %v7051_v3 }
 0x59d   : >> { %3516 = vmatmul.f32.gmra.mxu3 %v3341_v61  ;;  %3611 = vmatmul.f32.gmra.mxu0 %v3342_v21  ;;  %v2987_v8 = vpop.f32.mrf.mxu2 }
 0x59e   : >> { %v3009_v57 = vadd.f32 %v2987_v8, %v2911_v19  ;;  %v3214_v8 = vadd.f32 %v7075_v15, %v7072_v37 }
 0x5a0   : >> { %v2892_v49 = vpop.f32.mrf.mxu1  ;;  %v3105_v59 = vpop.f32.mrf.mxu3 }
 0x5a1   : >> { %v2912_v11 = vadd.f32 %v2892_v49, %v7034_v36  ;;  %v3127_v10 = vadd.f32 %v3105_v59, %v3009_v57 }
 0x5a2   : >> { %v3203_v41 = vpop.f32.mrf.mxu0  ;;  %3421 = vmatmul.f32.gmra.mxu2 %v3340_v7 }
 0x5a3   : >> { %v7150_v63 = vadd.f32 %v3203_v41, %v3127_v10  ;;  %3303 = vmatmul.f32.gmra.mxu1 %v3030_v34 }
 0x5a5   : >> { %3519 = vmatmul.f32.gmra.mxu3 %v3342_v21  ;;  %3614 = vmatmul.f32.gmra.mxu0 %v3343_v47  ;;  %v2990_v3 = vpop.f32.mrf.mxu2 }
 0x5a6   : >> { %v3010_v39 = vadd.f32 %v2990_v3, %v2912_v11 }
 0x5a8   : >> { %v2895_v25 = vpop.f32.mrf.mxu1  ;;  %v3108_v0 = vpop.f32.mrf.mxu3 }
 0x5a9   : >> { %v2913_v58 = vadd.f32 %v2895_v25, %v7047_v56  ;;  %v3128_v43 = vadd.f32 %v3108_v0, %v3010_v39  ;;  %v3345_v56 = vld [vmem:[%s6865_s4 + $0xe2] sm:$0xff] }
 0x5aa   : >> { %v3206_v36 = vpop.f32.mrf.mxu0  ;;  %3424 = vmatmul.f32.gmra.mxu2 %v3341_v61 }
 0x5ab   : >> { %v7155_v55 = vadd.f32 %v3206_v36, %v3128_v43  ;;  %3306 = vmatmul.f32.gmra.mxu1 %v3031_v12  ;;  %v3216_v36 = vadd.f32 %v7091_v52, %v7087_v14 }
 0x5ad   : >> { %3522 = vmatmul.f32.gmra.mxu3 %v3343_v47  ;;  %3617 = vmatmul.f32.gmra.mxu0 %v3344_v32  ;;  %v2993_v60 = vpop.f32.mrf.mxu2  ;;  %v3215_v47 = vadd.f32 %v7083_v40, %v7079_v45 }
 0x5ae   : >> { %v3011_v33 = vadd.f32 %v2993_v60, %v2913_v58 }
 0x5b0   : >> { %v3111_v54 = vpop.f32.mrf.mxu3  ;;  %v3262_v7 = vpop.f32.mrf.mxu1 }
 0x5b1   : >> { %v3129_v24 = vadd.f32 %v3111_v54, %v3011_v33  ;;  %v3310_v13 = vadd.f32 %v3262_v7, %v3212_v42 }
 0x5b2   : >> { %v3209_v9 = vpop.f32.mrf.mxu0 }
 0x5b3   : >> { %v7160_v38 = vadd.f32 %v3209_v9, %v3129_v24  ;;  %v3217_v9 = vadd.f32 %v7099_v20, %v7095_v53 }
 0x5b5   : >> { %3620 = vmatmul.f32.gmra.mxu0 %v3345_v56  ;;  %v3380_v4 = vpop.f32.mrf.mxu2 }
 0x5b6   : >> { %v3428_v26 = vadd.f32 %v3380_v4, %v3310_v13 }
 0x5b8   : >> { %v3265_v30 = vpop.f32.mrf.mxu1  ;;  %v3478_v61 = vpop.f32.mrf.mxu3 }
 0x5b9   : >> { %v3526_v17 = vadd.f32 %v3478_v61, %v3428_v26  ;;  %v3311_v48 = vadd.f32 %v3265_v30, %v3213_v29  ;;  %v3218_v29 = vadd.f32 %v7107_v35, %v7103_v44 }
 0x5ba   : >> { %v3576_v2 = vpop.f32.mrf.mxu0 }
 0x5bb   : >> { %v3624_v51 = vadd.f32 %v3576_v2, %v3526_v17 }
 0x5bd   : >> { %v3640_v50 = vmax.f32 %v3624_v51, 0.0  ;;  %v3383_v5 = vpop.f32.mrf.mxu2 }
 0x5be   : >> { %v3429_v19 = vadd.f32 %v3383_v5, %v3311_v48 }
 0x5bf   : >> { %5041 = vst [vmem:[%s6865_s4 + $0x1c9] sm:$0xff] %v3640_v50 }
 0x5c0   : >> { %v3268_v23 = vpop.f32.mrf.mxu1  ;;  %v3481_v28 = vpop.f32.mrf.mxu3 }
 0x5c1   : >> { %v3527_v21 = vadd.f32 %v3481_v28, %v3429_v19  ;;  %v3312_v59 = vadd.f32 %v3268_v23, %v3214_v8  ;;  %v3219_v28 = vadd.f32 %v7115_v6, %v7113_v31 }
 0x5c2   : >> { %v3579_v57 = vpop.f32.mrf.mxu0 }
 0x5c3   : >> { %v3625_v49 = vadd.f32 %v3579_v57, %v3527_v21 }
 0x5c5   : >> { %v3641_v34 = vmax.f32 %v3625_v49, 0.0  ;;  %v3386_v18 = vpop.f32.mrf.mxu2 }
 0x5c6   : >> { %v3430_v27 = vadd.f32 %v3386_v18, %v3312_v59 }
 0x5c7   : >> { %5042 = vst [vmem:[%s6865_s4 + $0x1d1] sm:$0xff] %v3641_v34 }
 0x5c8   : >> { %v3271_v11 = vpop.f32.mrf.mxu1  ;;  %v3484_v10 = vpop.f32.mrf.mxu3 }
 0x5c9   : >> { %v3528_v41 = vadd.f32 %v3484_v10, %v3430_v27  ;;  %v3313_v25 = vadd.f32 %v3271_v11, %v3215_v47 }
 0x5ca   : >> { %v3582_v3 = vpop.f32.mrf.mxu0 }
 0x5cb   : >> { %v3626_v39 = vadd.f32 %v3582_v3, %v3528_v41 }
 0x5cd   : >> { %v3642_v0 = vmax.f32 %v3626_v39, 0.0  ;;  %v3389_v37 = vpop.f32.mrf.mxu2 }
 0x5ce   : >> { %v3431_v15 = vadd.f32 %v3389_v37, %v3313_v25 }
 0x5cf   : >> { %5043 = vst [vmem:[%s6865_s4 + $0x1e1] sm:$0xff] %v3642_v0 }
 0x5d0   : >> { %v3274_v12 = vpop.f32.mrf.mxu1  ;;  %v3487_v58 = vpop.f32.mrf.mxu3 }
 0x5d1   : >> { %v3529_v43 = vadd.f32 %v3487_v58, %v3431_v15  ;;  %v3314_v33 = vadd.f32 %v3274_v12, %v3216_v36 }
 0x5d2   : >> { %v3585_v32 = vpop.f32.mrf.mxu0 }
 0x5d3   : >> { %v3627_v60 = vadd.f32 %v3585_v32, %v3529_v43 }
 0x5d5   : >> { %v3643_v54 = vmax.f32 %v3627_v60, 0.0  ;;  %v3392_v45 = vpop.f32.mrf.mxu2 }
 0x5d6   : >> { %v3432_v40 = vadd.f32 %v3392_v45, %v3314_v33 }
 0x5d7   : >> { %5044 = vst [vmem:[%s6865_s4 + $0x1e9] sm:$0xff] %v3643_v54 }
 0x5d8   : >> { %v3277_v7 = vpop.f32.mrf.mxu1  ;;  %v3490_v24 = vpop.f32.mrf.mxu3 }
 0x5d9   : >> { %v3530_v42 = vadd.f32 %v3490_v24, %v3432_v40  ;;  %v3315_v4 = vadd.f32 %v3277_v7, %v3217_v9 }
 0x5da   : >> { %v3588_v56 = vpop.f32.mrf.mxu0 }
 0x5db   : >> { %v3628_v13 = vadd.f32 %v3588_v56, %v3530_v42 }
 0x5dd   : >> { %v3644_v26 = vmax.f32 %v3628_v13, 0.0  ;;  %v3395_v14 = vpop.f32.mrf.mxu2 }
 0x5de   : >> { %v3433_v52 = vadd.f32 %v3395_v14, %v3315_v4 }
 0x5df   : >> { %5045 = vst [vmem:[%s6865_s4 + $0x1f9] sm:$0xff] %v3644_v26 }
 0x5e0   : >> { %v3280_v30 = vpop.f32.mrf.mxu1  ;;  %v3493_v61 = vpop.f32.mrf.mxu3 }
 0x5e1   : >> { %v3531_v17 = vadd.f32 %v3493_v61, %v3433_v52  ;;  %v3316_v48 = vadd.f32 %v3280_v30, %v3218_v29 }
 0x5e2   : >> { %v3591_v2 = vpop.f32.mrf.mxu0 }
 0x5e3   : >> { %v3629_v51 = vadd.f32 %v3591_v2, %v3531_v17 }
 0x5e5   : >> { %v3645_v50 = vmax.f32 %v3629_v51, 0.0  ;;  %v3398_v53 = vpop.f32.mrf.mxu2 }
 0x5e6   : >> { %v3434_v20 = vadd.f32 %v3398_v53, %v3316_v48 }
 0x5e7   : >> { %5046 = vst [vmem:[%s6865_s4 + $0x201] sm:$0xff] %v3645_v50 }
 0x5e8   : >> { %v3283_v5 = vpop.f32.mrf.mxu1  ;;  %v3496_v19 = vpop.f32.mrf.mxu3 }
 0x5e9   : >> { %v3532_v23 = vadd.f32 %v3496_v19, %v3434_v20  ;;  %v3317_v57 = vadd.f32 %v3283_v5, %v3219_v28 }
 0x5ea   : >> { %v3594_v21 = vpop.f32.mrf.mxu0 }
 0x5eb   : >> { %v3630_v8 = vadd.f32 %v3594_v21, %v3532_v23 }
 0x5ed   : >> { %v3646_v49 = vmax.f32 %v3630_v8, 0.0  ;;  %v3401_v44 = vpop.f32.mrf.mxu2 }
 0x5ee   : >> { %v3435_v35 = vadd.f32 %v3401_v44, %v3317_v57 }
 0x5ef   : >> { %5047 = vst [vmem:[%s6865_s4 + $0x211] sm:$0xff] %v3646_v49 }
 0x5f0   : >> { %v3286_v59 = vpop.f32.mrf.mxu1  ;;  %v3499_v34 = vpop.f32.mrf.mxu3 }
 0x5f1   : >> { %v3533_v18 = vadd.f32 %v3499_v34, %v3435_v35  ;;  %v3318_v10 = vadd.f32 %v3286_v59, %v7122_v46 }
 0x5f2   : >> { %v3597_v27 = vpop.f32.mrf.mxu0 }
 0x5f3   : >> { %v3631_v11 = vadd.f32 %v3597_v27, %v3533_v18 }
 0x5f5   : >> { %v3647_v41 = vmax.f32 %v3631_v11, 0.0  ;;  %v3404_v47 = vpop.f32.mrf.mxu2 }
 0x5f6   : >> { %v3436_v3 = vadd.f32 %v3404_v47, %v3318_v10 }
 0x5f7   : >> { %5048 = vst [vmem:[%s6865_s4 + $0x219] sm:$0xff] %v3647_v41 }
 0x5f8   : >> { %v3289_v31 = vpop.f32.mrf.mxu1  ;;  %v3502_v6 = vpop.f32.mrf.mxu3 }
 0x5f9   : >> { %v3534_v39 = vadd.f32 %v3502_v6, %v3436_v3  ;;  %v3319_v37 = vadd.f32 %v3289_v31, %v7127_v22 }
 0x5fa   : >> { %v3600_v25 = vpop.f32.mrf.mxu0 }
 0x5fb   : >> { %v3632_v0 = vadd.f32 %v3600_v25, %v3534_v39 }
 0x5fd   : >> { %v3648_v15 = vmax.f32 %v3632_v0, 0.0  ;;  %v3407_v12 = vpop.f32.mrf.mxu2 }
 0x5fe   : >> { %v3437_v58 = vadd.f32 %v3407_v12, %v3319_v37 }
 0x5ff   : >> { %5049 = vst [vmem:[%s6865_s4 + $0x229] sm:$0xff] %v3648_v15 }
 0x600   : >> { %v3292_v43 = vpop.f32.mrf.mxu1  ;;  %v3505_v36 = vpop.f32.mrf.mxu3 }
 0x601   : >> { %v3535_v32 = vadd.f32 %v3505_v36, %v3437_v58  ;;  %v3320_v33 = vadd.f32 %v3292_v43, %v7132_v1 }
 0x602   : >> { %v3603_v46 = vpop.f32.mrf.mxu0 }
 0x603   : >> { %v3633_v60 = vadd.f32 %v3603_v46, %v3535_v32 }
 0x605   : >> { %v3649_v54 = vmax.f32 %v3633_v60, 0.0  ;;  %v3410_v45 = vpop.f32.mrf.mxu2 }
 0x606   : >> { %v3438_v40 = vadd.f32 %v3410_v45, %v3320_v33 }
 0x607   : >> { %5050 = vst [vmem:[%s6865_s4 + $0x231] sm:$0xff] %v3649_v54 }
 0x608   : >> { %v3295_v7 = vpop.f32.mrf.mxu1  ;;  %v3508_v24 = vpop.f32.mrf.mxu3 }
 0x609   : >> { %v3536_v42 = vadd.f32 %v3508_v24, %v3438_v40  ;;  %v3321_v56 = vadd.f32 %v3295_v7, %v7138_v16 }
 0x60a   : >> { %v3606_v22 = vpop.f32.mrf.mxu0 }
 0x60b   : >> { %v3634_v9 = vadd.f32 %v3606_v22, %v3536_v42 }
 0x60d   : >> { %v3650_v13 = vmax.f32 %v3634_v9, 0.0  ;;  %v3413_v4 = vpop.f32.mrf.mxu2 }
 0x60e   : >> { %v3439_v26 = vadd.f32 %v3413_v4, %v3321_v56 }
 0x60f   : >> { %5051 = vst [vmem:[%s6865_s4 + $0x241] sm:$0xff] %v3650_v13 }
 0x610   : >> { %v3298_v14 = vpop.f32.mrf.mxu1  ;;  %v3511_v52 = vpop.f32.mrf.mxu3 }
 0x611   : >> { %v3537_v30 = vadd.f32 %v3511_v52, %v3439_v26  ;;  %v3322_v17 = vadd.f32 %v3298_v14, %v7144_v62 }
 0x612   : >> { %v3609_v1 = vpop.f32.mrf.mxu0 }
 0x613   : >> { %v3635_v61 = vadd.f32 %v3609_v1, %v3537_v30 }
 0x615   : >> { %v3651_v29 = vmax.f32 %v3635_v61, 0.0  ;;  %v3416_v2 = vpop.f32.mrf.mxu2 }
 0x616   : >> { %v3440_v51 = vadd.f32 %v3416_v2, %v3322_v17 }
 0x617   : >> { %5052 = vst [vmem:[%s6865_s4 + $0x249] sm:$0xff] %v3651_v29 }
 0x618   : >> { %v3301_v48 = vpop.f32.mrf.mxu1  ;;  %v3514_v50 = vpop.f32.mrf.mxu3 }
 0x619   : >> { %v3538_v53 = vadd.f32 %v3514_v50, %v3440_v51  ;;  %v3323_v5 = vadd.f32 %v3301_v48, %v7150_v63 }
 0x61a   : >> { %v3612_v16 = vpop.f32.mrf.mxu0 }
 0x61b   : >> { %v3636_v20 = vadd.f32 %v3612_v16, %v3538_v53 }
 0x61d   : >> { %v3652_v19 = vmax.f32 %v3636_v20, 0.0  ;;  %v3419_v23 = vpop.f32.mrf.mxu2 }
 0x61e   : >> { %v3441_v28 = vadd.f32 %v3419_v23, %v3323_v5 }
 0x61f   : >> { %5053 = vst [vmem:[%s6865_s4 + $0x259] sm:$0xff] %v3652_v19 }
 0x620   : >> { %v3304_v21 = vpop.f32.mrf.mxu1  ;;  %v3517_v8 = vpop.f32.mrf.mxu3 }
 0x621   : >> { %v3539_v57 = vadd.f32 %v3517_v8, %v3441_v28  ;;  %v3324_v44 = vadd.f32 %v3304_v21, %v7155_v55 }
 0x622   : >> { %v3615_v62 = vpop.f32.mrf.mxu0 }
 0x623   : >> { %v3637_v49 = vadd.f32 %v3615_v62, %v3539_v57 }
 0x625   : >> { %v3653_v35 = vmax.f32 %v3637_v49, 0.0  ;;  %v3422_v59 = vpop.f32.mrf.mxu2 }
 0x626   : >> { %v3442_v34 = vadd.f32 %v3422_v59, %v3324_v44 }
 0x627   : >> { %5054 = vst [vmem:[%s6865_s4 + $0x261] sm:$0xff] %v3653_v35 }
 0x628   : >> { %v3520_v18 = vpop.f32.mrf.mxu3  ;;  %v3307_v27 = vpop.f32.mrf.mxu1 }
 0x629   : >> { %v3540_v63 = vadd.f32 %v3520_v18, %v3442_v34  ;;  %v3325_v41 = vadd.f32 %v3307_v27, %v7160_v38 }
 0x62a   : >> { %v3618_v11 = vpop.f32.mrf.mxu0 }
 0x62b   : >> { %v3638_v10 = vadd.f32 %v3618_v11, %v3540_v63 }
 0x62d   : >> { %v3654_v47 = vmax.f32 %v3638_v10, 0.0  ;;  %v3425_v3 = vpop.f32.mrf.mxu2 }
 0x62e   : >> { %v3443_v31 = vadd.f32 %v3425_v3, %v3325_v41 }
 0x62f   : >> { %5055 = vst [vmem:[%s6865_s4 + $0x271] sm:$0xff] %v3654_v47 }
 0x630   : >> { %v3523_v6 = vpop.f32.mrf.mxu3 }
 0x631   : >> { %v3541_v39 = vadd.f32 %v3523_v6, %v3443_v31 }
 0x632   : >> { %v3621_v25 = vpop.f32.mrf.mxu0 }
 0x633   : >> { %v3639_v55 = vadd.f32 %v3621_v25, %v3541_v39  ;;  %2690 = sbr.rel (!%p2688_p8) target bundleno = 1133 (0x46d), region = 230 }
 0x635   : >> { %v3655_v0 = vmax.f32 %v3639_v55, 0.0 }
 0x637   : >> { %5056 = vst [vmem:[%s6865_s4 + $0x279] sm:$0xff] %v3655_v0 }
 0x638 LB: >> { %v3725_v38 = vld [vmem:[#allocation12 + $0x78] sm:$0xff]  ;;  %v3724_v37 = vld [vmem:[#allocation12 + $0x70] sm:$0xff]  ;;  %v3723_v15 = vld [vmem:[#allocation12 + $0x68] sm:$0xff]  ;;  %s4794_s8 = smul.u32 192, %s5766_s29  ;;  %s5145_s30 = sshll.u32 %s5766_s29, 7  ;;  %s5766_s29 = sphi %s7203_s29, %s3681_s29  }
 0x639   : >> { %5291 = vmatpush.msra.mxu1 %v3725_v38  ;;  %5292 = vmatpush.msra.mxu2 %v3725_v38  ;;  %v3722_v12 = vld [vmem:[#allocation12 + $0x60] sm:$0xff]  ;;  %v3721_v58 = vld [vmem:[#allocation12 + $0x58] sm:$0xff]  ;;  %v3720_v43 = vld [vmem:[#allocation12 + $0x50] sm:$0xff]  ;;  %s7512_s6 = scalar_lea.vmem %s487_s19, %s5145_s30 [#allocation14]  ;;  %s3681_s29 = sadd.s32 1, %s5766_s29  }
 0x63a   : >> { %5293 = vmatpush.msra.mxu3 %v3725_v38  ;;  %3726 = vmatpush.msra.mxu0 %v3725_v38  ;;  %v3719_v36 = vld [vmem:[#allocation12 + $0x48] sm:$0xff]  ;;  %v3718_v32 = vld [vmem:[#allocation12 + $0x40] sm:$0xff]  ;;  %v3717_v46 = vld [vmem:[#allocation12 + $0x38] sm:$0xff]  ;;  %s7209_s27 = scalar_lea.vmem [#allocation2], %s4794_s8  ;;  %p3678_p2 = scmp.ge.s32.totalorder %s3681_s29, 2  }
 0x63b   : >> { %5294 = vmatpush.msra.mxu1 %v3724_v37  ;;  %5295 = vmatpush.msra.mxu2 %v3724_v37  ;;  %v3716_v60 = vld [vmem:[#allocation12 + $0x30] sm:$0xff]  ;;  %v3715_v33 = vld [vmem:[#allocation12 + $0x28] sm:$0xff]  ;;  %v3714_v54 = vld [vmem:[#allocation12 + $0x20] sm:$0xff]  ;;  %s5146_s21 = sshll.u32 (%p3678_p2), %s5853_s17, 8  ;;  %s4713_s15 = sshll.u32 (%p3678_p2), %s487_s19, 4  ;;  %s4714_s15 = int_to_ptr.vmem [resolvable:$true] %s4713_s15 }
 0x63c   : >> { %5296 = vmatpush.msra.mxu3 %v3724_v37  ;;  %3727 = vmatpush.msra.mxu0 %v3724_v37  ;;  %v3713_v45 = vld [vmem:[#allocation12 + $0x18] sm:$0xff]  ;;  %v3712_v40 = vld [vmem:[#allocation12 + $0x10] sm:$0xff]  ;;  %v3711_v7 = vld [vmem:[#allocation12 + $0x8] sm:$0xff]  ;;  %s4712_s25 = scalar_lea.hbm (%p3678_p2), %s7613_s10, %s5146_s21  ;;  %s4701_s12 = scalar_lea.sflag (%p3678_p2), [#allocation5], %s5986_s11 }
 0x63d   : >> { %5297 = vmatpush.msra.mxu1 %v3723_v15  ;;  %5298 = vmatpush.msra.mxu2 %v3723_v15  ;;  %v3710_v24 = vld [vmem:[#allocation12] sm:$0xff]  ;;  %v3921_v9 = vld [vmem:[#allocation12 + $0x378] sm:$0xff]  ;;  %v3920_v4 = vld [vmem:[#allocation12 + $0x370] sm:$0xff]  ;;  %s4715_s0 = sshll.u32 (%p3678_p2), %s4712_s25, 4  ;;  %s5672_s17 = scalar_lea.hbm (%p3678_p2), %s7613_s10, 512  ;;  %s4716_s0 = int_to_ptr.hbm [resolvable:$true] %s4715_s0 }
 0x63e   : >> { %5299 = vmatpush.msra.mxu3 %v3723_v15  ;;  %3728 = vmatpush.msra.mxu0 %v3723_v15  ;;  %v7212_v42 = vld [vmem:[%s7209_s27 + $0x1e0] sm:$0xff]  ;;  %v7215_v22 = vld [vmem:[%s7209_s27 + $0x210] sm:$0xff]  ;;  %v3823_v56 = vld [vmem:[#allocation12 + $0x1f8] sm:$0xff]  ;;  %s5666_s4 = sshra.s32 (%p3678_p2), %s4716_s0, 4  ;;  %s5667_s4 = int_to_ptr.hbm [resolvable:$true] %s5666_s4 }
 0x63f   : >> { %5300 = vmatpush.msra.mxu1 %v3722_v12  ;;  %5301 = vmatpush.msra.mxu2 %v3722_v12  ;;  %v7218_v13 = vld [vmem:[%s7209_s27 + $0x240] sm:$0xff]  ;;  %v4039_v26 = vld [vmem:[#allocation12 + $0xf8] sm:$0xff]  ;;  %v3822_v14 = vld [vmem:[#allocation12 + $0x1f0] sm:$0xff]  ;;  %s5668_s24 = scalar_lea.hbm (%p3678_p2), %s5667_s4, 256  ;;  %p5673_p12 = scmp.lt.s32.totalorder (%p3678_p2), %s5667_s4, %s7613_s10 }
 0x640   : >> { %5302 = vmatpush.msra.mxu3 %v3722_v12  ;;  %3729 = vmatpush.msra.mxu0 %v3722_v12  ;;  %v3919_v52 = vld [vmem:[#allocation12 + $0x368] sm:$0xff]  ;;  %v4038_v30 = vld [vmem:[#allocation12 + $0xf0] sm:$0xff]  ;;  %v3918_v17 = vld [vmem:[#allocation12 + $0x360] sm:$0xff]  ;;  %p5669_p10 = scmp.ne.s32.totalorder (%p3678_p2), %s5667_s4, %s5668_s24  ;;  %p5674_p13 = scmp.lt.s32.totalorder (%p3678_p2), %s5672_s17, %s5668_s24 }
 0x641   : >> { %5303 = vmatpush.msra.mxu1 %v3721_v58  ;;  %5304 = vmatpush.msra.mxu2 %v3721_v58  ;;  %v3821_v1 = vld [vmem:[#allocation12 + $0x1e8] sm:$0xff]  ;;  %v5058_v61 = vld [vmem:[%s7209_s27 + $0x1b0] sm:$0xff]  ;;  %v3820_v2 = vld [vmem:[#allocation12 + $0x1e0] sm:$0xff] }
 0x642   : >> { %5305 = vmatpush.msra.mxu3 %v3721_v58  ;;  %3730 = vmatpush.msra.mxu0 %v3721_v58  ;;  %v4037_v29 = vld [vmem:[#allocation12 + $0xe8] sm:$0xff]  ;;  %v7225_v51 = vld [vmem:[%s7209_s27 + $0x218] sm:$0xff]  ;;  %v4036_v53 = vld [vmem:[#allocation12 + $0xe0] sm:$0xff]  ;;  %p5670_p9 = pnand (%p3678_p2), %p5669_p10, %p5928_p3  ;;  %p5675_p0 = por (%p3678_p2), %p5674_p13, %p5673_p12 }
 0x643   : >> { %5306 = vmatpush.msra.mxu1 %v3720_v43  ;;  %5307 = vmatpush.msra.mxu2 %v3720_v43  ;;  %v7228_v48 = vld [vmem:[%s7209_s27 + $0x1e8] sm:$0xff]  ;;  %v3917_v50 = vld [vmem:[#allocation12 + $0x358] sm:$0xff]  ;;  %v3916_v5 = vld [vmem:[#allocation12 + $0x350] sm:$0xff] }
 0x644   : >> { %5308 = vmatpush.msra.mxu3 %v3720_v43  ;;  %3731 = vmatpush.msra.mxu0 %v3720_v43  ;;  %v3819_v16 = vld [vmem:[#allocation12 + $0x1d8] sm:$0xff]  ;;  %v7232_v20 = vld [vmem:[%s7209_s27 + $0x248] sm:$0xff]  ;;  %v3818_v28 = vld [vmem:[#allocation12 + $0x1d0] sm:$0xff]  ;;  %p5671_p11 = pneg (%p3678_p2), %p5670_p9 }
 0x645   : >> { %5309 = vmatpush.msra.mxu1 %v3719_v36  ;;  %5310 = vmatpush.msra.mxu2 %v3719_v36  ;;  %v4035_v19 = vld [vmem:[#allocation12 + $0xd8] sm:$0xff]  ;;  %v3915_v21 = vld [vmem:[#allocation12 + $0x348] sm:$0xff]  ;;  %v4034_v8 = vld [vmem:[#allocation12 + $0xd0] sm:$0xff] }
 0x646   : >> { %5311 = vmatpush.msra.mxu3 %v3719_v36  ;;  %3732 = vmatpush.msra.mxu0 %v3719_v36  ;;  %v4137_v23 = vld [vmem:[#allocation12 + $0x278] sm:$0xff]  ;;  %v4136_v57 = vld [vmem:[#allocation12 + $0x270] sm:$0xff]  ;;  %v3817_v62 = vld [vmem:[#allocation12 + $0x1c8] sm:$0xff]  ;;  %p5676_p5 = pnand (%p3678_p2), %p5675_p0, %p5671_p11 }
 0x647   : >> { %5312 = vmatpush.msra.mxu1 %v3718_v32  ;;  %5313 = vmatpush.msra.mxu2 %v3718_v32  ;;  %v3914_v49 = vld [vmem:[#allocation12 + $0x340] sm:$0xff]  ;;  %v4033_v44 = vld [vmem:[#allocation12 + $0xc8] sm:$0xff]  ;;  %v7240_v18 = vld [vmem:[%s7209_s27 + $0x1f8] sm:$0xff] }
 0x648   : >> { %5314 = vmatpush.msra.mxu3 %v3718_v32  ;;  %3733 = vmatpush.msra.mxu0 %v3718_v32  ;;  %v4135_v35 = vld [vmem:[#allocation12 + $0x268] sm:$0xff]  ;;  %v3816_v59 = vld [vmem:[#allocation12 + $0x1c0] sm:$0xff]  ;;  %v3913_v27 = vld [vmem:[#allocation12 + $0x338] sm:$0xff] }
 0x649   : >> { %5315 = vmatpush.msra.mxu1 %v3717_v46  ;;  %5316 = vmatpush.msra.mxu2 %v3717_v46  ;;  %v7237_v34 = vld [vmem:[%s7209_s27 + $0x228] sm:$0xff]  ;;  %v4032_v63 = vld [vmem:[#allocation12 + $0xc0] sm:$0xff]  ;;  %v3815_v10 = vld [vmem:[#allocation12 + $0x1b8] sm:$0xff] }
 0x64a   : >> { %5317 = vmatpush.msra.mxu3 %v3717_v46  ;;  %3734 = vmatpush.msra.mxu0 %v3717_v46  ;;  %v4134_v11 = vld [vmem:[#allocation12 + $0x260] sm:$0xff]  ;;  %v5059_v41 = vld [vmem:[%s7209_s27 + $0x1b8] sm:$0xff]  ;;  %v3912_v3 = vld [vmem:[#allocation12 + $0x330] sm:$0xff] }
 0x64b   : >> { %5318 = vmatpush.msra.mxu1 %v3716_v60  ;;  %5319 = vmatpush.msra.mxu2 %v3716_v60  ;;  %v7246_v47 = vld [vmem:[%s7209_s27 + $0x258] sm:$0xff]  ;;  %v3814_v39 = vld [vmem:[#allocation12 + $0x1b0] sm:$0xff]  ;;  %v3911_v25 = vld [vmem:[#allocation12 + $0x328] sm:$0xff] }
 0x64c   : >> { %5320 = vmatpush.msra.mxu3 %v3716_v60  ;;  %3735 = vmatpush.msra.mxu0 %v3716_v60  ;;  %v4031_v31 = vld [vmem:[#allocation12 + $0xb8] sm:$0xff]  ;;  %v4030_v55 = vld [vmem:[#allocation12 + $0xb0] sm:$0xff]  ;;  %v3813_v38 = vld [vmem:[#allocation12 + $0x1a8] sm:$0xff] }
 0x64d   : >> { %5321 = vmatpush.msra.mxu1 %v3715_v33  ;;  %5322 = vmatpush.msra.mxu2 %v3715_v33  ;;  %v4133_v6 = vld [vmem:[#allocation12 + $0x258] sm:$0xff]  ;;  %v4132_v0 = vld [vmem:[#allocation12 + $0x250] sm:$0xff]  ;;  %v3910_v37 = vld [vmem:[#allocation12 + $0x320] sm:$0xff] }
 0x64e   : >> { %5323 = vmatpush.msra.mxu3 %v3715_v33  ;;  %3736 = vmatpush.msra.mxu0 %v3715_v33  ;;  %v4029_v15 = vld [vmem:[#allocation12 + $0xa8] sm:$0xff]  ;;  %v3812_v58 = vld [vmem:[#allocation12 + $0x1a0] sm:$0xff]  ;;  %v7250_v43 = vld [vmem:[%s7209_s27 + $0x230] sm:$0xff] }
 0x64f   : >> { %5324 = vmatpush.msra.mxu1 %v3714_v54  ;;  %5325 = vmatpush.msra.mxu2 %v3714_v54  ;;  %v4131_v12 = vld [vmem:[#allocation12 + $0x248] sm:$0xff]  ;;  %v7253_v36 = vld [vmem:[%s7209_s27 + $0x200] sm:$0xff]  ;;  %v3909_v32 = vld [vmem:[#allocation12 + $0x318] sm:$0xff] }
 0x650   : >> { %5326 = vmatpush.msra.mxu3 %v3714_v54  ;;  %3737 = vmatpush.msra.mxu0 %v3714_v54  ;;  %v4028_v46 = vld [vmem:[#allocation12 + $0xa0] sm:$0xff]  ;;  %v3811_v33 = vld [vmem:[#allocation12 + $0x198] sm:$0xff]  ;;  %v5060_v54 = vld [vmem:[%s7209_s27 + $0x1c8] sm:$0xff] }
 0x651   : >> { %5327 = vmatpush.msra.mxu1 %v3713_v45  ;;  %5328 = vmatpush.msra.mxu2 %v3713_v45  ;;  %v4130_v60 = vld [vmem:[#allocation12 + $0x240] sm:$0xff] }
 0x652   : >> { %5329 = vmatpush.msra.mxu3 %v3713_v45  ;;  %3738 = vmatpush.msra.mxu0 %v3713_v45  ;;  %v7259_v45 = vld [vmem:[%s7209_s27 + $0x260] sm:$0xff] }
 0x653   : >> { %5330 = vmatpush.msra.mxu1 %v3712_v40  ;;  %5331 = vmatpush.msra.mxu2 %v3712_v40 }
 0x654   : >> { %5332 = vmatpush.msra.mxu3 %v3712_v40  ;;  %3739 = vmatpush.msra.mxu0 %v3712_v40  ;;  %v3908_v40 = vld [vmem:[#allocation12 + $0x310] sm:$0xff] }
 0x655   : >> { %5333 = vmatpush.msra.mxu1 %v3711_v7  ;;  %5334 = vmatpush.msra.mxu2 %v3711_v7 }
 0x656   : >> { %5335 = vmatpush.msra.mxu3 %v3711_v7  ;;  %3740 = vmatpush.msra.mxu0 %v3711_v7  ;;  %v4027_v7 = vld [vmem:[#allocation12 + $0x98] sm:$0xff] }
 0x657   : >> { %5336 = vmatpush.msra.mxu1 %v3710_v24  ;;  %5337 = vmatpush.msra.mxu2 %v3710_v24 }
 0x658   : >> { %3754 = vmatmul.f32.vlgmr.msra.gmra.mxu1 %v7212_v42  ;;  %3766 = vmatmul.f32.vlgmr.msra.gmra.mxu2 %v7215_v22 }
 0x659   : >> { %3922 = vmatpush.msrb.mxu2 %v3921_v9  ;;  %5338 = vmatpush.msra.mxu3 %v3710_v24  ;;  %v3810_v9 = vld [vmem:[#allocation12 + $0x190] sm:$0xff] }
 0x65a   : >> { %3824 = vmatpush.msrb.mxu1 %v3823_v56  ;;  %3778 = vmatmul.f32.vlgmr.msra.gmra.mxu3 %v7218_v13  ;;  %v3907_v56 = vld [vmem:[#allocation12 + $0x308] sm:$0xff] }
 0x65b   : >> { %3923 = vmatpush.msrb.mxu2 %v3920_v4  ;;  %4040 = vmatpush.msrb.mxu3 %v4039_v26  ;;  %v4026_v4 = vld [vmem:[#allocation12 + $0x90] sm:$0xff] }
 0x65c   : >> { %3825 = vmatpush.msrb.mxu1 %v3822_v14  ;;  %3741 = vmatpush.msra.mxu0 %v3710_v24  ;;  %v4129_v24 = vld [vmem:[#allocation12 + $0x238] sm:$0xff]  ;;  %v4128_v26 = vld [vmem:[#allocation12 + $0x230] sm:$0xff]  ;;  %v3809_v14 = vld [vmem:[#allocation12 + $0x188] sm:$0xff] }
 0x65d   : >> { %3924 = vmatpush.msrb.mxu2 %v3919_v52  ;;  %4041 = vmatpush.msrb.mxu3 %v4038_v30  ;;  %v3906_v52 = vld [vmem:[#allocation12 + $0x300] sm:$0xff]  ;;  %v4025_v30 = vld [vmem:[#allocation12 + $0x88] sm:$0xff] }
 0x65e   : >> { %3826 = vmatpush.msrb.mxu1 %v3821_v1  ;;  %3742 = vmatmul.f32.vlgmr.msra.gmra.mxu0 %v5058_v61  ;;  %v4127_v1 = vld [vmem:[#allocation12 + $0x228] sm:$0xff]  ;;  %v3808_v61 = vld [vmem:[#allocation12 + $0x180] sm:$0xff] }
 0x65f   : >> { %3925 = vmatpush.msrb.mxu2 %v3918_v17  ;;  %4042 = vmatpush.msrb.mxu3 %v4037_v29  ;;  %v4024_v17 = vld [vmem:[#allocation12 + $0x80] sm:$0xff] }
 0x660   : >> { %3827 = vmatpush.msrb.mxu1 %v3820_v2  ;;  %3769 = vmatmul.f32.gmra.mxu2 %v7225_v51  ;;  %v4126_v29 = vld [vmem:[#allocation12 + $0x220] sm:$0xff]  ;;  %v4353_v2 = vld [vmem:[#allocation12 + $0x178] sm:$0xff] }
 0x661   : >> { %3757 = vmatmul.f32.gmra.mxu1 %v7228_v48  ;;  %3926 = vmatpush.msrb.mxu2 %v3917_v50  ;;  %v5061_v50 = vld [vmem:[%s7209_s27 + $0x1d0] sm:$0xff] }
 0x662   : >> { %4043 = vmatpush.msrb.mxu3 %v4036_v53  ;;  %3828 = vmatpush.msrb.mxu1 %v3819_v16  ;;  %v5078_v53 = vld [vmem:[%s7209_s27 + $0x1b1] sm:$0xff] }
 0x663   : >> { %3781 = vmatmul.f32.gmra.mxu3 %v7232_v20  ;;  %3927 = vmatpush.msrb.mxu2 %v3916_v5  ;;  %v4125_v16 = vld [vmem:[#allocation12 + $0x218] sm:$0xff] }
 0x664   : >> { %4044 = vmatpush.msrb.mxu3 %v4035_v19  ;;  %4138 = vmatpush.msrb.mxu0 %v4137_v23  ;;  %v4451_v5 = vld [vmem:[#allocation12 + $0x2f8] sm:$0xff]  ;;  %v4352_v23 = vld [vmem:[#allocation12 + $0x170] sm:$0xff] }
 0x665   : >> { %3829 = vmatpush.msrb.mxu1 %v3818_v28  ;;  %3928 = vmatpush.msrb.mxu2 %v3915_v21  ;;  %v4235_v19 = vld [vmem:[#allocation12 + $0x3f8] sm:$0xff]  ;;  %v4124_v28 = vld [vmem:[#allocation12 + $0x210] sm:$0xff] }
 0x666   : >> { %4045 = vmatpush.msrb.mxu3 %v4034_v8  ;;  %4139 = vmatpush.msrb.mxu0 %v4136_v57  ;;  %v4450_v21 = vld [vmem:[#allocation12 + $0x2f0] sm:$0xff]  ;;  %v4351_v57 = vld [vmem:[#allocation12 + $0x168] sm:$0xff] }
 0x667   : >> { %3830 = vmatpush.msrb.mxu1 %v3817_v62  ;;  %3929 = vmatpush.msrb.mxu2 %v3914_v49  ;;  %v4234_v8 = vld [vmem:[#allocation12 + $0x3f0] sm:$0xff]  ;;  %v4123_v62 = vld [vmem:[#allocation12 + $0x208] sm:$0xff] }
 0x668   : >> { %4046 = vmatpush.msrb.mxu3 %v4033_v44  ;;  %4140 = vmatpush.msrb.mxu0 %v4135_v35  ;;  %v4449_v49 = vld [vmem:[#allocation12 + $0x2e8] sm:$0xff]  ;;  %v4122_v44 = vld [vmem:[#allocation12 + $0x200] sm:$0xff] }
 0x669   : >> { %3831 = vmatpush.msrb.mxu1 %v3816_v59  ;;  %3772 = vmatmul.f32.gmra.mxu2 %v7237_v34  ;;  %v4233_v35 = vld [vmem:[#allocation12 + $0x3e8] sm:$0xff]  ;;  %v5079_v59 = vld [vmem:[%s7209_s27 + $0x1b9] sm:$0xff] }
 0x66a   : >> { %3760 = vmatmul.f32.gmra.mxu1 %v7240_v18  ;;  %3930 = vmatpush.msrb.mxu2 %v3913_v27  ;;  %v5080_v27 = vld [vmem:[%s7209_s27 + $0x1c9] sm:$0xff] }
 0x66b   : >> { %4047 = vmatpush.msrb.mxu3 %v4032_v63  ;;  %4141 = vmatpush.msrb.mxu0 %v4134_v11  ;;  %v4549_v63 = vld [vmem:[#allocation12 + $0x478] sm:$0xff]  ;;  %v4350_v11 = vld [vmem:[#allocation12 + $0x160] sm:$0xff] }
 0x66c   : >> { %3832 = vmatpush.msrb.mxu1 %v3815_v10  ;;  %3745 = vmatmul.f32.gmra.mxu0 %v5059_v41  ;;  %v4448_v10 = vld [vmem:[#allocation12 + $0x2e0] sm:$0xff] }
 0x66d   : >> { %3784 = vmatmul.f32.gmra.mxu3 %v7246_v47  ;;  %3931 = vmatpush.msrb.mxu2 %v3912_v3  ;;  %v4232_v41 = vld [vmem:[#allocation12 + $0x3e0] sm:$0xff]  ;;  %v4548_v3 = vld [vmem:[#allocation12 + $0x470] sm:$0xff] }
 0x66e   : >> { %4048 = vmatpush.msrb.mxu3 %v4031_v31  ;;  %4142 = vmatpush.msrb.mxu0 %v4133_v6  ;;  %v4349_v31 = vld [vmem:[#allocation12 + $0x158] sm:$0xff] }
 0x66f   : >> { %3833 = vmatpush.msrb.mxu1 %v3814_v39  ;;  %3932 = vmatpush.msrb.mxu2 %v3911_v25  ;;  %v4447_v6 = vld [vmem:[#allocation12 + $0x2d8] sm:$0xff]  ;;  %v4547_v25 = vld [vmem:[#allocation12 + $0x468] sm:$0xff] }
 0x670   : >> { %4049 = vmatpush.msrb.mxu3 %v4030_v55  ;;  %4143 = vmatpush.msrb.mxu0 %v4132_v0  ;;  %v4231_v39 = vld [vmem:[#allocation12 + $0x3d8] sm:$0xff]  ;;  %v4348_v55 = vld [vmem:[#allocation12 + $0x150] sm:$0xff]  ;;  %v4546_v0 = vld [vmem:[#allocation12 + $0x460] sm:$0xff] }
 0x671   : >> { %3834 = vmatpush.msrb.mxu1 %v3813_v38  ;;  %3933 = vmatpush.msrb.mxu2 %v3910_v37  ;;  %v4446_v38 = vld [vmem:[#allocation12 + $0x2d0] sm:$0xff] }
 0x672   : >> { %4050 = vmatpush.msrb.mxu3 %v4029_v15  ;;  %4144 = vmatpush.msrb.mxu0 %v4131_v12  ;;  %v5081_v37 = vld [vmem:[%s7209_s27 + $0x1d1] sm:$0xff] }
 0x673   : >> { %3835 = vmatpush.msrb.mxu1 %v3812_v58  ;;  %3775 = vmatmul.f32.gmra.mxu2 %v7250_v43  ;;  %v4545_v15 = vld [vmem:[#allocation12 + $0x458] sm:$0xff]  ;;  %v4230_v12 = vld [vmem:[#allocation12 + $0x3d0] sm:$0xff]  ;;  %v4347_v58 = vld [vmem:[#allocation12 + $0x148] sm:$0xff] }
 0x674   : >> { %3763 = vmatmul.f32.gmra.mxu1 %v7253_v36  ;;  %3934 = vmatpush.msrb.mxu2 %v3909_v32  ;;  %v4445_v32 = vld [vmem:[#allocation12 + $0x2c8] sm:$0xff] }
 0x675   : >> { %4051 = vmatpush.msrb.mxu3 %v4028_v46  ;;  %4145 = vmatpush.msrb.mxu0 %v4130_v60  ;;  %v4544_v46 = vld [vmem:[#allocation12 + $0x450] sm:$0xff]  ;;  %v4229_v60 = vld [vmem:[#allocation12 + $0x3c8] sm:$0xff] }
 0x676   : >> { %3836 = vmatpush.msrb.mxu1 %v3811_v33  ;;  %3748 = vmatmul.f32.gmra.mxu0 %v5060_v54  ;;  %v4346_v33 = vld [vmem:[#allocation12 + $0x140] sm:$0xff] }
 0x677   : >> { %3787 = vmatmul.f32.gmra.mxu3 %v7259_v45  ;;  %3935 = vmatpush.msrb.mxu2 %v3908_v40  ;;  %v4543_v40 = vld [vmem:[#allocation12 + $0x448] sm:$0xff] }
 0x678   : >> { %4052 = vmatpush.msrb.mxu3 %v4027_v7  ;;  %4146 = vmatpush.msrb.mxu0 %v4129_v24  ;;  %v4228_v7 = vld [vmem:[#allocation12 + $0x3c0] sm:$0xff]  ;;  %v7279_v24 = vld [vmem:[%s7209_s27 + $0x1e9] sm:$0xff] }
 0x679   : >> { %3837 = vmatpush.msrb.mxu1 %v3810_v9  ;;  %3936 = vmatpush.msrb.mxu2 %v3907_v56  ;;  %v4345_v9 = vld [vmem:[#allocation12 + $0x138] sm:$0xff]  ;;  %v4542_v56 = vld [vmem:[#allocation12 + $0x440] sm:$0xff] }
 0x67a   : >> { %4053 = vmatpush.msrb.mxu3 %v4026_v4  ;;  %4147 = vmatpush.msrb.mxu0 %v4128_v26  ;;  %v4227_v4 = vld [vmem:[#allocation12 + $0x3b8] sm:$0xff] }
 0x67b   : >> { %3838 = vmatpush.msrb.mxu1 %v3809_v14  ;;  %3937 = vmatpush.msrb.mxu2 %v3906_v52  ;;  %v7286_v26 = vld [vmem:[%s7209_s27 + $0x1f9] sm:$0xff]  ;;  %v4442_v14 = vld [vmem:[#allocation12 + $0x2b0] sm:$0xff] }
 0x67c   : >> { %4054 = vmatpush.msrb.mxu3 %v4025_v30  ;;  %4148 = vmatpush.msrb.mxu0 %v4127_v1  ;;  %v4541_v52 = vld [vmem:[#allocation12 + $0x438] sm:$0xff]  ;;  %v4226_v30 = vld [vmem:[#allocation12 + $0x3b0] sm:$0xff]  ;;  %v7293_v1 = vld [vmem:[%s7209_s27 + $0x201] sm:$0xff] }
 0x67d   : >> { %3839 = vmatpush.msrb.mxu1 %v3808_v61  ;;  %3938 = vmatmul.f32.vlgmr.msrb.gmra.mxu2 %v7212_v42  ;;  %v4441_v61 = vld [vmem:[#allocation12 + $0x2a8] sm:$0xff] }
 0x67e   : >> { %3840 = vmatmul.f32.vlgmr.msrb.gmra.mxu1 %v5060_v54  ;;  %4055 = vmatpush.msrb.mxu3 %v4024_v17  ;;  %v4444_v54 = vld [vmem:[#allocation12 + $0x2c0] sm:$0xff]  ;;  %v4540_v17 = vld [vmem:[#allocation12 + $0x430] sm:$0xff] }
 0x67f   : >> { %4149 = vmatpush.msrb.mxu0 %v4126_v29  ;;  %4354 = vmatpush.msra.mxu2 %v4353_v2  ;;  %v4225_v29 = vld [vmem:[#allocation12 + $0x3a8] sm:$0xff]  ;;  %v7300_v2 = vld [vmem:[%s7209_s27 + $0x211] sm:$0xff] }
 0x680   : >> { %3751 = vmatmul.f32.gmra.mxu0 %v5061_v50  ;;  %4056 = vmatmul.f32.vlgmr.msrb.gmra.mxu3 %v5078_v53  ;;  %v4539_v53 = vld [vmem:[#allocation12 + $0x428] sm:$0xff] }
 0x681   : >> { %4150 = vmatpush.msrb.mxu0 %v4125_v16  ;;  %4452 = vmatpush.msra.mxu3 %v4451_v5  ;;  %v4224_v16 = vld [vmem:[#allocation12 + $0x3a0] sm:$0xff] }
 0x682   : >> { %4236 = vmatpush.msra.mxu1 %v4235_v19  ;;  %4355 = vmatpush.msra.mxu2 %v4352_v23  ;;  %v7307_v5 = vld [vmem:[%s7209_s27 + $0x219] sm:$0xff] }
 0x683   : >> { %4151 = vmatpush.msrb.mxu0 %v4124_v28  ;;  %4453 = vmatpush.msra.mxu3 %v4450_v21  ;;  %v4439_v19 = vld [vmem:[#allocation12 + $0x298] sm:$0xff]  ;;  %v4538_v23 = vld [vmem:[#allocation12 + $0x420] sm:$0xff]  ;;  %v7314_v21 = vld [vmem:[%s7209_s27 + $0x229] sm:$0xff] }
 0x684   : >> { %4237 = vmatpush.msra.mxu1 %v4234_v8  ;;  %4356 = vmatpush.msra.mxu2 %v4351_v57  ;;  %v4223_v28 = vld [vmem:[#allocation12 + $0x398] sm:$0xff]  ;;  %v4438_v8 = vld [vmem:[#allocation12 + $0x290] sm:$0xff] }
 0x685   : >> { %4152 = vmatpush.msrb.mxu0 %v4123_v62  ;;  %3941 = vmatmul.f32.gmra.mxu2 %v7228_v48  ;;  %v4537_v57 = vld [vmem:[#allocation12 + $0x418] sm:$0xff]  ;;  %v4222_v62 = vld [vmem:[#allocation12 + $0x390] sm:$0xff] }
 0x686   : >> { %3843 = vmatmul.f32.gmra.mxu1 %v5061_v50  ;;  %4454 = vmatpush.msra.mxu3 %v4449_v49  ;;  %v4440_v50 = vld [vmem:[#allocation12 + $0x2a0] sm:$0xff]  ;;  %v7321_v49 = vld [vmem:[%s7209_s27 + $0x231] sm:$0xff] }
 0x687   : >> { %4153 = vmatpush.msrb.mxu0 %v4122_v44  ;;  %4238 = vmatpush.msra.mxu1 %v4233_v35  ;;  %v4437_v44 = vld [vmem:[#allocation12 + $0x288] sm:$0xff]  ;;  %v4536_v35 = vld [vmem:[#allocation12 + $0x410] sm:$0xff] }
 0x688   : >> { %4059 = vmatmul.f32.gmra.mxu3 %v5079_v59  ;;  %4154 = vmatmul.f32.vlgmr.msrb.gmra.mxu0 %v5080_v27  ;;  %v4221_v59 = vld [vmem:[#allocation12 + $0x388] sm:$0xff] }
 0x689   : >> { %4550 = vmatpush.msra.mxu0 %v4549_v63  ;;  %4357 = vmatpush.msra.mxu2 %v4350_v11  ;;  %v4436_v11 = vld [vmem:[#allocation12 + $0x280] sm:$0xff] }
 0x68a   : >> { %4455 = vmatpush.msra.mxu3 %v4448_v10  ;;  %4239 = vmatpush.msra.mxu1 %v4232_v41  ;;  %v4535_v10 = vld [vmem:[#allocation12 + $0x408] sm:$0xff]  ;;  %v4220_v41 = vld [vmem:[#allocation12 + $0x380] sm:$0xff] }
 0x68b   : >> { %4551 = vmatpush.msra.mxu0 %v4548_v3  ;;  %4358 = vmatpush.msra.mxu2 %v4349_v31  ;;  %v5074_v3 = vld [vmem:[%s7209_s27 + $0x270] sm:$0xff] }
 0x68c   : >> { %4456 = vmatpush.msra.mxu3 %v4447_v6  ;;  %4240 = vmatpush.msra.mxu1 %v4231_v39  ;;  %v7339_v6 = vld [vmem:[%s7209_s27 + $0x249] sm:$0xff] }
 0x68d   : >> { %3944 = vmatmul.f32.gmra.mxu2 %v7240_v18  ;;  %4552 = vmatpush.msra.mxu0 %v4547_v25 }
 0x68e   : >> { %3846 = vmatmul.f32.gmra.mxu1 %v7212_v42  ;;  %4359 = vmatpush.msra.mxu2 %v4348_v55  ;;  %v7273_v42 = vld [vmem:[%s7209_s27 + $0x1e1] sm:$0xff] }
 0x68f   : >> { %4553 = vmatpush.msra.mxu0 %v4546_v0  ;;  %4457 = vmatpush.msra.mxu3 %v4446_v38  ;;  %v4534_v55 = vld [vmem:[#allocation12 + $0x400] sm:$0xff]  ;;  %v5075_v0 = vld [vmem:[%s7209_s27 + $0x278] sm:$0xff] }
 0x690   : >> { %4062 = vmatmul.f32.gmra.mxu3 %v5080_v27  ;;  %4157 = vmatmul.f32.gmra.mxu0 %v5081_v37  ;;  %v7328_v27 = vld [vmem:[%s7209_s27 + $0x241] sm:$0xff] }
 0x691   : >> { %4554 = vmatpush.msra.mxu0 %v4545_v15  ;;  %4241 = vmatpush.msra.mxu1 %v4230_v12 }
 0x692   : >> { %4360 = vmatpush.msra.mxu2 %v4347_v58  ;;  %4458 = vmatpush.msra.mxu3 %v4445_v32  ;;  %v5076_v58 = vld [vmem:[%s7209_s27 + $0x288] sm:$0xff]  ;;  %v7365_v32 = vld [vmem:[%s7612_s9] ss:$0 sm:$0xff] }
 0x693   : >> { %4555 = vmatpush.msra.mxu0 %v4544_v46  ;;  %4242 = vmatpush.msra.mxu1 %v4229_v60 }
 0x694   : >> { %4361 = vmatpush.msra.mxu2 %v4346_v33  ;;  %4459 = vmatpush.msra.mxu3 %v4444_v54 }
 0x695   : >> { %3947 = vmatmul.f32.gmra.mxu2 %v7253_v36  ;;  %4556 = vmatpush.msra.mxu0 %v4543_v40 }
 0x696   : >> { %3849 = vmatmul.f32.gmra.mxu1 %v7228_v48  ;;  %4362 = vmatpush.msra.mxu2 %v4345_v9  ;;  %v4443_v48 = vld [vmem:[#allocation12 + $0x2b8] sm:$0xff] }
 0x697   : >> { %4243 = vmatpush.msra.mxu1 %v4228_v7  ;;  %4460 = vmatpush.msra.mxu3 %v4443_v48  ;;  %v5077_v7 = vld [vmem:[%s7209_s27 + $0x290] sm:$0xff] }
 0x698   : >> { %4065 = vmatmul.f32.gmra.mxu3 %v5081_v37  ;;  %4160 = vmatmul.f32.gmra.mxu0 %v7273_v42  ;;  %v7352_v37 = vld [vmem:[%s7209_s27 + $0x259] sm:$0xff]  ;;  %v7382_v48 = vld [vmem:[%s7209_s27 + $0x271] sm:$0xff] }
 0x699   : >> { %4557 = vmatpush.msra.mxu0 %v4542_v56  ;;  %4244 = vmatpush.msra.mxu1 %v4227_v4 }
 0x69a   : >> { %4461 = vmatpush.msra.mxu3 %v4442_v14  ;;  %v5098_v14 = vld [vmem:[%s7209_s27 + $0x1b2] sm:$0xff] }
 0x69b   : >> { %4558 = vmatpush.msra.mxu0 %v4541_v52  ;;  %4245 = vmatpush.msra.mxu1 %v4226_v30 }
 0x69c   : >> { %4462 = vmatpush.msra.mxu3 %v4441_v61 }
 0x69d   : >> { %3950 = vmatmul.f32.gmra.mxu2 %v7215_v22  ;;  %4559 = vmatpush.msra.mxu0 %v4540_v17  ;;  %v7395_v17 = vld [vmem:[%s7209_s27 + $0x279] sm:$0xff] }
 0x69e   : >> { %3852 = vmatmul.f32.gmra.mxu1 %v7240_v18  ;;  %v4344_v18 = vld [vmem:[#allocation12 + $0x130] sm:$0xff]  ;;  %4463 = vmatpush.msra.mxu3 %v4440_v50 }
 0x69f   : >> { %4363 = vmatpush.msra.mxu2 %v4344_v18  ;;  %4246 = vmatpush.msra.mxu1 %v4225_v29  ;;  %v5100_v29 = vld [vmem:[%s7209_s27 + $0x1ca] sm:$0xff] }
 0x6a0   : >> { %4068 = vmatmul.f32.gmra.mxu3 %v7273_v42  ;;  %4163 = vmatmul.f32.gmra.mxu0 %v7279_v24 }
 0x6a1   : >> { %4560 = vmatpush.msra.mxu0 %v4539_v53  ;;  %4247 = vmatpush.msra.mxu1 %v4224_v16  ;;  %v5099_v16 = vld [vmem:[%s7209_s27 + $0x1ba] sm:$0xff] }
 0x6a2   : >> { %4464 = vmatpush.msra.mxu3 %v4439_v19 }
 0x6a3   : >> { %4561 = vmatpush.msra.mxu0 %v4538_v23  ;;  %4248 = vmatpush.msra.mxu1 %v4223_v28 }
 0x6a4   : >> { %4465 = vmatpush.msra.mxu3 %v4438_v8  ;;  %v5101_v8 = vld [vmem:[%s7209_s27 + $0x1d2] sm:$0xff] }
 0x6a5   : >> { %3953 = vmatmul.f32.gmra.mxu2 %v7225_v51  ;;  %4562 = vmatpush.msra.mxu0 %v4537_v57  ;;  %v5102_v57 = vld [vmem:[%s7209_s27 + $0x1e2] sm:$0xff] }
 0x6a6   : >> { %3855 = vmatmul.f32.gmra.mxu1 %v7253_v36  ;;  %v4343_v36 = vld [vmem:[#allocation12 + $0x128] sm:$0xff]  ;;  %4466 = vmatpush.msra.mxu3 %v4437_v44 }
 0x6a7   : >> { %4364 = vmatpush.msra.mxu2 %v4343_v36  ;;  %4249 = vmatpush.msra.mxu1 %v4222_v62 }
 0x6a8   : >> { %4071 = vmatmul.f32.gmra.mxu3 %v7279_v24  ;;  %4166 = vmatmul.f32.gmra.mxu0 %v7286_v26 }
 0x6a9   : >> { %4563 = vmatpush.msra.mxu0 %v4536_v35  ;;  %4250 = vmatpush.msra.mxu1 %v4221_v59 }
 0x6aa   : >> { %4467 = vmatpush.msra.mxu3 %v4436_v11 }
 0x6ab   : >> { %4564 = vmatpush.msra.mxu0 %v4535_v10  ;;  %4251 = vmatpush.msra.mxu1 %v4220_v41  ;;  %v5103_v10 = vld [vmem:[%s7209_s27 + $0x1ea] sm:$0xff] }
 0x6ad   : >> { %3956 = vmatmul.f32.gmra.mxu2 %v7237_v34  ;;  %4565 = vmatpush.msra.mxu0 %v4534_v55 }
 0x6ae   : >> { %3858 = vmatmul.f32.gmra.mxu1 %v7215_v22  ;;  %v4342_v22 = vld [vmem:[#allocation12 + $0x120] sm:$0xff] }
 0x6af   : >> { %4365 = vmatpush.msra.mxu2 %v4342_v22 }
 0x6b0   : >> { %4074 = vmatmul.f32.gmra.mxu3 %v7286_v26  ;;  %4169 = vmatmul.f32.gmra.mxu0 %v7293_v1 }
 0x6b5   : >> { %3959 = vmatmul.f32.gmra.mxu2 %v7250_v43 }
 0x6b6   : >> { %3861 = vmatmul.f32.gmra.mxu1 %v7225_v51  ;;  %v4341_v51 = vld [vmem:[#allocation12 + $0x118] sm:$0xff] }
 0x6b7   : >> { %4366 = vmatpush.msra.mxu2 %v4341_v51 }
 0x6b8   : >> { %4077 = vmatmul.f32.gmra.mxu3 %v7293_v1  ;;  %4172 = vmatmul.f32.gmra.mxu0 %v7300_v2 }
 0x6bd   : >> { %3962 = vmatmul.f32.gmra.mxu2 %v7218_v13 }
 0x6be   : >> { %3864 = vmatmul.f32.gmra.mxu1 %v7237_v34  ;;  %v4340_v34 = vld [vmem:[#allocation12 + $0x110] sm:$0xff] }
 0x6bf   : >> { %4367 = vmatpush.msra.mxu2 %v4340_v34 }
 0x6c0   : >> { %4080 = vmatmul.f32.gmra.mxu3 %v7300_v2  ;;  %4175 = vmatmul.f32.gmra.mxu0 %v7307_v5 }
 0x6c5   : >> { %3965 = vmatmul.f32.gmra.mxu2 %v7232_v20 }
 0x6c6   : >> { %3867 = vmatmul.f32.gmra.mxu1 %v7250_v43  ;;  %v4339_v43 = vld [vmem:[#allocation12 + $0x108] sm:$0xff] }
 0x6c7   : >> { %4368 = vmatpush.msra.mxu2 %v4339_v43 }
 0x6c8   : >> { %4083 = vmatmul.f32.gmra.mxu3 %v7307_v5  ;;  %4178 = vmatmul.f32.gmra.mxu0 %v7314_v21 }
 0x6cd   : >> { %3968 = vmatmul.f32.gmra.mxu2 %v7246_v47 }
 0x6ce   : >> { %3870 = vmatmul.f32.gmra.mxu1 %v7218_v13  ;;  %v4338_v13 = vld [vmem:[#allocation12 + $0x100] sm:$0xff] }
 0x6cf   : >> { %4369 = vmatpush.msra.mxu2 %v4338_v13 }
 0x6d0   : >> { %4086 = vmatmul.f32.gmra.mxu3 %v7314_v21  ;;  %4181 = vmatmul.f32.gmra.mxu0 %v7321_v49 }
 0x6d5   : >> { %3971 = vmatmul.f32.gmra.mxu2 %v7259_v45  ;;  %v7330_v63 = vpop.f32.mrf.mxu1 }
 0x6d6   : >> { %3873 = vmatmul.f32.gmra.mxu1 %v7232_v20 }
 0x6d8   : >> { %4089 = vmatmul.f32.gmra.mxu3 %v7321_v49  ;;  %4184 = vmatmul.f32.gmra.mxu0 %v7328_v27 }
 0x6db   : >> { %v7336_v31 = vpop.f32.mrf.mxu2  ;;  %v3743_v25 = vpop.f32.mrf.mxu0 }
 0x6dc   : >> { %v3791_v36 = vadd.f32 %v7365_v32, %v3743_v25 }
 0x6dd   : >> { %3974 = vmatmul.f32.gmra.mxu2 %v5074_v3  ;;  %v7341_v20 = vpop.f32.mrf.mxu3 }
 0x6de   : >> { %3876 = vmatmul.f32.gmra.mxu1 %v7246_v47  ;;  %v7344_v39 = vpop.f32.mrf.mxu1 }
 0x6e0   : >> { %4092 = vmatmul.f32.gmra.mxu3 %v7328_v27  ;;  %4187 = vmatmul.f32.gmra.mxu0 %v7339_v6 }
 0x6e3   : >> { %v7349_v38 = vpop.f32.mrf.mxu2 }
 0x6e5   : >> { %3977 = vmatmul.f32.gmra.mxu2 %v5075_v0 }
 0x6e6   : >> { %3879 = vmatmul.f32.gmra.mxu1 %v7259_v45  ;;  %v7355_v47 = vpop.f32.mrf.mxu3  ;;  %v7368_v45 = vld [vmem:[%s7209_s27 + $0x261] sm:$0xff] }
 0x6e7   : >> { %v7357_v15 = vpop.f32.mrf.mxu1 }
 0x6e8   : >> { %4095 = vmatmul.f32.gmra.mxu3 %v7339_v6  ;;  %4190 = vmatmul.f32.gmra.mxu0 %v7352_v37 }
 0x6e9   : >> { %v3746_v12 = vpop.f32.mrf.mxu0 }
 0x6ea   : >> { %v3792_v28 = vadd.f32 %v7365_v32, %v3746_v12 }
 0x6ec   : >> { %v3773_v46 = vpop.f32.mrf.mxu2 }
 0x6ed   : >> { %3980 = vmatmul.f32.gmra.mxu2 %v5076_v58  ;;  %v7371_v60 = vadd.f32 %v7365_v32, %v3773_v46  ;;  %v5104_v46 = vld [vmem:[%s7209_s27 + $0x1fa] sm:$0xff] }
 0x6ee   : >> { %3882 = vmatmul.f32.gmra.mxu1 %v5074_v3 }
 0x6f0   : >> { %4098 = vmatmul.f32.gmra.mxu3 %v7352_v37  ;;  %4193 = vmatmul.f32.gmra.mxu0 %v7368_v45  ;;  %v3785_v33 = vpop.f32.mrf.mxu3 }
 0x6f1   : >> { %v7375_v54 = vpop.f32.mrf.mxu1  ;;  %v7378_v40 = vadd.f32 %v7365_v32, %v3785_v33 }
 0x6f3   : >> { %v3749_v9 = vpop.f32.mrf.mxu0 }
 0x6f4   : >> { %v3793_v13 = vadd.f32 %v7365_v32, %v3749_v9 }
 0x6f5   : >> { %3983 = vmatmul.f32.gmra.mxu2 %v5077_v7 }
 0x6f6   : >> { %3885 = vmatmul.f32.gmra.mxu1 %v5075_v0  ;;  %v3776_v56 = vpop.f32.mrf.mxu2 }
 0x6f7   : >> { %v7385_v4 = vadd.f32 %v7365_v32, %v3776_v56 }
 0x6f8   : >> { %4101 = vmatmul.f32.gmra.mxu3 %v7368_v45  ;;  %4196 = vmatmul.f32.gmra.mxu0 %v7382_v48 }
 0x6fa   : >> { %v3788_v18 = vpop.f32.mrf.mxu3 }
 0x6fb   : >> { %v7391_v52 = vadd.f32 %v7365_v32, %v3788_v18  ;;  %v3841_v30 = vpop.f32.mrf.mxu1 }
 0x6fc   : >> { %v3889_v22 = vadd.f32 %v3841_v30, %v3791_v36  ;;  %v5105_v36 = vld [vmem:[%s7209_s27 + $0x202] sm:$0xff] }
 0x6fd   : >> { %v3752_v61 = vpop.f32.mrf.mxu0  ;;  %4370 = vmatmul.f32.vlgmr.msra.gmra.mxu2 %v5098_v14  ;;  %v3795_v14 = vadd.f32 %v7365_v32, %v7330_v63 }
 0x6fe   : >> { %4252 = vmatmul.f32.vlgmr.msra.gmra.mxu1 %v7273_v42  ;;  %v3794_v12 = vadd.f32 %v7365_v32, %v3752_v61 }
 0x700   : >> { %4199 = vmatmul.f32.gmra.mxu0 %v7395_v17  ;;  %4468 = vmatmul.f32.vlgmr.msra.gmra.mxu3 %v5100_v29  ;;  %v3939_v50 = vpop.f32.mrf.mxu2 }
 0x701   : >> { %v3987_v53 = vadd.f32 %v3939_v50, %v3889_v22 }
 0x703   : >> { %v3844_v51 = vpop.f32.mrf.mxu1  ;;  %v4057_v19 = vpop.f32.mrf.mxu3 }
 0x704   : >> { %v7401_v23 = vadd.f32 %v4057_v19, %v3987_v53  ;;  %v3890_v42 = vadd.f32 %v3844_v51, %v3792_v28  ;;  %v5106_v51 = vld [vmem:[%s7209_s27 + $0x212] sm:$0xff] }
 0x705   : >> { %v7404_v34 = vpop.f32.mrf.mxu0  ;;  %4373 = vmatmul.f32.gmra.mxu2 %v5099_v16  ;;  %v3796_v16 = vadd.f32 %v7365_v32, %v7344_v39 }
 0x706   : >> { %4255 = vmatmul.f32.gmra.mxu1 %v7279_v24 }
 0x708   : >> { %4471 = vmatmul.f32.gmra.mxu3 %v5101_v8  ;;  %4566 = vmatmul.f32.vlgmr.msra.gmra.mxu0 %v5102_v57  ;;  %v3942_v62 = vpop.f32.mrf.mxu2 }
 0x709   : >> { %v3988_v43 = vadd.f32 %v3942_v62, %v3890_v42  ;;  %v3797_v62 = vadd.f32 %v7365_v32, %v7357_v15 }
 0x70b   : >> { %v3847_v44 = vpop.f32.mrf.mxu1  ;;  %v4060_v35 = vpop.f32.mrf.mxu3 }
 0x70c   : >> { %v7409_v59 = vadd.f32 %v4060_v35, %v3988_v43  ;;  %v3891_v41 = vadd.f32 %v3847_v44, %v3793_v13  ;;  %v5107_v43 = vld [vmem:[%s7209_s27 + $0x21a] sm:$0xff] }
 0x70d   : >> { %v7412_v11 = vpop.f32.mrf.mxu0  ;;  %4376 = vmatmul.f32.gmra.mxu2 %v5100_v29 }
 0x70e   : >> { %4258 = vmatmul.f32.gmra.mxu1 %v7286_v26 }
 0x710   : >> { %4474 = vmatmul.f32.gmra.mxu3 %v5102_v57  ;;  %4569 = vmatmul.f32.gmra.mxu0 %v5103_v10  ;;  %v3945_v24 = vpop.f32.mrf.mxu2 }
 0x711   : >> { %v3989_v3 = vadd.f32 %v3945_v24, %v3891_v41  ;;  %v3798_v24 = vadd.f32 %v7365_v32, %v7375_v54 }
 0x713   : >> { %v3850_v25 = vpop.f32.mrf.mxu1  ;;  %v4063_v55 = vpop.f32.mrf.mxu3 }
 0x714   : >> { %v7416_v0 = vadd.f32 %v4063_v55, %v3989_v3  ;;  %v3892_v33 = vadd.f32 %v3850_v25, %v3794_v12  ;;  %v5108_v3 = vld [vmem:[%s7209_s27 + $0x22a] sm:$0xff]  ;;  %v3799_v12 = vadd.f32 %v7365_v32, %v7336_v31 }
 0x715   : >> { %v7419_v58 = vpop.f32.mrf.mxu0  ;;  %4379 = vmatmul.f32.gmra.mxu2 %v5101_v8 }
 0x716   : >> { %4261 = vmatmul.f32.gmra.mxu1 %v7293_v1 }
 0x718   : >> { %4477 = vmatmul.f32.gmra.mxu3 %v5103_v10  ;;  %4572 = vmatmul.f32.gmra.mxu0 %v5104_v46  ;;  %v3948_v26 = vpop.f32.mrf.mxu2 }
 0x719   : >> { %v3990_v7 = vadd.f32 %v3948_v26, %v3892_v33 }
 0x71b   : >> { %v3853_v9 = vpop.f32.mrf.mxu1  ;;  %v4066_v56 = vpop.f32.mrf.mxu3 }
 0x71c   : >> { %v7423_v18 = vadd.f32 %v4066_v56, %v3990_v7  ;;  %v3893_v1 = vadd.f32 %v3853_v9, %v3795_v14  ;;  %v5109_v9 = vld [vmem:[%s7209_s27 + $0x232] sm:$0xff]  ;;  %v3800_v14 = vadd.f32 %v7365_v32, %v7349_v38 }
 0x71d   : >> { %v7427_v30 = vpop.f32.mrf.mxu0  ;;  %4382 = vmatmul.f32.gmra.mxu2 %v5102_v57 }
 0x71e   : >> { %4264 = vmatmul.f32.gmra.mxu1 %v7300_v2 }
 0x720   : >> { %4480 = vmatmul.f32.gmra.mxu3 %v5104_v46  ;;  %4575 = vmatmul.f32.gmra.mxu0 %v5105_v36  ;;  %v3951_v61 = vpop.f32.mrf.mxu2 }
 0x721   : >> { %v3991_v29 = vadd.f32 %v3951_v61, %v3893_v1 }
 0x723   : >> { %v3856_v22 = vpop.f32.mrf.mxu1  ;;  %v4069_v50 = vpop.f32.mrf.mxu3 }
 0x724   : >> { %v7431_v53 = vadd.f32 %v4069_v50, %v3991_v29  ;;  %v3894_v2 = vadd.f32 %v3856_v22, %v3796_v16  ;;  %v5110_v22 = vld [vmem:[%s7209_s27 + $0x242] sm:$0xff] }
 0x725   : >> { %v7435_v63 = vpop.f32.mrf.mxu0  ;;  %4385 = vmatmul.f32.gmra.mxu2 %v5103_v10 }
 0x726   : >> { %4267 = vmatmul.f32.gmra.mxu1 %v7307_v5 }
 0x728   : >> { %4483 = vmatmul.f32.gmra.mxu3 %v5105_v36  ;;  %4578 = vmatmul.f32.gmra.mxu0 %v5106_v51  ;;  %v3954_v19 = vpop.f32.mrf.mxu2 }
 0x729   : >> { %v3992_v28 = vadd.f32 %v3954_v19, %v3894_v2 }
 0x72b   : >> { %v3859_v8 = vpop.f32.mrf.mxu1  ;;  %v4072_v57 = vpop.f32.mrf.mxu3 }
 0x72c   : >> { %v7439_v42 = vadd.f32 %v4072_v57, %v3992_v28  ;;  %v3895_v5 = vadd.f32 %v3859_v8, %v3797_v62  ;;  %v5111_v8 = vld [vmem:[%s7209_s27 + $0x24a] sm:$0xff] }
 0x72d   : >> { %v7443_v39 = vpop.f32.mrf.mxu0  ;;  %4388 = vmatmul.f32.gmra.mxu2 %v5104_v46 }
 0x72e   : >> { %4270 = vmatmul.f32.gmra.mxu1 %v7314_v21 }
 0x730   : >> { %4486 = vmatmul.f32.gmra.mxu3 %v5106_v51  ;;  %4581 = vmatmul.f32.gmra.mxu0 %v5107_v43  ;;  %v3957_v44 = vpop.f32.mrf.mxu2 }
 0x731   : >> { %v3993_v35 = vadd.f32 %v3957_v44, %v3895_v5 }
 0x733   : >> { %v3862_v13 = vpop.f32.mrf.mxu1  ;;  %v4075_v10 = vpop.f32.mrf.mxu3 }
 0x734   : >> { %v7447_v41 = vadd.f32 %v4075_v10, %v3993_v35  ;;  %v3896_v21 = vadd.f32 %v3862_v13, %v3798_v24 }
 0x735   : >> { %v7451_v15 = vpop.f32.mrf.mxu0  ;;  %4391 = vmatmul.f32.gmra.mxu2 %v5105_v36 }
 0x736   : >> { %4273 = vmatmul.f32.gmra.mxu1 %v7321_v49 }
 0x738   : >> { %4489 = vmatmul.f32.gmra.mxu3 %v5107_v43  ;;  %4584 = vmatmul.f32.gmra.mxu0 %v5108_v3  ;;  %v3960_v25 = vpop.f32.mrf.mxu2 }
 0x739   : >> { %v3994_v55 = vadd.f32 %v3960_v25, %v3896_v21 }
 0x73b   : >> { %v3865_v46 = vpop.f32.mrf.mxu1  ;;  %v4078_v33 = vpop.f32.mrf.mxu3 }
 0x73c   : >> { %v3897_v26 = vadd.f32 %v3865_v46, %v3799_v12  ;;  %v7457_v7 = vadd.f32 %v4078_v33, %v3994_v55  ;;  %v5113_v46 = vld [vmem:[%s7209_s27 + $0x262] sm:$0xff] }
 0x73d   : >> { %v7459_v54 = vpop.f32.mrf.mxu0  ;;  %4394 = vmatmul.f32.gmra.mxu2 %v5106_v51 }
 0x73e   : >> { %4276 = vmatmul.f32.gmra.mxu1 %v7328_v27 }
 0x740   : >> { %4492 = vmatmul.f32.gmra.mxu3 %v5108_v3  ;;  %4587 = vmatmul.f32.gmra.mxu0 %v5109_v9  ;;  %v3963_v49 = vpop.f32.mrf.mxu2 }
 0x741   : >> { %v3995_v56 = vadd.f32 %v3963_v49, %v3897_v26 }
 0x743   : >> { %v3868_v31 = vpop.f32.mrf.mxu1  ;;  %v4081_v36 = vpop.f32.mrf.mxu3 }
 0x744   : >> { %v3898_v1 = vadd.f32 %v3868_v31, %v3800_v14  ;;  %v4113_v61 = vadd.f32 %v4081_v36, %v3995_v56  ;;  %v5114_v36 = vld [vmem:[%s7209_s27 + $0x272] sm:$0xff] }
 0x745   : >> { %v4179_v29 = vpop.f32.mrf.mxu0  ;;  %4397 = vmatmul.f32.gmra.mxu2 %v5107_v43 }
 0x746   : >> { %v7466_v50 = vadd.f32 %v4179_v29, %v4113_v61  ;;  %4279 = vmatmul.f32.gmra.mxu1 %v7339_v6 }
 0x748   : >> { %4495 = vmatmul.f32.gmra.mxu3 %v5109_v9  ;;  %4590 = vmatmul.f32.gmra.mxu0 %v5110_v22  ;;  %v3966_v27 = vpop.f32.mrf.mxu2 }
 0x749   : >> { %v3996_v16 = vadd.f32 %v3966_v27, %v3898_v1 }
 0x74b   : >> { %v3871_v51 = vpop.f32.mrf.mxu1  ;;  %v4084_v2 = vpop.f32.mrf.mxu3 }
 0x74c   : >> { %v3899_v38 = vadd.f32 %v3871_v51, %v7371_v60  ;;  %v4114_v19 = vadd.f32 %v4084_v2, %v3996_v16  ;;  %v5112_v60 = vld [vmem:[%s7209_s27 + $0x25a] sm:$0xff] }
 0x74d   : >> { %v4182_v28 = vpop.f32.mrf.mxu0  ;;  %4400 = vmatmul.f32.gmra.mxu2 %v5108_v3  ;;  %v3803_v3 = vadd.f32 %v7365_v32, %v7341_v20  ;;  %v5115_v51 = vld [vmem:[%s7209_s27 + $0x27a] sm:$0xff] }
 0x74e   : >> { %v7471_v57 = vadd.f32 %v4182_v28, %v4114_v19  ;;  %4282 = vmatmul.f32.gmra.mxu1 %v7352_v37 }
 0x750   : >> { %4498 = vmatmul.f32.gmra.mxu3 %v5110_v22  ;;  %4593 = vmatmul.f32.gmra.mxu0 %v5111_v8  ;;  %v3969_v6 = vpop.f32.mrf.mxu2 }
 0x751   : >> { %v3997_v62 = vadd.f32 %v3969_v6, %v3899_v38 }
 0x753   : >> { %v3874_v43 = vpop.f32.mrf.mxu1  ;;  %v4087_v5 = vpop.f32.mrf.mxu3 }
 0x754   : >> { %v3900_v44 = vadd.f32 %v3874_v43, %v7385_v4  ;;  %v4115_v35 = vadd.f32 %v4087_v5, %v3997_v62  ;;  %v5116_v43 = vld [vmem:[%s7209_s27 + $0x28a] sm:$0xff] }
 0x755   : >> { %v4185_v13 = vpop.f32.mrf.mxu0  ;;  %4403 = vmatmul.f32.gmra.mxu2 %v5109_v9  ;;  %v3804_v9 = vadd.f32 %v7365_v32, %v7355_v47  ;;  %v5096_v32 = vld [vmem:[%s7209_s27 + $0x289] sm:$0xff] }
 0x756   : >> { %v7476_v10 = vadd.f32 %v4185_v13, %v4115_v35  ;;  %4285 = vmatmul.f32.gmra.mxu1 %v7368_v45 }
 0x758   : >> { %4501 = vmatmul.f32.gmra.mxu3 %v5111_v8  ;;  %4596 = vmatmul.f32.gmra.mxu0 %v5112_v60  ;;  %v3972_v37 = vpop.f32.mrf.mxu2 }
 0x759   : >> { %v3998_v24 = vadd.f32 %v3972_v37, %v3900_v44 }
 0x75b   : >> { %v3877_v21 = vpop.f32.mrf.mxu1  ;;  %v4090_v25 = vpop.f32.mrf.mxu3 }
 0x75c   : >> { %v3901_v55 = vadd.f32 %v3877_v21, %v3803_v3  ;;  %v4116_v4 = vadd.f32 %v4090_v25, %v3998_v24  ;;  %v4203_v24 = vadd.f32 %v7404_v34, %v7401_v23  ;;  %v5117_v3 = vld [vmem:[%s7209_s27 + $0x292] sm:$0xff] }
 0x75d   : >> { %v4188_v12 = vpop.f32.mrf.mxu0  ;;  %4406 = vmatmul.f32.gmra.mxu2 %v5110_v22  ;;  %v5120_v34 = vld [vmem:[%s7209_s27 + $0x19] sm:$0xff] }
 0x75e   : >> { %v7482_v33 = vadd.f32 %v4188_v12, %v4116_v4  ;;  %4288 = vmatmul.f32.gmra.mxu1 %v7382_v48 }
 0x760   : >> { %4504 = vmatmul.f32.gmra.mxu3 %v5112_v60  ;;  %4599 = vmatmul.f32.gmra.mxu0 %v5113_v46  ;;  %v3975_v45 = vpop.f32.mrf.mxu2 }
 0x761   : >> { %v3999_v26 = vadd.f32 %v3975_v45, %v3901_v55 }
 0x763   : >> { %v3880_v20 = vpop.f32.mrf.mxu1  ;;  %v4093_v49 = vpop.f32.mrf.mxu3 }
 0x764   : >> { %v3902_v56 = vadd.f32 %v3880_v20, %v3804_v9  ;;  %v4117_v14 = vadd.f32 %v4093_v49, %v3999_v26  ;;  %v4204_v26 = vadd.f32 %v7412_v11, %v7409_v59  ;;  %v4205_v59 = vadd.f32 %v7419_v58, %v7416_v0 }
 0x765   : >> { %v4191_v31 = vpop.f32.mrf.mxu0  ;;  %4409 = vmatmul.f32.gmra.mxu2 %v5111_v8  ;;  %v5097_v8 = vld [vmem:[%s7209_s27 + $0x291] sm:$0xff] }
 0x766   : >> { %v7488_v1 = vadd.f32 %v4191_v31, %v4117_v14  ;;  %4291 = vmatmul.f32.gmra.mxu1 %v7395_v17 }
 0x768   : >> { %4507 = vmatmul.f32.gmra.mxu3 %v5113_v46  ;;  %4602 = vmatmul.f32.gmra.mxu0 %v5114_v36  ;;  %v3978_v48 = vpop.f32.mrf.mxu2 }
 0x769   : >> { %v4000_v61 = vadd.f32 %v3978_v48, %v3902_v56 }
 0x76b   : >> { %v3883_v29 = vpop.f32.mrf.mxu1  ;;  %v4096_v47 = vpop.f32.mrf.mxu3 }
 0x76c   : >> { %v3903_v22 = vadd.f32 %v3883_v29, %v7378_v40  ;;  %v4118_v27 = vadd.f32 %v4096_v47, %v4000_v61 }
 0x76d   : >> { %v4194_v16 = vpop.f32.mrf.mxu0  ;;  %4412 = vmatmul.f32.gmra.mxu2 %v5112_v60 }
 0x76e   : >> { %v7494_v2 = vadd.f32 %v4194_v16, %v4118_v27  ;;  %4294 = vmatmul.f32.gmra.mxu1 %v5096_v32  ;;  %v5121_v32 = vld [vmem:[%s7209_s27 + $0x21] sm:$0xff] }
 0x770   : >> { %4510 = vmatmul.f32.gmra.mxu3 %v5114_v36  ;;  %4605 = vmatmul.f32.gmra.mxu0 %v5115_v51  ;;  %v3981_v17 = vpop.f32.mrf.mxu2 }
 0x771   : >> { %v4001_v38 = vadd.f32 %v3981_v17, %v3903_v22 }
 0x773   : >> { %v3886_v19 = vpop.f32.mrf.mxu1  ;;  %v4099_v28 = vpop.f32.mrf.mxu3 }
 0x774   : >> { %v3904_v6 = vadd.f32 %v3886_v19, %v7391_v52  ;;  %v4119_v62 = vadd.f32 %v4099_v28, %v4001_v38  ;;  %v4206_v28 = vadd.f32 %v7427_v30, %v7423_v18 }
 0x775   : >> { %v4197_v40 = vpop.f32.mrf.mxu0  ;;  %4415 = vmatmul.f32.gmra.mxu2 %v5113_v46 }
 0x776   : >> { %v7499_v5 = vadd.f32 %v4197_v40, %v4119_v62  ;;  %4297 = vmatmul.f32.gmra.mxu1 %v5097_v8 }
 0x778   : >> { %4513 = vmatmul.f32.gmra.mxu3 %v5115_v51  ;;  %4608 = vmatmul.f32.gmra.mxu0 %v5116_v43  ;;  %v3984_v44 = vpop.f32.mrf.mxu2 }
 0x779   : >> { %v4002_v35 = vadd.f32 %v3984_v44, %v3904_v6  ;;  %v5122_v6 = vld [vmem:[%s7209_s27 + $0x31] sm:$0xff] }
 0x77b   : >> { %v4102_v13 = vpop.f32.mrf.mxu3  ;;  %v4253_v60 = vpop.f32.mrf.mxu1 }
 0x77c   : >> { %v4120_v37 = vadd.f32 %v4102_v13, %v4002_v35  ;;  %v4301_v25 = vadd.f32 %v4253_v60, %v4203_v24 }
 0x77d   : >> { %v4200_v52 = vpop.f32.mrf.mxu0 }
 0x77e   : >> { %v7504_v21 = vadd.f32 %v4200_v52, %v4120_v37  ;;  %v4207_v37 = vadd.f32 %v7435_v63, %v7431_v53  ;;  %v5123_v52 = vld [vmem:[%s7209_s27 + $0x39] sm:$0xff] }
 0x780   : >> { %4611 = vmatmul.f32.gmra.mxu0 %v5117_v3  ;;  %v4371_v55 = vpop.f32.mrf.mxu2 }
 0x781   : >> { %v4419_v4 = vadd.f32 %v4371_v55, %v4301_v25 }
 0x783   : >> { %v4256_v12 = vpop.f32.mrf.mxu1  ;;  %v4469_v46 = vpop.f32.mrf.mxu3 }
 0x784   : >> { %v4517_v45 = vadd.f32 %v4469_v46, %v4419_v4  ;;  %v4302_v23 = vadd.f32 %v4256_v12, %v4204_v26  ;;  %v4208_v26 = vadd.f32 %v7443_v39, %v7439_v42 }
 0x785   : >> { %v4567_v9 = vpop.f32.mrf.mxu0 }
 0x786   : >> { %v4615_v20 = vadd.f32 %v4567_v9, %v4517_v45 }
 0x788   : >> { %v4631_v49 = vmax.f32 %v4615_v20, 0.0  ;;  %v4374_v56 = vpop.f32.mrf.mxu2  ;;  %v5124_v20 = vld [vmem:[%s7209_s27 + $0x49] sm:$0xff] }
 0x789   : >> { %v4420_v14 = vadd.f32 %v4374_v56, %v4302_v23 }
 0x78a   : >> { %v4666_v31 = vadd.f32 %v5120_v34, %v4631_v49 }
 0x78b   : >> { %v4259_v36 = vpop.f32.mrf.mxu1  ;;  %v4472_v48 = vpop.f32.mrf.mxu3 }
 0x78c   : >> { %4684 = vst [vmem:[%s7512_s6] sm:$0xff] %v4666_v31  ;;  %v4518_v61 = vadd.f32 %v4472_v48, %v4420_v14  ;;  %v4303_v47 = vadd.f32 %v4259_v36, %v4205_v59  ;;  %v4209_v48 = vadd.f32 %v7451_v15, %v7447_v41  ;;  %v5125_v59 = vld [vmem:[%s7209_s27 + $0x51] sm:$0xff] }
 0x78d   : >> { %v4570_v11 = vpop.f32.mrf.mxu0 }
 0x78e   : >> { %v4616_v29 = vadd.f32 %v4570_v11, %v4518_v61 }
 0x790   : >> { %v4632_v22 = vmax.f32 %v4616_v29, 0.0  ;;  %v4377_v27 = vpop.f32.mrf.mxu2 }
 0x791   : >> { %v4421_v16 = vadd.f32 %v4377_v27, %v4303_v47 }
 0x792   : >> { %v4667_v51 = vadd.f32 %v5121_v32, %v4632_v22 }
 0x793   : >> { %v4262_v17 = vpop.f32.mrf.mxu1  ;;  %v4475_v38 = vpop.f32.mrf.mxu3 }
 0x794   : >> { %4685 = vst [vmem:[%s7512_s6 + $0x8] sm:$0xff] %v4667_v51  ;;  %v4519_v19 = vadd.f32 %v4475_v38, %v4421_v16  ;;  %v4304_v58 = vadd.f32 %v4262_v17, %v4206_v28  ;;  %v4210_v51 = vadd.f32 %v7459_v54, %v7457_v7  ;;  %v5126_v38 = vld [vmem:[%s7209_s27 + $0x61] sm:$0xff]  ;;  %v5127_v7 = vld [vmem:[%s7209_s27 + $0x69] sm:$0xff] }
 0x795   : >> { %v4573_v8 = vpop.f32.mrf.mxu0 }
 0x796   : >> { %v4617_v0 = vadd.f32 %v4573_v8, %v4519_v19 }
 0x798   : >> { %v4633_v62 = vmax.f32 %v4617_v0, 0.0  ;;  %v4380_v40 = vpop.f32.mrf.mxu2 }
 0x799   : >> { %v4422_v43 = vadd.f32 %v4380_v40, %v4304_v58 }
 0x79a   : >> { %v4668_v44 = vadd.f32 %v5122_v6, %v4633_v62 }
 0x79b   : >> { %v4265_v35 = vpop.f32.mrf.mxu1  ;;  %v4478_v13 = vpop.f32.mrf.mxu3 }
 0x79c   : >> { %4686 = vst [vmem:[%s7512_s6 + $0x10] sm:$0xff] %v4668_v44  ;;  %v4520_v60 = vadd.f32 %v4478_v13, %v4422_v43  ;;  %v4305_v30 = vadd.f32 %v4265_v35, %v4207_v37 }
 0x79d   : >> { %v4576_v24 = vpop.f32.mrf.mxu0 }
 0x79e   : >> { %v4618_v18 = vadd.f32 %v4576_v24, %v4520_v60 }
 0x7a0   : >> { %v4634_v3 = vmax.f32 %v4618_v18, 0.0  ;;  %v4383_v25 = vpop.f32.mrf.mxu2 }
 0x7a1   : >> { %v4423_v55 = vadd.f32 %v4383_v25, %v4305_v30  ;;  %v5128_v25 = vld [vmem:[%s7209_s27 + $0x79] sm:$0xff] }
 0x7a2   : >> { %v4669_v4 = vadd.f32 %v5123_v52, %v4634_v3 }
 0x7a3   : >> { %v4268_v12 = vpop.f32.mrf.mxu1  ;;  %v4481_v46 = vpop.f32.mrf.mxu3 }
 0x7a4   : >> { %4687 = vst [vmem:[%s7512_s6 + $0x18] sm:$0xff] %v4669_v4  ;;  %v4521_v45 = vadd.f32 %v4481_v46, %v4423_v55  ;;  %v4306_v63 = vadd.f32 %v4268_v12, %v4208_v26 }
 0x7a5   : >> { %v4579_v9 = vpop.f32.mrf.mxu0 }
 0x7a6   : >> { %v4619_v53 = vadd.f32 %v4579_v9, %v4521_v45 }
 0x7a8   : >> { %v4635_v23 = vmax.f32 %v4619_v53, 0.0  ;;  %v4386_v34 = vpop.f32.mrf.mxu2 }
 0x7a9   : >> { %v4424_v49 = vadd.f32 %v4386_v34, %v4306_v63 }
 0x7aa   : >> { %v4670_v56 = vadd.f32 %v5124_v20, %v4635_v23  ;;  %v5129_v20 = vld [vmem:[%s7209_s27 + $0x81] sm:$0xff] }
 0x7ab   : >> { %v4271_v14 = vpop.f32.mrf.mxu1  ;;  %v4484_v31 = vpop.f32.mrf.mxu3 }
 0x7ac   : >> { %4688 = vst [vmem:[%s7512_s6 + $0x20] sm:$0xff] %v4670_v56  ;;  %v4522_v36 = vadd.f32 %v4484_v31, %v4424_v49  ;;  %v4307_v39 = vadd.f32 %v4271_v14, %v4209_v48 }
 0x7ad   : >> { %v4582_v61 = vpop.f32.mrf.mxu0 }
 0x7ae   : >> { %v4620_v42 = vadd.f32 %v4582_v61, %v4522_v36 }
 0x7b0   : >> { %v4636_v11 = vmax.f32 %v4620_v42, 0.0  ;;  %v4389_v29 = vpop.f32.mrf.mxu2  ;;  %v5130_v42 = vld [vmem:[%s7209_s27 + $0x91] sm:$0xff] }
 0x7b1   : >> { %v4425_v47 = vadd.f32 %v4389_v29, %v4307_v39 }
 0x7b2   : >> { %v4671_v32 = vadd.f32 %v5125_v59, %v4636_v11 }
 0x7b3   : >> { %v4274_v22 = vpop.f32.mrf.mxu1  ;;  %v4487_v27 = vpop.f32.mrf.mxu3 }
 0x7b4   : >> { %4689 = vst [vmem:[%s7512_s6 + $0x28] sm:$0xff] %v4671_v32  ;;  %v4523_v16 = vadd.f32 %v4487_v27, %v4425_v47  ;;  %v4308_v15 = vadd.f32 %v4274_v22, %v4210_v51  ;;  %v5131_v51 = vld [vmem:[%s7209_s27 + $0x99] sm:$0xff] }
 0x7b5   : >> { %v4585_v17 = vpop.f32.mrf.mxu0 }
 0x7b6   : >> { %v4621_v41 = vadd.f32 %v4585_v17, %v4523_v16 }
 0x7b8   : >> { %v4637_v19 = vmax.f32 %v4621_v41, 0.0  ;;  %v4392_v28 = vpop.f32.mrf.mxu2 }
 0x7b9   : >> { %v4426_v8 = vadd.f32 %v4392_v28, %v4308_v15 }
 0x7ba   : >> { %v4672_v0 = vadd.f32 %v5126_v38, %v4637_v19 }
 0x7bb   : >> { %v4277_v58 = vpop.f32.mrf.mxu1  ;;  %v4490_v6 = vpop.f32.mrf.mxu3 }
 0x7bc   : >> { %4690 = vst [vmem:[%s7512_s6 + $0x30] sm:$0xff] %v4672_v0  ;;  %v4524_v62 = vadd.f32 %v4490_v6, %v4426_v8  ;;  %v4309_v44 = vadd.f32 %v4277_v58, %v7466_v50  ;;  %v5132_v6 = vld [vmem:[%s7209_s27 + $0xa9] sm:$0xff] }
 0x7bd   : >> { %v4588_v40 = vpop.f32.mrf.mxu0 }
 0x7be   : >> { %v4622_v43 = vadd.f32 %v4588_v40, %v4524_v62 }
 0x7c0   : >> { %v4638_v54 = vmax.f32 %v4622_v43, 0.0  ;;  %v4395_v35 = vpop.f32.mrf.mxu2 }
 0x7c1   : >> { %v4427_v13 = vadd.f32 %v4395_v35, %v4309_v44 }
 0x7c2   : >> { %v4673_v60 = vadd.f32 %v5127_v7, %v4638_v54 }
 0x7c3   : >> { %v4280_v37 = vpop.f32.mrf.mxu1  ;;  %v4493_v24 = vpop.f32.mrf.mxu3 }
 0x7c4   : >> { %4691 = vst [vmem:[%s7512_s6 + $0x38] sm:$0xff] %v4673_v60  ;;  %v4525_v18 = vadd.f32 %v4493_v24, %v4427_v13  ;;  %v4310_v3 = vadd.f32 %v4280_v37, %v7471_v57  ;;  %v5133_v37 = vld [vmem:[%s7209_s27 + $0xb1] sm:$0xff] }
 0x7c5   : >> { %v4591_v30 = vpop.f32.mrf.mxu0 }
 0x7c6   : >> { %v4623_v52 = vadd.f32 %v4591_v30, %v4525_v18 }
 0x7c8   : >> { %v4639_v55 = vmax.f32 %v4623_v52, 0.0  ;;  %v4398_v4 = vpop.f32.mrf.mxu2 }
 0x7c9   : >> { %v4428_v12 = vadd.f32 %v4398_v4, %v4310_v3 }
 0x7ca   : >> { %v4674_v50 = vadd.f32 %v5128_v25, %v4639_v55 }
 0x7cb   : >> { %v4283_v46 = vpop.f32.mrf.mxu1  ;;  %v4496_v45 = vpop.f32.mrf.mxu3 }
 0x7cc   : >> { %4692 = vst [vmem:[%s7512_s6 + $0x40] sm:$0xff] %v4674_v50  ;;  %v4526_v26 = vadd.f32 %v4496_v45, %v4428_v12  ;;  %v4311_v63 = vadd.f32 %v4283_v46, %v7476_v10  ;;  %v5134_v50 = vld [vmem:[%s7209_s27 + $0xc1] sm:$0xff] }
 0x7cd   : >> { %v4594_v9 = vpop.f32.mrf.mxu0 }
 0x7ce   : >> { %v4624_v53 = vadd.f32 %v4594_v9, %v4526_v26 }
 0x7d0   : >> { %v4640_v23 = vmax.f32 %v4624_v53, 0.0  ;;  %v4401_v34 = vpop.f32.mrf.mxu2 }
 0x7d1   : >> { %v4429_v49 = vadd.f32 %v4401_v34, %v4311_v63 }
 0x7d2   : >> { %v4675_v57 = vadd.f32 %v5129_v20, %v4640_v23  ;;  %v5135_v23 = vld [vmem:[%s7209_s27 + $0xc9] sm:$0xff] }
 0x7d3   : >> { %v4286_v56 = vpop.f32.mrf.mxu1  ;;  %v4499_v14 = vpop.f32.mrf.mxu3 }
 0x7d4   : >> { %4693 = vst [vmem:[%s7512_s6 + $0x48] sm:$0xff] %v4675_v57  ;;  %v4527_v31 = vadd.f32 %v4499_v14, %v4429_v49  ;;  %v4312_v61 = vadd.f32 %v4286_v56, %v7482_v33 }
 0x7d5   : >> { %v4597_v36 = vpop.f32.mrf.mxu0 }
 0x7d6   : >> { %v4625_v48 = vadd.f32 %v4597_v36, %v4527_v31 }
 0x7d8   : >> { %v4641_v39 = vmax.f32 %v4625_v48, 0.0  ;;  %v4404_v59 = vpop.f32.mrf.mxu2 }
 0x7d9   : >> { %v4430_v11 = vadd.f32 %v4404_v59, %v4312_v61 }
 0x7da   : >> { %v4676_v10 = vadd.f32 %v5130_v42, %v4641_v39 }
 0x7db   : >> { %v4289_v29 = vpop.f32.mrf.mxu1  ;;  %v4502_v47 = vpop.f32.mrf.mxu3 }
 0x7dc   : >> { %4694 = vst [vmem:[%s7512_s6 + $0x50] sm:$0xff] %v4676_v10  ;;  %v4528_v32 = vadd.f32 %v4502_v47, %v4430_v11  ;;  %v4313_v16 = vadd.f32 %v4289_v29, %v7488_v1 }
 0x7dd   : >> { %v4600_v22 = vpop.f32.mrf.mxu0 }
 0x7de   : >> { %v4626_v27 = vadd.f32 %v4600_v22, %v4528_v32 }
 0x7e0   : >> { %v4642_v17 = vmax.f32 %v4626_v27, 0.0  ;;  %v4407_v41 = vpop.f32.mrf.mxu2 }
 0x7e1   : >> { %v4431_v15 = vadd.f32 %v4407_v41, %v4313_v16 }
 0x7e2   : >> { %v4677_v33 = vadd.f32 %v5131_v51, %v4642_v17 }
 0x7e3   : >> { %v4292_v38 = vpop.f32.mrf.mxu1  ;;  %v4505_v19 = vpop.f32.mrf.mxu3 }
 0x7e4   : >> { %4695 = vst [vmem:[%s7512_s6 + $0x58] sm:$0xff] %v4677_v33  ;;  %v4529_v28 = vadd.f32 %v4505_v19, %v4431_v15  ;;  %v4314_v58 = vadd.f32 %v4292_v38, %v7494_v2 }
 0x7e5   : >> { %v4603_v8 = vpop.f32.mrf.mxu0 }
 0x7e6   : >> { %v4627_v0 = vadd.f32 %v4603_v8, %v4529_v28 }
 0x7e8   : >> { %v4643_v62 = vmax.f32 %v4627_v0, 0.0  ;;  %v4410_v40 = vpop.f32.mrf.mxu2 }
 0x7e9   : >> { %v4432_v1 = vadd.f32 %v4410_v40, %v4314_v58 }
 0x7ea   : >> { %v4678_v43 = vadd.f32 %v5132_v6, %v4643_v62 }
 0x7eb   : >> { %v4295_v44 = vpop.f32.mrf.mxu1  ;;  %v4508_v7 = vpop.f32.mrf.mxu3 }
 0x7ec   : >> { %4696 = vst [vmem:[%s7512_s6 + $0x60] sm:$0xff] %v4678_v43  ;;  %v4530_v54 = vadd.f32 %v4508_v7, %v4432_v1  ;;  %v4315_v60 = vadd.f32 %v4295_v44, %v7499_v5 }
 0x7ed   : >> { %v4606_v35 = vpop.f32.mrf.mxu0 }
 0x7ee   : >> { %v4628_v13 = vadd.f32 %v4606_v35, %v4530_v54 }
 0x7f0   : >> { %v4644_v24 = vmax.f32 %v4628_v13, 0.0  ;;  %v4413_v18 = vpop.f32.mrf.mxu2 }
 0x7f1   : >> { %v4433_v2 = vadd.f32 %v4413_v18, %v4315_v60 }
 0x7f2   : >> { %v4679_v30 = vadd.f32 %v5133_v37, %v4644_v24 }
 0x7f3   : >> { %v4511_v52 = vpop.f32.mrf.mxu3  ;;  %v4298_v3 = vpop.f32.mrf.mxu1 }
 0x7f4   : >> { %4697 = vst [vmem:[%s7512_s6 + $0x68] sm:$0xff] %v4679_v30  ;;  %v4531_v25 = vadd.f32 %v4511_v52, %v4433_v2  ;;  %v4316_v12 = vadd.f32 %v4298_v3, %v7504_v21 }
 0x7f5   : >> { %v4609_v55 = vpop.f32.mrf.mxu0 }
 0x7f6   : >> { %v4629_v4 = vadd.f32 %v4609_v55, %v4531_v25 }
 0x7f8   : >> { %v4645_v46 = vmax.f32 %v4629_v4, 0.0  ;;  %v4416_v45 = vpop.f32.mrf.mxu2 }
 0x7f9   : >> { %v4434_v5 = vadd.f32 %v4416_v45, %v4316_v12 }
 0x7fa   : >> { %v4680_v26 = vadd.f32 %v5134_v50, %v4645_v46 }
 0x7fb   : >> { %v4514_v9 = vpop.f32.mrf.mxu3 }
 0x7fc   : >> { %4698 = vst [vmem:[%s7512_s6 + $0x70] sm:$0xff] %v4680_v26  ;;  %v4532_v53 = vadd.f32 %v4514_v9, %v4434_v5 }
 0x7fd   : >> { %v4612_v63 = vpop.f32.mrf.mxu0 }
 0x7fe   : >> { %v4630_v20 = vadd.f32 %v4612_v63, %v4532_v53 }
 0x800   : >> { %v4646_v34 = vmax.f32 %v4630_v20, 0.0  ;;  %3680 = sbr.rel (!%p3678_p2) target bundleno = 1592 (0x638), region = 241 }
 0x802   : >> { %v4681_v49 = vadd.f32 %v5135_v23, %v4646_v34 }
 0x804   : >> { %4699 = vst [vmem:[%s7512_s6 + $0x78] sm:$0xff] %v4681_v49 }
 0x805   : > { %5679 = shalt.err (!%p5676_p5)
}
 0x806   : > { %s5775_s11 = smov 128   ;;  %s5776_s20 = smov 8  }
 0x807   : > { %5359 = dma.vmem_to_hbm [thread:$0]  (%p5928_p3), %s4714_s15, 4096, %s4716_s0, %s4701_s12, %s5775_s11, %s5775_s11, %s5776_s20  }
 0x808 PF: > { %s4730_s28 = sand.u32 1, %s5738_s13   ;;  %p7645_p7 = scmp.ge.s32.totalorder %s5750_s16, 2 }
 0x809   : > { %s4731_s22 = scalar_lea.sflag [#allocation5], %s4730_s28 }
 0x80a   : > { %p5382_p1 = pnand %p7645_p7, %p5867_p6 }
 0x80c   : > { %p5383_p4 = pneg %p5382_p1 }
 0x80e   : > { %5733 = dma.done.wait (%p5383_p4), %s4731_s22, 4096  }
 0x80f   : > { %5735 = vsyncadd (%p5383_p4), %s4731_s22, 4294963200  ;;  %s7646_s16 = sld [smem:[#allocation23_spill]]  ;;  %s7649_s13 = smov %s5742_s14 }
 0x810   : > { %s7647_s30 = sld [smem:[#allocation21_spill]] }
 0x811   : > { %s7648_s15 = sld [smem:[#allocation24_spill]] }
 0x815   : > { %p28_p8 = scmp.ge.s32.totalorder %s7646_s16, 4  }
 0x816   : > { %s7650_s14 = smov %s7647_s30 }
 0x817   :  { %30 = sbr.rel (!%p28_p8) target bundleno = 15 (0xf), region = 252 }
 0x81c   :  { %4737 = vsyncpa [#allocation4], 1 }
 0x81d   :  { %4739 = vsyncpa [#allocation4 + $0x1], 1 }
 0x81e   :  { %4740 = vsyncpa [#allocation7], 1 }
 0x81f   :  { %4742 = vsyncpa [#allocation7 + $0x1], 1 }
 0x820   :  { %4743 = vsyncpa [#allocation10], 1 }
 0x821   :  { %4744 = vsyncpa [#allocation13], 1 }
 0x822   :  { %4745 = vsyncpa [#allocation5], 1 }
 0x823   :  { %4747 = vsyncpa [#allocation5 + $0x1], 1 }

</bundles_post_ra>
